<compile_context>
chip_gen: v6e
topology: v6e:2x2x1
jax: 0.10.0
libtpu: 0.0.40
codegen_flags: <defaults>
</compile_context>

<pallas_src>
import jax
import jax.numpy as jnp
from jax import lax
from jax.experimental import pallas as pl
from jax.experimental.pallas import tpu as pltpu

H = W = 224
LANES = 128
ROWS_PER_IMG = (H * W) // LANES  # 392 (divisible by 8)


def _tpu_vmem_capacity_bytes():
    """Physical per-core VMEM, with a conservative fallback (v7x = 64 MiB)."""
    try:
        return int(pltpu.get_tpu_info().vmem_capacity_bytes)
    except Exception:
        return 64 * 1024 * 1024


def _default_images_per_step():
    # Double-buffered input footprint is ~1.15 MiB / image (f32 pred 2ch + target).
    # K=32 targets v5e/v6e (128 MiB VMEM); K=16 stays well inside v7x's 64 MiB.
    return 32 if _tpu_vmem_capacity_bytes() >= 96 * 1024 * 1024 else 16


def _make_kernel(k_imgs, n_imgs, blocks_per_slice, needs_tail_mask):
    def kernel(pred_ref, target_ref, out_ref, acc_ref, cnt_ref):
        j = pl.program_id(1)

        @pl.when(j == 0)
        def _():
            acc_ref[...] = jnp.zeros_like(acc_ref)
            cnt_ref[...] = jnp.zeros_like(cnt_ref)

        # Ref-level channel slices on the leading axes: no full (K,2,ROWS,LANES)
        # block value is materialized; last-two-dim tiling is untouched.
        p = pred_ref[:, 0]        # (K, ROWS, LANES)  mean prediction
        lv = pred_ref[:, 1]       # (K, ROWS, LANES)  log variance
        t = target_ref[...]       # (K, ROWS, LANES)

        mask = t > 0
        if needs_tail_mask:
            # Ragged tail / clamped duplicate blocks: out-of-range images hold
            # unspecified data that may have target > 0, so mask them out by
            # global image index (N, K, blocks_per_slice are static).
            blk = pl.program_id(0) * blocks_per_slice + j     # unclamped block id
            img_ids = blk * k_imgs + lax.broadcasted_iota(
                jnp.int32, (k_imgs, 1, 1), 0)
            mask = jnp.logical_and(mask, img_ids < n_imgs)

        diff = t - p
        # Fused masked term: exp(-lv) * diff^2 + lv (0.5 and the divide applied
        # once in the wrapper).  Keep the where-select (NOT mask * term):
        # exp(-lv) can be inf / garbage-lv can be NaN at masked positions.
        term = jnp.where(mask, jnp.exp(-lv) * diff * diff + lv, 0.0)

        # Pure VPU adds into per-lane VMEM accumulators; no per-step cross-lane
        # reduce.  Per-lane f32 counts are exact for any realistic batch size.
        acc_ref[...] += jnp.sum(term, axis=0)
        cnt_ref[...] += jnp.sum(mask.astype(jnp.float32), axis=0)

        @pl.when(j == pl.num_programs(1) - 1)
        def _():
            out_ref[0, 0] = jnp.sum(acc_ref[...])
            out_ref[0, 1] = jnp.sum(cnt_ref[...])

    return kernel


def heteroscedastic_loss(pred, target, images_per_step=None, num_core_slices=2):
    """pred: (N, 2, 224, 224) f32; target: (N, 1, 224, 224) f32 -> scalar f32."""
    N = pred.shape[0]
    assert pred.shape == (N, 2, H, W), "pred must be (N, 2, 224, 224)"
    assert target.shape == (N, 1, H, W), "inconsistent dimensions"

    if images_per_step is None:
        images_per_step = _default_images_per_step()
    K = max(1, min(int(images_per_step), N))

    total_blocks = pl.cdiv(N, K)                     # ragged tail allowed
    C = max(1, min(int(num_core_slices), total_blocks))
    bpc = pl.cdiv(total_blocks, C)                   # blocks per core slice
    last_block = total_blocks - 1
    needs_tail_mask = (N % K != 0) or (C * bpc != total_blocks)

    # Contiguous (free) reshapes only — no channel-slice copies in the wrapper.
    pred4 = pred.reshape(N, 2, ROWS_PER_IMG, LANES)
    tgt3 = target.reshape(N, ROWS_PER_IMG, LANES)

    # Clamp the block index so core slices with a ragged share of blocks never
    # index past the array; their contribution is zeroed by the in-kernel mask.
    def pred_map(c, j):
        return (jnp.minimum(c * bpc + j, last_block), 0, 0, 0)

    def tgt_map(c, j):
        return (jnp.minimum(c * bpc + j, last_block), 0, 0)

    # Scoped-VMEM budget: double-buffered inputs + accumulators + headroom for
    # compiler temporaries; never request more than physical minus a margin.
    per_img_bytes = 3 * ROWS_PER_IMG * LANES * 4       # pred (2ch) + target, f32
    acc_bytes = ROWS_PER_IMG * LANES * 4
    vmem_need = 2 * K * per_img_bytes + 2 * acc_bytes
    vmem_limit = max(32 * 1024 * 1024, vmem_need + 24 * 1024 * 1024)
    vmem_limit = int(min(vmem_limit, _tpu_vmem_capacity_bytes() - 8 * 1024 * 1024))

    partials = pl.pallas_call(
        _make_kernel(K, N, bpc, needs_tail_mask),
        out_shape=jax.ShapeDtypeStruct((C, 2), jnp.float32),
        grid_spec=pltpu.PrefetchScalarGridSpec(
            num_scalar_prefetch=0,
            grid=(C, bpc),
            in_specs=[
                pl.BlockSpec((K, 2, ROWS_PER_IMG, LANES), pred_map),
                pl.BlockSpec((K, ROWS_PER_IMG, LANES), tgt_map),
            ],
            out_specs=pl.BlockSpec((1, 2), lambda c, j: (c, 0),
                                   memory_space=pltpu.SMEM),
            scratch_shapes=[
                pltpu.VMEM((ROWS_PER_IMG, LANES), jnp.float32),  # fused term acc
                pltpu.VMEM((ROWS_PER_IMG, LANES), jnp.float32),  # valid-count acc
            ],
        ),
        compiler_params=pltpu.CompilerParams(
            dimension_semantics=("parallel", "arbitrary"),
            vmem_limit_bytes=vmem_limit,
        ),
    )(pred4, tgt3)

    total = jnp.sum(partials[:, 0])
    cnt = jnp.sum(partials[:, 1])
    # Matches the reference: NaN if there are no valid pixels at all.
    return 0.5 * total / cnt


def heteroscedastic_loss_ref(pred, target):
    """Pure-JAX reference matching the PyTorch module."""
    pred_mean = pred[:, 0:1, :, :]
    log_var = pred[:, 1:2, :, :]
    mask = target > 0
    diff = target - pred_mean
    cnt = jnp.sum(mask)
    term1 = jnp.where(mask, 0.5 * jnp.exp(-log_var) * diff * diff, 0.0)
    term2 = jnp.where(mask, 0.5 * log_var, 0.0)
    return jnp.sum(term1) / cnt + jnp.sum(term2) / cnt


if __name__ == "__main__":
    key = jax.random.PRNGKey(0)
    k1, k2 = jax.random.split(key)

    # Small batch; spatial size is fixed at 224x224 by the module.  target drawn
    # from N(0,1) so ~half the pixels are invalid (<= 0) and the mask path runs.
    N = 3
    pred = jax.random.normal(k1, (N, 2, H, W), dtype=jnp.float32)
    target = jax.random.normal(k2, (N, 1, H, W), dtype=jnp.float32)

    ref = heteroscedastic_loss_ref(pred, target)

    # 1) Default config (auto K, whole batch in one step here).
    loss = jax.block_until_ready(heteroscedastic_loss(pred, target))
    assert jnp.allclose(loss, ref, rtol=1e-4, atol=1e-5), (loss, ref)

    # 2) Ragged tail + two core slices: K=2 over 3 images -> last block overhangs.
    loss2 = jax.block_until_ready(
        heteroscedastic_loss(pred, target, images_per_step=2, num_core_slices=2))
    assert jnp.allclose(loss2, ref, rtol=1e-4, atol=1e-5), (loss2, ref)

    # 3) Uneven block split across core slices (clamped duplicate block is fully
    #    masked): 3 blocks over 2 slices, multi-step accumulation per slice.
    loss3 = jax.block_until_ready(
        heteroscedastic_loss(pred, target, images_per_step=1, num_core_slices=2))
    assert jnp.allclose(loss3, ref, rtol=1e-4, atol=1e-5), (loss3, ref)

    print("KERNEL_OK")
</pallas_src>

<mosaic_0001>
module attributes {stable_mosaic.version = 11 : i64} {
  func.func @kernel(%arg0: i32, %arg1: i32, %arg2: memref<3x2x392x128xf32, #tpu.memory_space<vmem>>, %arg3: memref<3x392x128xf32, #tpu.memory_space<vmem>>, %arg4: memref<1x2xf32, #tpu.memory_space<smem>>, %arg5: memref<392x128xf32, #tpu.memory_space<vmem>>, %arg6: memref<392x128xf32, #tpu.memory_space<vmem>>) attributes {dimension_semantics = [#tpu.dimension_semantics<parallel>, #tpu.dimension_semantics<arbitrary>], iteration_bounds = array<i64: 1, 1>, scalar_prefetch = 0 : i64, scratch_operands = 2 : i64, tpu.core_type = #tpu.core_type<tc>, window_params = [{transform_indices = @transform_0, window_bounds = array<i64: 3, 2, 392, 128>}, {transform_indices = @transform_1, window_bounds = array<i64: 3, 392, 128>}, {transform_indices = @transform_2, window_bounds = array<i64: 1, 2>}]} {
    %c0_i32 = arith.constant 0 : i32
    %0 = arith.cmpi eq, %arg1, %c0_i32 : i32
    %1 = arith.extui %0 : i1 to i32
    %c0_i32_0 = arith.constant 0 : i32
    %2 = arith.cmpi ne, %1, %c0_i32_0 : i32
    scf.if %2 {
      %cst_24 = arith.constant 0.000000e+00 : f32
      %32 = vector.broadcast %cst_24 : f32 to vector<392x128xf32>
      %c0_25 = arith.constant 0 : index
      %c0_26 = arith.constant 0 : index
      %33 = vector.load %arg5[%c0_25, %c0_26] : memref<392x128xf32, #tpu.memory_space<vmem>>, vector<392x128xf32>
      tpu.vector_store %arg5[%c0_25, %c0_26], %32 {strides = array<i32>} : memref<392x128xf32, #tpu.memory_space<vmem>>, vector<392x128xf32>,
      %cst_27 = arith.constant 0.000000e+00 : f32
      %34 = vector.broadcast %cst_27 : f32 to vector<392x128xf32>
      %c0_28 = arith.constant 0 : index
      %c0_29 = arith.constant 0 : index
      %35 = vector.load %arg6[%c0_28, %c0_29] : memref<392x128xf32, #tpu.memory_space<vmem>>, vector<392x128xf32>
      tpu.vector_store %arg6[%c0_28, %c0_29], %34 {strides = array<i32>} : memref<392x128xf32, #tpu.memory_space<vmem>>, vector<392x128xf32>,
    } else {
    }
    %c0 = arith.constant 0 : index
    %c0_1 = arith.constant 0 : index
    %c0_2 = arith.constant 0 : index
    %c0_3 = arith.constant 0 : index
    %3 = vector.load %arg2[%c0, %c0_1, %c0_2, %c0_3] : memref<3x2x392x128xf32, #tpu.memory_space<vmem>>, vector<3x1x392x128xf32>
    %4 = vector.shape_cast %3 : vector<3x1x392x128xf32> to vector<3x392x128xf32>
    %c0_4 = arith.constant 0 : index
    %c1 = arith.constant 1 : index
    %c0_5 = arith.constant 0 : index
    %c0_6 = arith.constant 0 : index
    %5 = vector.load %arg2[%c0_4, %c1, %c0_5, %c0_6] : memref<3x2x392x128xf32, #tpu.memory_space<vmem>>, vector<3x1x392x128xf32>
    %6 = vector.shape_cast %5 : vector<3x1x392x128xf32> to vector<3x392x128xf32>
    %c0_7 = arith.constant 0 : index
    %c0_8 = arith.constant 0 : index
    %c0_9 = arith.constant 0 : index
    %7 = vector.load %arg3[%c0_7, %c0_8, %c0_9] : memref<3x392x128xf32, #tpu.memory_space<vmem>>, vector<3x392x128xf32>
    %cst = arith.constant 0.000000e+00 : f32
    %8 = vector.broadcast %cst : f32 to vector<3x392x128xf32>
    %9 = arith.cmpf ogt, %7, %8 : vector<3x392x128xf32>
    %10 = arith.subf %7, %4 : vector<3x392x128xf32>
    %cst_10 = arith.constant 0.000000e+00 : f32
    %11 = vector.broadcast %cst_10 : f32 to vector<3x392x128xf32>
    %12 = arith.subf %11, %6 : vector<3x392x128xf32>
    %13 = math.exp %12 : vector<3x392x128xf32>
    %14 = arith.mulf %13, %10 : vector<3x392x128xf32>
    %15 = arith.mulf %14, %10 : vector<3x392x128xf32>
    %16 = arith.addf %15, %6 : vector<3x392x128xf32>
    %cst_11 = arith.constant 0.000000e+00 : f32
    %17 = vector.broadcast %cst_11 : f32 to vector<3x392x128xf32>
    %18 = arith.select %9, %16, %17 : vector<3x392x128xi1>, vector<3x392x128xf32>
    %c0_12 = arith.constant 0 : index
    %c0_13 = arith.constant 0 : index
    %19 = vector.load %arg5[%c0_12, %c0_13] : memref<392x128xf32, #tpu.memory_space<vmem>>, vector<392x128xf32>
    %cst_14 = arith.constant dense<0.000000e+00> : vector<392x128xf32>
    %20 = vector.multi_reduction <add>, %18, %cst_14 [0] : vector<3x392x128xf32> to vector<392x128xf32>
    %21 = arith.addf %19, %20 : vector<392x128xf32>
    %c0_15 = arith.constant 0 : index
    %c0_16 = arith.constant 0 : index
    %22 = vector.load %arg5[%c0_15, %c0_16] : memref<392x128xf32, #tpu.memory_space<vmem>>, vector<392x128xf32>
    tpu.vector_store %arg5[%c0_15, %c0_16], %21 {strides = array<i32>} : memref<392x128xf32, #tpu.memory_space<vmem>>, vector<392x128xf32>,
    %c0_17 = arith.constant 0 : index
    %c0_18 = arith.constant 0 : index
    %23 = vector.load %arg6[%c0_17, %c0_18] : memref<392x128xf32, #tpu.memory_space<vmem>>, vector<392x128xf32>
    %24 = arith.extui %9 : vector<3x392x128xi1> to vector<3x392x128xi32>
    %25 = arith.sitofp %24 : vector<3x392x128xi32> to vector<3x392x128xf32>
    %cst_19 = arith.constant dense<0.000000e+00> : vector<392x128xf32>
    %26 = vector.multi_reduction <add>, %25, %cst_19 [0] : vector<3x392x128xf32> to vector<392x128xf32>
    %27 = arith.addf %23, %26 : vector<392x128xf32>
    %c0_20 = arith.constant 0 : index
    %c0_21 = arith.constant 0 : index
    %28 = vector.load %arg6[%c0_20, %c0_21] : memref<392x128xf32, #tpu.memory_space<vmem>>, vector<392x128xf32>
    tpu.vector_store %arg6[%c0_20, %c0_21], %27 {strides = array<i32>} : memref<392x128xf32, #tpu.memory_space<vmem>>, vector<392x128xf32>,
    %c0_i32_22 = arith.constant 0 : i32
    %29 = arith.cmpi eq, %arg1, %c0_i32_22 : i32
    %30 = arith.extui %29 : i1 to i32
    %c0_i32_23 = arith.constant 0 : i32
    %31 = arith.cmpi ne, %30, %c0_i32_23 : i32
    scf.if %31 {
      %c0_24 = arith.constant 0 : index
      %c0_25 = arith.constant 0 : index
      %32 = vector.load %arg5[%c0_24, %c0_25] : memref<392x128xf32, #tpu.memory_space<vmem>>, vector<392x128xf32>
      %33 = vector.shape_cast %32 : vector<392x128xf32> to vector<1x392x128xf32>
      %cst_26 = arith.constant dense<0.000000e+00> : vector<1xf32>
      %34 = vector.multi_reduction <add>, %33, %cst_26 [1, 2] : vector<1x392x128xf32> to vector<1xf32>
      %35 = vector.shape_cast %34 : vector<1xf32> to vector<1x1x1xf32>
      %36 = vector.extract %35[0, 0, 0] : f32 from vector<1x1x1xf32>
      %c0_27 = arith.constant 0 : index
      %c0_28 = arith.constant 0 : index
      %37 = memref.load %arg4[%c0_27, %c0_28] : memref<1x2xf32, #tpu.memory_space<smem>>
      memref.store %36, %arg4[%c0_27, %c0_28] : memref<1x2xf32, #tpu.memory_space<smem>>
      %c0_29 = arith.constant 0 : index
      %c0_30 = arith.constant 0 : index
      %38 = vector.load %arg6[%c0_29, %c0_30] : memref<392x128xf32, #tpu.memory_space<vmem>>, vector<392x128xf32>
      %39 = vector.shape_cast %38 : vector<392x128xf32> to vector<1x392x128xf32>
      %cst_31 = arith.constant dense<0.000000e+00> : vector<1xf32>
      %40 = vector.multi_reduction <add>, %39, %cst_31 [1, 2] : vector<1x392x128xf32> to vector<1xf32>
      %41 = vector.shape_cast %40 : vector<1xf32> to vector<1x1x1xf32>
      %42 = vector.extract %41[0, 0, 0] : f32 from vector<1x1x1xf32>
      %c0_32 = arith.constant 0 : index
      %c1_33 = arith.constant 1 : index
      %43 = memref.load %arg4[%c0_32, %c1_33] : memref<1x2xf32, #tpu.memory_space<smem>>
      memref.store %42, %arg4[%c0_32, %c1_33] : memref<1x2xf32, #tpu.memory_space<smem>>
    } else {
    }
    return
  }
  func.func @transform_0(%arg0: i32, %arg1: i32) -> (i32, i32, i32, i32) {
    %c1_i32 = arith.constant 1 : i32
    %0 = arith.muli %arg0, %c1_i32 : i32
    %1 = arith.addi %0, %arg1 : i32
    %c0_i32 = arith.constant 0 : i32
    %2 = arith.minsi %1, %c0_i32 : i32
    %c0_i32_0 = arith.constant 0 : i32
    %c0_i32_1 = arith.constant 0 : i32
    %c0_i32_2 = arith.constant 0 : i32
    %c0_i32_3 = arith.constant 0 : i32
    return %2, %c0_i32_0, %c0_i32_1, %c0_i32_2 : i32, i32, i32, i32
  }
  func.func @transform_1(%arg0: i32, %arg1: i32) -> (i32, i32, i32) {
    %c1_i32 = arith.constant 1 : i32
    %0 = arith.muli %arg0, %c1_i32 : i32
    %1 = arith.addi %0, %arg1 : i32
    %c0_i32 = arith.constant 0 : i32
    %2 = arith.minsi %1, %c0_i32 : i32
    %c0_i32_0 = arith.constant 0 : i32
    %c0_i32_1 = arith.constant 0 : i32
    %c0_i32_2 = arith.constant 0 : i32
    return %2, %c0_i32_0, %c0_i32_1 : i32, i32, i32
  }
  func.func @transform_2(%arg0: i32, %arg1: i32) -> (i32, i32) {
    %c0_i32 = arith.constant 0 : i32
    %c0_i32_0 = arith.constant 0 : i32
    return %arg0, %c0_i32 : i32, i32
  }
}

</mosaic_0001>

<bundles_post_ra>
// kernel: tpu_custom_call.1
= control target key start
LH: loop header
LB: loop body
LE: loop exit
PB: predicated region body
PF: predicated region fallthrough
CT: control target
= control target key end

     0   :  { %7 = vsyncpa [#allocation5], 0  ;;  %s9171_s0 = inlined_call_operand.hbm [shape: f32[3,2,392,128], index: 0, kind: input, shape index: {}]   ;;  %s9172_s1 = inlined_call_operand.hbm [shape: f32[3,392,128], index: 1, kind: input, shape index: {}]   ;;  %s9173_s2 = inlined_call_operand.hbm [shape: f32[1,2], index: 2, kind: output, shape index: {}]  }
   0x1   :  { %8 = vsyncpa [#allocation8], 0 }
   0x2   :  { %9 = vsyncpa [#allocation6], 0  ;;  %s3750_s9 = smov [#allocation4]  }
   0x3   :  { %s22_s10 = sshll.u32 %s3750_s9, 4  ;;  %s23_s10 = int_to_ptr.vmem [resolvable:$true] %s22_s10 }
   0x4   :  { %s3704_s11 = scalar_lea.vmem %s23_s10, 37632  ;;  %p3709_p1 = scmp.lt.s32.totalorder %s23_s10, %s23_s10 }
   0x5   :  { %p3705_p0 = scmp.ne.s32.totalorder %s23_s10, %s3704_s11  ;;  %p3710_p2 = scmp.lt.s32.totalorder %s3704_s11, %s3704_s11 }
   0x7   :  { %p3711_p3 = por %p3710_p2, %p3709_p1 }
   0x9   :  { %p3712_p4 = pnand %p3711_p3, %p3705_p0 }
   0xb   :  { %3715 = shalt.err (!%p3712_p4)
}
   0xc   :  { %s3751_s12 = smov 128   ;;  %s3752_s13 = smov 8  }
   0xd   :  { %28 = dma.hbm_to_vmem [thread:$0]  %s9171_s0, 37632, %s23_s10, [#allocation5], %s3751_s12, %s3751_s12, %s3752_s13  }
   0xe   :  { %s3753_s16 = smov [#allocation7]  }
   0xf   :  { %s41_s17 = sshll.u32 %s3753_s16, 4  ;;  %s42_s17 = int_to_ptr.vmem [resolvable:$true] %s41_s17 }
  0x10   :  { %s3724_s18 = scalar_lea.vmem %s42_s17, 18816  ;;  %p3729_p6 = scmp.lt.s32.totalorder %s42_s17, %s42_s17 }
  0x11   :  { %p3725_p5 = scmp.ne.s32.totalorder %s42_s17, %s3724_s18  ;;  %p3730_p7 = scmp.lt.s32.totalorder %s3724_s18, %s3724_s18 }
  0x13   :  { %p3731_p8 = por %p3730_p7, %p3729_p6 }
  0x15   :  { %p3732_p9 = pnand %p3731_p8, %p3725_p5 }
  0x17   :  { %3735 = shalt.err (!%p3732_p9)
}
  0x18   :  { %47 = dma.hbm_to_vmem [thread:$0]  %s9172_s1, 18816, %s42_s17, [#allocation8], %s3751_s12, %s3751_s12, %s3752_s13  }
  0x19   :  { %3744 = dma.done.wait [#allocation5], 37632  }
  0x1a   :  { %3745 = vsyncadd [#allocation5], 4294929664 }
  0x1b   :  { %3746 = dma.done.wait [#allocation8], 18816  }
  0x1c   :  { %3747 = vsyncadd [#allocation8], 4294948480  ;;  %v3777_v0 = vld [vmem:[#allocation4 + $0x188] sm:$0xff]  ;;  %v3779_v1 = vld [vmem:[#allocation4 + $0x190] sm:$0xff]  ;;  %s3755_s21 = smov [#allocation9]  }
  0x1d   :  { %v3781_v2 = vld [vmem:[#allocation4 + $0x198] sm:$0xff]  ;;  %v3783_v3 = vld [vmem:[#allocation4 + $0x1a0] sm:$0xff]  ;;  %v3785_v4 = vld [vmem:[#allocation4 + $0x1a8] sm:$0xff] }
  0x1e   :  { %v3787_v5 = vld [vmem:[#allocation4 + $0x1b0] sm:$0xff]  ;;  %v3789_v6 = vld [vmem:[#allocation4 + $0x1b8] sm:$0xff]  ;;  %v3791_v7 = vld [vmem:[#allocation4 + $0x1c0] sm:$0xff] }
  0x1f   :  { %9646 = vst [vmem:[#allocation13_spill] sm:$0xff] %v3789_v6  ;;  %9647 = vst [vmem:[#allocation14_spill] sm:$0xff] %v3791_v7  ;;  %v3793_v8 = vld [vmem:[#allocation4 + $0x1c8] sm:$0xff]  ;;  %v3795_v9 = vld [vmem:[#allocation4 + $0x1d0] sm:$0xff] }
  0x20   :  { %9648 = vst [vmem:[#allocation15_spill] sm:$0xff] %v3793_v8  ;;  %9649 = vst [vmem:[#allocation16_spill] sm:$0xff] %v3795_v9  ;;  %v3797_v10 = vld [vmem:[#allocation4 + $0x1d8] sm:$0xff]  ;;  %v3799_v11 = vld [vmem:[#allocation4 + $0x1e0] sm:$0xff] }
  0x21   :  { %9650 = vst [vmem:[#allocation17_spill] sm:$0xff] %v3797_v10  ;;  %9651 = vst [vmem:[#allocation18_spill] sm:$0xff] %v3799_v11  ;;  %v3801_v12 = vld [vmem:[#allocation4 + $0x1e8] sm:$0xff]  ;;  %v3803_v13 = vld [vmem:[#allocation4 + $0x1f0] sm:$0xff] }
  0x22   :  { %9652 = vst [vmem:[#allocation19_spill] sm:$0xff] %v3801_v12  ;;  %9653 = vst [vmem:[#allocation20_spill] sm:$0xff] %v3803_v13  ;;  %v3805_v14 = vld [vmem:[#allocation4 + $0x1f8] sm:$0xff]  ;;  %v3807_v15 = vld [vmem:[#allocation4 + $0x200] sm:$0xff] }
  0x23   :  { %9654 = vst [vmem:[#allocation21_spill] sm:$0xff] %v3805_v14  ;;  %9655 = vst [vmem:[#allocation22_spill] sm:$0xff] %v3807_v15  ;;  %v3809_v16 = vld [vmem:[#allocation4 + $0x208] sm:$0xff]  ;;  %v3811_v17 = vld [vmem:[#allocation4 + $0x210] sm:$0xff] }
  0x24   :  { %9656 = vst [vmem:[#allocation23_spill] sm:$0xff] %v3809_v16  ;;  %9657 = vst [vmem:[#allocation24_spill] sm:$0xff] %v3811_v17  ;;  %v3816_v21 = vld [vmem:[#allocation4 + $0x218] sm:$0xff]  ;;  %v3818_v22 = vld [vmem:[#allocation4 + $0x220] sm:$0xff] }
  0x25   :  { %9658 = vst [vmem:[#allocation25_spill] sm:$0xff] %v3816_v21  ;;  %9659 = vst [vmem:[#allocation26_spill] sm:$0xff] %v3818_v22  ;;  %v3820_v23 = vld [vmem:[#allocation4 + $0x228] sm:$0xff]  ;;  %v3825_v27 = vld [vmem:[#allocation4 + $0x230] sm:$0xff] }
  0x26   :  { %9660 = vst [vmem:[#allocation27_spill] sm:$0xff] %v3820_v23  ;;  %9661 = vst [vmem:[#allocation28_spill] sm:$0xff] %v3825_v27  ;;  %v3827_v28 = vld [vmem:[#allocation4 + $0x238] sm:$0xff]  ;;  %v3829_v29 = vld [vmem:[#allocation4 + $0x240] sm:$0xff] }
  0x27   :  { %9662 = vst [vmem:[#allocation29_spill] sm:$0xff] %v3827_v28  ;;  %9663 = vst [vmem:[#allocation30_spill] sm:$0xff] %v3829_v29  ;;  %v3834_v33 = vld [vmem:[#allocation4 + $0x248] sm:$0xff]  ;;  %v3836_v34 = vld [vmem:[#allocation4 + $0x250] sm:$0xff] }
  0x28   :  { %9664 = vst [vmem:[#allocation31_spill] sm:$0xff] %v3834_v33  ;;  %9665 = vst [vmem:[#allocation32_spill] sm:$0xff] %v3836_v34  ;;  %v3838_v35 = vld [vmem:[#allocation4 + $0x258] sm:$0xff]  ;;  %v3843_v39 = vld [vmem:[#allocation4 + $0x260] sm:$0xff] }
  0x29   :  { %9666 = vst [vmem:[#allocation33_spill] sm:$0xff] %v3838_v35  ;;  %9667 = vst [vmem:[#allocation34_spill] sm:$0xff] %v3843_v39  ;;  %v3845_v40 = vld [vmem:[#allocation4 + $0x268] sm:$0xff]  ;;  %v3847_v41 = vld [vmem:[#allocation4 + $0x270] sm:$0xff] }
  0x2a   :  { %9668 = vst [vmem:[#allocation35_spill] sm:$0xff] %v3845_v40  ;;  %9669 = vst [vmem:[#allocation36_spill] sm:$0xff] %v3847_v41  ;;  %v3852_v45 = vld [vmem:[#allocation4 + $0x278] sm:$0xff]  ;;  %v3854_v46 = vld [vmem:[#allocation4 + $0x280] sm:$0xff] }
  0x2b   :  { %9670 = vst [vmem:[#allocation37_spill] sm:$0xff] %v3852_v45  ;;  %9671 = vst [vmem:[#allocation38_spill] sm:$0xff] %v3854_v46  ;;  %v3856_v47 = vld [vmem:[#allocation4 + $0x288] sm:$0xff]  ;;  %v3861_v51 = vld [vmem:[#allocation4 + $0x290] sm:$0xff] }
  0x2c   :  { %9672 = vst [vmem:[#allocation39_spill] sm:$0xff] %v3856_v47  ;;  %9673 = vst [vmem:[#allocation40_spill] sm:$0xff] %v3861_v51  ;;  %v3863_v52 = vld [vmem:[#allocation4 + $0x298] sm:$0xff]  ;;  %v3865_v53 = vld [vmem:[#allocation4 + $0x2a0] sm:$0xff] }
  0x2d   :  { %9674 = vst [vmem:[#allocation41_spill] sm:$0xff] %v3863_v52  ;;  %9675 = vst [vmem:[#allocation42_spill] sm:$0xff] %v3865_v53  ;;  %v3870_v57 = vld [vmem:[#allocation4 + $0x2a8] sm:$0xff]  ;;  %v3872_v58 = vld [vmem:[#allocation4 + $0x2b0] sm:$0xff] }
  0x2e   :  { %9676 = vst [vmem:[#allocation43_spill] sm:$0xff] %v3870_v57  ;;  %9677 = vst [vmem:[#allocation44_spill] sm:$0xff] %v3872_v58  ;;  %v3874_v59 = vld [vmem:[#allocation4 + $0x2b8] sm:$0xff]  ;;  %v3879_v63 = vld [vmem:[#allocation4 + $0x2c0] sm:$0xff] }
  0x2f   :  { %9678 = vst [vmem:[#allocation45_spill] sm:$0xff] %v3874_v59  ;;  %9679 = vst [vmem:[#allocation46_spill] sm:$0xff] %v3879_v63  ;;  %v3881_v50 = vld [vmem:[#allocation4 + $0x2c8] sm:$0xff]  ;;  %v3883_v54 = vld [vmem:[#allocation4 + $0x2d0] sm:$0xff] }
  0x30   :  { %9680 = vst [vmem:[#allocation47_spill] sm:$0xff] %v3881_v50  ;;  %9681 = vst [vmem:[#allocation48_spill] sm:$0xff] %v3883_v54  ;;  %v3888_v48 = vld [vmem:[#allocation4 + $0x2d8] sm:$0xff]  ;;  %v3890_v44 = vld [vmem:[#allocation4 + $0x2e0] sm:$0xff] }
  0x31   :  { %9682 = vst [vmem:[#allocation49_spill] sm:$0xff] %v3888_v48  ;;  %9683 = vst [vmem:[#allocation50_spill] sm:$0xff] %v3890_v44  ;;  %v3892_v60 = vld [vmem:[#allocation4 + $0x2e8] sm:$0xff]  ;;  %v3897_v42 = vld [vmem:[#allocation4 + $0x2f0] sm:$0xff] }
  0x32   :  { %9684 = vst [vmem:[#allocation51_spill] sm:$0xff] %v3892_v60  ;;  %9685 = vst [vmem:[#allocation52_spill] sm:$0xff] %v3897_v42  ;;  %v3899_v38 = vld [vmem:[#allocation4 + $0x2f8] sm:$0xff]  ;;  %v3901_v56 = vld [vmem:[#allocation4 + $0x300] sm:$0xff] }
  0x33   :  { %9686 = vst [vmem:[#allocation53_spill] sm:$0xff] %v3899_v38  ;;  %9687 = vst [vmem:[#allocation54_spill] sm:$0xff] %v3901_v56  ;;  %v3906_v36 = vld [vmem:[#allocation4 + $0x308] sm:$0xff]  ;;  %v3908_v32 = vld [vmem:[#allocation4 + $0x498] sm:$0xff] }
  0x34   :  { %9688 = vst [vmem:[#allocation55_spill] sm:$0xff] %v3906_v36  ;;  %9689 = vst [vmem:[#allocation56_spill] sm:$0xff] %v3908_v32  ;;  %v3910_v62 = vld [vmem:[#allocation4 + $0x4a0] sm:$0xff]  ;;  %v3915_v30 = vld [vmem:[#allocation4 + $0x4a8] sm:$0xff] }
  0x35   :  { %9690 = vst [vmem:[#allocation57_spill] sm:$0xff] %v3910_v62  ;;  %9691 = vst [vmem:[#allocation58_spill] sm:$0xff] %v3915_v30  ;;  %v3917_v26 = vld [vmem:[#allocation4 + $0x4b0] sm:$0xff]  ;;  %v3919_v49 = vld [vmem:[#allocation4 + $0x4b8] sm:$0xff] }
  0x36   :  { %9692 = vst [vmem:[#allocation59_spill] sm:$0xff] %v3917_v26  ;;  %9693 = vst [vmem:[#allocation60_spill] sm:$0xff] %v3919_v49  ;;  %v3924_v24 = vld [vmem:[#allocation4 + $0x4c0] sm:$0xff]  ;;  %v3926_v20 = vld [vmem:[#allocation4 + $0x4c8] sm:$0xff] }
  0x37   :  { %9694 = vst [vmem:[#allocation61_spill] sm:$0xff] %v3924_v24  ;;  %9695 = vst [vmem:[#allocation62_spill] sm:$0xff] %v3926_v20  ;;  %v3928_v43 = vld [vmem:[#allocation4 + $0x4d0] sm:$0xff]  ;;  %v3933_v18 = vld [vmem:[#allocation4 + $0x4d8] sm:$0xff] }
  0x38   :  { %9696 = vst [vmem:[#allocation63_spill] sm:$0xff] %v3928_v43  ;;  %9697 = vst [vmem:[#allocation64_spill] sm:$0xff] %v3933_v18  ;;  %v3935_v53 = vld [vmem:[#allocation4 + $0x4e0] sm:$0xff]  ;;  %v3937_v37 = vld [vmem:[#allocation4 + $0x4e8] sm:$0xff] }
  0x39   :  { %9698 = vst [vmem:[#allocation65_spill] sm:$0xff] %v3935_v53  ;;  %9699 = vst [vmem:[#allocation66_spill] sm:$0xff] %v3937_v37  ;;  %v3942_v58 = vld [vmem:[#allocation4 + $0x4f0] sm:$0xff]  ;;  %v3944_v57 = vld [vmem:[#allocation4 + $0x4f8] sm:$0xff] }
  0x3a   :  { %9700 = vst [vmem:[#allocation67_spill] sm:$0xff] %v3942_v58  ;;  %9701 = vst [vmem:[#allocation68_spill] sm:$0xff] %v3944_v57  ;;  %v3946_v31 = vld [vmem:[#allocation4 + $0x500] sm:$0xff]  ;;  %v3951_v50 = vld [vmem:[#allocation4 + $0x508] sm:$0xff] }
  0x3b   :  { %9702 = vst [vmem:[#allocation69_spill] sm:$0xff] %v3946_v31  ;;  %9703 = vst [vmem:[#allocation70_spill] sm:$0xff] %v3951_v50  ;;  %v3953_v63 = vld [vmem:[#allocation4 + $0x510] sm:$0xff]  ;;  %v3955_v25 = vld [vmem:[#allocation4 + $0x518] sm:$0xff] }
  0x3c   :  { %9704 = vst [vmem:[#allocation71_spill] sm:$0xff] %v3953_v63  ;;  %9705 = vst [vmem:[#allocation72_spill] sm:$0xff] %v3955_v25  ;;  %v3960_v44 = vld [vmem:[#allocation4 + $0x520] sm:$0xff]  ;;  %v3962_v48 = vld [vmem:[#allocation4 + $0x528] sm:$0xff] }
  0x3d   :  { %9706 = vst [vmem:[#allocation73_spill] sm:$0xff] %v3960_v44  ;;  %9707 = vst [vmem:[#allocation74_spill] sm:$0xff] %v3962_v48  ;;  %v3964_v19 = vld [vmem:[#allocation4 + $0x530] sm:$0xff]  ;;  %v3969_v38 = vld [vmem:[#allocation4 + $0x538] sm:$0xff] }
  0x3e   :  { %9708 = vst [vmem:[#allocation75_spill] sm:$0xff] %v3964_v19  ;;  %9709 = vst [vmem:[#allocation76_spill] sm:$0xff] %v3969_v38  ;;  %v3971_v42 = vld [vmem:[#allocation4 + $0x540] sm:$0xff]  ;;  %v3973_v59 = vld [vmem:[#allocation4 + $0x548] sm:$0xff] }
  0x3f   :  { %9710 = vst [vmem:[#allocation77_spill] sm:$0xff] %v3971_v42  ;;  %9711 = vst [vmem:[#allocation78_spill] sm:$0xff] %v3973_v59  ;;  %v3978_v32 = vld [vmem:[#allocation4 + $0x550] sm:$0xff]  ;;  %v3980_v36 = vld [vmem:[#allocation4 + $0x558] sm:$0xff] }
  0x40   :  { %9712 = vst [vmem:[#allocation79_spill] sm:$0xff] %v3978_v32  ;;  %9713 = vst [vmem:[#allocation80_spill] sm:$0xff] %v3980_v36  ;;  %v3982_v54 = vld [vmem:[#allocation4 + $0x560] sm:$0xff]  ;;  %v3987_v26 = vld [vmem:[#allocation4 + $0x568] sm:$0xff] }
  0x41   :  { %9714 = vst [vmem:[#allocation81_spill] sm:$0xff] %v3982_v54  ;;  %9715 = vst [vmem:[#allocation82_spill] sm:$0xff] %v3987_v26  ;;  %v3989_v30 = vld [vmem:[#allocation4 + $0x570] sm:$0xff]  ;;  %v3991_v60 = vld [vmem:[#allocation4 + $0x578] sm:$0xff] }
  0x42   :  { %9716 = vst [vmem:[#allocation83_spill] sm:$0xff] %v3989_v30  ;;  %9717 = vst [vmem:[#allocation84_spill] sm:$0xff] %v3991_v60  ;;  %v3996_v20 = vld [vmem:[#allocation4 + $0x580] sm:$0xff]  ;;  %v3998_v24 = vld [vmem:[#allocation4 + $0x588] sm:$0xff] }
  0x43   :  { %9718 = vst [vmem:[#allocation85_spill] sm:$0xff] %v3996_v20  ;;  %9719 = vst [vmem:[#allocation86_spill] sm:$0xff] %v3998_v24  ;;  %v4000_v56 = vld [vmem:[#allocation4 + $0x590] sm:$0xff]  ;;  %v4005_v53 = vld [vmem:[#allocation4 + $0x598] sm:$0xff] }
  0x44   :  { %9720 = vst [vmem:[#allocation87_spill] sm:$0xff] %v4000_v56  ;;  %9721 = vst [vmem:[#allocation88_spill] sm:$0xff] %v4005_v53  ;;  %v4007_v18 = vld [vmem:[#allocation4 + $0x5a0] sm:$0xff]  ;;  %v4009_v62 = vld [vmem:[#allocation4 + $0x5a8] sm:$0xff] }
  0x45   :  { %9722 = vst [vmem:[#allocation89_spill] sm:$0xff] %v4007_v18  ;;  %9723 = vst [vmem:[#allocation90_spill] sm:$0xff] %v4009_v62  ;;  %v4014_v57 = vld [vmem:[#allocation4 + $0x5b0] sm:$0xff]  ;;  %v4016_v58 = vld [vmem:[#allocation4 + $0x5b8] sm:$0xff] }
  0x46   :  { %9724 = vst [vmem:[#allocation91_spill] sm:$0xff] %v4014_v57  ;;  %9725 = vst [vmem:[#allocation92_spill] sm:$0xff] %v4016_v58  ;;  %v4018_v49 = vld [vmem:[#allocation4 + $0x5c0] sm:$0xff]  ;;  %v4023_v63 = vld [vmem:[#allocation4 + $0x5c8] sm:$0xff] }
  0x47   :  { %9726 = vst [vmem:[#allocation93_spill] sm:$0xff] %v4018_v49  ;;  %9727 = vst [vmem:[#allocation94_spill] sm:$0xff] %v4023_v63  ;;  %v4025_v50 = vld [vmem:[#allocation4 + $0x5d0] sm:$0xff]  ;;  %v4027_v43 = vld [vmem:[#allocation4 + $0x5d8] sm:$0xff] }
  0x48   :  { %9728 = vst [vmem:[#allocation95_spill] sm:$0xff] %v4025_v50  ;;  %9729 = vst [vmem:[#allocation96_spill] sm:$0xff] %v4027_v43  ;;  %v4032_v48 = vld [vmem:[#allocation4 + $0x5e0] sm:$0xff]  ;;  %v4034_v44 = vld [vmem:[#allocation4 + $0x5e8] sm:$0xff] }
  0x49   :  { %9730 = vst [vmem:[#allocation97_spill] sm:$0xff] %v4032_v48  ;;  %9731 = vst [vmem:[#allocation98_spill] sm:$0xff] %v4034_v44  ;;  %v4036_v37 = vld [vmem:[#allocation4 + $0x5f0] sm:$0xff]  ;;  %v4041_v42 = vld [vmem:[#allocation4 + $0x5f8] sm:$0xff] }
  0x4a   :  { %9732 = vst [vmem:[#allocation99_spill] sm:$0xff] %v4036_v37  ;;  %9733 = vst [vmem:[#allocation100_spill] sm:$0xff] %v4041_v42  ;;  %v4043_v38 = vld [vmem:[#allocation4 + $0x600] sm:$0xff]  ;;  %v4045_v31 = vld [vmem:[#allocation4 + $0x608] sm:$0xff] }
  0x4b   :  { %9734 = vst [vmem:[#allocation101_spill] sm:$0xff] %v4043_v38  ;;  %9735 = vst [vmem:[#allocation102_spill] sm:$0xff] %v4045_v31  ;;  %v4050_v36 = vld [vmem:[#allocation4 + $0x610] sm:$0xff]  ;;  %v4052_v32 = vld [vmem:[#allocation4 + $0x618] sm:$0xff] }
  0x4c   :  { %9736 = vst [vmem:[#allocation103_spill] sm:$0xff] %v4050_v36  ;;  %9737 = vst [vmem:[#allocation104_spill] sm:$0xff] %v4052_v32  ;;  %v4054_v25 = vld [vmem:[#allocation4 + $0x7a8] sm:$0xff]  ;;  %v4059_v30 = vld [vmem:[#allocation4 + $0x7b0] sm:$0xff] }
  0x4d   :  { %9738 = vst [vmem:[#allocation105_spill] sm:$0xff] %v4054_v25  ;;  %9739 = vst [vmem:[#allocation106_spill] sm:$0xff] %v4059_v30  ;;  %v4061_v26 = vld [vmem:[#allocation4 + $0x7b8] sm:$0xff]  ;;  %v4063_v19 = vld [vmem:[#allocation4 + $0x7c0] sm:$0xff] }
  0x4e   :  { %9740 = vst [vmem:[#allocation107_spill] sm:$0xff] %v4061_v26  ;;  %9741 = vst [vmem:[#allocation108_spill] sm:$0xff] %v4063_v19  ;;  %v4068_v24 = vld [vmem:[#allocation4 + $0x7c8] sm:$0xff]  ;;  %v4070_v20 = vld [vmem:[#allocation4 + $0x7d0] sm:$0xff] }
  0x4f   :  { %9742 = vst [vmem:[#allocation109_spill] sm:$0xff] %v4068_v24  ;;  %9743 = vst [vmem:[#allocation110_spill] sm:$0xff] %v4070_v20  ;;  %v4072_v59 = vld [vmem:[#allocation4 + $0x7d8] sm:$0xff]  ;;  %v4077_v18 = vld [vmem:[#allocation4 + $0x7e0] sm:$0xff] }
  0x50   :  { %9744 = vst [vmem:[#allocation111_spill] sm:$0xff] %v4072_v59  ;;  %9745 = vst [vmem:[#allocation112_spill] sm:$0xff] %v4077_v18  ;;  %v4079_v53 = vld [vmem:[#allocation4 + $0x7e8] sm:$0xff]  ;;  %v4081_v54 = vld [vmem:[#allocation4 + $0x7f0] sm:$0xff] }
  0x51   :  { %9746 = vst [vmem:[#allocation113_spill] sm:$0xff] %v4079_v53  ;;  %9747 = vst [vmem:[#allocation114_spill] sm:$0xff] %v4081_v54  ;;  %v4086_v58 = vld [vmem:[#allocation4 + $0x7f8] sm:$0xff]  ;;  %v4088_v57 = vld [vmem:[#allocation4 + $0x800] sm:$0xff] }
  0x52   :  { %9748 = vst [vmem:[#allocation115_spill] sm:$0xff] %v4086_v58  ;;  %9749 = vst [vmem:[#allocation116_spill] sm:$0xff] %v4088_v57  ;;  %v4090_v60 = vld [vmem:[#allocation4 + $0x808] sm:$0xff]  ;;  %v4095_v50 = vld [vmem:[#allocation4 + $0x810] sm:$0xff] }
  0x53   :  { %9750 = vst [vmem:[#allocation117_spill] sm:$0xff] %v4090_v60  ;;  %9751 = vst [vmem:[#allocation118_spill] sm:$0xff] %v4095_v50  ;;  %v4097_v63 = vld [vmem:[#allocation4 + $0x818] sm:$0xff]  ;;  %v4099_v56 = vld [vmem:[#allocation4 + $0x820] sm:$0xff] }
  0x54   :  { %9752 = vst [vmem:[#allocation119_spill] sm:$0xff] %v4097_v63  ;;  %9753 = vst [vmem:[#allocation120_spill] sm:$0xff] %v4099_v56  ;;  %v4104_v44 = vld [vmem:[#allocation4 + $0x828] sm:$0xff]  ;;  %v4106_v48 = vld [vmem:[#allocation4 + $0x830] sm:$0xff] }
  0x55   :  { %9754 = vst [vmem:[#allocation121_spill] sm:$0xff] %v4104_v44  ;;  %9755 = vst [vmem:[#allocation122_spill] sm:$0xff] %v4106_v48  ;;  %v4108_v62 = vld [vmem:[#allocation4 + $0x838] sm:$0xff]  ;;  %v4113_v38 = vld [vmem:[#allocation4 + $0x840] sm:$0xff] }
  0x56   :  { %9756 = vst [vmem:[#allocation123_spill] sm:$0xff] %v4108_v62  ;;  %9757 = vst [vmem:[#allocation124_spill] sm:$0xff] %v4113_v38  ;;  %v4115_v42 = vld [vmem:[#allocation4 + $0x848] sm:$0xff]  ;;  %v4117_v49 = vld [vmem:[#allocation4 + $0x850] sm:$0xff] }
  0x57   :  { %9758 = vst [vmem:[#allocation125_spill] sm:$0xff] %v4115_v42  ;;  %9759 = vst [vmem:[#allocation126_spill] sm:$0xff] %v4117_v49  ;;  %v4122_v32 = vld [vmem:[#allocation4 + $0x858] sm:$0xff]  ;;  %v4124_v36 = vld [vmem:[#allocation4 + $0x860] sm:$0xff] }
  0x58   :  { %9760 = vst [vmem:[#allocation127_spill] sm:$0xff] %v4122_v32  ;;  %9761 = vst [vmem:[#allocation128_spill] sm:$0xff] %v4124_v36  ;;  %v4126_v43 = vld [vmem:[#allocation4 + $0x868] sm:$0xff]  ;;  %v4131_v26 = vld [vmem:[#allocation4 + $0x870] sm:$0xff] }
  0x59   :  { %9762 = vst [vmem:[#allocation129_spill] sm:$0xff] %v4126_v43  ;;  %9763 = vst [vmem:[#allocation130_spill] sm:$0xff] %v4131_v26  ;;  %v4133_v30 = vld [vmem:[#allocation4 + $0x878] sm:$0xff]  ;;  %v4135_v37 = vld [vmem:[#allocation4 + $0x880] sm:$0xff] }
  0x5a   :  { %9764 = vst [vmem:[#allocation131_spill] sm:$0xff] %v4133_v30  ;;  %9765 = vst [vmem:[#allocation132_spill] sm:$0xff] %v4135_v37  ;;  %v4140_v20 = vld [vmem:[#allocation4 + $0x888] sm:$0xff]  ;;  %v4142_v24 = vld [vmem:[#allocation4 + $0x890] sm:$0xff] }
  0x5b   :  { %9766 = vst [vmem:[#allocation133_spill] sm:$0xff] %v4140_v20  ;;  %9767 = vst [vmem:[#allocation134_spill] sm:$0xff] %v4142_v24  ;;  %v4144_v31 = vld [vmem:[#allocation4 + $0x898] sm:$0xff]  ;;  %v4149_v53 = vld [vmem:[#allocation4 + $0x8a0] sm:$0xff] }
  0x5c   :  { %9768 = vst [vmem:[#allocation135_spill] sm:$0xff] %v4144_v31  ;;  %9769 = vst [vmem:[#allocation136_spill] sm:$0xff] %v4149_v53  ;;  %v4151_v18 = vld [vmem:[#allocation4 + $0x8a8] sm:$0xff]  ;;  %v4153_v25 = vld [vmem:[#allocation4 + $0x8b0] sm:$0xff] }
  0x5d   :  { %9770 = vst [vmem:[#allocation137_spill] sm:$0xff] %v4151_v18  ;;  %9771 = vst [vmem:[#allocation138_spill] sm:$0xff] %v4153_v25  ;;  %v4158_v57 = vld [vmem:[#allocation4 + $0x8b8] sm:$0xff]  ;;  %v4160_v58 = vld [vmem:[#allocation4 + $0x8c0] sm:$0xff] }
  0x5e   :  { %9772 = vst [vmem:[#allocation139_spill] sm:$0xff] %v4158_v57  ;;  %9773 = vst [vmem:[#allocation140_spill] sm:$0xff] %v4160_v58  ;;  %v4162_v19 = vld [vmem:[#allocation4 + $0x8c8] sm:$0xff]  ;;  %v4167_v63 = vld [vmem:[#allocation4 + $0x8d0] sm:$0xff] }
  0x5f   :  { %9774 = vst [vmem:[#allocation141_spill] sm:$0xff] %v4162_v19  ;;  %9775 = vst [vmem:[#allocation142_spill] sm:$0xff] %v4167_v63  ;;  %v4169_v50 = vld [vmem:[#allocation4 + $0x8d8] sm:$0xff]  ;;  %v4171_v59 = vld [vmem:[#allocation4 + $0x8e0] sm:$0xff] }
  0x60   :  { %9776 = vst [vmem:[#allocation143_spill] sm:$0xff] %v4169_v50  ;;  %9777 = vst [vmem:[#allocation144_spill] sm:$0xff] %v4171_v59  ;;  %v4176_v48 = vld [vmem:[#allocation4 + $0x8e8] sm:$0xff]  ;;  %v4178_v44 = vld [vmem:[#allocation4 + $0x8f0] sm:$0xff] }
  0x61   :  { %9778 = vst [vmem:[#allocation145_spill] sm:$0xff] %v4176_v48  ;;  %9779 = vst [vmem:[#allocation146_spill] sm:$0xff] %v4178_v44  ;;  %v4180_v54 = vld [vmem:[#allocation4 + $0x8f8] sm:$0xff]  ;;  %v4185_v42 = vld [vmem:[#allocation4 + $0x900] sm:$0xff] }
  0x62   :  { %9780 = vst [vmem:[#allocation147_spill] sm:$0xff] %v4180_v54  ;;  %9781 = vst [vmem:[#allocation148_spill] sm:$0xff] %v4185_v42  ;;  %v4187_v38 = vld [vmem:[#allocation4 + $0x908] sm:$0xff]  ;;  %v4189_v60 = vld [vmem:[#allocation4 + $0x910] sm:$0xff] }
  0x63   :  { %9782 = vst [vmem:[#allocation149_spill] sm:$0xff] %v4187_v38  ;;  %9783 = vst [vmem:[#allocation150_spill] sm:$0xff] %v4189_v60  ;;  %v4194_v36 = vld [vmem:[#allocation4 + $0x918] sm:$0xff]  ;;  %v4196_v32 = vld [vmem:[#allocation4 + $0x920] sm:$0xff] }
  0x64   :  { %9784 = vst [vmem:[#allocation151_spill] sm:$0xff] %v4194_v36  ;;  %9785 = vst [vmem:[#allocation152_spill] sm:$0xff] %v4196_v32  ;;  %v4198_v56 = vld [vmem:[#allocation4 + $0x928] sm:$0xff]  ;;  %v4203_v30 = vld [vmem:[#allocation4] sm:$0xff] }
  0x65   :  { %9786 = vst [vmem:[#allocation153_spill] sm:$0xff] %v4198_v56  ;;  %v4205_v26 = vld [vmem:[#allocation4 + $0x8] sm:$0xff]  ;;  %v4207_v62 = vld [vmem:[#allocation4 + $0x10] sm:$0xff]  ;;  %v4209_v55 = vld [vmem:[#allocation4 + $0x18] sm:$0xff] }
  0x66   :  { %v459_v43 = vld [vmem:[#allocation7] sm:$0xff]  ;;  %v460_v31 = vld [vmem:[#allocation7 + $0x8] sm:$0xff]  ;;  %v461_v24 = vld [vmem:[#allocation7 + $0x10] sm:$0xff] }
  0x67   :  { %v462_v20 = vld [vmem:[#allocation7 + $0x18] sm:$0xff]  ;;  %v4214_v18 = vld [vmem:[#allocation4 + $0x20] sm:$0xff]  ;;  %v4218_v25 = vld [vmem:[#allocation4 + $0x30] sm:$0xff]  ;;  %v4283_v41 = vsub.f32 %v459_v43, %v4203_v30  ;;  %v4286_v22 = vsub.f32 %v460_v31, %v4205_v26  ;;  %v4289_v33 = vsub.f32 %v461_v24, %v4207_v62 }
  0x68   :  { %v4216_v37 = vld [vmem:[#allocation4 + $0x28] sm:$0xff]  ;;  %v4220_v53 = vld [vmem:[#allocation4 + $0x38] sm:$0xff]  ;;  %v463_v51 = vld [vmem:[#allocation7 + $0x20] sm:$0xff]  ;;  %v4292_v56 = vsub.f32 %v462_v20, %v4209_v55 }
  0x69   :  { %v464_v47 = vld [vmem:[#allocation7 + $0x28] sm:$0xff]  ;;  %v465_v46 = vld [vmem:[#allocation7 + $0x30] sm:$0xff]  ;;  %v466_v45 = vld [vmem:[#allocation7 + $0x38] sm:$0xff]  ;;  %9787 = vst [vmem:[#allocation154_spill] sm:$0xff] %v4283_v41  ;;  %v4311_v24 = vsub.f32 %v463_v51, %v4214_v18 }
  0x6a   :  { %v4225_v58 = vld [vmem:[#allocation4 + $0x40] sm:$0xff]  ;;  %v4227_v61 = vld [vmem:[#allocation4 + $0x48] sm:$0xff]  ;;  %v4229_v19 = vld [vmem:[#allocation4 + $0x50] sm:$0xff]  ;;  %9788 = vst [vmem:[#allocation155_spill] sm:$0xff] %v4286_v22  ;;  %v4314_v20 = vsub.f32 %v464_v47, %v4216_v37  ;;  %v4317_v43 = vsub.f32 %v465_v46, %v4218_v25  ;;  %v4320_v55 = vsub.f32 %v466_v45, %v4220_v53 }
  0x6b   :  { %v4231_v57 = vld [vmem:[#allocation4 + $0x58] sm:$0xff]  ;;  %v467_v40 = vld [vmem:[#allocation7 + $0x40] sm:$0xff]  ;;  %v469_v35 = vld [vmem:[#allocation7 + $0x50] sm:$0xff]  ;;  %9789 = vst [vmem:[#allocation156_spill] sm:$0xff] %v4289_v33 }
  0x6c   :  { %v468_v39 = vld [vmem:[#allocation7 + $0x48] sm:$0xff]  ;;  %v470_v34 = vld [vmem:[#allocation7 + $0x58] sm:$0xff]  ;;  %v4236_v50 = vld [vmem:[#allocation4 + $0x60] sm:$0xff]  ;;  %9790 = vst [vmem:[#allocation157_spill] sm:$0xff] %v4292_v56  ;;  %v4339_v25 = vsub.f32 %v467_v40, %v4225_v58  ;;  %v4345_v46 = vsub.f32 %v469_v35, %v4229_v19 }
  0x6d   :  { %v4238_v49 = vld [vmem:[#allocation4 + $0x68] sm:$0xff]  ;;  %v4240_v59 = vld [vmem:[#allocation4 + $0x70] sm:$0xff]  ;;  %v4242_v63 = vld [vmem:[#allocation4 + $0x78] sm:$0xff]  ;;  %9791 = vst [vmem:[#allocation158_spill] sm:$0xff] %v4311_v24  ;;  %v4342_v45 = vsub.f32 %v468_v39, %v4227_v61  ;;  %v4348_v51 = vsub.f32 %v470_v34, %v4231_v57 }
  0x6e   :  { %v471_v29 = vld [vmem:[#allocation7 + $0x60] sm:$0xff]  ;;  %v472_v28 = vld [vmem:[#allocation7 + $0x68] sm:$0xff]  ;;  %v473_v27 = vld [vmem:[#allocation7 + $0x70] sm:$0xff]  ;;  %9792 = vst [vmem:[#allocation159_spill] sm:$0xff] %v4314_v20 }
  0x6f   :  { %v474_v23 = vld [vmem:[#allocation7 + $0x78] sm:$0xff]  ;;  %v4247_v44 = vld [vmem:[#allocation4 + $0x80] sm:$0xff]  ;;  %v4251_v54 = vld [vmem:[#allocation4 + $0x90] sm:$0xff]  ;;  %9793 = vst [vmem:[#allocation160_spill] sm:$0xff] %v4317_v43  ;;  %v4367_v19 = vsub.f32 %v471_v29, %v4236_v50  ;;  %v4370_v34 = vsub.f32 %v472_v28, %v4238_v49  ;;  %v4373_v35 = vsub.f32 %v473_v27, %v4240_v59 }
  0x70   :  { %v4249_v52 = vld [vmem:[#allocation4 + $0x88] sm:$0xff]  ;;  %v4253_v48 = vld [vmem:[#allocation4 + $0x98] sm:$0xff]  ;;  %v4255_v21 = vld [vmem:[#allocation7 + $0x80] sm:$0xff]  ;;  %9794 = vst [vmem:[#allocation161_spill] sm:$0xff] %v4320_v55  ;;  %v4376_v57 = vsub.f32 %v474_v23, %v4242_v63 }
  0x71   :  { %v4257_v17 = vld [vmem:[#allocation7 + $0x88] sm:$0xff]  ;;  %v4259_v16 = vld [vmem:[#allocation7 + $0x90] sm:$0xff]  ;;  %v4261_v15 = vld [vmem:[#allocation7 + $0x98] sm:$0xff]  ;;  %9795 = vst [vmem:[#allocation162_spill] sm:$0xff] %v4339_v25  ;;  %v4396_v23 = vsub.f32 %v4255_v21, %v4247_v44 }
  0x72   :  { %v4266_v60 = vld [vmem:[#allocation4 + $0xa0] sm:$0xff]  ;;  %v4268_v38 = vld [vmem:[#allocation4 + $0xa8] sm:$0xff]  ;;  %v4270_v42 = vld [vmem:[#allocation4 + $0xb0] sm:$0xff]  ;;  %9796 = vst [vmem:[#allocation163_spill] sm:$0xff] %v4342_v45  ;;  %v4400_v27 = vsub.f32 %v4257_v17, %v4249_v52  ;;  %v4404_v50 = vsub.f32 %v4259_v16, %v4251_v54  ;;  %v4408_v59 = vsub.f32 %v4261_v15, %v4253_v48 }
  0x73   :  { %v4272_v14 = vld [vmem:[#allocation4 + $0xb8] sm:$0xff]  ;;  %v4274_v13 = vld [vmem:[#allocation7 + $0xa0] sm:$0xff]  ;;  %v4278_v11 = vld [vmem:[#allocation7 + $0xb0] sm:$0xff]  ;;  %9797 = vst [vmem:[#allocation164_spill] sm:$0xff] %v4345_v46 }
  0x74   :  { %v4276_v12 = vld [vmem:[#allocation7 + $0xa8] sm:$0xff]  ;;  %v4280_v10 = vld [vmem:[#allocation7 + $0xb8] sm:$0xff]  ;;  %v4294_v32 = vld [vmem:[#allocation4 + $0xc0] sm:$0xff]  ;;  %9798 = vst [vmem:[#allocation165_spill] sm:$0xff] %v4348_v51  ;;  %v4428_v15 = vsub.f32 %v4274_v13, %v4266_v60  ;;  %v4436_v54 = vsub.f32 %v4278_v11, %v4270_v42 }
  0x75   :  { %v4296_v36 = vld [vmem:[#allocation4 + $0xc8] sm:$0xff]  ;;  %v4298_v9 = vld [vmem:[#allocation4 + $0xd0] sm:$0xff]  ;;  %v4300_v8 = vld [vmem:[#allocation4 + $0xd8] sm:$0xff]  ;;  %9799 = vst [vmem:[#allocation166_spill] sm:$0xff] %v4367_v19  ;;  %v4432_v48 = vsub.f32 %v4276_v12, %v4268_v38 }
  0x76   :  { %v4302_v7 = vld [vmem:[#allocation7 + $0xc0] sm:$0xff]  ;;  %v4304_v30 = vld [vmem:[#allocation7 + $0xc8] sm:$0xff]  ;;  %v4306_v26 = vld [vmem:[#allocation7 + $0xd0] sm:$0xff]  ;;  %9800 = vst [vmem:[#allocation167_spill] sm:$0xff] %v4370_v34 }
  0x77   :  { %v4308_v31 = vld [vmem:[#allocation7 + $0xd8] sm:$0xff]  ;;  %v4322_v62 = vld [vmem:[#allocation4 + $0xe0] sm:$0xff]  ;;  %v4326_v33 = vld [vmem:[#allocation4 + $0xf0] sm:$0xff]  ;;  %9801 = vst [vmem:[#allocation168_spill] sm:$0xff] %v4373_v35  ;;  %v4468_v42 = vsub.f32 %v4306_v26, %v4298_v9 }
  0x78   :  { %v4324_v56 = vld [vmem:[#allocation4 + $0xe8] sm:$0xff]  ;;  %v4328_v22 = vld [vmem:[#allocation4 + $0xf8] sm:$0xff]  ;;  %v4330_v41 = vld [vmem:[#allocation7 + $0xe0] sm:$0xff]  ;;  %9802 = vst [vmem:[#allocation169_spill] sm:$0xff] %v4376_v57 }
  0x79   :  { %v4332_v18 = vld [vmem:[#allocation7 + $0xe8] sm:$0xff]  ;;  %v4334_v37 = vld [vmem:[#allocation7 + $0xf0] sm:$0xff]  ;;  %v4336_v47 = vld [vmem:[#allocation7 + $0xf8] sm:$0xff]  ;;  %9803 = vst [vmem:[#allocation170_spill] sm:$0xff] %v4396_v23 }
  0x7a   :  { %v4350_v53 = vld [vmem:[#allocation4 + $0x100] sm:$0xff]  ;;  %v4352_v55 = vld [vmem:[#allocation4 + $0x108] sm:$0xff]  ;;  %v4354_v43 = vld [vmem:[#allocation4 + $0x110] sm:$0xff]  ;;  %9804 = vst [vmem:[#allocation171_spill] sm:$0xff] %v4400_v27  ;;  %v4496_v26 = vsub.f32 %v4332_v18, %v4324_v56 }
  0x7b   :  { %v4356_v20 = vld [vmem:[#allocation4 + $0x118] sm:$0xff]  ;;  %v4358_v24 = vld [vmem:[#allocation7 + $0x100] sm:$0xff]  ;;  %v4362_v39 = vld [vmem:[#allocation7 + $0x110] sm:$0xff]  ;;  %9805 = vst [vmem:[#allocation172_spill] sm:$0xff] %v4404_v50 }
  0x7c   :  { %v4360_v40 = vld [vmem:[#allocation7 + $0x108] sm:$0xff]  ;;  %v4364_v58 = vld [vmem:[#allocation7 + $0x118] sm:$0xff]  ;;  %v4378_v61 = vld [vmem:[#allocation4 + $0x120] sm:$0xff]  ;;  %9806 = vst [vmem:[#allocation173_spill] sm:$0xff] %v4408_v59  ;;  %v4440_v59 = vsub.f32 %v4280_v10, %v4272_v14  ;;  %v4460_v10 = vsub.f32 %v4302_v7, %v4294_v32  ;;  %v4464_v14 = vsub.f32 %v4304_v30, %v4296_v36 }
  0x7d   :  { %v4380_v51 = vld [vmem:[#allocation4 + $0x128] sm:$0xff]  ;;  %v4382_v46 = vld [vmem:[#allocation4 + $0x130] sm:$0xff]  ;;  %v4384_v45 = vld [vmem:[#allocation4 + $0x138] sm:$0xff]  ;;  %9807 = vst [vmem:[#allocation174_spill] sm:$0xff] %v4428_v15 }
  0x7e   :  { %v4386_v25 = vld [vmem:[#allocation7 + $0x120] sm:$0xff]  ;;  %v4388_v29 = vld [vmem:[#allocation7 + $0x128] sm:$0xff]  ;;  %v4390_v28 = vld [vmem:[#allocation7 + $0x130] sm:$0xff]  ;;  %9808 = vst [vmem:[#allocation175_spill] sm:$0xff] %v4432_v48 }
  0x7f   :  { %v4392_v49 = vld [vmem:[#allocation7 + $0x138] sm:$0xff]  ;;  %v4410_v63 = vld [vmem:[#allocation4 + $0x140] sm:$0xff]  ;;  %v4414_v35 = vld [vmem:[#allocation4 + $0x150] sm:$0xff]  ;;  %9809 = vst [vmem:[#allocation176_spill] sm:$0xff] %v4436_v54 }
  0x80   :  { %v4412_v57 = vld [vmem:[#allocation4 + $0x148] sm:$0xff]  ;;  %v4416_v21 = vld [vmem:[#allocation4 + $0x158] sm:$0xff]  ;;  %v4418_v44 = vld [vmem:[#allocation7 + $0x140] sm:$0xff]  ;;  %9810 = vst [vmem:[#allocation177_spill] sm:$0xff] %v4440_v59  ;;  %v4472_v59 = vsub.f32 %v4308_v31, %v4300_v8  ;;  %v4492_v8 = vsub.f32 %v4330_v41, %v4322_v62  ;;  %v4500_v31 = vsub.f32 %v4334_v37, %v4326_v33  ;;  %v4528_v37 = vsub.f32 %v4360_v40, %v4352_v55 }
  0x81   :  { %v4420_v17 = vld [vmem:[#allocation7 + $0x148] sm:$0xff]  ;;  %v4422_v52 = vld [vmem:[#allocation7 + $0x150] sm:$0xff]  ;;  %v4424_v16 = vld [vmem:[#allocation7 + $0x158] sm:$0xff]  ;;  %9811 = vst [vmem:[#allocation178_spill] sm:$0xff] %v4460_v10 }
  0x82   :  { %v4442_v50 = vld [vmem:[#allocation4 + $0x160] sm:$0xff]  ;;  %v4444_v27 = vld [vmem:[#allocation4 + $0x168] sm:$0xff]  ;;  %v4446_v23 = vld [vmem:[#allocation4 + $0x170] sm:$0xff]  ;;  %9812 = vst [vmem:[#allocation179_spill] sm:$0xff] %v4464_v14 }
  0x83   :  { %v4448_v13 = vld [vmem:[#allocation4 + $0x178] sm:$0xff]  ;;  %v4450_v60 = vld [vmem:[#allocation7 + $0x160] sm:$0xff]  ;;  %v4454_v38 = vld [vmem:[#allocation7 + $0x170] sm:$0xff]  ;;  %9813 = vst [vmem:[#allocation180_spill] sm:$0xff] %v4468_v42 }
  0x84   :  { %v4452_v12 = vld [vmem:[#allocation7 + $0x168] sm:$0xff]  ;;  %v4456_v11 = vld [vmem:[#allocation7 + $0x178] sm:$0xff]  ;;  %9814 = vst [vmem:[#allocation181_spill] sm:$0xff] %v4472_v59  ;;  %v4474_v54 = vld [vmem:[#allocation4 + $0x180] sm:$0xff]  ;;  %v4504_v59 = vsub.f32 %v4336_v47, %v4328_v22  ;;  %v4524_v22 = vsub.f32 %v4358_v24, %v4350_v53  ;;  %v4532_v47 = vsub.f32 %v4362_v39, %v4354_v43  ;;  %v4560_v39 = vsub.f32 %v4388_v29, %v4380_v51 }
  0x85   :  { %v4476_v48 = vld [vmem:[#allocation4 + $0x310] sm:$0xff]  ;;  %v4478_v15 = vld [vmem:[#allocation4 + $0x318] sm:$0xff]  ;;  %v4480_v7 = vld [vmem:[#allocation4 + $0x320] sm:$0xff]  ;;  %9815 = vst [vmem:[#allocation182_spill] sm:$0xff] %v4492_v8 }
  0x86   :  { %v4482_v32 = vld [vmem:[#allocation7 + $0x180] sm:$0xff]  ;;  %v4484_v36 = vld [vmem:[#allocation7 + $0x188] sm:$0xff]  ;;  %v4486_v30 = vld [vmem:[#allocation7 + $0x190] sm:$0xff]  ;;  %9816 = vst [vmem:[#allocation183_spill] sm:$0xff] %v4496_v26 }
  0x87   :  { %v4488_v9 = vld [vmem:[#allocation7 + $0x198] sm:$0xff]  ;;  %9817 = vst [vmem:[#allocation184_spill] sm:$0xff] %v4500_v31  ;;  %9818 = vst [vmem:[#allocation185_spill] sm:$0xff] %v4504_v59  ;;  %v4508_v14 = vld [vmem:[#allocation4 + $0x330] sm:$0xff]  ;;  %v4536_v59 = vsub.f32 %v4364_v58, %v4356_v20  ;;  %v4556_v20 = vsub.f32 %v4386_v25, %v4378_v61  ;;  %v4564_v58 = vsub.f32 %v4390_v28, %v4382_v46 }
  0x88   :  { %v4506_v42 = vld [vmem:[#allocation4 + $0x328] sm:$0xff]  ;;  %v4510_v10 = vld [vmem:[#allocation4 + $0x338] sm:$0xff]  ;;  %v4512_v41 = vld [vmem:[#allocation4 + $0x340] sm:$0xff]  ;;  %9819 = vst [vmem:[#allocation186_spill] sm:$0xff] %v4524_v22  ;;  %v4592_v28 = vsub.f32 %v4420_v17, %v4412_v57 }
  0x89   :  { %v4514_v62 = vld [vmem:[#allocation7 + $0x1a0] sm:$0xff]  ;;  %v4516_v56 = vld [vmem:[#allocation7 + $0x1a8] sm:$0xff]  ;;  %v4518_v18 = vld [vmem:[#allocation7 + $0x1b0] sm:$0xff]  ;;  %9820 = vst [vmem:[#allocation187_spill] sm:$0xff] %v4528_v37 }
  0x8a   :  { %v4520_v33 = vld [vmem:[#allocation7 + $0x1b8] sm:$0xff]  ;;  %9821 = vst [vmem:[#allocation188_spill] sm:$0xff] %v4532_v47  ;;  %9822 = vst [vmem:[#allocation189_spill] sm:$0xff] %v4536_v59  ;;  %v4540_v26 = vld [vmem:[#allocation4 + $0x350] sm:$0xff]  ;;  %v4568_v59 = vsub.f32 %v4392_v49, %v4384_v45  ;;  %v4588_v45 = vsub.f32 %v4418_v44, %v4410_v63  ;;  %v4596_v49 = vsub.f32 %v4422_v52, %v4414_v35 }
  0x8b   :  { %v4538_v31 = vld [vmem:[#allocation4 + $0x348] sm:$0xff]  ;;  %v4542_v8 = vld [vmem:[#allocation4 + $0x358] sm:$0xff]  ;;  %v4544_v24 = vld [vmem:[#allocation4 + $0x360] sm:$0xff]  ;;  %9823 = vst [vmem:[#allocation190_spill] sm:$0xff] %v4556_v20  ;;  %v4624_v52 = vsub.f32 %v4452_v12, %v4444_v27 }
  0x8c   :  { %v4546_v53 = vld [vmem:[#allocation7 + $0x1c0] sm:$0xff]  ;;  %v4548_v55 = vld [vmem:[#allocation7 + $0x1c8] sm:$0xff]  ;;  %v4550_v40 = vld [vmem:[#allocation7 + $0x1d0] sm:$0xff]  ;;  %9824 = vst [vmem:[#allocation191_spill] sm:$0xff] %v4560_v39 }
  0x8d   :  { %v4552_v43 = vld [vmem:[#allocation7 + $0x1d8] sm:$0xff]  ;;  %9825 = vst [vmem:[#allocation192_spill] sm:$0xff] %v4564_v58  ;;  %9826 = vst [vmem:[#allocation193_spill] sm:$0xff] %v4568_v59  ;;  %v4572_v37 = vld [vmem:[#allocation4 + $0x370] sm:$0xff]  ;;  %v4600_v59 = vsub.f32 %v4424_v16, %v4416_v21  ;;  %v4620_v21 = vsub.f32 %v4450_v60, %v4442_v50  ;;  %v4628_v16 = vsub.f32 %v4454_v38, %v4446_v23 }
  0x8e   :  { %v4570_v47 = vld [vmem:[#allocation4 + $0x368] sm:$0xff]  ;;  %v4574_v22 = vld [vmem:[#allocation4 + $0x378] sm:$0xff]  ;;  %v4576_v25 = vld [vmem:[#allocation4 + $0x380] sm:$0xff]  ;;  %9827 = vst [vmem:[#allocation194_spill] sm:$0xff] %v4588_v45  ;;  %v4656_v38 = vsub.f32 %v4484_v36, %v4476_v48 }
  0x8f   :  { %v4578_v61 = vld [vmem:[#allocation7 + $0x1e0] sm:$0xff]  ;;  %v4580_v51 = vld [vmem:[#allocation7 + $0x1e8] sm:$0xff]  ;;  %v4582_v29 = vld [vmem:[#allocation7 + $0x1f0] sm:$0xff]  ;;  %9828 = vst [vmem:[#allocation195_spill] sm:$0xff] %v4592_v28 }
  0x90   :  { %v4584_v46 = vld [vmem:[#allocation7 + $0x1f8] sm:$0xff]  ;;  %9829 = vst [vmem:[#allocation196_spill] sm:$0xff] %v4596_v49  ;;  %9830 = vst [vmem:[#allocation197_spill] sm:$0xff] %v4600_v59  ;;  %v4604_v39 = vld [vmem:[#allocation4 + $0x390] sm:$0xff]  ;;  %v4632_v59 = vsub.f32 %v4456_v11, %v4448_v13  ;;  %v4652_v13 = vsub.f32 %v4482_v32, %v4474_v54  ;;  %v4660_v11 = vsub.f32 %v4486_v30, %v4478_v15 }
  0x91   :  { %v4602_v58 = vld [vmem:[#allocation4 + $0x388] sm:$0xff]  ;;  %v4606_v20 = vld [vmem:[#allocation4 + $0x398] sm:$0xff]  ;;  %v4608_v63 = vld [vmem:[#allocation4 + $0x3a0] sm:$0xff]  ;;  %9831 = vst [vmem:[#allocation198_spill] sm:$0xff] %v4620_v21  ;;  %v4688_v30 = vsub.f32 %v4516_v56, %v4508_v14 }
  0x92   :  { %v4610_v44 = vld [vmem:[#allocation7 + $0x200] sm:$0xff]  ;;  %v4612_v57 = vld [vmem:[#allocation7 + $0x208] sm:$0xff]  ;;  %v4614_v17 = vld [vmem:[#allocation7 + $0x210] sm:$0xff]  ;;  %9832 = vst [vmem:[#allocation199_spill] sm:$0xff] %v4624_v52 }
  0x93   :  { %v4616_v35 = vld [vmem:[#allocation7 + $0x218] sm:$0xff]  ;;  %9833 = vst [vmem:[#allocation200_spill] sm:$0xff] %v4628_v16  ;;  %9834 = vst [vmem:[#allocation201_spill] sm:$0xff] %v4632_v59  ;;  %v4636_v28 = vld [vmem:[#allocation4 + $0x3b0] sm:$0xff]  ;;  %v4664_v59 = vsub.f32 %v4488_v9, %v4480_v7  ;;  %v4684_v7 = vsub.f32 %v4514_v62, %v4506_v42  ;;  %v4692_v9 = vsub.f32 %v4518_v18, %v4510_v10 }
  0x94   :  { %v4634_v49 = vld [vmem:[#allocation4 + $0x3a8] sm:$0xff]  ;;  %v4638_v45 = vld [vmem:[#allocation4 + $0x3b8] sm:$0xff]  ;;  %v4640_v50 = vld [vmem:[#allocation4 + $0x3c0] sm:$0xff]  ;;  %9835 = vst [vmem:[#allocation202_spill] sm:$0xff] %v4652_v13  ;;  %v4720_v18 = vsub.f32 %v4548_v55, %v4540_v26 }
  0x95   :  { %v4642_v60 = vld [vmem:[#allocation7 + $0x220] sm:$0xff]  ;;  %v4644_v27 = vld [vmem:[#allocation7 + $0x228] sm:$0xff]  ;;  %v4646_v12 = vld [vmem:[#allocation7 + $0x230] sm:$0xff]  ;;  %9836 = vst [vmem:[#allocation203_spill] sm:$0xff] %v4656_v38 }
  0x96   :  { %v4648_v23 = vld [vmem:[#allocation7 + $0x238] sm:$0xff]  ;;  %9837 = vst [vmem:[#allocation204_spill] sm:$0xff] %v4660_v11  ;;  %9838 = vst [vmem:[#allocation205_spill] sm:$0xff] %v4664_v59  ;;  %v4668_v52 = vld [vmem:[#allocation4 + $0x3d0] sm:$0xff]  ;;  %v4696_v59 = vsub.f32 %v4520_v33, %v4512_v41  ;;  %v4716_v41 = vsub.f32 %v4546_v53, %v4538_v31  ;;  %v4724_v33 = vsub.f32 %v4550_v40, %v4542_v8 }
  0x97   :  { %v4666_v16 = vld [vmem:[#allocation4 + $0x3c8] sm:$0xff]  ;;  %v4670_v21 = vld [vmem:[#allocation4 + $0x3d8] sm:$0xff]  ;;  %v4672_v54 = vld [vmem:[#allocation4 + $0x3e0] sm:$0xff]  ;;  %9839 = vst [vmem:[#allocation206_spill] sm:$0xff] %v4684_v7  ;;  %v4740_v8 = vsub.f32 %v4578_v61, %v4570_v47  ;;  %v4748_v40 = vsub.f32 %v4582_v29, %v4574_v22  ;;  %v4764_v22 = vsub.f32 %v4610_v44, %v4602_v58  ;;  %v4772_v29 = vsub.f32 %v4614_v17, %v4606_v20 }
  0x98   :  { %v4674_v32 = vld [vmem:[#allocation7 + $0x240] sm:$0xff]  ;;  %v4676_v48 = vld [vmem:[#allocation7 + $0x248] sm:$0xff]  ;;  %v4678_v36 = vld [vmem:[#allocation7 + $0x250] sm:$0xff]  ;;  %9840 = vst [vmem:[#allocation207_spill] sm:$0xff] %v4688_v30  ;;  %v4788_v20 = vsub.f32 %v4642_v60, %v4634_v49  ;;  %v4796_v17 = vsub.f32 %v4646_v12, %v4638_v45 }
  0x99   :  { %v4680_v15 = vld [vmem:[#allocation7 + $0x258] sm:$0xff]  ;;  %9841 = vst [vmem:[#allocation208_spill] sm:$0xff] %v4692_v9  ;;  %9842 = vst [vmem:[#allocation209_spill] sm:$0xff] %v4696_v59  ;;  %v4700_v38 = vld [vmem:[#allocation4 + $0x3f0] sm:$0xff]  ;;  %v4728_v59 = vsub.f32 %v4552_v43, %v4544_v24  ;;  %v4744_v24 = vsub.f32 %v4580_v51, %v4572_v37  ;;  %v4752_v43 = vsub.f32 %v4584_v46, %v4576_v25 }
  0x9a   :  { %v4698_v11 = vld [vmem:[#allocation4 + $0x3e8] sm:$0xff]  ;;  %v4702_v13 = vld [vmem:[#allocation4 + $0x3f8] sm:$0xff]  ;;  %v4704_v42 = vld [vmem:[#allocation4 + $0x400] sm:$0xff]  ;;  %9843 = vst [vmem:[#allocation210_spill] sm:$0xff] %v4716_v41  ;;  %v4768_v25 = vsub.f32 %v4612_v57, %v4604_v39  ;;  %v4776_v46 = vsub.f32 %v4616_v35, %v4608_v63  ;;  %v4792_v63 = vsub.f32 %v4644_v27, %v4636_v28  ;;  %v4800_v35 = vsub.f32 %v4648_v23, %v4640_v50 }
  0x9b   :  { %v4706_v62 = vld [vmem:[#allocation7 + $0x260] sm:$0xff]  ;;  %v4708_v14 = vld [vmem:[#allocation7 + $0x268] sm:$0xff]  ;;  %v4710_v56 = vld [vmem:[#allocation7 + $0x270] sm:$0xff]  ;;  %9844 = vst [vmem:[#allocation211_spill] sm:$0xff] %v4720_v18  ;;  %v4812_v45 = vsub.f32 %v4674_v32, %v4666_v16  ;;  %v4816_v50 = vsub.f32 %v4676_v48, %v4668_v52  ;;  %v4820_v12 = vsub.f32 %v4678_v36, %v4670_v21  ;;  %v4824_v23 = vsub.f32 %v4680_v15, %v4672_v54 }
  0x9c   :  { %v4712_v10 = vld [vmem:[#allocation7 + $0x278] sm:$0xff]  ;;  %9845 = vst [vmem:[#allocation212_spill] sm:$0xff] %v4724_v33  ;;  %9846 = vst [vmem:[#allocation213_spill] sm:$0xff] %v4728_v59  ;;  %v4732_v30 = vld [vmem:[#allocation4 + $0x410] sm:$0xff]  ;;  %v4828_v32 = vsub.f32 %v4706_v62, %v4698_v11  ;;  %v4832_v52 = vsub.f32 %v4708_v14, %v4700_v38  ;;  %v4836_v21 = vsub.f32 %v4710_v56, %v4702_v13 }
  0x9d   :  { %v4730_v9 = vld [vmem:[#allocation4 + $0x408] sm:$0xff]  ;;  %v4734_v7 = vld [vmem:[#allocation4 + $0x418] sm:$0xff]  ;;  %v4736_v31 = vld [vmem:[#allocation4 + $0x420] sm:$0xff]  ;;  %9847 = vst [vmem:[#allocation214_spill] sm:$0xff] %v4740_v8  ;;  %v4840_v54 = vsub.f32 %v4712_v10, %v4704_v42 }
  0x9e   :  { %v539_v53 = vld [vmem:[#allocation7 + $0x280] sm:$0xff]  ;;  %v540_v41 = vld [vmem:[#allocation7 + $0x288] sm:$0xff]  ;;  %v541_v26 = vld [vmem:[#allocation7 + $0x290] sm:$0xff]  ;;  %9848 = vst [vmem:[#allocation215_spill] sm:$0xff] %v4744_v24 }
  0x9f   :  { %v542_v55 = vld [vmem:[#allocation7 + $0x298] sm:$0xff]  ;;  %9849 = vst [vmem:[#allocation216_spill] sm:$0xff] %v4748_v40  ;;  %9850 = vst [vmem:[#allocation217_spill] sm:$0xff] %v4752_v43  ;;  %v4756_v33 = vld [vmem:[#allocation4 + $0x430] sm:$0xff]  ;;  %v4843_v62 = vsub.f32 %v539_v53, %v4730_v9  ;;  %v4846_v38 = vsub.f32 %v540_v41, %v4732_v30  ;;  %v4849_v13 = vsub.f32 %v541_v26, %v4734_v7 }
  0xa0   :  { %v4754_v59 = vld [vmem:[#allocation4 + $0x428] sm:$0xff]  ;;  %v4758_v18 = vld [vmem:[#allocation4 + $0x438] sm:$0xff]  ;;  %v4760_v47 = vld [vmem:[#allocation4 + $0x440] sm:$0xff]  ;;  %9851 = vst [vmem:[#allocation218_spill] sm:$0xff] %v4764_v22  ;;  %v4852_v14 = vsub.f32 %v542_v55, %v4736_v31 }
  0xa1   :  { %v543_v61 = vld [vmem:[#allocation7 + $0x2a0] sm:$0xff]  ;;  %v544_v8 = vld [vmem:[#allocation7 + $0x2a8] sm:$0xff]  ;;  %v545_v37 = vld [vmem:[#allocation7 + $0x2b0] sm:$0xff]  ;;  %9852 = vst [vmem:[#allocation219_spill] sm:$0xff] %v4768_v25 }
  0xa2   :  { %v546_v51 = vld [vmem:[#allocation7 + $0x2b8] sm:$0xff]  ;;  %9853 = vst [vmem:[#allocation220_spill] sm:$0xff] %v4772_v29  ;;  %9854 = vst [vmem:[#allocation221_spill] sm:$0xff] %v4776_v46  ;;  %v4780_v40 = vld [vmem:[#allocation4 + $0x450] sm:$0xff]  ;;  %v4858_v9 = vsub.f32 %v544_v8, %v4756_v33  ;;  %v4861_v30 = vsub.f32 %v545_v37, %v4758_v18 }
  0xa3   :  { %v4778_v43 = vld [vmem:[#allocation4 + $0x448] sm:$0xff]  ;;  %v4782_v24 = vld [vmem:[#allocation4 + $0x458] sm:$0xff]  ;;  %v4784_v58 = vld [vmem:[#allocation4 + $0x460] sm:$0xff]  ;;  %9855 = vst [vmem:[#allocation222_spill] sm:$0xff] %v4788_v20  ;;  %v4864_v7 = vsub.f32 %v546_v51, %v4760_v47 }
  0xa4   :  { %v547_v44 = vld [vmem:[#allocation7 + $0x2c0] sm:$0xff]  ;;  %v548_v22 = vld [vmem:[#allocation7 + $0x2c8] sm:$0xff]  ;;  %v549_v39 = vld [vmem:[#allocation7 + $0x2d0] sm:$0xff]  ;;  %9856 = vst [vmem:[#allocation223_spill] sm:$0xff] %v4792_v63 }
  0xa5   :  { %v550_v57 = vld [vmem:[#allocation7 + $0x2d8] sm:$0xff]  ;;  %9857 = vst [vmem:[#allocation224_spill] sm:$0xff] %v4796_v17  ;;  %9858 = vst [vmem:[#allocation225_spill] sm:$0xff] %v4800_v35  ;;  %v4804_v29 = vld [vmem:[#allocation4 + $0x470] sm:$0xff]  ;;  %v4873_v33 = vsub.f32 %v549_v39, %v4782_v24 }
  0xa6   :  { %v4802_v46 = vld [vmem:[#allocation4 + $0x468] sm:$0xff]  ;;  %v4806_v25 = vld [vmem:[#allocation4 + $0x478] sm:$0xff]  ;;  %v4808_v49 = vld [vmem:[#allocation4 + $0x480] sm:$0xff]  ;;  %9859 = vst [vmem:[#allocation226_spill] sm:$0xff] %v4812_v45  ;;  %v4855_v45 = vsub.f32 %v543_v61, %v4754_v59  ;;  %v4870_v59 = vsub.f32 %v548_v22, %v4780_v40  ;;  %v4876_v18 = vsub.f32 %v550_v57, %v4784_v58 }
  0xa7   :  { %v551_v60 = vld [vmem:[#allocation7 + $0x2e0] sm:$0xff]  ;;  %v552_v20 = vld [vmem:[#allocation7 + $0x2e8] sm:$0xff]  ;;  %v553_v28 = vld [vmem:[#allocation7 + $0x2f0] sm:$0xff]  ;;  %9860 = vst [vmem:[#allocation227_spill] sm:$0xff] %v4816_v50 }
  0xa8   :  { %v554_v27 = vld [vmem:[#allocation7 + $0x2f8] sm:$0xff]  ;;  %9861 = vst [vmem:[#allocation228_spill] sm:$0xff] %v4820_v12  ;;  %9862 = vst [vmem:[#allocation229_spill] sm:$0xff] %v4824_v23  ;;  %v261_v17 = vld [vmem:[#allocation4 + $0x490] sm:$0xff]  ;;  %v4885_v40 = vsub.f32 %v553_v28, %v4806_v25 }
  0xa9   :  { %v260_v35 = vld [vmem:[#allocation4 + $0x488] sm:$0xff]  ;;  %v262_v63 = vld [vmem:[#allocation4 + $0x620] sm:$0xff]  ;;  %v555_v19 = vld [vmem:[#allocation7 + $0x300] sm:$0xff]  ;;  %9863 = vst [vmem:[#allocation230_spill] sm:$0xff] %v4828_v32  ;;  %v4888_v24 = vsub.f32 %v554_v27, %v4808_v49 }
  0xaa   :  { %v263_v34 = vld [vmem:[#allocation4 + $0x628] sm:$0xff]  ;;  %v556_v6 = vld [vmem:[#allocation7 + $0x308] sm:$0xff]  ;;  %v557_v16 = vld [vmem:[#allocation7 + $0x310] sm:$0xff]  ;;  %9864 = vst [vmem:[#allocation231_spill] sm:$0xff] %v4832_v52 }
  0xab   :  { %9865 = vst [vmem:[#allocation232_spill] sm:$0xff] %v4836_v21  ;;  %9866 = vst [vmem:[#allocation233_spill] sm:$0xff] %v4840_v54  ;;  %v264_v48 = vld [vmem:[#allocation4 + $0x630] sm:$0xff]  ;;  %v265_v36 = vld [vmem:[#allocation4 + $0x638] sm:$0xff] }
  0xac   :  { %v266_v15 = vld [vmem:[#allocation4 + $0x640] sm:$0xff]  ;;  %v267_v23 = vld [vmem:[#allocation4 + $0x648] sm:$0xff]  ;;  %v559_v50 = vld [vmem:[#allocation7 + $0x320] sm:$0xff]  ;;  %9867 = vst [vmem:[#allocation234_spill] sm:$0xff] %v4843_v62 }
  0xad   :  { %v558_v12 = vld [vmem:[#allocation7 + $0x318] sm:$0xff]  ;;  %v560_v11 = vld [vmem:[#allocation7 + $0x328] sm:$0xff]  ;;  %9868 = vst [vmem:[#allocation235_spill] sm:$0xff] %v4846_v38  ;;  %9869 = vst [vmem:[#allocation236_spill] sm:$0xff] %v4849_v13  ;;  %v4867_v38 = vsub.f32 %v547_v44, %v4778_v43  ;;  %v4882_v43 = vsub.f32 %v552_v20, %v4804_v29 }
  0xae   :  { %9870 = vst [vmem:[#allocation237_spill] sm:$0xff] %v4852_v14  ;;  %v268_v42 = vld [vmem:[#allocation4 + $0x650] sm:$0xff]  ;;  %v269_v56 = vld [vmem:[#allocation4 + $0x658] sm:$0xff]  ;;  %v270_v10 = vld [vmem:[#allocation4 + $0x660] sm:$0xff]  ;;  %v4896_v29 = vsub.f32 %v558_v12, %v263_v34 }
  0xaf   :  { %v271_v54 = vld [vmem:[#allocation4 + $0x668] sm:$0xff]  ;;  %v561_v21 = vld [vmem:[#allocation7 + $0x330] sm:$0xff]  ;;  %v563_v32 = vld [vmem:[#allocation7 + $0x340] sm:$0xff]  ;;  %9871 = vst [vmem:[#allocation238_spill] sm:$0xff] %v4855_v45 }
  0xb0   :  { %v562_v52 = vld [vmem:[#allocation7 + $0x338] sm:$0xff]  ;;  %9872 = vst [vmem:[#allocation239_spill] sm:$0xff] %v4858_v9  ;;  %9873 = vst [vmem:[#allocation240_spill] sm:$0xff] %v4861_v30  ;;  %v272_v41 = vld [vmem:[#allocation4 + $0x670] sm:$0xff]  ;;  %v4879_v9 = vsub.f32 %v551_v60, %v4802_v46  ;;  %v4892_v46 = vsub.f32 %v556_v6, %v261_v17  ;;  %v4894_v60 = vsub.f32 %v557_v16, %v262_v63 }
  0xb1   :  { %9874 = vst [vmem:[#allocation241_spill] sm:$0xff] %v4864_v7  ;;  %v273_v31 = vld [vmem:[#allocation4 + $0x678] sm:$0xff]  ;;  %v274_v53 = vld [vmem:[#allocation4 + $0x680] sm:$0xff]  ;;  %v275_v26 = vld [vmem:[#allocation4 + $0x688] sm:$0xff]  ;;  %v4906_v16 = vsub.f32 %v563_v32, %v268_v42 }
  0xb2   :  { %v564_v55 = vld [vmem:[#allocation7 + $0x348] sm:$0xff]  ;;  %v565_v14 = vld [vmem:[#allocation7 + $0x350] sm:$0xff]  ;;  %v566_v13 = vld [vmem:[#allocation7 + $0x358] sm:$0xff]  ;;  %9875 = vst [vmem:[#allocation242_spill] sm:$0xff] %v4867_v38 }
  0xb3   :  { %9876 = vst [vmem:[#allocation243_spill] sm:$0xff] %v4870_v59  ;;  %9877 = vst [vmem:[#allocation244_spill] sm:$0xff] %v4873_v33  ;;  %v276_v8 = vld [vmem:[#allocation4 + $0x690] sm:$0xff]  ;;  %v277_v47 = vld [vmem:[#allocation4 + $0x698] sm:$0xff]  ;;  %v4890_v59 = vsub.f32 %v555_v19, %v260_v35  ;;  %v4904_v19 = vsub.f32 %v562_v52, %v267_v23 }
  0xb4   :  { %9878 = vst [vmem:[#allocation245_spill] sm:$0xff] %v4876_v18  ;;  %v278_v61 = vld [vmem:[#allocation4 + $0x6a0] sm:$0xff]  ;;  %v279_v37 = vld [vmem:[#allocation4 + $0x6a8] sm:$0xff]  ;;  %v567_v51 = vld [vmem:[#allocation7 + $0x360] sm:$0xff] }
  0xb5   :  { %v568_v7 = vld [vmem:[#allocation7 + $0x368] sm:$0xff]  ;;  %v569_v30 = vld [vmem:[#allocation7 + $0x370] sm:$0xff]  ;;  %9879 = vst [vmem:[#allocation246_spill] sm:$0xff] %v4879_v9  ;;  %9880 = vst [vmem:[#allocation247_spill] sm:$0xff] %v4882_v43  ;;  %v4900_v43 = vsub.f32 %v560_v11, %v265_v36  ;;  %v4902_v9 = vsub.f32 %v561_v21, %v266_v15  ;;  %v4914_v11 = vsub.f32 %v567_v51, %v272_v41 }
  0xb6   :  { %9881 = vst [vmem:[#allocation248_spill] sm:$0xff] %v4885_v40  ;;  %9882 = vst [vmem:[#allocation249_spill] sm:$0xff] %v4888_v24  ;;  %v280_v22 = vld [vmem:[#allocation4 + $0x6b0] sm:$0xff]  ;;  %v281_v58 = vld [vmem:[#allocation4 + $0x6b8] sm:$0xff]  ;;  %v4898_v40 = vsub.f32 %v559_v50, %v264_v48  ;;  %v4912_v50 = vsub.f32 %v566_v13, %v271_v54 }
  0xb7   :  { %v282_v44 = vld [vmem:[#allocation4 + $0x6c0] sm:$0xff]  ;;  %v283_v39 = vld [vmem:[#allocation4 + $0x6c8] sm:$0xff]  ;;  %v571_v18 = vld [vmem:[#allocation7 + $0x380] sm:$0xff]  ;;  %9883 = vst [vmem:[#allocation250_spill] sm:$0xff] %v4890_v59 }
  0xb8   :  { %v570_v57 = vld [vmem:[#allocation7 + $0x378] sm:$0xff]  ;;  %v572_v33 = vld [vmem:[#allocation7 + $0x388] sm:$0xff]  ;;  %9884 = vst [vmem:[#allocation251_spill] sm:$0xff] %v4892_v46  ;;  %9885 = vst [vmem:[#allocation252_spill] sm:$0xff] %v4894_v60  ;;  %v4910_v60 = vsub.f32 %v565_v14, %v270_v10 }
  0xb9   :  { %9886 = vst [vmem:[#allocation253_spill] sm:$0xff] %v4896_v29  ;;  %v284_v25 = vld [vmem:[#allocation4 + $0x6d0] sm:$0xff]  ;;  %v285_v20 = vld [vmem:[#allocation4 + $0x6d8] sm:$0xff]  ;;  %v286_v28 = vld [vmem:[#allocation4 + $0x6e0] sm:$0xff]  ;;  %v4908_v29 = vsub.f32 %v564_v55, %v269_v56  ;;  %v4920_v32 = vsub.f32 %v570_v57, %v275_v26  ;;  %v4922_v55 = vsub.f32 %v571_v18, %v276_v8 }
  0xba   :  { %v573_v49 = vld [vmem:[#allocation7 + $0x390] sm:$0xff]  ;;  %v574_v27 = vld [vmem:[#allocation7 + $0x398] sm:$0xff]  ;;  %v575_v24 = vld [vmem:[#allocation7 + $0x3a0] sm:$0xff]  ;;  %9887 = vst [vmem:[#allocation254_spill] sm:$0xff] %v4898_v40 }
  0xbb   :  { %9888 = vst [vmem:[#allocation255_spill] sm:$0xff] %v4900_v43  ;;  %9889 = vst [vmem:[#allocation256_spill] sm:$0xff] %v4902_v9  ;;  %v287_v6 = vld [vmem:[#allocation4 + $0x6e8] sm:$0xff]  ;;  %v288_v17 = vld [vmem:[#allocation4 + $0x6f0] sm:$0xff]  ;;  %v4918_v9 = vsub.f32 %v569_v30, %v274_v53  ;;  %v4928_v41 = vsub.f32 %v574_v27, %v279_v37  ;;  %v4930_v51 = vsub.f32 %v575_v24, %v280_v22  ;;  %v9910_v24 = vsub.f32 0.0, %v3777_v0 }
  0xbc   :  { %9890 = vst [vmem:[#allocation257_spill] sm:$0xff] %v4904_v19  ;;  %v289_v63 = vld [vmem:[#allocation4 + $0x6f8] sm:$0xff]  ;;  %v577_v34 = vld [vmem:[#allocation7 + $0x3b0] sm:$0xff]  ;;  %v578_v12 = vld [vmem:[#allocation7 + $0x3b8] sm:$0xff]  ;;  %v4916_v19 = vsub.f32 %v568_v7, %v273_v31 }
  0xbd   :  { %v576_v35 = vld [vmem:[#allocation7 + $0x3a8] sm:$0xff]  ;;  %9891 = vst [vmem:[#allocation258_spill] sm:$0xff] %v4906_v16  ;;  %9892 = vst [vmem:[#allocation259_spill] sm:$0xff] %v4908_v29  ;;  %v290_v48 = vld [vmem:[#allocation4 + $0x700] sm:$0xff]  ;;  %v1047_v22 = vmul.f32 1.442695, %v9910_v24 }
  0xbe   :  { %9893 = vst [vmem:[#allocation260_spill] sm:$0xff] %v4910_v60  ;;  %9894 = vst [vmem:[#allocation261_spill] sm:$0xff] %v4912_v50  ;;  %v291_v36 = vld [vmem:[#allocation4 + $0x708] sm:$0xff]  ;;  %v292_v21 = vld [vmem:[#allocation4 + $0x710] sm:$0xff]  ;;  %v4924_v50 = vsub.f32 %v572_v33, %v277_v47  ;;  %v4926_v60 = vsub.f32 %v573_v49, %v278_v61  ;;  %v4932_v57 = vsub.f32 %v576_v35, %v281_v58 }
  0xbf   :  { %v579_v15 = vld [vmem:[#allocation7 + $0x3c0] sm:$0xff]  ;;  %v580_v23 = vld [vmem:[#allocation7 + $0x3c8] sm:$0xff]  ;;  %v581_v52 = vld [vmem:[#allocation7 + $0x3d0] sm:$0xff]  ;;  %9895 = vst [vmem:[#allocation262_spill] sm:$0xff] %v4914_v11  ;;  %3108 = vpow2.f32 %v1047_v22 }
  0xc0   :  { %9896 = vst [vmem:[#allocation263_spill] sm:$0xff] %v4916_v19  ;;  %9897 = vst [vmem:[#allocation264_spill] sm:$0xff] %v4918_v9  ;;  %v293_v42 = vld [vmem:[#allocation4 + $0x718] sm:$0xff]  ;;  %v294_v56 = vld [vmem:[#allocation4 + $0x720] sm:$0xff]  ;;  %v4936_v9 = vsub.f32 %v578_v12, %v283_v39  ;;  %v4938_v37 = vsub.f32 %v579_v15, %v284_v25  ;;  %v4940_v49 = vsub.f32 %v580_v23, %v285_v20  ;;  %v9914_v25 = vsub.f32 0.0, %v3779_v1 }
  0xc1   :  { %9898 = vst [vmem:[#allocation265_spill] sm:$0xff] %v4920_v32  ;;  %v295_v14 = vld [vmem:[#allocation4 + $0x728] sm:$0xff]  ;;  %v583_v54 = vld [vmem:[#allocation7 + $0x3e0] sm:$0xff]  ;;  %v584_v13 = vld [vmem:[#allocation7 + $0x3e8] sm:$0xff]  ;;  %v4934_v32 = vsub.f32 %v577_v34, %v282_v44  ;;  %v4942_v27 = vsub.f32 %v581_v52, %v286_v28 }
  0xc2   :  { %v582_v10 = vld [vmem:[#allocation7 + $0x3d8] sm:$0xff]  ;;  %9899 = vst [vmem:[#allocation266_spill] sm:$0xff] %v4922_v55  ;;  %9900 = vst [vmem:[#allocation267_spill] sm:$0xff] %v4924_v50  ;;  %v296_v7 = vld [vmem:[#allocation4 + $0x730] sm:$0xff]  ;;  %v4948_v12 = vsub.f32 %v583_v54, %v288_v17  ;;  %v1049_v15 = vmul.f32 1.442695, %v9914_v25 }
  0xc3   :  { %9901 = vst [vmem:[#allocation268_spill] sm:$0xff] %v4926_v60  ;;  %9902 = vst [vmem:[#allocation269_spill] sm:$0xff] %v4928_v41  ;;  %v297_v31 = vld [vmem:[#allocation4 + $0x738] sm:$0xff]  ;;  %v585_v30 = vld [vmem:[#allocation7 + $0x3f0] sm:$0xff]  ;;  %v4946_v39 = vsub.f32 %v582_v10, %v287_v6  ;;  %v9918_v6 = vsub.f32 0.0, %v3781_v2 }
  0xc4   :  { %v586_v53 = vld [vmem:[#allocation7 + $0x3f8] sm:$0xff]  ;;  %v587_v26 = vld [vmem:[#allocation7 + $0x400] sm:$0xff]  ;;  %9903 = vst [vmem:[#allocation270_spill] sm:$0xff] %v4930_v51  ;;  %9904 = vst [vmem:[#allocation271_spill] sm:$0xff] %v4932_v57  ;;  %3110 = vpow2.f32 %v1049_v15 }
  0xc5   :  { %9905 = vst [vmem:[#allocation272_spill] sm:$0xff] %v4934_v32  ;;  %9906 = vst [vmem:[#allocation273_spill] sm:$0xff] %v4936_v9  ;;  %v298_v18 = vld [vmem:[#allocation4 + $0x740] sm:$0xff]  ;;  %v299_v33 = vld [vmem:[#allocation4 + $0x748] sm:$0xff]  ;;  %v4950_v9 = vsub.f32 %v584_v13, %v289_v63  ;;  %v4956_v0 = vsub.f32 %v586_v53, %v291_v36  ;;  %v4958_v24 = vsub.f32 %v587_v26, %v292_v21  ;;  %v1051_v10 = vmul.f32 1.442695, %v9918_v6 }
  0xc6   :  { %v588_v8 = vld [vmem:[#allocation7 + $0x408] sm:$0xff]  ;;  %v589_v47 = vld [vmem:[#allocation7 + $0x410] sm:$0xff]  ;;  %v590_v61 = vld [vmem:[#allocation7 + $0x418] sm:$0xff]  ;;  %9907 = vst [vmem:[#allocation274_spill] sm:$0xff] %v4938_v37  ;;  %v9925_v6 = vsub.f32 0.0, %v3785_v4 }
  0xc7   :  { %9908 = vst [vmem:[#allocation275_spill] sm:$0xff] %v4940_v49  ;;  %9909 = vst [vmem:[#allocation276_spill] sm:$0xff] %v4942_v27  ;;  %v300_v58 = vld [vmem:[#allocation4 + $0x750] sm:$0xff]  ;;  %v301_v35 = vld [vmem:[#allocation4 + $0x758] sm:$0xff]  ;;  %v4954_v27 = vsub.f32 %v585_v30, %v290_v48  ;;  %v4964_v1 = vsub.f32 %v589_v47, %v294_v56  ;;  %v4966_v25 = vsub.f32 %v590_v61, %v295_v14  ;;  %v9922_v48 = vsub.f32 0.0, %v3783_v3 }
  0xc8   :  { %v591_v44 = vld [vmem:[#allocation7 + $0x420] sm:$0xff]  ;;  %v592_v34 = vld [vmem:[#allocation7 + $0x428] sm:$0xff]  ;;  %9911 = vst [vmem:[#allocation277_spill] sm:$0xff] %v4946_v39  ;;  %9912 = vst [vmem:[#allocation278_spill] sm:$0xff] %v4948_v12  ;;  %v9928_v3 = vsub.f32 0.0, %v3787_v5  ;;  %3112 = vpow2.f32 %v1051_v10 }
  0xc9   :  { %9913 = vst [vmem:[#allocation279_spill] sm:$0xff] %v4950_v9  ;;  %v302_v20 = vld [vmem:[#allocation4 + $0x760] sm:$0xff]  ;;  %v303_v23 = vld [vmem:[#allocation4 + $0x768] sm:$0xff]  ;;  %9915 = vst [vmem:[#allocation280_spill] sm:$0xff] %v4954_v27  ;;  %v4962_v9 = vsub.f32 %v588_v8, %v293_v42  ;;  %v1053_v30 = vmul.f32 1.442695, %v9922_v48  ;;  %v4970_v26 = vsub.f32 %v591_v44, %v296_v7  ;;  %v4972_v2 = vsub.f32 %v592_v34, %v297_v31 }
  0xca   :  { %v593_v28 = vld [vmem:[#allocation7 + $0x430] sm:$0xff]  ;;  %v594_v52 = vld [vmem:[#allocation7 + $0x438] sm:$0xff]  ;;  %9916 = vst [vmem:[#allocation281_spill] sm:$0xff] %v4956_v0  ;;  %9917 = vst [vmem:[#allocation282_spill] sm:$0xff] %v4958_v24  ;;  %v1055_v24 = vmul.f32 1.442695, %v9925_v6 }
  0xcb   :  { %v304_v17 = vld [vmem:[#allocation4 + $0x770] sm:$0xff]  ;;  %v305_v54 = vld [vmem:[#allocation4 + $0x778] sm:$0xff]  ;;  %9919 = vst [vmem:[#allocation283_spill] sm:$0xff] %v4962_v9  ;;  %9920 = vst [vmem:[#allocation284_spill] sm:$0xff] %v4964_v1  ;;  %v4976_v47 = vsub.f32 %v593_v28, %v298_v18  ;;  %v4978_v14 = vsub.f32 %v594_v52, %v299_v33  ;;  %v1057_v61 = vmul.f32 1.442695, %v9928_v3  ;;  %3114 = vpow2.f32 %v1053_v30 }
  0xcc   :  { %v595_v63 = vld [vmem:[#allocation7 + $0x440] sm:$0xff]  ;;  %v596_v13 = vld [vmem:[#allocation7 + $0x448] sm:$0xff]  ;;  %9921 = vst [vmem:[#allocation285_spill] sm:$0xff] %v4966_v25  ;;  %v306_v36 = vld [vmem:[#allocation4 + $0x780] sm:$0xff]  ;;  %3116 = vpow2.f32 %v1055_v24 }
  0xcd   :  { %v597_v53 = vld [vmem:[#allocation7 + $0x450] sm:$0xff]  ;;  %v598_v21 = vld [vmem:[#allocation7 + $0x458] sm:$0xff]  ;;  %9923 = vst [vmem:[#allocation286_spill] sm:$0xff] %v4970_v26  ;;  %9924 = vst [vmem:[#allocation287_spill] sm:$0xff] %v4972_v2  ;;  %v4982_v31 = vsub.f32 %v595_v63, %v300_v58  ;;  %v4984_v22 = vsub.f32 %v596_v13, %v301_v35  ;;  %3118 = vpow2.f32 %v1057_v61 }
  0xce   :  { %v307_v42 = vld [vmem:[#allocation4 + $0x788] sm:$0xff]  ;;  %v599_v8 = vld [vmem:[#allocation7 + $0x460] sm:$0xff]  ;;  %v600_v56 = vld [vmem:[#allocation7 + $0x468] sm:$0xff]  ;;  %9926 = vst [vmem:[#allocation288_spill] sm:$0xff] %v4976_v47  ;;  %v4988_v33 = vsub.f32 %v597_v53, %v302_v20  ;;  %v4990_v15 = vsub.f32 %v598_v21, %v303_v23 }
  0xcf   :  { %9927 = vst [vmem:[#allocation289_spill] sm:$0xff] %v4978_v14  ;;  %v308_v48 = vld [vmem:[#allocation4 + $0x790] sm:$0xff]  ;;  %v601_v7 = vld [vmem:[#allocation7 + $0x470] sm:$0xff]  ;;  %v602_v44 = vld [vmem:[#allocation7 + $0x478] sm:$0xff]  ;;  %v4994_v63 = vsub.f32 %v599_v8, %v304_v17  ;;  %v4996_v35 = vsub.f32 %v600_v56, %v305_v54 }
  0xd0   :  { %9929 = vst [vmem:[#allocation290_spill] sm:$0xff] %v4982_v31  ;;  %9930 = vst [vmem:[#allocation291_spill] sm:$0xff] %v4984_v22  ;;  %v9931_v4 = vld [vmem:[#allocation13_spill] sm:$0xff]  ;;  %v309_v2 = vld [vmem:[#allocation4 + $0x798] sm:$0xff]  ;;  %v5002_v20 = vsub.f32 %v602_v44, %v307_v42 }
  0xd1   :  { %v9932_v34 = vsub.f32 0.0, %v9931_v4  ;;  %v603_v18 = vld [vmem:[#allocation7 + $0x480] sm:$0xff]  ;;  %v604_v28 = vld [vmem:[#allocation7 + $0x488] sm:$0xff]  ;;  %9933 = vst [vmem:[#allocation13_spill] sm:$0xff] %v4988_v33  ;;  %9934 = vst [vmem:[#allocation292_spill] sm:$0xff] %v4990_v15 }
  0xd2   :  { %v9935_v5 = vld [vmem:[#allocation14_spill] sm:$0xff]  ;;  %v310_v14 = vld [vmem:[#allocation4 + $0x7a0] sm:$0xff]  ;;  %9938 = vst [vmem:[#allocation293_spill] sm:$0xff] %v4996_v35  ;;  %v9939_v10 = vld [vmem:[#allocation15_spill] sm:$0xff]  ;;  %v5006_v21 = vsub.f32 %v603_v18, %v308_v48 }
  0xd3   :  { %v1059_v6 = vmul.f32 1.442695, %v9932_v34  ;;  %v9936_v52 = vsub.f32 0.0, %v9935_v5  ;;  %v605_v58 = vld [vmem:[#allocation7 + $0x490] sm:$0xff]  ;;  %9937 = vst [vmem:[#allocation14_spill] sm:$0xff] %v4994_v63  ;;  %v9940_v13 = vsub.f32 0.0, %v9939_v10  ;;  %v5000_v34 = vsub.f32 %v601_v7, %v306_v36 }
  0xd4   :  { %9942 = vst [vmem:[#allocation294_spill] sm:$0xff] %v5002_v20  ;;  %v9943_v23 = vld [vmem:[#allocation16_spill] sm:$0xff]  ;;  %v5008_v5 = vsub.f32 %v604_v28, %v309_v2  ;;  %v9947_v17 = vld [vmem:[#allocation17_spill] sm:$0xff]  ;;  %v5012_v24 = vsub.f32 %v605_v58, %v310_v14  ;;  %v9950_v56 = vld [vmem:[#allocation18_spill] sm:$0xff] }
  0xd5   :  { %v1061_v3 = vmul.f32 1.442695, %v9936_v52  ;;  %v1063_v4 = vmul.f32 1.442695, %v9940_v13  ;;  %9941 = vst [vmem:[#allocation15_spill] sm:$0xff] %v5000_v34  ;;  %v9944_v30 = vsub.f32 0.0, %v9943_v23  ;;  %3120 = vpow2.f32 %v1059_v6 }
  0xd6   :  { %9945 = vst [vmem:[#allocation16_spill] sm:$0xff] %v5006_v21  ;;  %9946 = vst [vmem:[#allocation295_spill] sm:$0xff] %v5008_v5  ;;  %v9948_v54 = vsub.f32 0.0, %v9947_v17  ;;  %v9951_v36 = vsub.f32 0.0, %v9950_v56  ;;  %v9952_v42 = vld [vmem:[#allocation19_spill] sm:$0xff]  ;;  %v9954_v52 = vld [vmem:[#allocation20_spill] sm:$0xff] }
  0xd7   :  { %v1065_v53 = vmul.f32 1.442695, %v9944_v30  ;;  %9949 = vst [vmem:[#allocation17_spill] sm:$0xff] %v5012_v24  ;;  %3122 = vpow2.f32 %v1061_v3  ;;  %v9953_v44 = vsub.f32 0.0, %v9952_v42  ;;  %v9955_v10 = vsub.f32 0.0, %v9954_v52  ;;  %v9956_v18 = vld [vmem:[#allocation21_spill] sm:$0xff] }
  0xd8   :  { %v1067_v8 = vmul.f32 1.442695, %v9948_v54  ;;  %v1069_v7 = vmul.f32 1.442695, %v9951_v36  ;;  %3124 = vpow2.f32 %v1063_v4  ;;  %v9957_v2 = vsub.f32 0.0, %v9956_v18  ;;  %v9958_v6 = vld [vmem:[#allocation22_spill] sm:$0xff] }
  0xd9   :  { %v1071_v61 = vmul.f32 1.442695, %v9953_v44  ;;  %v1073_v48 = vmul.f32 1.442695, %v9955_v10  ;;  %v9959_v13 = vsub.f32 0.0, %v9958_v6  ;;  %3126 = vpow2.f32 %v1065_v53  ;;  %v9960_v14 = vld [vmem:[#allocation23_spill] sm:$0xff] }
  0xda   :  { %v1075_v28 = vmul.f32 1.442695, %v9957_v2  ;;  %v9961_v58 = vsub.f32 0.0, %v9960_v14  ;;  %v9962_v30 = vld [vmem:[#allocation24_spill] sm:$0xff]  ;;  %v9964_v56 = vld [vmem:[#allocation25_spill] sm:$0xff]  ;;  %3128 = vpow2.f32 %v1067_v8  ;;  %v9966_v4 = vld [vmem:[#allocation26_spill] sm:$0xff] }
  0xdb   :  { %v1077_v23 = vmul.f32 1.442695, %v9959_v13  ;;  %v9963_v17 = vsub.f32 0.0, %v9962_v30  ;;  %v9965_v36 = vsub.f32 0.0, %v9964_v56  ;;  %v9967_v44 = vsub.f32 0.0, %v9966_v4  ;;  %v9968_v10 = vld [vmem:[#allocation27_spill] sm:$0xff] }
  0xdc   :  { %v1079_v3 = vmul.f32 1.442695, %v9961_v58  ;;  %v9969_v18 = vsub.f32 0.0, %v9968_v10  ;;  %v9970_v24 = vld [vmem:[#allocation28_spill] sm:$0xff]  ;;  %3130 = vpow2.f32 %v1069_v7  ;;  %v9972_v53 = vld [vmem:[#allocation29_spill] sm:$0xff]  ;;  %v9974_v5 = vld [vmem:[#allocation30_spill] sm:$0xff] }
  0xdd   :  { %v1081_v54 = vmul.f32 1.442695, %v9963_v17  ;;  %v1083_v42 = vmul.f32 1.442695, %v9965_v36  ;;  %v1085_v52 = vmul.f32 1.442695, %v9967_v44  ;;  %3132 = vpow2.f32 %v1071_v61 }
  0xde   :  { %v1087_v2 = vmul.f32 1.442695, %v9969_v18  ;;  %v9971_v6 = vsub.f32 0.0, %v9970_v24  ;;  %v9973_v14 = vsub.f32 0.0, %v9972_v53  ;;  %v9975_v30 = vsub.f32 0.0, %v9974_v5  ;;  %v9976_v21 = vld [vmem:[#allocation31_spill] sm:$0xff]  ;;  %v5054_v53 = vpop.eup %3108 }
  0xdf   :  { %v9977_v56 = vsub.f32 0.0, %v9976_v21  ;;  %v9978_v8 = vld [vmem:[#allocation32_spill] sm:$0xff]  ;;  %v9980_v10 = vld [vmem:[#allocation33_spill] sm:$0xff]  ;;  %v9982_v24 = vld [vmem:[#allocation34_spill] sm:$0xff]  ;;  %3134 = vpow2.f32 %v1073_v48 }
  0xe0   :  { %v1089_v13 = vmul.f32 1.442695, %v9971_v6  ;;  %v1091_v58 = vmul.f32 1.442695, %v9973_v14  ;;  %v1093_v17 = vmul.f32 1.442695, %v9975_v30  ;;  %3136 = vpow2.f32 %v1075_v28 }
  0xe1   :  { %v1095_v36 = vmul.f32 1.442695, %v9977_v56  ;;  %v9979_v4 = vsub.f32 0.0, %v9978_v8  ;;  %v9981_v18 = vsub.f32 0.0, %v9980_v10  ;;  %v9983_v7 = vsub.f32 0.0, %v9982_v24  ;;  %v9984_v5 = vld [vmem:[#allocation35_spill] sm:$0xff] }
  0xe2   :  { %v9985_v14 = vsub.f32 0.0, %v9984_v5  ;;  %v9986_v61 = vld [vmem:[#allocation36_spill] sm:$0xff]  ;;  %v9988_v8 = vld [vmem:[#allocation37_spill] sm:$0xff]  ;;  %v9990_v24 = vld [vmem:[#allocation38_spill] sm:$0xff]  ;;  %3138 = vpow2.f32 %v1077_v23 }
  0xe3   :  { %v5044_v44 = vmul.f32 1.442695, %v9979_v4  ;;  %v5048_v20 = vmul.f32 1.442695, %v9981_v18  ;;  %v5052_v6 = vmul.f32 1.442695, %v9983_v7  ;;  %v5068_v18 = vpop.eup %3110  ;;  %3140 = vpow2.f32 %v1079_v3 }
  0xe4   :  { %v5058_v21 = vmul.f32 1.442695, %v9985_v14  ;;  %v9987_v30 = vsub.f32 0.0, %v9986_v61  ;;  %v9989_v4 = vsub.f32 0.0, %v9988_v8  ;;  %v9991_v7 = vsub.f32 0.0, %v9990_v24  ;;  %v9992_v48 = vld [vmem:[#allocation39_spill] sm:$0xff] }
  0xe5   :  { %v9993_v35 = vsub.f32 0.0, %v9992_v48  ;;  %v9994_v14 = vld [vmem:[#allocation40_spill] sm:$0xff]  ;;  %v9996_v8 = vld [vmem:[#allocation41_spill] sm:$0xff]  ;;  %v9998_v28 = vld [vmem:[#allocation42_spill] sm:$0xff]  ;;  %3142 = vpow2.f32 %v1081_v54 }
  0xe6   :  { %v5062_v56 = vmul.f32 1.442695, %v9987_v30  ;;  %v5066_v10 = vmul.f32 1.442695, %v9989_v4  ;;  %v5072_v34 = vmul.f32 1.442695, %v9991_v7  ;;  %v5082_v30 = vpop.eup %3112  ;;  %3144 = vpow2.f32 %v1083_v42 }
  0xe7   :  { %v5076_v5 = vmul.f32 1.442695, %v9993_v35  ;;  %v9995_v63 = vsub.f32 0.0, %v9994_v14  ;;  %v9997_v4 = vsub.f32 0.0, %v9996_v8  ;;  %v9999_v33 = vsub.f32 0.0, %v9998_v28  ;;  %v10000_v7 = vld [vmem:[#allocation43_spill] sm:$0xff]  ;;  %v5096_v35 = vpop.eup %3114 }
  0xe8   :  { %v10001_v22 = vsub.f32 0.0, %v10000_v7  ;;  %v10004_v23 = vld [vmem:[#allocation45_spill] sm:$0xff]  ;;  %v10010_v3 = vld [vmem:[#allocation48_spill] sm:$0xff]  ;;  %v10016_v54 = vld [vmem:[#allocation51_spill] sm:$0xff]  ;;  %3146 = vpow2.f32 %v1085_v52 }
  0xe9   :  { %v5080_v61 = vmul.f32 1.442695, %v9995_v63  ;;  %v5086_v15 = vmul.f32 1.442695, %v9997_v4  ;;  %v5090_v24 = vmul.f32 1.442695, %v9999_v33  ;;  %v5110_v33 = vpop.eup %3116  ;;  %3148 = vpow2.f32 %v1087_v2 }
  0xea   :  { %v5094_v48 = vmul.f32 1.442695, %v10001_v22  ;;  %v10002_v63 = vld [vmem:[#allocation44_spill] sm:$0xff]  ;;  %v10005_v47 = vsub.f32 0.0, %v10004_v23  ;;  %v10006_v4 = vld [vmem:[#allocation46_spill] sm:$0xff]  ;;  %v10008_v22 = vld [vmem:[#allocation47_spill] sm:$0xff] }
  0xeb   :  { %v10003_v14 = vsub.f32 0.0, %v10002_v63  ;;  %v10007_v26 = vsub.f32 0.0, %v10006_v4  ;;  %v10009_v7 = vsub.f32 0.0, %v10008_v22  ;;  %v10011_v1 = vsub.f32 0.0, %v10010_v3  ;;  %v10022_v42 = vld [vmem:[#allocation54_spill] sm:$0xff]  ;;  %v10028_v52 = vld [vmem:[#allocation57_spill] sm:$0xff] }
  0xec   :  { %v5104_v8 = vmul.f32 1.442695, %v10005_v47  ;;  %v5124_v47 = vpop.eup %3118  ;;  %v10017_v27 = vsub.f32 0.0, %v10016_v54  ;;  %v10023_v49 = vsub.f32 0.0, %v10022_v42  ;;  %v10029_v57 = vsub.f32 0.0, %v10028_v52  ;;  %v10034_v2 = vld [vmem:[#allocation60_spill] sm:$0xff] }
  0xed   :  { %v5100_v31 = vmul.f32 1.442695, %v10003_v14  ;;  %v5108_v28 = vmul.f32 1.442695, %v10007_v26  ;;  %v5114_v25 = vmul.f32 1.442695, %v10009_v7  ;;  %3150 = vpow2.f32 %v1089_v13 }
  0xee   :  { %v5118_v63 = vmul.f32 1.442695, %v10011_v1  ;;  %v10012_v14 = vld [vmem:[#allocation49_spill] sm:$0xff]  ;;  %v10014_v26 = vld [vmem:[#allocation50_spill] sm:$0xff]  ;;  %v5132_v22 = vmul.f32 1.442695, %v10017_v27  ;;  %v5138_v1 = vpop.eup %3120  ;;  %3152 = vpow2.f32 %v1091_v58 }
  0xef   :  { %v10013_v9 = vsub.f32 0.0, %v10012_v14  ;;  %v10015_v4 = vsub.f32 0.0, %v10014_v26  ;;  %v10018_v7 = vld [vmem:[#allocation52_spill] sm:$0xff]  ;;  %v5146_v26 = vmul.f32 1.442695, %v10023_v49  ;;  %v5152_v27 = vpop.eup %3122  ;;  %v10035_v60 = vsub.f32 0.0, %v10034_v2 }
  0xf0   :  { %v10019_v12 = vsub.f32 0.0, %v10018_v7  ;;  %v5166_v49 = vpop.eup %3124  ;;  %v10040_v13 = vld [vmem:[#allocation63_spill] sm:$0xff]  ;;  %3154 = vpow2.f32 %v1093_v17  ;;  %v10046_v58 = vld [vmem:[#allocation66_spill] sm:$0xff]  ;;  %v10052_v17 = vld [vmem:[#allocation69_spill] sm:$0xff] }
  0xf1   :  { %v5122_v23 = vmul.f32 1.442695, %v10013_v9  ;;  %v5128_v0 = vmul.f32 1.442695, %v10015_v4  ;;  %v10020_v9 = vld [vmem:[#allocation53_spill] sm:$0xff]  ;;  %v10024_v4 = vld [vmem:[#allocation55_spill] sm:$0xff]  ;;  %3156 = vpow2.f32 %v1095_v36 }
  0xf2   :  { %v5136_v3 = vmul.f32 1.442695, %v10019_v12  ;;  %v10021_v14 = vsub.f32 0.0, %v10020_v9  ;;  %v10025_v37 = vsub.f32 0.0, %v10024_v4  ;;  %v10026_v12 = vld [vmem:[#allocation56_spill] sm:$0xff]  ;;  %v10041_v19 = vsub.f32 0.0, %v10040_v13 }
  0xf3   :  { %v10027_v7 = vsub.f32 0.0, %v10026_v12  ;;  %v5160_v9 = vmul.f32 1.442695, %v10029_v57  ;;  %v5174_v12 = vmul.f32 1.442695, %v10035_v60  ;;  %v5180_v57 = vpop.eup %3126  ;;  %v10047_v16 = vsub.f32 0.0, %v10046_v58 }
  0xf4   :  { %v5142_v39 = vmul.f32 1.442695, %v10021_v14  ;;  %v5150_v54 = vmul.f32 1.442695, %v10025_v37  ;;  %v10030_v14 = vld [vmem:[#allocation58_spill] sm:$0xff]  ;;  %v10032_v37 = vld [vmem:[#allocation59_spill] sm:$0xff]  ;;  %v5194_v60 = vpop.eup %3128  ;;  %3158 = vpow2.f32 %v5044_v44 }
  0xf5   :  { %v5156_v32 = vmul.f32 1.442695, %v10027_v7  ;;  %v10031_v51 = vsub.f32 0.0, %v10030_v14  ;;  %v10033_v4 = vsub.f32 0.0, %v10032_v37  ;;  %v10036_v7 = vld [vmem:[#allocation61_spill] sm:$0xff]  ;;  %v10053_v46 = vsub.f32 0.0, %v10052_v17 }
  0xf6   :  { %v10037_v50 = vsub.f32 0.0, %v10036_v7  ;;  %v5188_v37 = vmul.f32 1.442695, %v10041_v19  ;;  %v5208_v19 = vpop.eup %3130  ;;  %v10060_v36 = vld [vmem:[#allocation72_spill] sm:$0xff]  ;;  %v10063_v45 = vld [vmem:[#allocation73_spill] sm:$0xff]  ;;  %3160 = vpow2.f32 %v5048_v20  ;;  %v10069_v44 = vld [vmem:[#allocation75_spill] sm:$0xff] }
  0xf7   :  { %v5164_v42 = vmul.f32 1.442695, %v10031_v51  ;;  %v5170_v41 = vmul.f32 1.442695, %v10033_v4  ;;  %v10038_v51 = vld [vmem:[#allocation62_spill] sm:$0xff]  ;;  %v10042_v4 = vld [vmem:[#allocation64_spill] sm:$0xff]  ;;  %3162 = vpow2.f32 %v5052_v6 }
  0xf8   :  { %v5178_v52 = vmul.f32 1.442695, %v10037_v50  ;;  %v10039_v14 = vsub.f32 0.0, %v10038_v51  ;;  %v10043_v11 = vsub.f32 0.0, %v10042_v4  ;;  %v10044_v50 = vld [vmem:[#allocation65_spill] sm:$0xff]  ;;  %v10064_v17 = vsub.f32 0.0, %v10063_v45 }
  0xf9   :  { %v10045_v7 = vsub.f32 0.0, %v10044_v50  ;;  %v5202_v51 = vmul.f32 1.442695, %v10047_v16  ;;  %v5216_v50 = vmul.f32 1.442695, %v10053_v46  ;;  %v5222_v16 = vpop.eup %3132  ;;  %v10075_v45 = vld [vmem:[#allocation77_spill] sm:$0xff]  ;;  %3164 = vpow2.f32 %v5058_v21 }
  0xfa   :  { %v5184_v55 = vmul.f32 1.442695, %v10039_v14  ;;  %v5192_v2 = vmul.f32 1.442695, %v10043_v11  ;;  %v10048_v14 = vld [vmem:[#allocation67_spill] sm:$0xff]  ;;  %v10050_v11 = vld [vmem:[#allocation68_spill] sm:$0xff]  ;;  %v5237_v62 = vpop.eup %3134  ;;  %3166 = vpow2.f32 %v5062_v56 }
  0xfb   :  { %v5198_v29 = vmul.f32 1.442695, %v10045_v7  ;;  %v10049_v43 = vsub.f32 0.0, %v10048_v14  ;;  %v10051_v4 = vsub.f32 0.0, %v10050_v11  ;;  %v10054_v7 = vld [vmem:[#allocation70_spill] sm:$0xff]  ;;  %v10061_v11 = vsub.f32 0.0, %v10060_v36 }
  0xfc   :  { %v10055_v59 = vsub.f32 0.0, %v10054_v7  ;;  %v5235_v46 = vmul.f32 1.442695, %v10064_v17  ;;  %v10076_v17 = vsub.f32 0.0, %v10075_v45  ;;  %v10078_v20 = vld [vmem:[#allocation78_spill] sm:$0xff]  ;;  %v10087_v6 = vld [vmem:[#allocation81_spill] sm:$0xff] }
  0xfd   :  { %v5206_v13 = vmul.f32 1.442695, %v10049_v43  ;;  %v5212_v40 = vmul.f32 1.442695, %v10051_v4  ;;  %v10057_v43 = vld [vmem:[#allocation71_spill] sm:$0xff]  ;;  %v10088_v45 = vsub.f32 0.0, %v10087_v6 }
  0xfe   :  { %v5220_v58 = vmul.f32 1.442695, %v10055_v59  ;;  %v10058_v14 = vsub.f32 0.0, %v10057_v43  ;;  %v5231_v4 = vmul.f32 1.442695, %v10061_v11  ;;  %10065 = vst [vmem:[#allocation21_spill] sm:$0xff] %v5235_v46 }
  0xff   :  { %v10066_v59 = vld [vmem:[#allocation74_spill] sm:$0xff]  ;;  %v10070_v43 = vsub.f32 0.0, %v10069_v44  ;;  %v5257_v46 = vmul.f32 1.442695, %v10076_v17  ;;  %v5276_v17 = vmul.f32 1.442695, %v10088_v45 }
 0x100   :  { %10056 = vst [vmem:[#allocation18_spill] sm:$0xff] %v5220_v58  ;;  %v5227_v38 = vmul.f32 1.442695, %v10058_v14  ;;  %10062 = vst [vmem:[#allocation20_spill] sm:$0xff] %v5231_v4  ;;  %v10067_v7 = vsub.f32 0.0, %v10066_v59  ;;  %v5252_v4 = vpop.eup %3136  ;;  %v10079_v59 = vsub.f32 0.0, %v10078_v20  ;;  %3168 = vpow2.f32 %v5066_v10 }
 0x101   :  { %v5246_v14 = vmul.f32 1.442695, %v10070_v43  ;;  %10077 = vst [vmem:[#allocation25_spill] sm:$0xff] %v5257_v46  ;;  %10089 = vst [vmem:[#allocation29_spill] sm:$0xff] %v5276_v17  ;;  %v10090_v46 = vld [vmem:[#allocation82_spill] sm:$0xff]  ;;  %v10096_v21 = vld [vmem:[#allocation84_spill] sm:$0xff] }
 0x102   :  { %10059 = vst [vmem:[#allocation19_spill] sm:$0xff] %v5227_v38  ;;  %v5242_v58 = vmul.f32 1.442695, %v10067_v7  ;;  %v10072_v38 = vld [vmem:[#allocation76_spill] sm:$0xff]  ;;  %v5261_v7 = vmul.f32 1.442695, %v10079_v59 }
 0x103   :  { %10071 = vst [vmem:[#allocation23_spill] sm:$0xff] %v5246_v14  ;;  %v10073_v36 = vsub.f32 0.0, %v10072_v38  ;;  %v5267_v14 = vpop.eup %3138  ;;  %v10084_v38 = vld [vmem:[#allocation80_spill] sm:$0xff]  ;;  %v10091_v20 = vsub.f32 0.0, %v10090_v46  ;;  %v10102_v46 = vld [vmem:[#allocation86_spill] sm:$0xff]  ;;  %v10105_v56 = vld [vmem:[#allocation87_spill] sm:$0xff]  ;;  %3170 = vpow2.f32 %v5072_v34 }
 0x104   :  { %10068 = vst [vmem:[#allocation22_spill] sm:$0xff] %v5242_v58  ;;  %10080 = vst [vmem:[#allocation26_spill] sm:$0xff] %v5261_v7  ;;  %v10081_v58 = vld [vmem:[#allocation79_spill] sm:$0xff]  ;;  %v5282_v7 = vpop.eup %3140  ;;  %v10114_v10 = vld [vmem:[#allocation90_spill] sm:$0xff]  ;;  %3172 = vpow2.f32 %v5076_v5 }
 0x105   :  { %v5250_v11 = vmul.f32 1.442695, %v10073_v36  ;;  %v10082_v44 = vsub.f32 0.0, %v10081_v58  ;;  %v10085_v36 = vsub.f32 0.0, %v10084_v38  ;;  %v5280_v59 = vmul.f32 1.442695, %v10091_v20  ;;  %v5297_v17 = vpop.eup %3142 }
 0x106   :  { %v10093_v58 = vld [vmem:[#allocation83_spill] sm:$0xff]  ;;  %v10097_v38 = vsub.f32 0.0, %v10096_v21  ;;  %v10103_v20 = vsub.f32 0.0, %v10102_v46  ;;  %v10115_v46 = vsub.f32 0.0, %v10114_v10  ;;  %v10123_v34 = vld [vmem:[#allocation93_spill] sm:$0xff]  ;;  %3174 = vpow2.f32 %v5080_v61  ;;  %v10132_v5 = vld [vmem:[#allocation96_spill] sm:$0xff] }
 0x107   :  { %10074 = vst [vmem:[#allocation24_spill] sm:$0xff] %v5250_v11  ;;  %v5265_v43 = vmul.f32 1.442695, %v10082_v44  ;;  %v5272_v11 = vmul.f32 1.442695, %v10085_v36  ;;  %10092 = vst [vmem:[#allocation30_spill] sm:$0xff] %v5280_v59 }
 0x108   :  { %v10094_v44 = vsub.f32 0.0, %v10093_v58  ;;  %v5291_v36 = vmul.f32 1.442695, %v10097_v38  ;;  %v5302_v59 = vmul.f32 1.442695, %v10103_v20  ;;  %v10106_v58 = vsub.f32 0.0, %v10105_v56 }
 0x109   :  { %10083 = vst [vmem:[#allocation27_spill] sm:$0xff] %v5265_v43  ;;  %10086 = vst [vmem:[#allocation28_spill] sm:$0xff] %v5272_v11  ;;  %v10099_v11 = vld [vmem:[#allocation85_spill] sm:$0xff]  ;;  %v5321_v20 = vmul.f32 1.442695, %v10115_v46  ;;  %v10141_v61 = vld [vmem:[#allocation99_spill] sm:$0xff] }
 0x10a   :  { %v5287_v43 = vmul.f32 1.442695, %v10094_v44  ;;  %10098 = vst [vmem:[#allocation32_spill] sm:$0xff] %v5291_v36  ;;  %v10100_v6 = vsub.f32 0.0, %v10099_v11  ;;  %10104 = vst [vmem:[#allocation34_spill] sm:$0xff] %v5302_v59  ;;  %v5312_v36 = vpop.eup %3144  ;;  %v10111_v11 = vld [vmem:[#allocation89_spill] sm:$0xff]  ;;  %3176 = vpow2.f32 %v5086_v15 }
 0x10b   :  { %v5306_v44 = vmul.f32 1.442695, %v10106_v58  ;;  %10116 = vst [vmem:[#allocation38_spill] sm:$0xff] %v5321_v20  ;;  %v10117_v59 = vld [vmem:[#allocation91_spill] sm:$0xff]  ;;  %v10150_v15 = vld [vmem:[#allocation102_spill] sm:$0xff] }
 0x10c   :  { %10095 = vst [vmem:[#allocation31_spill] sm:$0xff] %v5287_v43  ;;  %v5295_v45 = vmul.f32 1.442695, %v10100_v6  ;;  %v10108_v43 = vld [vmem:[#allocation88_spill] sm:$0xff]  ;;  %v10112_v6 = vsub.f32 0.0, %v10111_v11  ;;  %v10118_v56 = vsub.f32 0.0, %v10117_v59 }
 0x10d   :  { %10107 = vst [vmem:[#allocation35_spill] sm:$0xff] %v5306_v44  ;;  %v10109_v21 = vsub.f32 0.0, %v10108_v43  ;;  %v5327_v44 = vpop.eup %3146  ;;  %v10120_v43 = vld [vmem:[#allocation92_spill] sm:$0xff]  ;;  %v10124_v11 = vsub.f32 0.0, %v10123_v34  ;;  %v10129_v59 = vld [vmem:[#allocation95_spill] sm:$0xff]  ;;  %3178 = vpow2.f32 %v5090_v24  ;;  %v10159_v24 = vld [vmem:[#allocation105_spill] sm:$0xff] }
 0x10e   :  { %10101 = vst [vmem:[#allocation33_spill] sm:$0xff] %v5295_v45  ;;  %v5317_v45 = vmul.f32 1.442695, %v10112_v6  ;;  %v5325_v58 = vmul.f32 1.442695, %v10118_v56  ;;  %v5342_v20 = vpop.eup %3148  ;;  %v10130_v56 = vsub.f32 0.0, %v10129_v59  ;;  %3180 = vpow2.f32 %v5094_v48 }
 0x10f   :  { %v5310_v38 = vmul.f32 1.442695, %v10109_v21  ;;  %v10121_v21 = vsub.f32 0.0, %v10120_v43  ;;  %v5336_v6 = vmul.f32 1.442695, %v10124_v11  ;;  %v10133_v43 = vsub.f32 0.0, %v10132_v5 }
 0x110   :  { %10113 = vst [vmem:[#allocation37_spill] sm:$0xff] %v5317_v45  ;;  %10119 = vst [vmem:[#allocation39_spill] sm:$0xff] %v5325_v58  ;;  %v10126_v45 = vld [vmem:[#allocation94_spill] sm:$0xff]  ;;  %v5347_v58 = vmul.f32 1.442695, %v10130_v56  ;;  %v10142_v59 = vsub.f32 0.0, %v10141_v61 }
 0x111   :  { %10110 = vst [vmem:[#allocation36_spill] sm:$0xff] %v5310_v38  ;;  %v5332_v38 = vmul.f32 1.442695, %v10121_v21  ;;  %10125 = vst [vmem:[#allocation41_spill] sm:$0xff] %v5336_v6  ;;  %v10127_v10 = vsub.f32 0.0, %v10126_v45  ;;  %v5357_v6 = vpop.eup %3150  ;;  %v10138_v45 = vld [vmem:[#allocation98_spill] sm:$0xff]  ;;  %3182 = vpow2.f32 %v5100_v31 }
 0x112   :  { %10131 = vst [vmem:[#allocation43_spill] sm:$0xff] %v5347_v58  ;;  %v5351_v21 = vmul.f32 1.442695, %v10133_v43  ;;  %v5366_v56 = vmul.f32 1.442695, %v10142_v59  ;;  %v10144_v58 = vld [vmem:[#allocation100_spill] sm:$0xff] }
 0x113   :  { %10122 = vst [vmem:[#allocation40_spill] sm:$0xff] %v5332_v38  ;;  %v5340_v46 = vmul.f32 1.442695, %v10127_v10  ;;  %v10135_v38 = vld [vmem:[#allocation97_spill] sm:$0xff]  ;;  %v10139_v10 = vsub.f32 0.0, %v10138_v45  ;;  %v10145_v5 = vsub.f32 0.0, %v10144_v58 }
 0x114   :  { %10134 = vst [vmem:[#allocation44_spill] sm:$0xff] %v5351_v21  ;;  %v10136_v34 = vsub.f32 0.0, %v10135_v38  ;;  %10143 = vst [vmem:[#allocation47_spill] sm:$0xff] %v5366_v56  ;;  %v5372_v21 = vpop.eup %3152  ;;  %v10147_v38 = vld [vmem:[#allocation101_spill] sm:$0xff]  ;;  %v10151_v45 = vsub.f32 0.0, %v10150_v15  ;;  %v10156_v58 = vld [vmem:[#allocation104_spill] sm:$0xff]  ;;  %3184 = vpow2.f32 %v5104_v8 }
 0x115   :  { %10128 = vst [vmem:[#allocation42_spill] sm:$0xff] %v5340_v46  ;;  %v5362_v46 = vmul.f32 1.442695, %v10139_v10  ;;  %v5370_v43 = vmul.f32 1.442695, %v10145_v5  ;;  %v5387_v56 = vpop.eup %3154  ;;  %v10157_v5 = vsub.f32 0.0, %v10156_v58  ;;  %3186 = vpow2.f32 %v5108_v28 }
 0x116   :  { %v5355_v11 = vmul.f32 1.442695, %v10136_v34  ;;  %v10148_v34 = vsub.f32 0.0, %v10147_v38  ;;  %v5381_v10 = vmul.f32 1.442695, %v10151_v45  ;;  %v10160_v38 = vsub.f32 0.0, %v10159_v24 }
 0x117   :  { %10140 = vst [vmem:[#allocation46_spill] sm:$0xff] %v5362_v46  ;;  %10146 = vst [vmem:[#allocation48_spill] sm:$0xff] %v5370_v43  ;;  %v10153_v46 = vld [vmem:[#allocation103_spill] sm:$0xff]  ;;  %v5392_v43 = vmul.f32 1.442695, %v10157_v5  ;;  %v10168_v48 = vld [vmem:[#allocation108_spill] sm:$0xff] }
 0x118   :  { %10137 = vst [vmem:[#allocation45_spill] sm:$0xff] %v5355_v11  ;;  %v5377_v11 = vmul.f32 1.442695, %v10148_v34  ;;  %10152 = vst [vmem:[#allocation50_spill] sm:$0xff] %v5381_v10  ;;  %v10154_v61 = vsub.f32 0.0, %v10153_v46  ;;  %v5402_v10 = vpop.eup %3156  ;;  %v10165_v46 = vld [vmem:[#allocation107_spill] sm:$0xff]  ;;  %3188 = vpow2.f32 %v5114_v25 }
 0x119   :  { %10158 = vst [vmem:[#allocation52_spill] sm:$0xff] %v5392_v43  ;;  %v5396_v34 = vmul.f32 1.442695, %v10160_v38  ;;  %v10169_v58 = vsub.f32 0.0, %v10168_v48  ;;  %v10171_v43 = vld [vmem:[#allocation109_spill] sm:$0xff]  ;;  %v10177_v31 = vld [vmem:[#allocation111_spill] sm:$0xff] }
 0x11a   :  { %10149 = vst [vmem:[#allocation49_spill] sm:$0xff] %v5377_v11  ;;  %v5385_v59 = vmul.f32 1.442695, %v10154_v61  ;;  %v10162_v11 = vld [vmem:[#allocation106_spill] sm:$0xff]  ;;  %v10166_v61 = vsub.f32 0.0, %v10165_v46  ;;  %v10172_v24 = vsub.f32 0.0, %v10171_v43 }
 0x11b   :  { %10161 = vst [vmem:[#allocation53_spill] sm:$0xff] %v5396_v34  ;;  %v10163_v15 = vsub.f32 0.0, %v10162_v11  ;;  %v5411_v5 = vmul.f32 1.442695, %v10169_v58  ;;  %v5417_v34 = vpop.eup %3158  ;;  %v10174_v11 = vld [vmem:[#allocation110_spill] sm:$0xff]  ;;  %v10178_v46 = vsub.f32 0.0, %v10177_v31  ;;  %3190 = vpow2.f32 %v5118_v63 }
 0x11c   :  { %10155 = vst [vmem:[#allocation51_spill] sm:$0xff] %v5385_v59  ;;  %v5407_v59 = vmul.f32 1.442695, %v10166_v61  ;;  %v5415_v38 = vmul.f32 1.442695, %v10172_v24  ;;  %v10183_v43 = vld [vmem:[#allocation113_spill] sm:$0xff] }
 0x11d   :  { %v5400_v45 = vmul.f32 1.442695, %v10163_v15  ;;  %10170 = vst [vmem:[#allocation56_spill] sm:$0xff] %v5411_v5  ;;  %v10175_v15 = vsub.f32 0.0, %v10174_v11  ;;  %v5426_v61 = vmul.f32 1.442695, %v10178_v46  ;;  %v5432_v5 = vpop.eup %3160  ;;  %3192 = vpow2.f32 %v5122_v23 }
 0x11e   :  { %10167 = vst [vmem:[#allocation55_spill] sm:$0xff] %v5407_v59  ;;  %10173 = vst [vmem:[#allocation57_spill] sm:$0xff] %v5415_v38  ;;  %v10180_v59 = vld [vmem:[#allocation112_spill] sm:$0xff]  ;;  %v10184_v24 = vsub.f32 0.0, %v10183_v43  ;;  %v10186_v8 = vld [vmem:[#allocation114_spill] sm:$0xff] }
 0x11f   :  { %10164 = vst [vmem:[#allocation54_spill] sm:$0xff] %v5400_v45  ;;  %v5422_v45 = vmul.f32 1.442695, %v10175_v15  ;;  %10179 = vst [vmem:[#allocation59_spill] sm:$0xff] %v5426_v61  ;;  %v10181_v48 = vsub.f32 0.0, %v10180_v59  ;;  %v10187_v11 = vsub.f32 0.0, %v10186_v8  ;;  %v5447_v61 = vpop.eup %3162  ;;  %3194 = vpow2.f32 %v5128_v0 }
 0x120   :  { %v5437_v38 = vmul.f32 1.442695, %v10184_v24  ;;  %v10192_v59 = vld [vmem:[#allocation116_spill] sm:$0xff]  ;;  %v10195_v28 = vld [vmem:[#allocation117_spill] sm:$0xff]  ;;  %v10213_v63 = vld [vmem:[#allocation123_spill] sm:$0xff] }
 0x121   :  { %10176 = vst [vmem:[#allocation58_spill] sm:$0xff] %v5422_v45  ;;  %v5430_v58 = vmul.f32 1.442695, %v10181_v48  ;;  %v5441_v15 = vmul.f32 1.442695, %v10187_v11  ;;  %v10189_v45 = vld [vmem:[#allocation115_spill] sm:$0xff] }
 0x122   :  { %10185 = vst [vmem:[#allocation61_spill] sm:$0xff] %v5437_v38  ;;  %v10190_v31 = vsub.f32 0.0, %v10189_v45  ;;  %v10193_v48 = vsub.f32 0.0, %v10192_v59  ;;  %v10196_v43 = vsub.f32 0.0, %v10195_v28  ;;  %v10198_v38 = vld [vmem:[#allocation118_spill] sm:$0xff]  ;;  %v10201_v45 = vld [vmem:[#allocation119_spill] sm:$0xff] }
 0x123   :  { %10182 = vst [vmem:[#allocation60_spill] sm:$0xff] %v5430_v58  ;;  %10188 = vst [vmem:[#allocation62_spill] sm:$0xff] %v5441_v15  ;;  %v10199_v8 = vsub.f32 0.0, %v10198_v38  ;;  %v5462_v15 = vpop.eup %3164  ;;  %v10204_v25 = vld [vmem:[#allocation120_spill] sm:$0xff]  ;;  %v10210_v38 = vld [vmem:[#allocation122_spill] sm:$0xff]  ;;  %3196 = vpow2.f32 %v5132_v22 }
 0x124   :  { %v5445_v46 = vmul.f32 1.442695, %v10190_v31  ;;  %v5452_v58 = vmul.f32 1.442695, %v10193_v48  ;;  %v5456_v24 = vmul.f32 1.442695, %v10196_v43 }
 0x125   :  { %v5460_v11 = vmul.f32 1.442695, %v10199_v8  ;;  %v10202_v31 = vsub.f32 0.0, %v10201_v45  ;;  %v10205_v59 = vsub.f32 0.0, %v10204_v25  ;;  %v10211_v8 = vsub.f32 0.0, %v10210_v38  ;;  %v10222_v23 = vld [vmem:[#allocation126_spill] sm:$0xff] }
 0x126   :  { %10191 = vst [vmem:[#allocation63_spill] sm:$0xff] %v5445_v46  ;;  %10194 = vst [vmem:[#allocation64_spill] sm:$0xff] %v5452_v58  ;;  %v10207_v58 = vld [vmem:[#allocation121_spill] sm:$0xff]  ;;  %v10214_v45 = vsub.f32 0.0, %v10213_v63  ;;  %v10223_v38 = vsub.f32 0.0, %v10222_v23  ;;  %v10240_v22 = vld [vmem:[#allocation132_spill] sm:$0xff] }
 0x127   :  { %10197 = vst [vmem:[#allocation65_spill] sm:$0xff] %v5456_v24  ;;  %10200 = vst [vmem:[#allocation66_spill] sm:$0xff] %v5460_v11  ;;  %v5467_v46 = vmul.f32 1.442695, %v10202_v31  ;;  %v5471_v48 = vmul.f32 1.442695, %v10205_v59  ;;  %v5477_v24 = vpop.eup %3166  ;;  %3198 = vpow2.f32 %v5136_v3 }
 0x128   :  { %v10208_v28 = vsub.f32 0.0, %v10207_v58  ;;  %v5482_v11 = vmul.f32 1.442695, %v10211_v8  ;;  %v5486_v31 = vmul.f32 1.442695, %v10214_v45  ;;  %v10219_v58 = vld [vmem:[#allocation125_spill] sm:$0xff] }
 0x129   :  { %10203 = vst [vmem:[#allocation67_spill] sm:$0xff] %v5467_v46  ;;  %10206 = vst [vmem:[#allocation68_spill] sm:$0xff] %v5471_v48  ;;  %v10216_v46 = vld [vmem:[#allocation124_spill] sm:$0xff]  ;;  %v5492_v48 = vpop.eup %3168  ;;  %v5501_v8 = vmul.f32 1.442695, %v10223_v38  ;;  %v10231_v0 = vld [vmem:[#allocation129_spill] sm:$0xff]  ;;  %3200 = vpow2.f32 %v5142_v39 }
 0x12a   :  { %v5475_v43 = vmul.f32 1.442695, %v10208_v28  ;;  %10212 = vst [vmem:[#allocation70_spill] sm:$0xff] %v5482_v11  ;;  %10215 = vst [vmem:[#allocation71_spill] sm:$0xff] %v5486_v31  ;;  %v10217_v25 = vsub.f32 0.0, %v10216_v46  ;;  %v10220_v28 = vsub.f32 0.0, %v10219_v58  ;;  %v5507_v31 = vpop.eup %3170  ;;  %3202 = vpow2.f32 %v5146_v26 }
 0x12b   :  { %10224 = vst [vmem:[#allocation74_spill] sm:$0xff] %v5501_v8  ;;  %v10225_v11 = vld [vmem:[#allocation127_spill] sm:$0xff]  ;;  %v10228_v46 = vld [vmem:[#allocation128_spill] sm:$0xff]  ;;  %v10232_v58 = vsub.f32 0.0, %v10231_v0  ;;  %v5522_v8 = vpop.eup %3172  ;;  %v10258_v39 = vld [vmem:[#allocation138_spill] sm:$0xff]  ;;  %3204 = vpow2.f32 %v5150_v54 }
 0x12c   :  { %10209 = vst [vmem:[#allocation69_spill] sm:$0xff] %v5475_v43  ;;  %v5490_v59 = vmul.f32 1.442695, %v10217_v25  ;;  %v5497_v43 = vmul.f32 1.442695, %v10220_v28  ;;  %v10226_v63 = vsub.f32 0.0, %v10225_v11 }
 0x12d   :  { %v10229_v25 = vsub.f32 0.0, %v10228_v46  ;;  %v5516_v28 = vmul.f32 1.442695, %v10232_v58  ;;  %v10237_v11 = vld [vmem:[#allocation131_spill] sm:$0xff]  ;;  %v10241_v46 = vsub.f32 0.0, %v10240_v22  ;;  %v10267_v26 = vld [vmem:[#allocation141_spill] sm:$0xff] }
 0x12e   :  { %10218 = vst [vmem:[#allocation72_spill] sm:$0xff] %v5490_v59  ;;  %10221 = vst [vmem:[#allocation73_spill] sm:$0xff] %v5497_v43  ;;  %v5505_v45 = vmul.f32 1.442695, %v10226_v63  ;;  %v10234_v43 = vld [vmem:[#allocation130_spill] sm:$0xff]  ;;  %v10238_v63 = vsub.f32 0.0, %v10237_v11 }
 0x12f   :  { %v5512_v59 = vmul.f32 1.442695, %v10229_v25  ;;  %10233 = vst [vmem:[#allocation77_spill] sm:$0xff] %v5516_v28  ;;  %v10235_v23 = vsub.f32 0.0, %v10234_v43  ;;  %v5531_v25 = vmul.f32 1.442695, %v10241_v46  ;;  %v5537_v28 = vpop.eup %3174  ;;  %3206 = vpow2.f32 %v5156_v32 }
 0x130   :  { %10227 = vst [vmem:[#allocation75_spill] sm:$0xff] %v5505_v45  ;;  %v5527_v45 = vmul.f32 1.442695, %v10238_v63  ;;  %v10246_v43 = vld [vmem:[#allocation134_spill] sm:$0xff]  ;;  %v10249_v3 = vld [vmem:[#allocation135_spill] sm:$0xff]  ;;  %v10276_v54 = vld [vmem:[#allocation144_spill] sm:$0xff] }
 0x131   :  { %10230 = vst [vmem:[#allocation76_spill] sm:$0xff] %v5512_v59  ;;  %v5520_v38 = vmul.f32 1.442695, %v10235_v23  ;;  %10242 = vst [vmem:[#allocation80_spill] sm:$0xff] %v5531_v25  ;;  %v10243_v59 = vld [vmem:[#allocation133_spill] sm:$0xff]  ;;  %v10247_v23 = vsub.f32 0.0, %v10246_v43  ;;  %v5552_v25 = vpop.eup %3176  ;;  %3208 = vpow2.f32 %v5160_v9 }
 0x132   :  { %10239 = vst [vmem:[#allocation79_spill] sm:$0xff] %v5527_v45  ;;  %v10244_v0 = vsub.f32 0.0, %v10243_v59  ;;  %v10250_v11 = vsub.f32 0.0, %v10249_v3  ;;  %v10252_v45 = vld [vmem:[#allocation136_spill] sm:$0xff]  ;;  %v10255_v59 = vld [vmem:[#allocation137_spill] sm:$0xff]  ;;  %v10259_v43 = vsub.f32 0.0, %v10258_v39 }
 0x133   :  { %10236 = vst [vmem:[#allocation78_spill] sm:$0xff] %v5520_v38  ;;  %v5542_v38 = vmul.f32 1.442695, %v10247_v23  ;;  %v10253_v22 = vsub.f32 0.0, %v10252_v45  ;;  %v10264_v45 = vld [vmem:[#allocation140_spill] sm:$0xff]  ;;  %v10285_v32 = vld [vmem:[#allocation147_spill] sm:$0xff] }
 0x134   :  { %v5535_v58 = vmul.f32 1.442695, %v10244_v0  ;;  %v5546_v63 = vmul.f32 1.442695, %v10250_v11  ;;  %v10256_v0 = vsub.f32 0.0, %v10255_v59  ;;  %v10268_v59 = vsub.f32 0.0, %v10267_v26 }
 0x135   :  { %10248 = vst [vmem:[#allocation82_spill] sm:$0xff] %v5542_v38  ;;  %v5550_v46 = vmul.f32 1.442695, %v10253_v22  ;;  %v5561_v23 = vmul.f32 1.442695, %v10259_v43  ;;  %v10261_v38 = vld [vmem:[#allocation139_spill] sm:$0xff] }
 0x136   :  { %10245 = vst [vmem:[#allocation81_spill] sm:$0xff] %v5535_v58  ;;  %10251 = vst [vmem:[#allocation83_spill] sm:$0xff] %v5546_v63  ;;  %v5557_v58 = vmul.f32 1.442695, %v10256_v0  ;;  %v10262_v3 = vsub.f32 0.0, %v10261_v38  ;;  %v5567_v63 = vpop.eup %3178  ;;  %v10265_v22 = vsub.f32 0.0, %v10264_v45  ;;  %3210 = vpow2.f32 %v5164_v42 }
 0x137   :  { %10254 = vst [vmem:[#allocation84_spill] sm:$0xff] %v5550_v46  ;;  %10260 = vst [vmem:[#allocation86_spill] sm:$0xff] %v5561_v23  ;;  %v5576_v0 = vmul.f32 1.442695, %v10268_v59  ;;  %v5582_v23 = vpop.eup %3180  ;;  %v10273_v38 = vld [vmem:[#allocation143_spill] sm:$0xff]  ;;  %v10277_v45 = vsub.f32 0.0, %v10276_v54  ;;  %3212 = vpow2.f32 %v5170_v41 }
 0x138   :  { %10257 = vst [vmem:[#allocation85_spill] sm:$0xff] %v5557_v58  ;;  %v5565_v11 = vmul.f32 1.442695, %v10262_v3  ;;  %v5572_v46 = vmul.f32 1.442695, %v10265_v22  ;;  %v10270_v58 = vld [vmem:[#allocation142_spill] sm:$0xff] }
 0x139   :  { %10269 = vst [vmem:[#allocation89_spill] sm:$0xff] %v5576_v0  ;;  %v10271_v39 = vsub.f32 0.0, %v10270_v58  ;;  %v10274_v3 = vsub.f32 0.0, %v10273_v38  ;;  %v5591_v22 = vmul.f32 1.442695, %v10277_v45  ;;  %v5597_v0 = vpop.eup %3182  ;;  %v10282_v58 = vld [vmem:[#allocation146_spill] sm:$0xff]  ;;  %3214 = vpow2.f32 %v5174_v12 }
 0x13a   :  { %10263 = vst [vmem:[#allocation87_spill] sm:$0xff] %v5565_v11  ;;  %10266 = vst [vmem:[#allocation88_spill] sm:$0xff] %v5572_v46  ;;  %v10279_v46 = vld [vmem:[#allocation145_spill] sm:$0xff]  ;;  %v10286_v38 = vsub.f32 0.0, %v10285_v32  ;;  %v10294_v9 = vld [vmem:[#allocation150_spill] sm:$0xff] }
 0x13b   :  { %v5580_v43 = vmul.f32 1.442695, %v10271_v39  ;;  %v5587_v11 = vmul.f32 1.442695, %v10274_v3  ;;  %10278 = vst [vmem:[#allocation92_spill] sm:$0xff] %v5591_v22  ;;  %v10280_v26 = vsub.f32 0.0, %v10279_v46  ;;  %v5612_v22 = vpop.eup %3184  ;;  %3216 = vpow2.f32 %v5178_v52 }
 0x13c   :  { %v10283_v39 = vsub.f32 0.0, %v10282_v58  ;;  %v5606_v3 = vmul.f32 1.442695, %v10286_v38  ;;  %v10291_v46 = vld [vmem:[#allocation149_spill] sm:$0xff]  ;;  %v10295_v58 = vsub.f32 0.0, %v10294_v9  ;;  %v10308_v41 = vld [vmem:[#allocation156_spill] sm:$0xff] }
 0x13d   :  { %10272 = vst [vmem:[#allocation90_spill] sm:$0xff] %v5580_v43  ;;  %10275 = vst [vmem:[#allocation91_spill] sm:$0xff] %v5587_v11  ;;  %v5595_v59 = vmul.f32 1.442695, %v10280_v26  ;;  %v10288_v11 = vld [vmem:[#allocation148_spill] sm:$0xff]  ;;  %v10292_v26 = vsub.f32 0.0, %v10291_v46 }
 0x13e   :  { %v5602_v43 = vmul.f32 1.442695, %v10283_v39  ;;  %10287 = vst [vmem:[#allocation95_spill] sm:$0xff] %v5606_v3  ;;  %v10289_v54 = vsub.f32 0.0, %v10288_v11  ;;  %v5621_v39 = vmul.f32 1.442695, %v10295_v58  ;;  %v5627_v3 = vpop.eup %3186  ;;  %3218 = vpow2.f32 %v5184_v55 }
 0x13f   :  { %10281 = vst [vmem:[#allocation93_spill] sm:$0xff] %v5595_v59  ;;  %v5617_v59 = vmul.f32 1.442695, %v10292_v26  ;;  %v10300_v11 = vld [vmem:[#allocation152_spill] sm:$0xff]  ;;  %v10303_v42 = vld [vmem:[#allocation153_spill] sm:$0xff]  ;;  %v5642_v58 = vpop.eup %3188  ;;  %v10313_v12 = vld [vmem:[#allocation159_spill] sm:$0xff]  ;;  %3220 = vpow2.f32 %v5188_v37 }
 0x140   :  { %10284 = vst [vmem:[#allocation94_spill] sm:$0xff] %v5602_v43  ;;  %v5610_v45 = vmul.f32 1.442695, %v10289_v54  ;;  %10296 = vst [vmem:[#allocation98_spill] sm:$0xff] %v5621_v39  ;;  %v10297_v43 = vld [vmem:[#allocation151_spill] sm:$0xff]  ;;  %v10301_v54 = vsub.f32 0.0, %v10300_v11  ;;  %v5651_v11 = vmul.f32 %v5082_v30, %v10308_v41 }
 0x141   :  { %10293 = vst [vmem:[#allocation97_spill] sm:$0xff] %v5617_v59  ;;  %v10298_v32 = vsub.f32 0.0, %v10297_v43  ;;  %v10304_v46 = vsub.f32 0.0, %v10303_v42  ;;  %v10306_v59 = vld [vmem:[#allocation154_spill] sm:$0xff]  ;;  %v10307_v43 = vld [vmem:[#allocation155_spill] sm:$0xff]  ;;  %v10323_v55 = vld [vmem:[#allocation165_spill] sm:$0xff] }
 0x142   :  { %10290 = vst [vmem:[#allocation96_spill] sm:$0xff] %v5610_v45  ;;  %v5632_v45 = vmul.f32 1.442695, %v10301_v54  ;;  %v5640_v9 = vmul.f32 %v5054_v53, %v10306_v59  ;;  %v10309_v54 = vld [vmem:[#allocation157_spill] sm:$0xff]  ;;  %v10311_v53 = vld [vmem:[#allocation158_spill] sm:$0xff]  ;;  %v10328_v37 = vld [vmem:[#allocation168_spill] sm:$0xff] }
 0x143   :  { %v5625_v38 = vmul.f32 1.442695, %v10298_v32  ;;  %v5636_v26 = vmul.f32 1.442695, %v10304_v46  ;;  %v5647_v32 = vmul.f32 %v5068_v18, %v10307_v43  ;;  %v5655_v42 = vmul.f32 %v5096_v35, %v10309_v54  ;;  %v5657_v46 = vpop.eup %3190  ;;  %v10316_v35 = vld [vmem:[#allocation161_spill] sm:$0xff]  ;;  %v10318_v52 = vld [vmem:[#allocation162_spill] sm:$0xff] }
 0x144   :  { %10302 = vst [vmem:[#allocation100_spill] sm:$0xff] %v5632_v45  ;;  %v5666_v18 = vmul.f32 %v5124_v47, %v10313_v12  ;;  %v10314_v45 = vld [vmem:[#allocation160_spill] sm:$0xff]  ;;  %v5675_v39 = vmul.f32 %v5152_v27, %v10316_v35  ;;  %v10324_v27 = vld [vmem:[#allocation166_spill] sm:$0xff]  ;;  %3222 = vpow2.f32 %v5192_v2  ;;  %v10333_v2 = vld [vmem:[#allocation171_spill] sm:$0xff] }
 0x145   :  { %10299 = vst [vmem:[#allocation99_spill] sm:$0xff] %v5625_v38  ;;  %10305 = vst [vmem:[#allocation101_spill] sm:$0xff] %v5636_v26  ;;  %v5662_v26 = vmul.f32 %v5110_v33, %v10311_v53  ;;  %v5670_v30 = vmul.f32 %v5138_v1, %v10314_v45  ;;  %v3193_v38 = vpop.eup %3192  ;;  %v10319_v33 = vld [vmem:[#allocation163_spill] sm:$0xff]  ;;  %v10321_v1 = vld [vmem:[#allocation164_spill] sm:$0xff]  ;;  %v5692_v45 = vmul.f32 %v5208_v19, %v10323_v55  ;;  %3224 = vpow2.f32 %v5198_v29 }
 0x146   :  { %10310 = vst [vmem:[#allocation102_spill] sm:$0xff] %v5655_v42  ;;  %10317 = vst [vmem:[#allocation105_spill] sm:$0xff] %v5675_v39  ;;  %v5679_v42 = vmul.f32 %v5166_v49, %v10318_v52  ;;  %v3195_v47 = vpop.eup %3194  ;;  %v5696_v39 = vmul.f32 %v5222_v16, %v10324_v27  ;;  %v10331_v16 = vld [vmem:[#allocation170_spill] sm:$0xff]  ;;  %v5718_v27 = vmul.f32 %v5297_v17, %v10333_v2  ;;  %3226 = vpow2.f32 %v5202_v51  ;;  %v10343_v51 = vld [vmem:[#allocation177_spill] sm:$0xff] }
 0x147   :  { %10312 = vst [vmem:[#allocation103_spill] sm:$0xff] %v5662_v26  ;;  %10315 = vst [vmem:[#allocation104_spill] sm:$0xff] %v5670_v30  ;;  %v5683_v26 = vmul.f32 %v5180_v57, %v10319_v33  ;;  %v5688_v30 = vmul.f32 %v5194_v60, %v10321_v1  ;;  %v3197_v49 = vpop.eup %3196  ;;  %v10326_v57 = vld [vmem:[#allocation167_spill] sm:$0xff]  ;;  %v5705_v33 = vmul.f32 %v5252_v4, %v10328_v37  ;;  %v10329_v60 = vld [vmem:[#allocation169_spill] sm:$0xff]  ;;  %3228 = vpow2.f32 %v5206_v13 }
 0x148   :  { %10325 = vst [vmem:[#allocation108_spill] sm:$0xff] %v5696_v39  ;;  %v3199_v19 = vpop.eup %3198  ;;  %v5714_v39 = vmul.f32 %v5282_v7, %v10331_v16  ;;  %v10338_v29 = vld [vmem:[#allocation174_spill] sm:$0xff]  ;;  %v10339_v7 = vld [vmem:[#allocation175_spill] sm:$0xff]  ;;  %3230 = vpow2.f32 %v5212_v40  ;;  %v10348_v13 = vld [vmem:[#allocation180_spill] sm:$0xff] }
 0x149   :  { %10320 = vst [vmem:[#allocation106_spill] sm:$0xff] %v5683_v26  ;;  %10322 = vst [vmem:[#allocation107_spill] sm:$0xff] %v5688_v30  ;;  %v5701_v26 = vmul.f32 %v5237_v62, %v10326_v57  ;;  %v5709_v30 = vmul.f32 %v5267_v14, %v10329_v60  ;;  %v10334_v62 = vld [vmem:[#allocation172_spill] sm:$0xff]  ;;  %v3201_v4 = vpop.eup %3200  ;;  %v10336_v14 = vld [vmem:[#allocation173_spill] sm:$0xff]  ;;  %v5731_v60 = vmul.f32 %v5342_v20, %v10338_v29  ;;  %3232 = vpow2.f32 %v5216_v50 }
 0x14a   :  { %10332 = vst [vmem:[#allocation111_spill] sm:$0xff] %v5714_v39  ;;  %v5735_v39 = vmul.f32 %v5357_v6, %v10339_v7  ;;  %v3203_v17 = vpop.eup %3202  ;;  %v10346_v6 = vld [vmem:[#allocation179_spill] sm:$0xff]  ;;  %v5757_v7 = vmul.f32 %v5432_v5, %v10348_v13  ;;  %v10361_v50 = vld [vmem:[#allocation186_spill] sm:$0xff] }
 0x14b   :  { %10327 = vst [vmem:[#allocation109_spill] sm:$0xff] %v5701_v26  ;;  %10330 = vst [vmem:[#allocation110_spill] sm:$0xff] %v5709_v30  ;;  %v5722_v26 = vmul.f32 %v5312_v36, %v10334_v62  ;;  %v5727_v30 = vmul.f32 %v5327_v44, %v10336_v14  ;;  %v10341_v36 = vld [vmem:[#allocation176_spill] sm:$0xff]  ;;  %v5744_v62 = vmul.f32 %v5387_v56, %v10343_v51  ;;  %v10344_v44 = vld [vmem:[#allocation178_spill] sm:$0xff]  ;;  %v3205_v20 = vpop.eup %3204 }
 0x14c   :  { %10340 = vst [vmem:[#allocation114_spill] sm:$0xff] %v5735_v39  ;;  %v5753_v39 = vmul.f32 %v5417_v34, %v10346_v6  ;;  %10349 = vst [vmem:[#allocation118_spill] sm:$0xff] %v5757_v7  ;;  %v3207_v56 = vpop.eup %3206  ;;  %v10354_v40 = vld [vmem:[#allocation183_spill] sm:$0xff]  ;;  %v10356_v34 = vld [vmem:[#allocation184_spill] sm:$0xff] }
 0x14d   :  { %10335 = vst [vmem:[#allocation112_spill] sm:$0xff] %v5722_v26  ;;  %10337 = vst [vmem:[#allocation113_spill] sm:$0xff] %v5727_v30  ;;  %v5740_v26 = vmul.f32 %v5372_v21, %v10341_v36  ;;  %v5748_v30 = vmul.f32 %v5402_v10, %v10344_v44  ;;  %v10350_v21 = vld [vmem:[#allocation181_spill] sm:$0xff]  ;;  %v10352_v10 = vld [vmem:[#allocation182_spill] sm:$0xff]  ;;  %v5770_v44 = vmul.f32 %v5477_v24, %v10354_v40  ;;  %v3209_v5 = vpop.eup %3208 }
 0x14e   :  { %10347 = vst [vmem:[#allocation117_spill] sm:$0xff] %v5753_v39  ;;  %v5774_v39 = vmul.f32 %v5492_v48, %v10356_v34  ;;  %v10358_v7 = vld [vmem:[#allocation18_spill] sm:$0xff]  ;;  %v3211_v24 = vpop.eup %3210  ;;  %v10366_v48 = vld [vmem:[#allocation188_spill] sm:$0xff] }
 0x14f   :  { %10342 = vst [vmem:[#allocation115_spill] sm:$0xff] %v5740_v26  ;;  %10345 = vst [vmem:[#allocation116_spill] sm:$0xff] %v5748_v30  ;;  %v5761_v26 = vmul.f32 %v5447_v61, %v10350_v21  ;;  %v5766_v30 = vmul.f32 %v5462_v15, %v10352_v10  ;;  %3234 = vpow2.f32 %v10358_v7  ;;  %v10359_v61 = vld [vmem:[#allocation185_spill] sm:$0xff]  ;;  %v5783_v21 = vmul.f32 %v5522_v8, %v10361_v50  ;;  %v10363_v15 = vld [vmem:[#allocation187_spill] sm:$0xff]  ;;  %v3213_v8 = vpop.eup %3212 }
 0x150   :  { %10355 = vst [vmem:[#allocation121_spill] sm:$0xff] %v5770_v44  ;;  %10357 = vst [vmem:[#allocation122_spill] sm:$0xff] %v5774_v39  ;;  %v10365_v44 = vld [vmem:[#allocation19_spill] sm:$0xff]  ;;  %v5792_v39 = vmul.f32 %v5552_v25, %v10366_v48  ;;  %v10368_v7 = vld [vmem:[#allocation189_spill] sm:$0xff] }
 0x151   :  { %10351 = vst [vmem:[#allocation119_spill] sm:$0xff] %v5761_v26  ;;  %10353 = vst [vmem:[#allocation120_spill] sm:$0xff] %v5766_v30  ;;  %v5779_v26 = vmul.f32 %v5507_v31, %v10359_v61  ;;  %v5787_v30 = vmul.f32 %v5537_v28, %v10363_v15  ;;  %3236 = vpow2.f32 %v10365_v44  ;;  %v5796_v34 = vmul.f32 %v5567_v63, %v10368_v7  ;;  %v10370_v31 = vld [vmem:[#allocation190_spill] sm:$0xff]  ;;  %v10373_v28 = vld [vmem:[#allocation191_spill] sm:$0xff]  ;;  %v3215_v63 = vpop.eup %3214 }
 0x152   :  { %10362 = vst [vmem:[#allocation124_spill] sm:$0xff] %v5783_v21  ;;  %10367 = vst [vmem:[#allocation126_spill] sm:$0xff] %v5792_v39  ;;  %v10372_v21 = vld [vmem:[#allocation20_spill] sm:$0xff]  ;;  %v10377_v25 = vld [vmem:[#allocation193_spill] sm:$0xff] }
 0x153   :  { %10360 = vst [vmem:[#allocation123_spill] sm:$0xff] %v5779_v26  ;;  %10364 = vst [vmem:[#allocation125_spill] sm:$0xff] %v5787_v30  ;;  %v5800_v26 = vmul.f32 %v5582_v23, %v10370_v31  ;;  %3238 = vpow2.f32 %v10372_v21  ;;  %v5805_v30 = vmul.f32 %v5597_v0, %v10373_v28  ;;  %v10375_v44 = vld [vmem:[#allocation192_spill] sm:$0xff]  ;;  %v5813_v39 = vmul.f32 %v5627_v3, %v10377_v25  ;;  %v10380_v23 = vld [vmem:[#allocation194_spill] sm:$0xff] }
 0x154   :  { %10369 = vst [vmem:[#allocation127_spill] sm:$0xff] %v5796_v34  ;;  %v5809_v15 = vmul.f32 %v5612_v22, %v10375_v44  ;;  %v10379_v34 = vld [vmem:[#allocation21_spill] sm:$0xff]  ;;  %v10382_v21 = vld [vmem:[#allocation195_spill] sm:$0xff]  ;;  %v10384_v0 = vld [vmem:[#allocation196_spill] sm:$0xff]  ;;  %v3217_v22 = vpop.eup %3216 }
 0x155   :  { %10371 = vst [vmem:[#allocation128_spill] sm:$0xff] %v5800_v26  ;;  %10374 = vst [vmem:[#allocation129_spill] sm:$0xff] %v5805_v30  ;;  %3240 = vpow2.f32 %v10379_v34  ;;  %v5818_v26 = vmul.f32 %v5642_v58, %v10380_v23  ;;  %v5822_v31 = vmul.f32 %v5657_v46, %v10382_v21  ;;  %v5825_v30 = vmul.f32 %v3193_v38, %v10384_v0  ;;  %v10387_v44 = vld [vmem:[#allocation197_spill] sm:$0xff]  ;;  %v10391_v34 = vld [vmem:[#allocation199_spill] sm:$0xff]  ;;  %v3219_v58 = vpop.eup %3218 }
 0x156   :  { %10376 = vst [vmem:[#allocation130_spill] sm:$0xff] %v5809_v15  ;;  %10378 = vst [vmem:[#allocation131_spill] sm:$0xff] %v5813_v39  ;;  %v10386_v15 = vld [vmem:[#allocation22_spill] sm:$0xff]  ;;  %v5829_v3 = vmul.f32 %v3195_v47, %v10387_v44  ;;  %v5835_v28 = vmul.f32 %v3199_v19, %v10391_v34  ;;  %v10394_v46 = vld [vmem:[#allocation200_spill] sm:$0xff]  ;;  %v3221_v47 = vpop.eup %3220 }
 0x157   :  { %10381 = vst [vmem:[#allocation132_spill] sm:$0xff] %v5818_v26  ;;  %10383 = vst [vmem:[#allocation133_spill] sm:$0xff] %v5822_v31  ;;  %3242 = vpow2.f32 %v10386_v15  ;;  %v10389_v39 = vld [vmem:[#allocation198_spill] sm:$0xff]  ;;  %v10393_v26 = vld [vmem:[#allocation23_spill] sm:$0xff]  ;;  %v5839_v31 = vmul.f32 %v3201_v4, %v10394_v46  ;;  %v3223_v4 = vpop.eup %3222 }
 0x158   :  { %10385 = vst [vmem:[#allocation134_spill] sm:$0xff] %v5825_v30  ;;  %10388 = vst [vmem:[#allocation135_spill] sm:$0xff] %v5829_v3  ;;  %v5832_v25 = vmul.f32 %v3197_v49, %v10389_v39  ;;  %3244 = vpow2.f32 %v10393_v26  ;;  %v10396_v38 = vld [vmem:[#allocation201_spill] sm:$0xff]  ;;  %v10398_v0 = vld [vmem:[#allocation202_spill] sm:$0xff]  ;;  %v5856_v26 = vmul.f32 %v5640_v9, %v10306_v59 }
 0x159   :  { %10392 = vst [vmem:[#allocation137_spill] sm:$0xff] %v5835_v28  ;;  %10395 = vst [vmem:[#allocation138_spill] sm:$0xff] %v5839_v31  ;;  %v5842_v30 = vmul.f32 %v3203_v17, %v10396_v38  ;;  %v5845_v15 = vmul.f32 %v3205_v20, %v10398_v0  ;;  %v10399_v3 = vld [vmem:[#allocation24_spill] sm:$0xff]  ;;  %v10400_v49 = vld [vmem:[#allocation203_spill] sm:$0xff]  ;;  %v5864_v20 = vmul.f32 %v5647_v32, %v10307_v43 }
 0x15a   :  { %10390 = vst [vmem:[#allocation136_spill] sm:$0xff] %v5832_v25  ;;  %3246 = vpow2.f32 %v10399_v3  ;;  %v5849_v25 = vmul.f32 %v3207_v56, %v10400_v49  ;;  %v10401_v19 = vld [vmem:[#allocation204_spill] sm:$0xff]  ;;  %10403 = vst [vmem:[#allocation141_spill] sm:$0xff] %v5856_v26  ;;  %v10404_v31 = vld [vmem:[#allocation25_spill] sm:$0xff]  ;;  %v5868_v56 = vmul.f32 %v5651_v11, %v10308_v41  ;;  %v5888_v11 = vmul.f32 %v5666_v18, %v10313_v12 }
 0x15b   :  { %10397 = vst [vmem:[#allocation139_spill] sm:$0xff] %v5842_v30  ;;  %v5852_v28 = vmul.f32 %v3209_v5, %v10401_v19  ;;  %3248 = vpow2.f32 %v10404_v31  ;;  %v10405_v17 = vld [vmem:[#allocation205_spill] sm:$0xff]  ;;  %10406 = vst [vmem:[#allocation142_spill] sm:$0xff] %v5864_v20  ;;  %v3225_v5 = vpop.eup %3224  ;;  %v10408_v3 = vld [vmem:[#allocation26_spill] sm:$0xff] }
 0x15c   :  { %v5860_v30 = vmul.f32 %v3211_v24, %v10405_v17  ;;  %10407 = vst [vmem:[#allocation143_spill] sm:$0xff] %v5868_v56  ;;  %3250 = vpow2.f32 %v10408_v3  ;;  %v10410_v9 = vld [vmem:[#allocation102_spill] sm:$0xff]  ;;  %v10412_v24 = vld [vmem:[#allocation103_spill] sm:$0xff]  ;;  %v3227_v43 = vpop.eup %3226  ;;  %10416 = vst [vmem:[#allocation146_spill] sm:$0xff] %v5888_v11 }
 0x15d   :  { %10402 = vst [vmem:[#allocation140_spill] sm:$0xff] %v5852_v28  ;;  %v10409_v28 = vld [vmem:[#allocation206_spill] sm:$0xff]  ;;  %v5876_v31 = vmul.f32 %v10410_v9, %v10309_v54  ;;  %v5880_v26 = vmul.f32 %v10412_v24, %v10311_v53  ;;  %v10414_v32 = vld [vmem:[#allocation27_spill] sm:$0xff]  ;;  %v10418_v3 = vld [vmem:[#allocation104_spill] sm:$0xff]  ;;  %v3229_v54 = vpop.eup %3228 }
 0x15e   :  { %v5872_v59 = vmul.f32 %v3213_v8, %v10409_v28  ;;  %3252 = vpow2.f32 %v10414_v32  ;;  %v10415_v20 = vld [vmem:[#allocation207_spill] sm:$0xff]  ;;  %v10417_v8 = vld [vmem:[#allocation160_spill] sm:$0xff]  ;;  %v10422_v24 = vld [vmem:[#allocation105_spill] sm:$0xff]  ;;  %v3231_v12 = vpop.eup %3230 }
 0x15f   :  { %10411 = vst [vmem:[#allocation144_spill] sm:$0xff] %v5876_v31  ;;  %10413 = vst [vmem:[#allocation145_spill] sm:$0xff] %v5880_v26  ;;  %v5884_v41 = vmul.f32 %v3215_v63, %v10415_v20  ;;  %v5892_v56 = vmul.f32 %v10418_v3, %v10417_v8  ;;  %v10420_v9 = vld [vmem:[#allocation28_spill] sm:$0xff]  ;;  %v5900_v32 = vmul.f32 %v10422_v24, %v10316_v35  ;;  %v10425_v18 = vld [vmem:[#allocation29_spill] sm:$0xff]  ;;  %v3233_v35 = vpop.eup %3232 }
 0x160   :  { %3254 = vpow2.f32 %v10420_v9  ;;  %v10421_v31 = vld [vmem:[#allocation208_spill] sm:$0xff]  ;;  %v5904_v63 = vmul.f32 %v5679_v42, %v10318_v52  ;;  %v10426_v11 = vld [vmem:[#allocation209_spill] sm:$0xff]  ;;  %v10427_v3 = vld [vmem:[#allocation163_spill] sm:$0xff]  ;;  %v5924_v52 = vmul.f32 %v5692_v45, %v10323_v55 }
 0x161   :  { %10419 = vst [vmem:[#allocation147_spill] sm:$0xff] %v5892_v56  ;;  %v5896_v53 = vmul.f32 %v3217_v22, %v10421_v31  ;;  %10423 = vst [vmem:[#allocation148_spill] sm:$0xff] %v5900_v32  ;;  %3256 = vpow2.f32 %v10425_v18  ;;  %v5908_v8 = vmul.f32 %v3219_v58, %v10426_v11  ;;  %v10428_v56 = vld [vmem:[#allocation106_spill] sm:$0xff]  ;;  %v10430_v22 = vld [vmem:[#allocation107_spill] sm:$0xff] }
 0x162   :  { %10424 = vst [vmem:[#allocation149_spill] sm:$0xff] %v5904_v63  ;;  %v5912_v9 = vmul.f32 %v10428_v56, %v10427_v3  ;;  %v5916_v26 = vmul.f32 %v10430_v22, %v10321_v1  ;;  %v10432_v24 = vld [vmem:[#allocation30_spill] sm:$0xff]  ;;  %10434 = vst [vmem:[#allocation152_spill] sm:$0xff] %v5924_v52  ;;  %v10436_v18 = vld [vmem:[#allocation108_spill] sm:$0xff]  ;;  %v3235_v56 = vpop.eup %3234 }
 0x163   :  { %3258 = vpow2.f32 %v10432_v24  ;;  %v10433_v32 = vld [vmem:[#allocation210_spill] sm:$0xff]  ;;  %v10438_v3 = vld [vmem:[#allocation31_spill] sm:$0xff]  ;;  %v10440_v22 = vld [vmem:[#allocation109_spill] sm:$0xff]  ;;  %v3237_v45 = vpop.eup %3236 }
 0x164   :  { %10429 = vst [vmem:[#allocation150_spill] sm:$0xff] %v5912_v9  ;;  %10431 = vst [vmem:[#allocation151_spill] sm:$0xff] %v5916_v26  ;;  %v5920_v42 = vmul.f32 %v3221_v47, %v10433_v32  ;;  %v10435_v58 = vld [vmem:[#allocation166_spill] sm:$0xff]  ;;  %3260 = vpow2.f32 %v10438_v3  ;;  %v10439_v9 = vld [vmem:[#allocation211_spill] sm:$0xff]  ;;  %v5936_v24 = vmul.f32 %v10440_v22, %v10326_v57  ;;  %v5940_v47 = vmul.f32 %v5705_v33, %v10328_v37  ;;  %v3239_v57 = vpop.eup %3238 }
 0x165   :  { %v5928_v63 = vmul.f32 %v10436_v18, %v10435_v58  ;;  %v5932_v1 = vmul.f32 %v3223_v4, %v10439_v9  ;;  %v10443_v55 = vld [vmem:[#allocation32_spill] sm:$0xff]  ;;  %v10445_v18 = vld [vmem:[#allocation169_spill] sm:$0xff]  ;;  %v10448_v4 = vld [vmem:[#allocation111_spill] sm:$0xff]  ;;  %v5960_v37 = vmul.f32 %v5718_v27, %v10333_v2 }
 0x166   :  { %10441 = vst [vmem:[#allocation154_spill] sm:$0xff] %v5936_v24  ;;  %10442 = vst [vmem:[#allocation155_spill] sm:$0xff] %v5940_v47  ;;  %3262 = vpow2.f32 %v10443_v55  ;;  %v10444_v52 = vld [vmem:[#allocation212_spill] sm:$0xff]  ;;  %v5952_v26 = vmul.f32 %v10448_v4, %v10331_v16  ;;  %v10450_v22 = vld [vmem:[#allocation33_spill] sm:$0xff] }
 0x167   :  { %10437 = vst [vmem:[#allocation153_spill] sm:$0xff] %v5928_v63  ;;  %v5944_v58 = vmul.f32 %v3225_v5, %v10444_v52  ;;  %v10446_v63 = vld [vmem:[#allocation110_spill] sm:$0xff]  ;;  %3264 = vpow2.f32 %v10450_v22  ;;  %v10451_v24 = vld [vmem:[#allocation213_spill] sm:$0xff]  ;;  %10452 = vst [vmem:[#allocation158_spill] sm:$0xff] %v5960_v37 }
 0x168   :  { %v5948_v3 = vmul.f32 %v10446_v63, %v10445_v18  ;;  %10449 = vst [vmem:[#allocation157_spill] sm:$0xff] %v5952_v26  ;;  %v5956_v33 = vmul.f32 %v3227_v43, %v10451_v24  ;;  %v10453_v5 = vld [vmem:[#allocation172_spill] sm:$0xff]  ;;  %v3241_v63 = vpop.eup %3240  ;;  %v10456_v18 = vld [vmem:[#allocation34_spill] sm:$0xff]  ;;  %v10458_v4 = vld [vmem:[#allocation113_spill] sm:$0xff]  ;;  %v5976_v43 = vmul.f32 %v5731_v60, %v10338_v29  ;;  %v5996_v29 = vmul.f32 %v5744_v62, %v10343_v51 }
 0x169   :  { %v10454_v55 = vld [vmem:[#allocation112_spill] sm:$0xff]  ;;  %3266 = vpow2.f32 %v10456_v18  ;;  %v5972_v22 = vmul.f32 %v10458_v4, %v10336_v14  ;;  %v3243_v27 = vpop.eup %3242  ;;  %v10461_v2 = vld [vmem:[#allocation35_spill] sm:$0xff]  ;;  %v10481_v51 = vld [vmem:[#allocation38_spill] sm:$0xff] }
 0x16a   :  { %10447 = vst [vmem:[#allocation156_spill] sm:$0xff] %v5948_v3  ;;  %v5964_v47 = vmul.f32 %v10454_v55, %v10453_v5  ;;  %v10457_v3 = vld [vmem:[#allocation214_spill] sm:$0xff]  ;;  %10460 = vst [vmem:[#allocation162_spill] sm:$0xff] %v5976_v43  ;;  %3268 = vpow2.f32 %v10461_v2  ;;  %v10462_v37 = vld [vmem:[#allocation215_spill] sm:$0xff]  ;;  %v3245_v14 = vpop.eup %3244 }
 0x16b   :  { %v5968_v16 = vmul.f32 %v3229_v54, %v10457_v3  ;;  %10459 = vst [vmem:[#allocation161_spill] sm:$0xff] %v5972_v22  ;;  %v5980_v5 = vmul.f32 %v3231_v12, %v10462_v37  ;;  %v10463_v55 = vld [vmem:[#allocation175_spill] sm:$0xff]  ;;  %v10468_v4 = vld [vmem:[#allocation36_spill] sm:$0xff]  ;;  %10470 = vst [vmem:[#allocation167_spill] sm:$0xff] %v5996_v29 }
 0x16c   :  { %10455 = vst [vmem:[#allocation159_spill] sm:$0xff] %v5964_v47  ;;  %v10464_v47 = vld [vmem:[#allocation114_spill] sm:$0xff]  ;;  %v10466_v54 = vld [vmem:[#allocation115_spill] sm:$0xff]  ;;  %3270 = vpow2.f32 %v10468_v4  ;;  %v10469_v22 = vld [vmem:[#allocation216_spill] sm:$0xff] }
 0x16d   :  { %v5984_v18 = vmul.f32 %v10464_v47, %v10463_v55  ;;  %v5988_v26 = vmul.f32 %v10466_v54, %v10341_v36  ;;  %v5992_v60 = vmul.f32 %v3233_v35, %v10469_v22  ;;  %v10471_v12 = vld [vmem:[#allocation178_spill] sm:$0xff]  ;;  %v10472_v2 = vld [vmem:[#allocation116_spill] sm:$0xff]  ;;  %v3247_v47 = vpop.eup %3246  ;;  %v10474_v55 = vld [vmem:[#allocation37_spill] sm:$0xff] }
 0x16e   :  { %v6000_v43 = vmul.f32 %v10472_v2, %v10471_v12  ;;  %3272 = vpow2.f32 %v10474_v55  ;;  %v10477_v54 = vld [vmem:[#allocation117_spill] sm:$0xff]  ;;  %v10479_v35 = vld [vmem:[#allocation118_spill] sm:$0xff]  ;;  %v3249_v62 = vpop.eup %3248 }
 0x16f   :  { %10465 = vst [vmem:[#allocation164_spill] sm:$0xff] %v5984_v18  ;;  %10467 = vst [vmem:[#allocation165_spill] sm:$0xff] %v5988_v26  ;;  %v10475_v18 = vld [vmem:[#allocation217_spill] sm:$0xff]  ;;  %v6008_v4 = vmul.f32 %v10477_v54, %v10346_v6  ;;  %v6012_v26 = vmul.f32 %v10479_v35, %v10348_v13  ;;  %3274 = vpow2.f32 %v10481_v51  ;;  %v10482_v29 = vld [vmem:[#allocation218_spill] sm:$0xff]  ;;  %v3251_v6 = vpop.eup %3250 }
 0x170   :  { %10473 = vst [vmem:[#allocation168_spill] sm:$0xff] %v6000_v43  ;;  %v6004_v36 = vmul.f32 %v3235_v56, %v10475_v18  ;;  %v6016_v12 = vmul.f32 %v3237_v45, %v10482_v29  ;;  %v10484_v2 = vld [vmem:[#allocation181_spill] sm:$0xff]  ;;  %v10485_v43 = vld [vmem:[#allocation119_spill] sm:$0xff]  ;;  %v10487_v56 = vld [vmem:[#allocation120_spill] sm:$0xff] }
 0x171   :  { %10478 = vst [vmem:[#allocation171_spill] sm:$0xff] %v6008_v4  ;;  %10480 = vst [vmem:[#allocation173_spill] sm:$0xff] %v6012_v26  ;;  %v6020_v55 = vmul.f32 %v10485_v43, %v10484_v2  ;;  %v10489_v54 = vld [vmem:[#allocation39_spill] sm:$0xff]  ;;  %v10491_v35 = vld [vmem:[#allocation121_spill] sm:$0xff]  ;;  %v3253_v43 = vpop.eup %3252 }
 0x172   :  { %10476 = vst [vmem:[#allocation170_spill] sm:$0xff] %v6004_v36  ;;  %10483 = vst [vmem:[#allocation174_spill] sm:$0xff] %v6016_v12  ;;  %v6024_v36 = vmul.f32 %v10487_v56, %v10352_v10  ;;  %3276 = vpow2.f32 %v10489_v54  ;;  %v10490_v4 = vld [vmem:[#allocation219_spill] sm:$0xff]  ;;  %v6032_v51 = vmul.f32 %v10491_v35, %v10354_v40  ;;  %v10493_v45 = vld [vmem:[#allocation184_spill] sm:$0xff]  ;;  %v3255_v40 = vpop.eup %3254 }
 0x173   :  { %10486 = vst [vmem:[#allocation176_spill] sm:$0xff] %v6020_v55  ;;  %v6028_v13 = vmul.f32 %v3239_v57, %v10490_v4  ;;  %v10494_v26 = vld [vmem:[#allocation122_spill] sm:$0xff]  ;;  %v10496_v2 = vld [vmem:[#allocation40_spill] sm:$0xff]  ;;  %v10499_v56 = vld [vmem:[#allocation123_spill] sm:$0xff] }
 0x174   :  { %10488 = vst [vmem:[#allocation177_spill] sm:$0xff] %v6024_v36  ;;  %10492 = vst [vmem:[#allocation179_spill] sm:$0xff] %v6032_v51  ;;  %v6036_v12 = vmul.f32 %v10494_v26, %v10493_v45  ;;  %3278 = vpow2.f32 %v10496_v2  ;;  %v10497_v55 = vld [vmem:[#allocation220_spill] sm:$0xff]  ;;  %v6044_v54 = vmul.f32 %v10499_v56, %v10359_v61  ;;  %v10503_v35 = vld [vmem:[#allocation41_spill] sm:$0xff]  ;;  %v3257_v61 = vpop.eup %3256 }
 0x175   :  { %v6040_v10 = vmul.f32 %v3241_v63, %v10497_v55  ;;  %v10501_v57 = vld [vmem:[#allocation124_spill] sm:$0xff]  ;;  %3280 = vpow2.f32 %v10503_v35  ;;  %v10504_v51 = vld [vmem:[#allocation221_spill] sm:$0xff]  ;;  %v10506_v45 = vld [vmem:[#allocation187_spill] sm:$0xff] }
 0x176   :  { %10495 = vst [vmem:[#allocation180_spill] sm:$0xff] %v6036_v12  ;;  %10500 = vst [vmem:[#allocation183_spill] sm:$0xff] %v6044_v54  ;;  %v6048_v36 = vmul.f32 %v10501_v57, %v10361_v50  ;;  %v6052_v26 = vmul.f32 %v3243_v27, %v10504_v51  ;;  %v10507_v12 = vld [vmem:[#allocation125_spill] sm:$0xff]  ;;  %v10509_v63 = vld [vmem:[#allocation126_spill] sm:$0xff] }
 0x177   :  { %10498 = vst [vmem:[#allocation182_spill] sm:$0xff] %v6040_v10  ;;  %v6056_v2 = vmul.f32 %v10507_v12, %v10506_v45  ;;  %v6060_v10 = vmul.f32 %v10509_v63, %v10366_v48  ;;  %v10511_v56 = vld [vmem:[#allocation42_spill] sm:$0xff]  ;;  %v10514_v57 = vld [vmem:[#allocation127_spill] sm:$0xff]  ;;  %v3259_v12 = vpop.eup %3258 }
 0x178   :  { %10502 = vst [vmem:[#allocation18_spill] sm:$0xff] %v6048_v36  ;;  %10505 = vst [vmem:[#allocation185_spill] sm:$0xff] %v6052_v26  ;;  %3282 = vpow2.f32 %v10511_v56  ;;  %v10512_v54 = vld [vmem:[#allocation222_spill] sm:$0xff]  ;;  %v6068_v35 = vmul.f32 %v10514_v57, %v10368_v7  ;;  %v10517_v36 = vld [vmem:[#allocation128_spill] sm:$0xff]  ;;  %v3261_v7 = vpop.eup %3260 }
 0x179   :  { %10508 = vst [vmem:[#allocation186_spill] sm:$0xff] %v6056_v2  ;;  %10510 = vst [vmem:[#allocation19_spill] sm:$0xff] %v6060_v10  ;;  %v6064_v50 = vmul.f32 %v3245_v14, %v10512_v54  ;;  %v10516_v27 = vld [vmem:[#allocation190_spill] sm:$0xff]  ;;  %v10519_v45 = vld [vmem:[#allocation43_spill] sm:$0xff] }
 0x17a   :  { %10515 = vst [vmem:[#allocation189_spill] sm:$0xff] %v6068_v35  ;;  %v6072_v26 = vmul.f32 %v10517_v36, %v10516_v27  ;;  %3284 = vpow2.f32 %v10519_v45  ;;  %v10520_v2 = vld [vmem:[#allocation223_spill] sm:$0xff]  ;;  %v10523_v10 = vld [vmem:[#allocation129_spill] sm:$0xff]  ;;  %v10525_v14 = vld [vmem:[#allocation192_spill] sm:$0xff] }
 0x17b   :  { %10513 = vst [vmem:[#allocation188_spill] sm:$0xff] %v6064_v50  ;;  %v6076_v48 = vmul.f32 %v3247_v47, %v10520_v2  ;;  %v10522_v63 = vld [vmem:[#allocation191_spill] sm:$0xff]  ;;  %v10526_v50 = vld [vmem:[#allocation130_spill] sm:$0xff]  ;;  %v10528_v57 = vld [vmem:[#allocation44_spill] sm:$0xff] }
 0x17c   :  { %10518 = vst [vmem:[#allocation20_spill] sm:$0xff] %v6072_v26  ;;  %v6080_v56 = vmul.f32 %v10523_v10, %v10522_v63  ;;  %v6084_v54 = vmul.f32 %v10526_v50, %v10525_v14  ;;  %3286 = vpow2.f32 %v10528_v57  ;;  %v10529_v35 = vld [vmem:[#allocation224_spill] sm:$0xff]  ;;  %v10531_v27 = vld [vmem:[#allocation193_spill] sm:$0xff]  ;;  %v10532_v26 = vld [vmem:[#allocation131_spill] sm:$0xff]  ;;  %v3263_v10 = vpop.eup %3262 }
 0x17d   :  { %10521 = vst [vmem:[#allocation21_spill] sm:$0xff] %v6076_v48  ;;  %v6088_v36 = vmul.f32 %v3249_v62, %v10529_v35  ;;  %v6092_v45 = vmul.f32 %v10532_v26, %v10531_v27  ;;  %v10534_v47 = vld [vmem:[#allocation132_spill] sm:$0xff]  ;;  %v10536_v63 = vld [vmem:[#allocation45_spill] sm:$0xff]  ;;  %v3265_v26 = vpop.eup %3264  ;;  %v10543_v27 = vld [vmem:[#allocation46_spill] sm:$0xff] }
 0x17e   :  { %10524 = vst [vmem:[#allocation194_spill] sm:$0xff] %v6080_v56  ;;  %10527 = vst [vmem:[#allocation195_spill] sm:$0xff] %v6084_v54  ;;  %v6096_v48 = vmul.f32 %v10534_v47, %v10380_v23  ;;  %3288 = vpow2.f32 %v10536_v63  ;;  %v10537_v56 = vld [vmem:[#allocation225_spill] sm:$0xff]  ;;  %v10540_v62 = vld [vmem:[#allocation196_spill] sm:$0xff] }
 0x17f   :  { %10530 = vst [vmem:[#allocation22_spill] sm:$0xff] %v6088_v36  ;;  %10533 = vst [vmem:[#allocation197_spill] sm:$0xff] %v6092_v45  ;;  %v6100_v50 = vmul.f32 %v3251_v6, %v10537_v56  ;;  %v10538_v14 = vld [vmem:[#allocation133_spill] sm:$0xff]  ;;  %v10541_v54 = vld [vmem:[#allocation134_spill] sm:$0xff]  ;;  %3290 = vpow2.f32 %v10543_v27 }
 0x180   :  { %10535 = vst [vmem:[#allocation198_spill] sm:$0xff] %v6096_v48  ;;  %v6104_v57 = vmul.f32 %v10538_v14, %v10382_v21  ;;  %v6108_v36 = vmul.f32 %v10541_v54, %v10540_v62  ;;  %v10544_v45 = vld [vmem:[#allocation226_spill] sm:$0xff]  ;;  %v10545_v47 = vld [vmem:[#allocation135_spill] sm:$0xff]  ;;  %v10547_v6 = vld [vmem:[#allocation136_spill] sm:$0xff]  ;;  %v3267_v21 = vpop.eup %3266 }
 0x181   :  { %v6112_v23 = vmul.f32 %v3253_v43, %v10544_v45  ;;  %v6116_v63 = vmul.f32 %v10545_v47, %v10387_v44  ;;  %v6120_v48 = vmul.f32 %v10547_v6, %v10389_v39  ;;  %v10548_v14 = vld [vmem:[#allocation47_spill] sm:$0xff]  ;;  %v10550_v62 = vld [vmem:[#allocation137_spill] sm:$0xff]  ;;  %v10552_v43 = vld [vmem:[#allocation138_spill] sm:$0xff]  ;;  %v3269_v44 = vpop.eup %3268 }
 0x182   :  { %10539 = vst [vmem:[#allocation199_spill] sm:$0xff] %v6104_v57  ;;  %10542 = vst [vmem:[#allocation23_spill] sm:$0xff] %v6108_v36  ;;  %3292 = vpow2.f32 %v10548_v14  ;;  %v10549_v57 = vld [vmem:[#allocation227_spill] sm:$0xff]  ;;  %v6128_v27 = vmul.f32 %v10550_v62, %v10391_v34  ;;  %v6132_v36 = vmul.f32 %v10552_v43, %v10394_v46  ;;  %v10553_v47 = vld [vmem:[#allocation48_spill] sm:$0xff]  ;;  %v3271_v34 = vpop.eup %3270  ;;  %v6152_v43 = vmul.f32 %v5849_v25, %v10400_v49 }
 0x183   :  { %10546 = vst [vmem:[#allocation200_spill] sm:$0xff] %v6116_v63  ;;  %v6124_v54 = vmul.f32 %v3255_v40, %v10549_v57  ;;  %3294 = vpow2.f32 %v10553_v47  ;;  %v10554_v63 = vld [vmem:[#allocation228_spill] sm:$0xff]  ;;  %v10555_v6 = vld [vmem:[#allocation139_spill] sm:$0xff]  ;;  %v6144_v40 = vmul.f32 %v5845_v15, %v10398_v0  ;;  %v10557_v62 = vld [vmem:[#allocation49_spill] sm:$0xff]  ;;  %v6162_v15 = vmul.f32 %v5860_v30, %v10405_v17 }
 0x184   :  { %10551 = vst [vmem:[#allocation201_spill] sm:$0xff] %v6128_v27  ;;  %v6136_v39 = vmul.f32 %v3257_v61, %v10554_v63  ;;  %v6140_v14 = vmul.f32 %v10555_v6, %v10396_v38  ;;  %3296 = vpow2.f32 %v10557_v62  ;;  %v10558_v27 = vld [vmem:[#allocation229_spill] sm:$0xff]  ;;  %10559 = vst [vmem:[#allocation24_spill] sm:$0xff] %v6152_v43  ;;  %v10560_v61 = vld [vmem:[#allocation140_spill] sm:$0xff]  ;;  %v3273_v38 = vpop.eup %3272 }
 0x185   :  { %v6148_v46 = vmul.f32 %v3259_v12, %v10558_v27  ;;  %v6156_v47 = vmul.f32 %v10560_v61, %v10401_v19  ;;  %v10561_v6 = vld [vmem:[#allocation50_spill] sm:$0xff]  ;;  %v6166_v12 = vmul.f32 %v5872_v59, %v10409_v28  ;;  %v3275_v62 = vpop.eup %3274  ;;  %v10563_v25 = vld [vmem:[#allocation51_spill] sm:$0xff]  ;;  %v6172_v19 = vmul.f32 %v5884_v41, %v10415_v20  ;;  %v10565_v30 = vld [vmem:[#allocation52_spill] sm:$0xff] }
 0x186   :  { %10556 = vst [vmem:[#allocation202_spill] sm:$0xff] %v6140_v14  ;;  %3298 = vpow2.f32 %v10561_v6  ;;  %v10562_v14 = vld [vmem:[#allocation230_spill] sm:$0xff]  ;;  %v10564_v49 = vld [vmem:[#allocation231_spill] sm:$0xff]  ;;  %v3277_v61 = vpop.eup %3276  ;;  %v10566_v17 = vld [vmem:[#allocation232_spill] sm:$0xff]  ;;  %v6182_v28 = vmul.f32 %v5908_v8, %v10426_v11  ;;  %v6186_v59 = vmul.f32 %v5920_v42, %v10433_v32  ;;  %v6202_v32 = vmul.f32 %v5956_v33, %v10451_v24 }
 0x187   :  { %v1417_v0 = vmul.f32 %v3261_v7, %v10562_v14  ;;  %3300 = vpow2.f32 %v10563_v25  ;;  %v1418_v43 = vmul.f32 %v3263_v10, %v10564_v49  ;;  %v6176_v7 = vmul.f32 %v5896_v53, %v10421_v31  ;;  %v3279_v10 = vpop.eup %3278  ;;  %v10567_v20 = vld [vmem:[#allocation53_spill] sm:$0xff]  ;;  %v10569_v11 = vld [vmem:[#allocation54_spill] sm:$0xff]  ;;  %v10576_v24 = vld [vmem:[#allocation56_spill] sm:$0xff] }
 0x188   :  { %3302 = vpow2.f32 %v10565_v30  ;;  %v1419_v6 = vmul.f32 %v3265_v26, %v10566_v17  ;;  %v10568_v41 = vld [vmem:[#allocation233_spill] sm:$0xff]  ;;  %v6192_v31 = vmul.f32 %v5932_v1, %v10439_v9  ;;  %v6196_v53 = vmul.f32 %v5944_v58, %v10444_v52  ;;  %v3281_v26 = vpop.eup %3280  ;;  %v10570_v8 = vld [vmem:[#allocation234_spill] sm:$0xff]  ;;  %v10572_v9 = vld [vmem:[#allocation55_spill] sm:$0xff] }
 0x189   :  { %3304 = vpow2.f32 %v10567_v20  ;;  %v1420_v25 = vmul.f32 %v3267_v21, %v10568_v41  ;;  %v1421_v30 = vmul.f32 %v3269_v44, %v10570_v8  ;;  %v6206_v42 = vmul.f32 %v5968_v16, %v10457_v3  ;;  %v3283_v21 = vpop.eup %3282  ;;  %v10573_v1 = vld [vmem:[#allocation235_spill] sm:$0xff]  ;;  %v10577_v33 = vld [vmem:[#allocation236_spill] sm:$0xff]  ;;  %v10578_v3 = vld [vmem:[#allocation170_spill] sm:$0xff] }
 0x18a   :  { %3306 = vpow2.f32 %v10569_v11  ;;  %v1422_v20 = vmul.f32 %v3271_v34, %v10573_v1  ;;  %v6212_v52 = vmul.f32 %v5980_v5, %v10462_v37  ;;  %v6216_v58 = vmul.f32 %v5992_v60, %v10469_v22  ;;  %v3285_v44 = vpop.eup %3284  ;;  %v10582_v37 = vld [vmem:[#allocation57_spill] sm:$0xff]  ;;  %v10585_v60 = vld [vmem:[#allocation182_spill] sm:$0xff] }
 0x18b   :  { %10571 = vst [vmem:[#allocation203_spill] sm:$0xff] %v6206_v42  ;;  %3308 = vpow2.f32 %v10572_v9  ;;  %v1423_v11 = vmul.f32 %v3273_v38, %v10577_v33  ;;  %v6222_v16 = vmul.f32 %v10578_v3, %v10475_v18  ;;  %v10580_v9 = vld [vmem:[#allocation174_spill] sm:$0xff]  ;;  %v3287_v42 = vpop.eup %3286  ;;  %v10583_v5 = vld [vmem:[#allocation237_spill] sm:$0xff]  ;;  %v6232_v22 = vmul.f32 %v6028_v13, %v10490_v4  ;;  %v10593_v4 = vld [vmem:[#allocation59_spill] sm:$0xff] }
 0x18c   :  { %10574 = vst [vmem:[#allocation204_spill] sm:$0xff] %v6212_v52  ;;  %10575 = vst [vmem:[#allocation25_spill] sm:$0xff] %v6216_v58  ;;  %3310 = vpow2.f32 %v10576_v24  ;;  %v6226_v34 = vmul.f32 %v10580_v9, %v10482_v29  ;;  %v1424_v52 = vmul.f32 %v3275_v62, %v10583_v5  ;;  %v6236_v38 = vmul.f32 %v10585_v60, %v10497_v55  ;;  %v3289_v24 = vpop.eup %3288  ;;  %v10587_v18 = vld [vmem:[#allocation58_spill] sm:$0xff]  ;;  %v10589_v29 = vld [vmem:[#allocation185_spill] sm:$0xff] }
 0x18d   :  { %10579 = vst [vmem:[#allocation205_spill] sm:$0xff] %v6222_v16  ;;  %3312 = vpow2.f32 %v10582_v37  ;;  %10584 = vst [vmem:[#allocation206_spill] sm:$0xff] %v6232_v22  ;;  %v10588_v3 = vld [vmem:[#allocation238_spill] sm:$0xff]  ;;  %v6242_v9 = vmul.f32 %v10589_v29, %v10504_v51  ;;  %v3291_v58 = vpop.eup %3290  ;;  %v10594_v13 = vld [vmem:[#allocation239_spill] sm:$0xff] }
 0x18e   :  { %10581 = vst [vmem:[#allocation26_spill] sm:$0xff] %v6226_v34  ;;  %10586 = vst [vmem:[#allocation102_spill] sm:$0xff] %v6236_v38  ;;  %3314 = vpow2.f32 %v10587_v18  ;;  %v1425_v16 = vmul.f32 %v3277_v61, %v10588_v3  ;;  %v10591_v37 = vld [vmem:[#allocation222_spill] sm:$0xff]  ;;  %v10592_v34 = vld [vmem:[#allocation188_spill] sm:$0xff]  ;;  %v1426_v22 = vmul.f32 %v3279_v10, %v10594_v13  ;;  %v6266_v10 = vmul.f32 %v6112_v23, %v10544_v45 }
 0x18f   :  { %10590 = vst [vmem:[#allocation103_spill] sm:$0xff] %v6242_v9  ;;  %v6246_v62 = vmul.f32 %v10592_v34, %v10591_v37  ;;  %3316 = vpow2.f32 %v10593_v4  ;;  %v10595_v55 = vld [vmem:[#allocation21_spill] sm:$0xff]  ;;  %v10596_v18 = vld [vmem:[#allocation22_spill] sm:$0xff]  ;;  %v3293_v38 = vpop.eup %3292  ;;  %v10597_v51 = vld [vmem:[#allocation60_spill] sm:$0xff]  ;;  %v6262_v34 = vmul.f32 %v6100_v50, %v10537_v56  ;;  %v6282_v45 = vmul.f32 %v6148_v46, %v10558_v27 }
 0x190   :  { %v6252_v60 = vmul.f32 %v10595_v55, %v10520_v2  ;;  %v6256_v61 = vmul.f32 %v10596_v18, %v10529_v35  ;;  %3318 = vpow2.f32 %v10597_v51  ;;  %v10598_v29 = vld [vmem:[#allocation240_spill] sm:$0xff]  ;;  %v3295_v37 = vpop.eup %3294  ;;  %v10599_v2 = vld [vmem:[#allocation61_spill] sm:$0xff]  ;;  %v6272_v35 = vmul.f32 %v6124_v54, %v10549_v57  ;;  %v10602_v56 = vld [vmem:[#allocation62_spill] sm:$0xff] }
 0x191   :  { %v1427_v9 = vmul.f32 %v3281_v26, %v10598_v29  ;;  %3320 = vpow2.f32 %v10599_v2  ;;  %v10600_v4 = vld [vmem:[#allocation241_spill] sm:$0xff]  ;;  %v6276_v26 = vmul.f32 %v6136_v39, %v10554_v63  ;;  %v3297_v18 = vpop.eup %3296  ;;  %v10603_v50 = vld [vmem:[#allocation242_spill] sm:$0xff]  ;;  %v6285_v23 = vmul.f32 %v1417_v0, %v10562_v14  ;;  %v10604_v2 = vld [vmem:[#allocation63_spill] sm:$0xff] }
 0x192   :  { %v1428_v55 = vmul.f32 %v3283_v21, %v10600_v4  ;;  %3322 = vpow2.f32 %v10602_v56  ;;  %v1429_v51 = vmul.f32 %v3285_v44, %v10603_v50  ;;  %v10605_v57 = vld [vmem:[#allocation243_spill] sm:$0xff]  ;;  %v6290_v63 = vmul.f32 %v1418_v43, %v10564_v49  ;;  %v10606_v44 = vld [vmem:[#allocation64_spill] sm:$0xff] }
 0x193   :  { %10601 = vst [vmem:[#allocation27_spill] sm:$0xff] %v6276_v26  ;;  %v3299_v21 = vpop.eup %3298  ;;  %3324 = vpow2.f32 %v10604_v2  ;;  %v1430_v54 = vmul.f32 %v3287_v42, %v10605_v57  ;;  %v6293_v39 = vmul.f32 %v1419_v6, %v10566_v17  ;;  %v10607_v26 = vld [vmem:[#allocation244_spill] sm:$0xff]  ;;  %v6298_v46 = vmul.f32 %v1420_v25, %v10568_v41  ;;  %v10608_v2 = vld [vmem:[#allocation65_spill] sm:$0xff] }
 0x194   :  { %v3301_v56 = vpop.eup %3300  ;;  %3326 = vpow2.f32 %v10606_v44  ;;  %v1431_v27 = vmul.f32 %v3289_v24, %v10607_v26  ;;  %v6301_v14 = vmul.f32 %v1421_v30, %v10570_v8  ;;  %v10609_v42 = vld [vmem:[#allocation245_spill] sm:$0xff]  ;;  %v6306_v49 = vmul.f32 %v1422_v20, %v10573_v1  ;;  %v10610_v44 = vld [vmem:[#allocation66_spill] sm:$0xff] }
 0x195   :  { %v3303_v0 = vpop.eup %3302  ;;  %3328 = vpow2.f32 %v10608_v2  ;;  %v1432_v43 = vmul.f32 %v3291_v58, %v10609_v42  ;;  %v6309_v17 = vmul.f32 %v1423_v11, %v10577_v33  ;;  %v10611_v24 = vld [vmem:[#allocation246_spill] sm:$0xff]  ;;  %v6314_v25 = vmul.f32 %v1424_v52, %v10583_v5  ;;  %v10614_v2 = vld [vmem:[#allocation67_spill] sm:$0xff]  ;;  %v10618_v5 = vld [vmem:[#allocation249_spill] sm:$0xff] }
 0x196   :  { %v3305_v6 = vpop.eup %3304  ;;  %3330 = vpow2.f32 %v10610_v44  ;;  %v1433_v41 = vmul.f32 %v3293_v38, %v10611_v24  ;;  %v6317_v8 = vmul.f32 %v1425_v16, %v10588_v3  ;;  %v10615_v58 = vld [vmem:[#allocation247_spill] sm:$0xff]  ;;  %v6322_v20 = vmul.f32 %v1426_v22, %v10594_v13  ;;  %v10616_v44 = vld [vmem:[#allocation68_spill] sm:$0xff] }
 0x197   :  { %10612 = vst [vmem:[#allocation207_spill] sm:$0xff] %v6314_v25  ;;  %v3307_v30 = vpop.eup %3306  ;;  %3332 = vpow2.f32 %v10614_v2  ;;  %v1434_v1 = vmul.f32 %v3295_v37, %v10615_v58  ;;  %v6325_v33 = vmul.f32 %v1427_v9, %v10598_v29  ;;  %v10617_v38 = vld [vmem:[#allocation248_spill] sm:$0xff]  ;;  %v1436_v25 = vmul.f32 %v3299_v21, %v10618_v5  ;;  %v10619_v2 = vld [vmem:[#allocation69_spill] sm:$0xff]  ;;  %v10620_v37 = vld [vmem:[#allocation250_spill] sm:$0xff] }
 0x198   :  { %10613 = vst [vmem:[#allocation160_spill] sm:$0xff] %v6317_v8  ;;  %v3309_v11 = vpop.eup %3308  ;;  %3334 = vpow2.f32 %v10616_v44  ;;  %v1435_v52 = vmul.f32 %v3297_v18, %v10617_v38  ;;  %v6331_v16 = vmul.f32 %v1428_v55, %v10600_v4  ;;  %v1437_v8 = vmul.f32 %v3301_v56, %v10620_v37  ;;  %v10621_v29 = vld [vmem:[#allocation70_spill] sm:$0xff]  ;;  %v10622_v18 = vld [vmem:[#allocation251_spill] sm:$0xff]  ;;  %v10625_v56 = vld [vmem:[#allocation252_spill] sm:$0xff] }
 0x199   :  { %v3311_v3 = vpop.eup %3310  ;;  %3336 = vpow2.f32 %v10619_v2  ;;  %v6336_v22 = vmul.f32 %v1429_v51, %v10603_v50  ;;  %v6339_v9 = vmul.f32 %v1430_v54, %v10605_v57  ;;  %v1438_v44 = vmul.f32 %v3303_v0, %v10622_v18  ;;  %v10624_v2 = vld [vmem:[#allocation71_spill] sm:$0xff]  ;;  %v10629_v0 = vld [vmem:[#allocation253_spill] sm:$0xff] }
 0x19a   :  { %v3313_v13 = vpop.eup %3312  ;;  %3338 = vpow2.f32 %v10621_v29  ;;  %v6344_v21 = vmul.f32 %v1431_v27, %v10607_v26  ;;  %v6347_v4 = vmul.f32 %v1432_v43, %v10609_v42  ;;  %v1439_v50 = vmul.f32 %v3305_v6, %v10625_v56  ;;  %v10628_v29 = vld [vmem:[#allocation72_spill] sm:$0xff]  ;;  %v10633_v6 = vld [vmem:[#allocation254_spill] sm:$0xff] }
 0x19b   :  { %v3315_v55 = vpop.eup %3314  ;;  %3340 = vpow2.f32 %v10624_v2  ;;  %v6352_v51 = vmul.f32 %v1433_v41, %v10611_v24  ;;  %v6355_v57 = vmul.f32 %v1434_v1, %v10615_v58  ;;  %v1440_v26 = vmul.f32 %v3307_v30, %v10629_v0  ;;  %v10632_v2 = vld [vmem:[#allocation73_spill] sm:$0xff]  ;;  %v10637_v30 = vld [vmem:[#allocation74_spill] sm:$0xff] }
 0x19c   :  { %10623 = vst [vmem:[#allocation104_spill] sm:$0xff] %v6347_v4  ;;  %v3317_v54 = vpop.eup %3316  ;;  %3342 = vpow2.f32 %v10628_v29  ;;  %v6360_v27 = vmul.f32 %v1435_v52, %v10617_v38  ;;  %v6363_v42 = vmul.f32 %v1436_v25, %v10618_v5  ;;  %v1441_v24 = vmul.f32 %v3309_v11, %v10633_v6  ;;  %v3402_v58 = vld [vmem:[#allocation4 + $0x188] sm:$0xff]  ;;  %v10638_v38 = vld [vmem:[#allocation255_spill] sm:$0xff]  ;;  %v3403_v5 = vld [vmem:[#allocation4 + $0x190] sm:$0xff] }
 0x19d   :  { %10626 = vst [vmem:[#allocation28_spill] sm:$0xff] %v6352_v51  ;;  %10627 = vst [vmem:[#allocation208_spill] sm:$0xff] %v6355_v57  ;;  %v3319_v43 = vpop.eup %3318  ;;  %3344 = vpow2.f32 %v10632_v2  ;;  %v6368_v41 = vmul.f32 %v1437_v8, %v10620_v37  ;;  %v10635_v1 = vld [vmem:[#allocation141_spill] sm:$0xff]  ;;  %v1442_v52 = vmul.f32 %v3311_v3, %v10638_v38  ;;  %v6376_v25 = vmul.f32 %v1438_v44, %v10622_v18  ;;  %v10643_v8 = vld [vmem:[#allocation256_spill] sm:$0xff] }
 0x19e   :  { %10630 = vst [vmem:[#allocation105_spill] sm:$0xff] %v6360_v27  ;;  %10631 = vst [vmem:[#allocation29_spill] sm:$0xff] %v6363_v42  ;;  %v6371_v57 = vadd.f32 %v3402_v58, %v10635_v1  ;;  %v3321_v29 = vpop.eup %3320  ;;  %3346 = vpow2.f32 %v10637_v30  ;;  %v10640_v42 = vld [vmem:[#allocation142_spill] sm:$0xff]  ;;  %v10642_v27 = vld [vmem:[#allocation75_spill] sm:$0xff]  ;;  %v1443_v37 = vmul.f32 %v3313_v13, %v10643_v8  ;;  %v6384_v58 = vmul.f32 %v1439_v50, %v10625_v56 }
 0x19f   :  { %10634 = vst [vmem:[#allocation209_spill] sm:$0xff] %v6368_v41  ;;  %10639 = vst [vmem:[#allocation106_spill] sm:$0xff] %v6376_v25  ;;  %v6379_v2 = vadd.f32 %v3403_v5, %v10640_v42  ;;  %v3323_v11 = vpop.eup %3322  ;;  %3348 = vpow2.f32 %v10642_v27  ;;  %v3404_v1 = vld [vmem:[#allocation4 + $0x198] sm:$0xff]  ;;  %v10647_v41 = vld [vmem:[#allocation76_spill] sm:$0xff]  ;;  %v6392_v42 = vmul.f32 %v1440_v26, %v10629_v0 }
 0x1a0   :  { %10636 = vst [vmem:[#allocation163_spill] sm:$0xff] %v6371_v57  ;;  %10644 = vst [vmem:[#allocation30_spill] sm:$0xff] %v6384_v58  ;;  %v10645_v57 = vld [vmem:[#allocation143_spill] sm:$0xff]  ;;  %v3325_v3 = vpop.eup %3324  ;;  %3350 = vpow2.f32 %v10647_v41  ;;  %v10648_v18 = vld [vmem:[#allocation257_spill] sm:$0xff] }
 0x1a1   :  { %10641 = vst [vmem:[#allocation107_spill] sm:$0xff] %v6379_v2  ;;  %v6387_v30 = vadd.f32 %v3404_v1, %v10645_v57  ;;  %v1444_v44 = vmul.f32 %v3315_v55, %v10648_v18  ;;  %10649 = vst [vmem:[#allocation166_spill] sm:$0xff] %v6392_v42  ;;  %v3405_v5 = vld [vmem:[#allocation4 + $0x1a0] sm:$0xff]  ;;  %v3327_v13 = vpop.eup %3326  ;;  %v10652_v25 = vld [vmem:[#allocation77_spill] sm:$0xff]  ;;  %v6400_v57 = vmul.f32 %v1441_v24, %v10633_v6 }
 0x1a2   :  { %v10650_v2 = vld [vmem:[#allocation144_spill] sm:$0xff]  ;;  %3352 = vpow2.f32 %v10652_v25  ;;  %v10653_v56 = vld [vmem:[#allocation258_spill] sm:$0xff]  ;;  %v3406_v1 = vld [vmem:[#allocation4 + $0x1a8] sm:$0xff]  ;;  %v3329_v55 = vpop.eup %3328 }
 0x1a3   :  { %10646 = vst [vmem:[#allocation210_spill] sm:$0xff] %v6387_v30  ;;  %v6395_v27 = vadd.f32 %v3405_v5, %v10650_v2  ;;  %v1445_v50 = vmul.f32 %v3317_v54, %v10653_v56  ;;  %10654 = vst [vmem:[#allocation31_spill] sm:$0xff] %v6400_v57  ;;  %v10655_v30 = vld [vmem:[#allocation145_spill] sm:$0xff]  ;;  %v10657_v58 = vld [vmem:[#allocation78_spill] sm:$0xff]  ;;  %v6408_v2 = vmul.f32 %v1442_v52, %v10638_v38  ;;  %v3331_v54 = vpop.eup %3330 }
 0x1a4   :  { %v6403_v41 = vadd.f32 %v3406_v1, %v10655_v30  ;;  %3354 = vpow2.f32 %v10657_v58  ;;  %v10658_v0 = vld [vmem:[#allocation259_spill] sm:$0xff]  ;;  %v3407_v5 = vld [vmem:[#allocation4 + $0x1b0] sm:$0xff]  ;;  %v10663_v6 = vld [vmem:[#allocation260_spill] sm:$0xff]  ;;  %v6416_v30 = vmul.f32 %v1443_v37, %v10643_v8 }
 0x1a5   :  { %10651 = vst [vmem:[#allocation108_spill] sm:$0xff] %v6395_v27  ;;  %v1446_v26 = vmul.f32 %v3319_v43, %v10658_v0  ;;  %10659 = vst [vmem:[#allocation109_spill] sm:$0xff] %v6408_v2  ;;  %v10660_v27 = vld [vmem:[#allocation146_spill] sm:$0xff]  ;;  %v10662_v42 = vld [vmem:[#allocation79_spill] sm:$0xff]  ;;  %v1447_v24 = vmul.f32 %v3321_v29, %v10663_v6  ;;  %v3333_v43 = vpop.eup %3332 }
 0x1a6   :  { %10656 = vst [vmem:[#allocation211_spill] sm:$0xff] %v6403_v41  ;;  %v6411_v25 = vadd.f32 %v3407_v5, %v10660_v27  ;;  %3356 = vpow2.f32 %v10662_v42  ;;  %10664 = vst [vmem:[#allocation212_spill] sm:$0xff] %v6416_v30  ;;  %v3408_v1 = vld [vmem:[#allocation4 + $0x1b8] sm:$0xff]  ;;  %v10667_v57 = vld [vmem:[#allocation80_spill] sm:$0xff]  ;;  %v6424_v27 = vmul.f32 %v1444_v44, %v10648_v18  ;;  %v3335_v29 = vpop.eup %3334 }
 0x1a7   :  { %v10665_v41 = vld [vmem:[#allocation147_spill] sm:$0xff]  ;;  %3358 = vpow2.f32 %v10667_v57  ;;  %v10668_v38 = vld [vmem:[#allocation261_spill] sm:$0xff]  ;;  %v3409_v5 = vld [vmem:[#allocation4 + $0x1c0] sm:$0xff] }
 0x1a8   :  { %10661 = vst [vmem:[#allocation32_spill] sm:$0xff] %v6411_v25  ;;  %v6419_v58 = vadd.f32 %v3408_v1, %v10665_v41  ;;  %v1448_v52 = vmul.f32 %v3323_v11, %v10668_v38  ;;  %10669 = vst [vmem:[#allocation110_spill] sm:$0xff] %v6424_v27  ;;  %v10670_v25 = vld [vmem:[#allocation148_spill] sm:$0xff]  ;;  %v10672_v2 = vld [vmem:[#allocation81_spill] sm:$0xff]  ;;  %v6432_v41 = vmul.f32 %v1445_v50, %v10653_v56  ;;  %v3337_v11 = vpop.eup %3336 }
 0x1a9   :  { %v6427_v42 = vadd.f32 %v3409_v5, %v10670_v25  ;;  %3360 = vpow2.f32 %v10672_v2  ;;  %v10673_v8 = vld [vmem:[#allocation262_spill] sm:$0xff]  ;;  %v3410_v1 = vld [vmem:[#allocation4 + $0x1c8] sm:$0xff]  ;;  %v10678_v18 = vld [vmem:[#allocation263_spill] sm:$0xff]  ;;  %v6440_v25 = vmul.f32 %v1446_v26, %v10658_v0 }
 0x1aa   :  { %10666 = vst [vmem:[#allocation169_spill] sm:$0xff] %v6419_v58  ;;  %v1449_v37 = vmul.f32 %v3325_v3, %v10673_v8  ;;  %10674 = vst [vmem:[#allocation33_spill] sm:$0xff] %v6432_v41  ;;  %v10675_v58 = vld [vmem:[#allocation149_spill] sm:$0xff]  ;;  %v10677_v30 = vld [vmem:[#allocation82_spill] sm:$0xff]  ;;  %v1450_v44 = vmul.f32 %v3327_v13, %v10678_v18  ;;  %v3339_v3 = vpop.eup %3338 }
 0x1ab   :  { %10671 = vst [vmem:[#allocation111_spill] sm:$0xff] %v6427_v42  ;;  %v6435_v57 = vadd.f32 %v3410_v1, %v10675_v58  ;;  %3362 = vpow2.f32 %v10677_v30  ;;  %10679 = vst [vmem:[#allocation172_spill] sm:$0xff] %v6440_v25  ;;  %v3411_v5 = vld [vmem:[#allocation4 + $0x1d0] sm:$0xff]  ;;  %v10682_v27 = vld [vmem:[#allocation83_spill] sm:$0xff]  ;;  %v6448_v58 = vmul.f32 %v1447_v24, %v10663_v6  ;;  %v3341_v13 = vpop.eup %3340 }
 0x1ac   :  { %v10680_v42 = vld [vmem:[#allocation150_spill] sm:$0xff]  ;;  %3364 = vpow2.f32 %v10682_v27  ;;  %v10683_v56 = vld [vmem:[#allocation264_spill] sm:$0xff]  ;;  %v3412_v1 = vld [vmem:[#allocation4 + $0x1d8] sm:$0xff] }
 0x1ad   :  { %10676 = vst [vmem:[#allocation213_spill] sm:$0xff] %v6435_v57  ;;  %v6443_v2 = vadd.f32 %v3411_v5, %v10680_v42  ;;  %v1451_v50 = vmul.f32 %v3329_v55, %v10683_v56  ;;  %10684 = vst [vmem:[#allocation34_spill] sm:$0xff] %v6448_v58  ;;  %v10685_v57 = vld [vmem:[#allocation151_spill] sm:$0xff]  ;;  %v10687_v41 = vld [vmem:[#allocation84_spill] sm:$0xff]  ;;  %v6456_v42 = vmul.f32 %v1448_v52, %v10668_v38  ;;  %v3343_v55 = vpop.eup %3342 }
 0x1ae   :  { %v6451_v30 = vadd.f32 %v3412_v1, %v10685_v57  ;;  %3366 = vpow2.f32 %v10687_v41  ;;  %v10688_v0 = vld [vmem:[#allocation265_spill] sm:$0xff]  ;;  %v3413_v5 = vld [vmem:[#allocation4 + $0x1e0] sm:$0xff]  ;;  %v10693_v6 = vld [vmem:[#allocation266_spill] sm:$0xff]  ;;  %v6464_v57 = vmul.f32 %v1449_v37, %v10673_v8 }
 0x1af   :  { %10681 = vst [vmem:[#allocation112_spill] sm:$0xff] %v6443_v2  ;;  %v1452_v26 = vmul.f32 %v3331_v54, %v10688_v0  ;;  %10689 = vst [vmem:[#allocation113_spill] sm:$0xff] %v6456_v42  ;;  %v10690_v2 = vld [vmem:[#allocation152_spill] sm:$0xff]  ;;  %v10692_v25 = vld [vmem:[#allocation85_spill] sm:$0xff]  ;;  %v1453_v24 = vmul.f32 %v3333_v43, %v10693_v6  ;;  %v3345_v54 = vpop.eup %3344 }
 0x1b0   :  { %10686 = vst [vmem:[#allocation214_spill] sm:$0xff] %v6451_v30  ;;  %v6459_v27 = vadd.f32 %v3413_v5, %v10690_v2  ;;  %3368 = vpow2.f32 %v10692_v25  ;;  %10694 = vst [vmem:[#allocation215_spill] sm:$0xff] %v6464_v57  ;;  %v3414_v1 = vld [vmem:[#allocation4 + $0x1e8] sm:$0xff]  ;;  %v10697_v58 = vld [vmem:[#allocation86_spill] sm:$0xff]  ;;  %v6472_v2 = vmul.f32 %v1450_v44, %v10678_v18  ;;  %v3347_v43 = vpop.eup %3346 }
 0x1b1   :  { %v10695_v30 = vld [vmem:[#allocation153_spill] sm:$0xff]  ;;  %3370 = vpow2.f32 %v10697_v58  ;;  %v10698_v38 = vld [vmem:[#allocation267_spill] sm:$0xff]  ;;  %v3415_v5 = vld [vmem:[#allocation4 + $0x1f0] sm:$0xff] }
 0x1b2   :  { %10691 = vst [vmem:[#allocation35_spill] sm:$0xff] %v6459_v27  ;;  %v6467_v41 = vadd.f32 %v3414_v1, %v10695_v30  ;;  %v1454_v52 = vmul.f32 %v3335_v29, %v10698_v38  ;;  %10699 = vst [vmem:[#allocation114_spill] sm:$0xff] %v6472_v2  ;;  %v10700_v27 = vld [vmem:[#allocation154_spill] sm:$0xff]  ;;  %v10702_v42 = vld [vmem:[#allocation87_spill] sm:$0xff]  ;;  %v6480_v30 = vmul.f32 %v1451_v50, %v10683_v56  ;;  %v3349_v29 = vpop.eup %3348 }
 0x1b3   :  { %v6475_v25 = vadd.f32 %v3415_v5, %v10700_v27  ;;  %3372 = vpow2.f32 %v10702_v42  ;;  %v10703_v8 = vld [vmem:[#allocation268_spill] sm:$0xff]  ;;  %v3416_v1 = vld [vmem:[#allocation4 + $0x1f8] sm:$0xff]  ;;  %v10708_v18 = vld [vmem:[#allocation269_spill] sm:$0xff]  ;;  %v6488_v27 = vmul.f32 %v1452_v26, %v10688_v0 }
 0x1b4   :  { %10696 = vst [vmem:[#allocation175_spill] sm:$0xff] %v6467_v41  ;;  %v1455_v37 = vmul.f32 %v3337_v11, %v10703_v8  ;;  %10704 = vst [vmem:[#allocation36_spill] sm:$0xff] %v6480_v30  ;;  %v10705_v41 = vld [vmem:[#allocation155_spill] sm:$0xff]  ;;  %v10707_v57 = vld [vmem:[#allocation88_spill] sm:$0xff]  ;;  %v1456_v44 = vmul.f32 %v3339_v3, %v10708_v18  ;;  %v3351_v11 = vpop.eup %3350 }
 0x1b5   :  { %10701 = vst [vmem:[#allocation115_spill] sm:$0xff] %v6475_v25  ;;  %v6483_v58 = vadd.f32 %v3416_v1, %v10705_v41  ;;  %3374 = vpow2.f32 %v10707_v57  ;;  %10709 = vst [vmem:[#allocation178_spill] sm:$0xff] %v6488_v27  ;;  %v3417_v5 = vld [vmem:[#allocation4 + $0x200] sm:$0xff]  ;;  %v10712_v2 = vld [vmem:[#allocation89_spill] sm:$0xff]  ;;  %v6496_v41 = vmul.f32 %v1453_v24, %v10693_v6  ;;  %v3353_v3 = vpop.eup %3352 }
 0x1b6   :  { %v10710_v25 = vld [vmem:[#allocation156_spill] sm:$0xff]  ;;  %3376 = vpow2.f32 %v10712_v2  ;;  %v10713_v56 = vld [vmem:[#allocation270_spill] sm:$0xff]  ;;  %v3418_v1 = vld [vmem:[#allocation4 + $0x208] sm:$0xff] }
 0x1b7   :  { %10706 = vst [vmem:[#allocation216_spill] sm:$0xff] %v6483_v58  ;;  %v6491_v42 = vadd.f32 %v3417_v5, %v10710_v25  ;;  %v1457_v50 = vmul.f32 %v3341_v13, %v10713_v56  ;;  %10714 = vst [vmem:[#allocation37_spill] sm:$0xff] %v6496_v41  ;;  %v10715_v58 = vld [vmem:[#allocation157_spill] sm:$0xff]  ;;  %v10717_v30 = vld [vmem:[#allocation90_spill] sm:$0xff]  ;;  %v6504_v25 = vmul.f32 %v1454_v52, %v10698_v38  ;;  %v3355_v13 = vpop.eup %3354 }
 0x1b8   :  { %v6499_v57 = vadd.f32 %v3418_v1, %v10715_v58  ;;  %3378 = vpow2.f32 %v10717_v30  ;;  %v10718_v0 = vld [vmem:[#allocation271_spill] sm:$0xff]  ;;  %v3419_v5 = vld [vmem:[#allocation4 + $0x210] sm:$0xff]  ;;  %v10723_v6 = vld [vmem:[#allocation272_spill] sm:$0xff]  ;;  %v6512_v58 = vmul.f32 %v1455_v37, %v10703_v8 }
 0x1b9   :  { %10711 = vst [vmem:[#allocation116_spill] sm:$0xff] %v6491_v42  ;;  %v1458_v26 = vmul.f32 %v3343_v55, %v10718_v0  ;;  %10719 = vst [vmem:[#allocation117_spill] sm:$0xff] %v6504_v25  ;;  %v10720_v42 = vld [vmem:[#allocation158_spill] sm:$0xff]  ;;  %v10722_v27 = vld [vmem:[#allocation91_spill] sm:$0xff]  ;;  %v1459_v24 = vmul.f32 %v3345_v54, %v10723_v6  ;;  %v3357_v55 = vpop.eup %3356 }
 0x1ba   :  { %10716 = vst [vmem:[#allocation217_spill] sm:$0xff] %v6499_v57  ;;  %v6507_v2 = vadd.f32 %v3419_v5, %v10720_v42  ;;  %3380 = vpow2.f32 %v10722_v27  ;;  %10724 = vst [vmem:[#allocation38_spill] sm:$0xff] %v6512_v58  ;;  %v3420_v1 = vld [vmem:[#allocation4 + $0x218] sm:$0xff]  ;;  %v10727_v41 = vld [vmem:[#allocation92_spill] sm:$0xff]  ;;  %v6520_v42 = vmul.f32 %v1456_v44, %v10708_v18  ;;  %v3359_v54 = vpop.eup %3358 }
 0x1bb   :  { %v10725_v57 = vld [vmem:[#allocation159_spill] sm:$0xff]  ;;  %3382 = vpow2.f32 %v10727_v41  ;;  %v10728_v38 = vld [vmem:[#allocation273_spill] sm:$0xff]  ;;  %v3421_v5 = vld [vmem:[#allocation4 + $0x220] sm:$0xff] }
 0x1bc   :  { %10721 = vst [vmem:[#allocation118_spill] sm:$0xff] %v6507_v2  ;;  %v6515_v30 = vadd.f32 %v3420_v1, %v10725_v57  ;;  %v1460_v52 = vmul.f32 %v3347_v43, %v10728_v38  ;;  %10729 = vst [vmem:[#allocation181_spill] sm:$0xff] %v6520_v42  ;;  %v10730_v2 = vld [vmem:[#allocation161_spill] sm:$0xff]  ;;  %v10733_v8 = vld [vmem:[#allocation274_spill] sm:$0xff]  ;;  %v6528_v57 = vmul.f32 %v1457_v50, %v10713_v56  ;;  %v3361_v43 = vpop.eup %3360 }
 0x1bd   :  { %v6523_v27 = vadd.f32 %v3421_v5, %v10730_v2  ;;  %v10732_v25 = vld [vmem:[#allocation93_spill] sm:$0xff]  ;;  %v1461_v37 = vmul.f32 %v3349_v29, %v10733_v8  ;;  %v10737_v58 = vld [vmem:[#allocation94_spill] sm:$0xff]  ;;  %v10738_v18 = vld [vmem:[#allocation275_spill] sm:$0xff]  ;;  %v6536_v2 = vmul.f32 %v1458_v26, %v10718_v0  ;;  %v3363_v29 = vpop.eup %3362 }
 0x1be   :  { %10726 = vst [vmem:[#allocation218_spill] sm:$0xff] %v6515_v30  ;;  %3384 = vpow2.f32 %v10732_v25  ;;  %10734 = vst [vmem:[#allocation120_spill] sm:$0xff] %v6528_v57  ;;  %v3422_v1 = vld [vmem:[#allocation4 + $0x228] sm:$0xff]  ;;  %v10735_v30 = vld [vmem:[#allocation162_spill] sm:$0xff]  ;;  %v1462_v44 = vmul.f32 %v3351_v11, %v10738_v18  ;;  %v3365_v11 = vpop.eup %3364 }
 0x1bf   :  { %10731 = vst [vmem:[#allocation119_spill] sm:$0xff] %v6523_v27  ;;  %v6531_v41 = vadd.f32 %v3422_v1, %v10735_v30  ;;  %3386 = vpow2.f32 %v10737_v58  ;;  %10739 = vst [vmem:[#allocation219_spill] sm:$0xff] %v6536_v2  ;;  %v3423_v5 = vld [vmem:[#allocation4 + $0x230] sm:$0xff]  ;;  %v10740_v27 = vld [vmem:[#allocation164_spill] sm:$0xff]  ;;  %v6544_v30 = vmul.f32 %v1459_v24, %v10723_v6 }
 0x1c0   :  { %v6539_v25 = vadd.f32 %v3423_v5, %v10740_v27  ;;  %v10742_v42 = vld [vmem:[#allocation95_spill] sm:$0xff]  ;;  %v10743_v56 = vld [vmem:[#allocation276_spill] sm:$0xff]  ;;  %v10748_v0 = vld [vmem:[#allocation277_spill] sm:$0xff]  ;;  %v6552_v27 = vmul.f32 %v1460_v52, %v10728_v38 }
 0x1c1   :  { %10736 = vst [vmem:[#allocation39_spill] sm:$0xff] %v6531_v41  ;;  %3388 = vpow2.f32 %v10742_v42  ;;  %v1463_v50 = vmul.f32 %v3353_v3, %v10743_v56  ;;  %10744 = vst [vmem:[#allocation184_spill] sm:$0xff] %v6544_v30  ;;  %v3424_v1 = vld [vmem:[#allocation4 + $0x238] sm:$0xff]  ;;  %v10745_v41 = vld [vmem:[#allocation165_spill] sm:$0xff]  ;;  %v1464_v26 = vmul.f32 %v3355_v13, %v10748_v0  ;;  %v3367_v3 = vpop.eup %3366 }
 0x1c2   :  { %10741 = vst [vmem:[#allocation121_spill] sm:$0xff] %v6539_v25  ;;  %v6547_v58 = vadd.f32 %v3424_v1, %v10745_v41  ;;  %v10747_v57 = vld [vmem:[#allocation96_spill] sm:$0xff]  ;;  %10749 = vst [vmem:[#allocation40_spill] sm:$0xff] %v6552_v27  ;;  %v10750_v25 = vld [vmem:[#allocation167_spill] sm:$0xff]  ;;  %v6560_v41 = vmul.f32 %v1461_v37, %v10733_v8  ;;  %v3369_v13 = vpop.eup %3368 }
 0x1c3   :  { %3390 = vpow2.f32 %v10747_v57  ;;  %v3425_v5 = vld [vmem:[#allocation4 + $0x240] sm:$0xff]  ;;  %v10752_v2 = vld [vmem:[#allocation97_spill] sm:$0xff]  ;;  %v10753_v6 = vld [vmem:[#allocation278_spill] sm:$0xff] }
 0x1c4   :  { %10746 = vst [vmem:[#allocation122_spill] sm:$0xff] %v6547_v58  ;;  %v6555_v42 = vadd.f32 %v3425_v5, %v10750_v25  ;;  %3392 = vpow2.f32 %v10752_v2  ;;  %v1465_v24 = vmul.f32 %v3357_v55, %v10753_v6  ;;  %10754 = vst [vmem:[#allocation123_spill] sm:$0xff] %v6560_v41  ;;  %v3426_v1 = vld [vmem:[#allocation4 + $0x248] sm:$0xff]  ;;  %v10755_v58 = vld [vmem:[#allocation168_spill] sm:$0xff]  ;;  %v6568_v25 = vmul.f32 %v1462_v44, %v10738_v18  ;;  %v3371_v55 = vpop.eup %3370 }
 0x1c5   :  { %v6563_v57 = vadd.f32 %v3426_v1, %v10755_v58  ;;  %v10757_v30 = vld [vmem:[#allocation98_spill] sm:$0xff]  ;;  %v10758_v38 = vld [vmem:[#allocation279_spill] sm:$0xff]  ;;  %v10763_v8 = vld [vmem:[#allocation280_spill] sm:$0xff]  ;;  %v6576_v58 = vmul.f32 %v1463_v50, %v10743_v56 }
 0x1c6   :  { %10751 = vst [vmem:[#allocation220_spill] sm:$0xff] %v6555_v42  ;;  %3394 = vpow2.f32 %v10757_v30  ;;  %v1466_v52 = vmul.f32 %v3359_v54, %v10758_v38  ;;  %10759 = vst [vmem:[#allocation41_spill] sm:$0xff] %v6568_v25  ;;  %v3427_v5 = vld [vmem:[#allocation4 + $0x250] sm:$0xff]  ;;  %v10760_v42 = vld [vmem:[#allocation171_spill] sm:$0xff]  ;;  %v1467_v37 = vmul.f32 %v3361_v43, %v10763_v8  ;;  %v3373_v54 = vpop.eup %3372  ;;  %v6590_v50 = vmul.f32 %v1465_v24, %v10753_v6 }
 0x1c7   :  { %10756 = vst [vmem:[#allocation124_spill] sm:$0xff] %v6563_v57  ;;  %v6571_v2 = vadd.f32 %v3427_v5, %v10760_v42  ;;  %v10762_v27 = vld [vmem:[#allocation99_spill] sm:$0xff]  ;;  %10764 = vst [vmem:[#allocation187_spill] sm:$0xff] %v6576_v58  ;;  %v10765_v57 = vld [vmem:[#allocation173_spill] sm:$0xff]  ;;  %v6585_v5 = vmul.f32 %v1464_v26, %v10748_v0 }
 0x1c8   :  { %3396 = vpow2.f32 %v10762_v27  ;;  %v3428_v1 = vld [vmem:[#allocation4 + $0x258] sm:$0xff]  ;;  %v10767_v41 = vld [vmem:[#allocation100_spill] sm:$0xff]  ;;  %v10768_v18 = vld [vmem:[#allocation281_spill] sm:$0xff]  ;;  %v3375_v27 = vpop.eup %3374  ;;  %10773 = vst [vmem:[#allocation42_spill] sm:$0xff] %v6590_v50  ;;  %v6598_v0 = vmul.f32 %v1466_v52, %v10758_v38  ;;  %v6605_v24 = vmul.f32 %v1467_v37, %v10763_v8 }
 0x1c9   :  { %10761 = vst [vmem:[#allocation221_spill] sm:$0xff] %v6571_v2  ;;  %v6579_v30 = vadd.f32 %v3428_v1, %v10765_v57  ;;  %3398 = vpow2.f32 %v10767_v41  ;;  %v1468_v44 = vmul.f32 %v3363_v29, %v10768_v18  ;;  %v10769_v25 = vld [vmem:[#allocation282_spill] sm:$0xff]  ;;  %10770 = vst [vmem:[#allocation126_spill] sm:$0xff] %v6585_v5  ;;  %v10771_v2 = vld [vmem:[#allocation101_spill] sm:$0xff]  ;;  %v3377_v41 = vpop.eup %3376 }
 0x1ca   :  { %v1469_v42 = vmul.f32 %v3365_v11, %v10769_v25  ;;  %3400 = vpow2.f32 %v10771_v2  ;;  %v10772_v43 = vld [vmem:[#allocation283_spill] sm:$0xff]  ;;  %v3429_v57 = vld [vmem:[#allocation4 + $0x260] sm:$0xff]  ;;  %v10777_v51 = vld [vmem:[#allocation285_spill] sm:$0xff]  ;;  %10778 = vst [vmem:[#allocation190_spill] sm:$0xff] %v6598_v0 }
 0x1cb   :  { %10766 = vst [vmem:[#allocation125_spill] sm:$0xff] %v6579_v30  ;;  %v1470_v56 = vmul.f32 %v3367_v3, %v10772_v43  ;;  %v10774_v1 = vld [vmem:[#allocation176_spill] sm:$0xff]  ;;  %v1472_v11 = vmul.f32 %v3371_v55, %v10777_v51  ;;  %v3430_v26 = vld [vmem:[#allocation4 + $0x268] sm:$0xff]  ;;  %v3379_v3 = vpop.eup %3378  ;;  %v10781_v4 = vld [vmem:[#allocation286_spill] sm:$0xff] }
 0x1cc   :  { %v6593_v30 = vadd.f32 %v3429_v57, %v10774_v1  ;;  %v10776_v58 = vld [vmem:[#allocation284_spill] sm:$0xff]  ;;  %v10779_v5 = vld [vmem:[#allocation177_spill] sm:$0xff]  ;;  %v1473_v6 = vmul.f32 %v3373_v54, %v10781_v4  ;;  %v3431_v57 = vld [vmem:[#allocation4 + $0x270] sm:$0xff]  ;;  %v3381_v38 = vpop.eup %3380 }
 0x1cd   :  { %v1471_v29 = vmul.f32 %v3369_v13, %v10776_v58  ;;  %v6601_v2 = vadd.f32 %v3430_v26, %v10779_v5  ;;  %v10782_v1 = vld [vmem:[#allocation179_spill] sm:$0xff]  ;;  %v10784_v50 = vld [vmem:[#allocation180_spill] sm:$0xff]  ;;  %v6615_v5 = vmul.f32 %v1468_v44, %v10768_v18  ;;  %v6618_v26 = vmul.f32 %v1469_v42, %v10769_v25  ;;  %v10793_v18 = vld [vmem:[#allocation186_spill] sm:$0xff] }
 0x1ce   :  { %10775 = vst [vmem:[#allocation127_spill] sm:$0xff] %v6593_v30  ;;  %v6608_v30 = vadd.f32 %v3431_v57, %v10782_v1  ;;  %v3432_v13 = vld [vmem:[#allocation4 + $0x278] sm:$0xff]  ;;  %v3433_v54 = vld [vmem:[#allocation4 + $0x280] sm:$0xff]  ;;  %v10795_v42 = vld [vmem:[#allocation289_spill] sm:$0xff] }
 0x1cf   :  { %10780 = vst [vmem:[#allocation128_spill] sm:$0xff] %v6601_v2  ;;  %v6611_v55 = vadd.f32 %v3432_v13, %v10784_v50  ;;  %v10786_v52 = vld [vmem:[#allocation287_spill] sm:$0xff]  ;;  %10787 = vst [vmem:[#allocation191_spill] sm:$0xff] %v6618_v26  ;;  %v3383_v2 = vpop.eup %3382  ;;  %v10790_v57 = vld [vmem:[#allocation288_spill] sm:$0xff]  ;;  %v1476_v26 = vmul.f32 %v3379_v3, %v10795_v42 }
 0x1d0   :  { %10783 = vst [vmem:[#allocation43_spill] sm:$0xff] %v6608_v30  ;;  %v1474_v0 = vmul.f32 %v3375_v27, %v10786_v52  ;;  %v10788_v8 = vld [vmem:[#allocation183_spill] sm:$0xff]  ;;  %v1475_v1 = vmul.f32 %v3377_v41, %v10790_v57  ;;  %v6625_v30 = vmul.f32 %v1470_v56, %v10772_v43  ;;  %v3434_v50 = vld [vmem:[#allocation4 + $0x288] sm:$0xff]  ;;  %v10791_v13 = vld [vmem:[#allocation18_spill] sm:$0xff]  ;;  %v3385_v25 = vpop.eup %3384 }
 0x1d1   :  { %10785 = vst [vmem:[#allocation223_spill] sm:$0xff] %v6611_v55  ;;  %v6621_v37 = vadd.f32 %v3433_v54, %v10788_v8  ;;  %v6628_v55 = vadd.f32 %v3434_v50, %v10791_v13  ;;  %v3435_v27 = vld [vmem:[#allocation4 + $0x290] sm:$0xff]  ;;  %v6635_v54 = vmul.f32 %v1471_v29, %v10776_v58  ;;  %v6638_v8 = vmul.f32 %v1472_v11, %v10777_v51  ;;  %v3436_v41 = vld [vmem:[#allocation4 + $0x298] sm:$0xff]  ;;  %v3438_v3 = vld [vmem:[#allocation4 + $0x2a8] sm:$0xff] }
 0x1d2   :  { %v6631_v44 = vadd.f32 %v3435_v27, %v10793_v18  ;;  %v10797_v43 = vld [vmem:[#allocation19_spill] sm:$0xff]  ;;  %v10799_v50 = vld [vmem:[#allocation290_spill] sm:$0xff]  ;;  %v3437_v27 = vld [vmem:[#allocation4 + $0x2a0] sm:$0xff] }
 0x1d3   :  { %10789 = vst [vmem:[#allocation129_spill] sm:$0xff] %v6621_v37  ;;  %10792 = vst [vmem:[#allocation192_spill] sm:$0xff] %v6628_v55  ;;  %v6641_v56 = vadd.f32 %v3436_v41, %v10797_v43  ;;  %v3387_v37 = vpop.eup %3386  ;;  %v1477_v13 = vmul.f32 %v3381_v38, %v10799_v50  ;;  %v6645_v55 = vmul.f32 %v1473_v6, %v10781_v4  ;;  %v10801_v18 = vld [vmem:[#allocation189_spill] sm:$0xff]  ;;  %v10803_v58 = vld [vmem:[#allocation20_spill] sm:$0xff] }
 0x1d4   :  { %10794 = vst [vmem:[#allocation130_spill] sm:$0xff] %v6631_v44  ;;  %10796 = vst [vmem:[#allocation44_spill] sm:$0xff] %v6638_v8  ;;  %v6648_v44 = vadd.f32 %v3437_v27, %v10801_v18  ;;  %v6651_v29 = vadd.f32 %v3438_v3, %v10803_v58  ;;  %v3389_v51 = vpop.eup %3388  ;;  %v10805_v11 = vld [vmem:[#allocation291_spill] sm:$0xff]  ;;  %v6655_v41 = vmul.f32 %v1474_v0, %v10786_v52  ;;  %v3439_v43 = vld [vmem:[#allocation4 + $0x2b0] sm:$0xff] }
 0x1d5   :  { %10798 = vst [vmem:[#allocation224_spill] sm:$0xff] %v6641_v56  ;;  %10800 = vst [vmem:[#allocation193_spill] sm:$0xff] %v6645_v55  ;;  %v1478_v8 = vmul.f32 %v3383_v2, %v10805_v11  ;;  %v10807_v56 = vld [vmem:[#allocation194_spill] sm:$0xff]  ;;  %v3440_v4 = vld [vmem:[#allocation4 + $0x2b8] sm:$0xff]  ;;  %v3391_v27 = vpop.eup %3390  ;;  %v6665_v3 = vmul.f32 %v1475_v1, %v10790_v57 }
 0x1d6   :  { %10802 = vst [vmem:[#allocation131_spill] sm:$0xff] %v6648_v44  ;;  %10804 = vst [vmem:[#allocation132_spill] sm:$0xff] %v6651_v29  ;;  %v6658_v38 = vadd.f32 %v3439_v43, %v10807_v56  ;;  %v10809_v6 = vld [vmem:[#allocation195_spill] sm:$0xff]  ;;  %v10811_v18 = vld [vmem:[#allocation13_spill] sm:$0xff]  ;;  %v3393_v56 = vpop.eup %3392 }
 0x1d7   :  { %10806 = vst [vmem:[#allocation45_spill] sm:$0xff] %v6655_v41  ;;  %v6661_v55 = vadd.f32 %v3440_v4, %v10809_v6  ;;  %v1479_v44 = vmul.f32 %v3385_v25, %v10811_v18  ;;  %10812 = vst [vmem:[#allocation196_spill] sm:$0xff] %v6665_v3  ;;  %v3441_v58 = vld [vmem:[#allocation4 + $0x2c0] sm:$0xff]  ;;  %v10813_v29 = vld [vmem:[#allocation197_spill] sm:$0xff]  ;;  %v6675_v4 = vmul.f32 %v1476_v26, %v10795_v42 }
 0x1d8   :  { %10808 = vst [vmem:[#allocation225_spill] sm:$0xff] %v6658_v38  ;;  %v6668_v2 = vadd.f32 %v3441_v58, %v10813_v29  ;;  %v3442_v0 = vld [vmem:[#allocation4 + $0x2c8] sm:$0xff]  ;;  %v10815_v52 = vld [vmem:[#allocation198_spill] sm:$0xff]  ;;  %v10817_v43 = vld [vmem:[#allocation292_spill] sm:$0xff]  ;;  %v3395_v29 = vpop.eup %3394 }
 0x1d9   :  { %10810 = vst [vmem:[#allocation133_spill] sm:$0xff] %v6661_v55  ;;  %v6671_v41 = vadd.f32 %v3442_v0, %v10815_v52  ;;  %v1480_v38 = vmul.f32 %v3387_v37, %v10817_v43  ;;  %v3443_v6 = vld [vmem:[#allocation4 + $0x2d0] sm:$0xff]  ;;  %v10818_v55 = vld [vmem:[#allocation199_spill] sm:$0xff]  ;;  %v6685_v0 = vmul.f32 %v1477_v13, %v10799_v50  ;;  %v3445_v52 = vld [vmem:[#allocation4 + $0x2e0] sm:$0xff] }
 0x1da   :  { %10814 = vst [vmem:[#allocation134_spill] sm:$0xff] %v6668_v2  ;;  %v6678_v25 = vadd.f32 %v3443_v6, %v10818_v55  ;;  %v3444_v57 = vld [vmem:[#allocation4 + $0x2d8] sm:$0xff]  ;;  %v10822_v58 = vld [vmem:[#allocation14_spill] sm:$0xff]  ;;  %v3446_v26 = vld [vmem:[#allocation4 + $0x2e8] sm:$0xff]  ;;  %v3397_v55 = vpop.eup %3396 }
 0x1db   :  { %10816 = vst [vmem:[#allocation46_spill] sm:$0xff] %v6671_v41  ;;  %v10820_v1 = vld [vmem:[#allocation23_spill] sm:$0xff]  ;;  %v1481_v2 = vmul.f32 %v3389_v51, %v10822_v58  ;;  %v10823_v41 = vld [vmem:[#allocation200_spill] sm:$0xff]  ;;  %v6691_v42 = vadd.f32 %v3446_v26, %v6120_v48  ;;  %v10826_v6 = vld [vmem:[#allocation293_spill] sm:$0xff]  ;;  %v6705_v48 = vmul.f32 %v1479_v44, %v10811_v18 }
 0x1dc   :  { %10819 = vst [vmem:[#allocation226_spill] sm:$0xff] %v6678_v25  ;;  %v6681_v3 = vadd.f32 %v3444_v57, %v10820_v1  ;;  %v6688_v37 = vadd.f32 %v3445_v52, %v10823_v41  ;;  %v1482_v25 = vmul.f32 %v3391_v27, %v10826_v6  ;;  %v6695_v57 = vmul.f32 %v1478_v8, %v10805_v11  ;;  %v3447_v1 = vld [vmem:[#allocation4 + $0x2f0] sm:$0xff]  ;;  %v3448_v50 = vld [vmem:[#allocation4 + $0x2f8] sm:$0xff]  ;;  %v3399_v41 = vpop.eup %3398  ;;  %v3449_v26 = vld [vmem:[#allocation4 + $0x300] sm:$0xff] }
 0x1dd   :  { %10825 = vst [vmem:[#allocation47_spill] sm:$0xff] %v6691_v42  ;;  %v6701_v13 = vadd.f32 %v3448_v50, %v6132_v36  ;;  %v10830_v52 = vld [vmem:[#allocation15_spill] sm:$0xff]  ;;  %v10831_v42 = vld [vmem:[#allocation202_spill] sm:$0xff]  ;;  %v3450_v8 = vld [vmem:[#allocation4 + $0x308] sm:$0xff]  ;;  %v6715_v36 = vmul.f32 %v1480_v38, %v10817_v43 }
 0x1de   :  { %10821 = vst [vmem:[#allocation135_spill] sm:$0xff] %v6681_v3  ;;  %10824 = vst [vmem:[#allocation136_spill] sm:$0xff] %v6688_v37  ;;  %v10827_v3 = vld [vmem:[#allocation201_spill] sm:$0xff]  ;;  %v1483_v37 = vmul.f32 %v3393_v56, %v10830_v52  ;;  %v6708_v27 = vadd.f32 %v3449_v26, %v10831_v42  ;;  %v6711_v11 = vadd.f32 %v3450_v8, %v6144_v40  ;;  %v3451_v50 = vld [vmem:[#allocation4 + $0x498] sm:$0xff] }
 0x1df   :  { %v6698_v51 = vadd.f32 %v3447_v1, %v10827_v3  ;;  %10829 = vst [vmem:[#allocation137_spill] sm:$0xff] %v6701_v13  ;;  %v3401_v3 = vpop.eup %3400  ;;  %v10833_v1 = vld [vmem:[#allocation294_spill] sm:$0xff]  ;;  %v10834_v13 = vld [vmem:[#allocation24_spill] sm:$0xff]  ;;  %v3453_v40 = vld [vmem:[#allocation4 + $0x4a8] sm:$0xff] }
 0x1e0   :  { %10832 = vst [vmem:[#allocation138_spill] sm:$0xff] %v6708_v27  ;;  %v6718_v56 = vadd.f32 %v3451_v50, %v10834_v13  ;;  %v3452_v44 = vld [vmem:[#allocation4 + $0x4a0] sm:$0xff]  ;;  %v6725_v27 = vmul.f32 %v1481_v2, %v10822_v58  ;;  %v6728_v8 = vadd.f32 %v3453_v40, %v6162_v15  ;;  %v10836_v43 = vld [vmem:[#allocation295_spill] sm:$0xff]  ;;  %v6735_v50 = vmul.f32 %v1482_v25, %v10826_v6  ;;  %v10838_v58 = vld [vmem:[#allocation17_spill] sm:$0xff] }
 0x1e1   :  { %10828 = vst [vmem:[#allocation227_spill] sm:$0xff] %v6698_v51  ;;  %v1484_v51 = vmul.f32 %v3395_v29, %v10833_v1  ;;  %v6721_v18 = vadd.f32 %v3452_v44, %v6156_v47  ;;  %v10835_v42 = vld [vmem:[#allocation16_spill] sm:$0xff]  ;;  %v3454_v29 = vld [vmem:[#allocation4 + $0x4b0] sm:$0xff]  ;;  %v1486_v13 = vmul.f32 %v3399_v41, %v10836_v43  ;;  %v3455_v47 = vld [vmem:[#allocation4 + $0x4b8] sm:$0xff]  ;;  %v1487_v15 = vmul.f32 %v3401_v3, %v10838_v58 }
 0x1e2   :  { %v1485_v26 = vmul.f32 %v3397_v55, %v10835_v42  ;;  %v6731_v38 = vadd.f32 %v3454_v29, %v6166_v12  ;;  %v6738_v44 = vadd.f32 %v3455_v47, %v6172_v19  ;;  %v3456_v55 = vld [vmem:[#allocation4 + $0x4c0] sm:$0xff]  ;;  %v6745_v40 = vmul.f32 %v1483_v37, %v10830_v52  ;;  %v3457_v12 = vld [vmem:[#allocation4 + $0x4c8] sm:$0xff]  ;;  %v3458_v41 = vld [vmem:[#allocation4 + $0x4d0] sm:$0xff] }
 0x1e3   :  { %v6741_v2 = vadd.f32 %v3456_v55, %v6176_v7  ;;  %v6748_v29 = vadd.f32 %v3457_v12, %v6182_v28  ;;  %v6751_v25 = vadd.f32 %v3458_v41, %v6186_v59  ;;  %v6754_v19 = vmul.f32 %v1484_v51, %v10833_v1  ;;  %v3459_v6 = vld [vmem:[#allocation4 + $0x4d8] sm:$0xff]  ;;  %v3460_v47 = vld [vmem:[#allocation4 + $0x4e0] sm:$0xff]  ;;  %v3461_v37 = vld [vmem:[#allocation4 + $0x4e8] sm:$0xff] }
 0x1e4   :  { %v6757_v7 = vadd.f32 %v3459_v6, %v6192_v31  ;;  %v6760_v3 = vadd.f32 %v3460_v47, %v6196_v53  ;;  %v6763_v52 = vadd.f32 %v3461_v37, %v6202_v32  ;;  %v6766_v28 = vmul.f32 %v1485_v26, %v10835_v42  ;;  %v3462_v59 = vld [vmem:[#allocation4 + $0x4f0] sm:$0xff]  ;;  %v10844_v55 = vld [vmem:[#allocation203_spill] sm:$0xff]  ;;  %v10846_v1 = vld [vmem:[#allocation204_spill] sm:$0xff] }
 0x1e5   :  { %10837 = vst [vmem:[#allocation48_spill] sm:$0xff] %v6741_v2  ;;  %10839 = vst [vmem:[#allocation228_spill] sm:$0xff] %v6748_v29  ;;  %v6769_v12 = vadd.f32 %v3462_v59, %v10844_v55  ;;  %v3463_v51 = vld [vmem:[#allocation4 + $0x4f8] sm:$0xff]  ;;  %v3464_v31 = vld [vmem:[#allocation4 + $0x500] sm:$0xff]  ;;  %v6778_v53 = vmul.f32 %v1486_v13, %v10836_v43 }
 0x1e6   :  { %10840 = vst [vmem:[#allocation139_spill] sm:$0xff] %v6751_v25  ;;  %10841 = vst [vmem:[#allocation49_spill] sm:$0xff] %v6757_v7  ;;  %v6772_v41 = vadd.f32 %v3463_v51, %v10846_v1  ;;  %v10848_v6 = vld [vmem:[#allocation25_spill] sm:$0xff]  ;;  %v3466_v42 = vld [vmem:[#allocation4 + $0x510] sm:$0xff]  ;;  %v6790_v51 = vmul.f32 %v1487_v15, %v10838_v58 }
 0x1e7   :  { %10842 = vst [vmem:[#allocation229_spill] sm:$0xff] %v6760_v3  ;;  %10843 = vst [vmem:[#allocation140_spill] sm:$0xff] %v6763_v52  ;;  %v6775_v7 = vadd.f32 %v3464_v31, %v10848_v6  ;;  %v3465_v32 = vld [vmem:[#allocation4 + $0x508] sm:$0xff]  ;;  %v10852_v26 = vld [vmem:[#allocation26_spill] sm:$0xff] }
 0x1e8   :  { %10845 = vst [vmem:[#allocation50_spill] sm:$0xff] %v6769_v12  ;;  %10847 = vst [vmem:[#allocation230_spill] sm:$0xff] %v6772_v41  ;;  %v10850_v47 = vld [vmem:[#allocation205_spill] sm:$0xff]  ;;  %v6784_v52 = vadd.f32 %v3466_v42, %v10852_v26  ;;  %v3467_v59 = vld [vmem:[#allocation4 + $0x518] sm:$0xff] }
 0x1e9   :  { %10849 = vst [vmem:[#allocation51_spill] sm:$0xff] %v6775_v7  ;;  %v6781_v37 = vadd.f32 %v3465_v32, %v10850_v47  ;;  %v10854_v55 = vld [vmem:[#allocation206_spill] sm:$0xff]  ;;  %v3468_v1 = vld [vmem:[#allocation4 + $0x520] sm:$0xff]  ;;  %v3469_v43 = vld [vmem:[#allocation4 + $0x528] sm:$0xff] }
 0x1ea   :  { %10853 = vst [vmem:[#allocation52_spill] sm:$0xff] %v6784_v52  ;;  %v6787_v12 = vadd.f32 %v3467_v59, %v10854_v55  ;;  %v10856_v31 = vld [vmem:[#allocation102_spill] sm:$0xff]  ;;  %v10858_v13 = vld [vmem:[#allocation103_spill] sm:$0xff]  ;;  %v3472_v59 = vld [vmem:[#allocation4 + $0x540] sm:$0xff] }
 0x1eb   :  { %10851 = vst [vmem:[#allocation231_spill] sm:$0xff] %v6781_v37  ;;  %v6793_v6 = vadd.f32 %v3468_v1, %v10856_v31  ;;  %v6796_v7 = vadd.f32 %v3469_v43, %v10858_v13  ;;  %v3470_v32 = vld [vmem:[#allocation4 + $0x530] sm:$0xff]  ;;  %v3471_v42 = vld [vmem:[#allocation4 + $0x538] sm:$0xff]  ;;  %v6805_v58 = vadd.f32 %v3472_v59, %v6256_v61  ;;  %v3473_v15 = vld [vmem:[#allocation4 + $0x548] sm:$0xff] }
 0x1ec   :  { %10855 = vst [vmem:[#allocation232_spill] sm:$0xff] %v6787_v12  ;;  %v6799_v47 = vadd.f32 %v3470_v32, %v6246_v62  ;;  %v6802_v26 = vadd.f32 %v3471_v42, %v6252_v60  ;;  %v6808_v55 = vadd.f32 %v3473_v15, %v6262_v34  ;;  %v3474_v1 = vld [vmem:[#allocation4 + $0x550] sm:$0xff]  ;;  %v3475_v43 = vld [vmem:[#allocation4 + $0x558] sm:$0xff]  ;;  %v3476_v13 = vld [vmem:[#allocation4 + $0x560] sm:$0xff] }
 0x1ed   :  { %10857 = vst [vmem:[#allocation53_spill] sm:$0xff] %v6793_v6  ;;  %10859 = vst [vmem:[#allocation233_spill] sm:$0xff] %v6796_v7  ;;  %v6811_v31 = vadd.f32 %v3474_v1, %v6266_v10  ;;  %v6814_v62 = vadd.f32 %v3475_v43, %v6272_v35  ;;  %v10866_v32 = vld [vmem:[#allocation27_spill] sm:$0xff]  ;;  %v3477_v42 = vld [vmem:[#allocation4 + $0x568] sm:$0xff] }
 0x1ee   :  { %10860 = vst [vmem:[#allocation54_spill] sm:$0xff] %v6799_v47  ;;  %10861 = vst [vmem:[#allocation234_spill] sm:$0xff] %v6802_v26  ;;  %v6817_v60 = vadd.f32 %v3476_v13, %v10866_v32  ;;  %v6820_v61 = vadd.f32 %v3477_v42, %v6282_v45  ;;  %v3478_v59 = vld [vmem:[#allocation4 + $0x570] sm:$0xff]  ;;  %v3479_v15 = vld [vmem:[#allocation4 + $0x578] sm:$0xff] }
 0x1ef   :  { %10862 = vst [vmem:[#allocation55_spill] sm:$0xff] %v6805_v58  ;;  %10863 = vst [vmem:[#allocation235_spill] sm:$0xff] %v6808_v55  ;;  %v6823_v34 = vadd.f32 %v3478_v59, %v6285_v23  ;;  %v6826_v10 = vadd.f32 %v3479_v15, %v6290_v63  ;;  %v3480_v1 = vld [vmem:[#allocation4 + $0x580] sm:$0xff]  ;;  %v3481_v43 = vld [vmem:[#allocation4 + $0x588] sm:$0xff] }
 0x1f0   :  { %10864 = vst [vmem:[#allocation56_spill] sm:$0xff] %v6811_v31  ;;  %10865 = vst [vmem:[#allocation236_spill] sm:$0xff] %v6814_v62  ;;  %v6829_v35 = vadd.f32 %v3480_v1, %v6293_v39  ;;  %v6832_v13 = vadd.f32 %v3481_v43, %v6298_v46  ;;  %v3482_v32 = vld [vmem:[#allocation4 + $0x590] sm:$0xff]  ;;  %v3483_v42 = vld [vmem:[#allocation4 + $0x598] sm:$0xff] }
 0x1f1   :  { %10867 = vst [vmem:[#allocation170_spill] sm:$0xff] %v6817_v60  ;;  %10868 = vst [vmem:[#allocation174_spill] sm:$0xff] %v6820_v61  ;;  %v6835_v45 = vadd.f32 %v3482_v32, %v6301_v14  ;;  %v6838_v23 = vadd.f32 %v3483_v42, %v6306_v49  ;;  %v3484_v59 = vld [vmem:[#allocation4 + $0x5a0] sm:$0xff]  ;;  %v3485_v15 = vld [vmem:[#allocation4 + $0x5a8] sm:$0xff] }
 0x1f2   :  { %10869 = vst [vmem:[#allocation57_spill] sm:$0xff] %v6823_v34  ;;  %10870 = vst [vmem:[#allocation237_spill] sm:$0xff] %v6826_v10  ;;  %v6841_v63 = vadd.f32 %v3484_v59, %v6309_v17  ;;  %v10876_v10 = vld [vmem:[#allocation207_spill] sm:$0xff]  ;;  %v3486_v1 = vld [vmem:[#allocation4 + $0x5b0] sm:$0xff] }
 0x1f3   :  { %10871 = vst [vmem:[#allocation182_spill] sm:$0xff] %v6829_v35  ;;  %10872 = vst [vmem:[#allocation58_spill] sm:$0xff] %v6832_v13  ;;  %v6844_v39 = vadd.f32 %v3485_v15, %v10876_v10  ;;  %v10878_v35 = vld [vmem:[#allocation160_spill] sm:$0xff]  ;;  %v3487_v43 = vld [vmem:[#allocation4 + $0x5b8] sm:$0xff] }
 0x1f4   :  { %10873 = vst [vmem:[#allocation238_spill] sm:$0xff] %v6835_v45  ;;  %10874 = vst [vmem:[#allocation185_spill] sm:$0xff] %v6838_v23  ;;  %v6847_v46 = vadd.f32 %v3486_v1, %v10878_v35  ;;  %v6850_v14 = vadd.f32 %v3487_v43, %v6322_v20  ;;  %v3488_v32 = vld [vmem:[#allocation4 + $0x5c0] sm:$0xff]  ;;  %v3489_v42 = vld [vmem:[#allocation4 + $0x5c8] sm:$0xff] }
 0x1f5   :  { %10875 = vst [vmem:[#allocation222_spill] sm:$0xff] %v6841_v63  ;;  %10877 = vst [vmem:[#allocation188_spill] sm:$0xff] %v6844_v39  ;;  %v6853_v49 = vadd.f32 %v3488_v32, %v6325_v33  ;;  %v6856_v17 = vadd.f32 %v3489_v42, %v6331_v16  ;;  %v3490_v59 = vld [vmem:[#allocation4 + $0x5d0] sm:$0xff]  ;;  %v3491_v15 = vld [vmem:[#allocation4 + $0x5d8] sm:$0xff] }
 0x1f6   :  { %10879 = vst [vmem:[#allocation59_spill] sm:$0xff] %v6847_v46  ;;  %10880 = vst [vmem:[#allocation239_spill] sm:$0xff] %v6850_v14  ;;  %v6859_v10 = vadd.f32 %v3490_v59, %v6336_v22  ;;  %v6862_v35 = vadd.f32 %v3491_v15, %v6339_v9  ;;  %v3492_v1 = vld [vmem:[#allocation4 + $0x5e0] sm:$0xff]  ;;  %v3493_v43 = vld [vmem:[#allocation4 + $0x5e8] sm:$0xff] }
 0x1f7   :  { %10881 = vst [vmem:[#allocation21_spill] sm:$0xff] %v6853_v49  ;;  %10882 = vst [vmem:[#allocation22_spill] sm:$0xff] %v6856_v17  ;;  %v6865_v20 = vadd.f32 %v3492_v1, %v6344_v21  ;;  %v10886_v14 = vld [vmem:[#allocation104_spill] sm:$0xff]  ;;  %v3494_v32 = vld [vmem:[#allocation4 + $0x5f0] sm:$0xff] }
 0x1f8   :  { %10883 = vst [vmem:[#allocation60_spill] sm:$0xff] %v6859_v10  ;;  %10884 = vst [vmem:[#allocation240_spill] sm:$0xff] %v6862_v35  ;;  %v6868_v33 = vadd.f32 %v3493_v43, %v10886_v14  ;;  %v10888_v49 = vld [vmem:[#allocation28_spill] sm:$0xff]  ;;  %v3495_v42 = vld [vmem:[#allocation4 + $0x5f8] sm:$0xff] }
 0x1f9   :  { %10885 = vst [vmem:[#allocation61_spill] sm:$0xff] %v6865_v20  ;;  %v6871_v16 = vadd.f32 %v3494_v32, %v10888_v49  ;;  %v10890_v17 = vld [vmem:[#allocation208_spill] sm:$0xff]  ;;  %v10892_v10 = vld [vmem:[#allocation105_spill] sm:$0xff]  ;;  %v3498_v1 = vld [vmem:[#allocation4 + $0x610] sm:$0xff] }
 0x1fa   :  { %10887 = vst [vmem:[#allocation241_spill] sm:$0xff] %v6868_v33  ;;  %v6874_v22 = vadd.f32 %v3495_v42, %v10890_v17  ;;  %v3496_v59 = vld [vmem:[#allocation4 + $0x600] sm:$0xff]  ;;  %v3497_v15 = vld [vmem:[#allocation4 + $0x608] sm:$0xff]  ;;  %v3499_v43 = vld [vmem:[#allocation4 + $0x618] sm:$0xff] }
 0x1fb   :  { %10889 = vst [vmem:[#allocation62_spill] sm:$0xff] %v6871_v16  ;;  %v6877_v9 = vadd.f32 %v3496_v59, %v10892_v10  ;;  %v10894_v35 = vld [vmem:[#allocation29_spill] sm:$0xff]  ;;  %v10898_v33 = vld [vmem:[#allocation106_spill] sm:$0xff]  ;;  %v3502_v59 = vld [vmem:[#allocation4 + $0x7b8] sm:$0xff] }
 0x1fc   :  { %10891 = vst [vmem:[#allocation242_spill] sm:$0xff] %v6874_v22  ;;  %v6880_v21 = vadd.f32 %v3497_v15, %v10894_v35  ;;  %v10896_v20 = vld [vmem:[#allocation209_spill] sm:$0xff]  ;;  %v6886_v49 = vadd.f32 %v3499_v43, %v10898_v33  ;;  %v10900_v16 = vld [vmem:[#allocation30_spill] sm:$0xff]  ;;  %v3505_v33 = vld [vmem:[#allocation4 + $0x7c0] sm:$0xff] }
 0x1fd   :  { %10893 = vst [vmem:[#allocation63_spill] sm:$0xff] %v6877_v9  ;;  %v6883_v14 = vadd.f32 %v3498_v1, %v10896_v20  ;;  %v3500_v32 = vld [vmem:[#allocation4 + $0x7a8] sm:$0xff]  ;;  %v3501_v42 = vld [vmem:[#allocation4 + $0x7b0] sm:$0xff]  ;;  %v10904_v9 = vld [vmem:[#allocation31_spill] sm:$0xff] }
 0x1fe   :  { %10895 = vst [vmem:[#allocation243_spill] sm:$0xff] %v6880_v21  ;;  %10899 = vst [vmem:[#allocation244_spill] sm:$0xff] %v6886_v49  ;;  %v6889_v17 = vadd.f32 %v3500_v32, %v10900_v16  ;;  %v10902_v22 = vld [vmem:[#allocation166_spill] sm:$0xff]  ;;  %v6895_v35 = vadd.f32 %v3502_v59, %v10904_v9  ;;  %v6900_v20 = vld [vmem:[#allocation7 + $0x8] sm:$0xff] }
 0x1ff   :  { %10897 = vst [vmem:[#allocation64_spill] sm:$0xff] %v6883_v14  ;;  %v6892_v10 = vadd.f32 %v3501_v42, %v10902_v22  ;;  %v6897_v15 = vld [vmem:[#allocation7] sm:$0xff]  ;;  %10907 = vst [vmem:[#allocation67_spill] sm:$0xff] %v6900_v20  ;;  %vm9466_vm1 = vcmp.gt.f32.partialorder %v6900_v20, 0.0  ;;  %v10908_v1 = vld [vmem:[#allocation109_spill] sm:$0xff] }
 0x200   :  { %10901 = vst [vmem:[#allocation65_spill] sm:$0xff] %v6889_v17  ;;  %10905 = vst [vmem:[#allocation66_spill] sm:$0xff] %v6895_v35  ;;  %vm9462_vm0 = vcmp.gt.f32.partialorder %v6897_v15, 0.0  ;;  %v6904_v16 = vadd.f32 %v3505_v33, %v10908_v1  ;;  %v3506_v43 = vld [vmem:[#allocation4 + $0x7c8] sm:$0xff]  ;;  %v10910_v32 = vld [vmem:[#allocation212_spill] sm:$0xff] }
 0x201   :  { %10903 = vst [vmem:[#allocation245_spill] sm:$0xff] %v6892_v10  ;;  %10906 = vst [vmem:[#allocation246_spill] sm:$0xff] %v6897_v15  ;;  %v6907_v22 = vadd.f32 %v3506_v43, %v10910_v32  ;;  %v3507_v42 = vld [vmem:[#allocation4 + $0x7d0] sm:$0xff]  ;;  %v3508_v59 = vld [vmem:[#allocation4 + $0x7d8] sm:$0xff] }
 0x202   :  { %10909 = vst [vmem:[#allocation247_spill] sm:$0xff] %v6904_v16  ;;  %v10912_v49 = vld [vmem:[#allocation110_spill] sm:$0xff]  ;;  %v10914_v14 = vld [vmem:[#allocation33_spill] sm:$0xff]  ;;  %v6915_v35 = vld [vmem:[#allocation7 + $0x10] sm:$0xff] }
 0x203   :  { %10911 = vst [vmem:[#allocation68_spill] sm:$0xff] %v6907_v22  ;;  %v6910_v9 = vadd.f32 %v3507_v42, %v10912_v49  ;;  %v6913_v21 = vadd.f32 %v3508_v59, %v10914_v14  ;;  %10916 = vst [vmem:[#allocation69_spill] sm:$0xff] %v6915_v35  ;;  %vm9465_vm2 = vcmp.gt.f32.partialorder %v6915_v35, 0.0  ;;  %v6918_v10 = vld [vmem:[#allocation7 + $0x18] sm:$0xff]  ;;  %v6921_v33 = vld [vmem:[#allocation7 + $0x20] sm:$0xff] }
 0x204   :  { %10917 = vst [vmem:[#allocation250_spill] sm:$0xff] %v6918_v10  ;;  %vm9467_vm3 = vcmp.gt.f32.partialorder %v6918_v10, 0.0  ;;  %10918 = vst [vmem:[#allocation70_spill] sm:$0xff] %v6921_v33  ;;  %vm9469_vm4 = vcmp.gt.f32.partialorder %v6921_v33, 0.0  ;;  %v6924_v1 = vld [vmem:[#allocation7 + $0x28] sm:$0xff]  ;;  %v3513_v49 = vld [vmem:[#allocation4 + $0x7e0] sm:$0xff] }
 0x205   :  { %10913 = vst [vmem:[#allocation248_spill] sm:$0xff] %v6910_v9  ;;  %10915 = vst [vmem:[#allocation249_spill] sm:$0xff] %v6913_v21  ;;  %vm9474_vm5 = vcmp.gt.f32.partialorder %v6924_v1, 0.0  ;;  %v10920_v43 = vld [vmem:[#allocation172_spill] sm:$0xff]  ;;  %v3514_v32 = vld [vmem:[#allocation4 + $0x7e8] sm:$0xff] }
 0x206   :  { %10919 = vst [vmem:[#allocation251_spill] sm:$0xff] %v6924_v1  ;;  %v6928_v14 = vadd.f32 %v3513_v49, %v10920_v43  ;;  %v10922_v42 = vld [vmem:[#allocation34_spill] sm:$0xff]  ;;  %v10924_v9 = vld [vmem:[#allocation113_spill] sm:$0xff]  ;;  %v3516_v16 = vld [vmem:[#allocation4 + $0x7f8] sm:$0xff] }
 0x207   :  { %v6931_v59 = vadd.f32 %v3514_v32, %v10922_v42  ;;  %v3515_v21 = vld [vmem:[#allocation4 + $0x7f0] sm:$0xff]  ;;  %v10926_v17 = vld [vmem:[#allocation215_spill] sm:$0xff]  ;;  %v6939_v39 = vld [vmem:[#allocation7 + $0x30] sm:$0xff] }
 0x208   :  { %10921 = vst [vmem:[#allocation71_spill] sm:$0xff] %v6928_v14  ;;  %v6934_v22 = vadd.f32 %v3515_v21, %v10924_v9  ;;  %v6937_v46 = vadd.f32 %v3516_v16, %v10926_v17  ;;  %10928 = vst [vmem:[#allocation73_spill] sm:$0xff] %v6939_v39  ;;  %vm9473_vm6 = vcmp.gt.f32.partialorder %v6939_v39, 0.0  ;;  %v6942_v63 = vld [vmem:[#allocation7 + $0x38] sm:$0xff]  ;;  %v6945_v49 = vld [vmem:[#allocation7 + $0x40] sm:$0xff] }
 0x209   :  { %10923 = vst [vmem:[#allocation252_spill] sm:$0xff] %v6931_v59  ;;  %10929 = vst [vmem:[#allocation254_spill] sm:$0xff] %v6942_v63  ;;  %vm9475_vm7 = vcmp.gt.f32.partialorder %v6942_v63, 0.0  ;;  %vm9477_vm8 = vcmp.gt.f32.partialorder %v6945_v49, 0.0  ;;  %v6948_v43 = vld [vmem:[#allocation7 + $0x48] sm:$0xff]  ;;  %v3521_v21 = vld [vmem:[#allocation4 + $0x800] sm:$0xff] }
 0x20a   :  { %10925 = vst [vmem:[#allocation72_spill] sm:$0xff] %v6934_v22  ;;  %10927 = vst [vmem:[#allocation253_spill] sm:$0xff] %v6937_v46  ;;  %vm9481_vm9 = vcmp.gt.f32.partialorder %v6948_v43, 0.0  ;;  %v10932_v9 = vld [vmem:[#allocation114_spill] sm:$0xff]  ;;  %v3522_v16 = vld [vmem:[#allocation4 + $0x808] sm:$0xff] }
 0x20b   :  { %10930 = vst [vmem:[#allocation141_spill] sm:$0xff] %v6945_v49  ;;  %10931 = vst [vmem:[#allocation74_spill] sm:$0xff] %v6948_v43  ;;  %v6952_v17 = vadd.f32 %v3521_v21, %v10932_v9  ;;  %v10934_v32 = vld [vmem:[#allocation36_spill] sm:$0xff]  ;;  %v3523_v46 = vld [vmem:[#allocation4 + $0x810] sm:$0xff] }
 0x20c   :  { %v6955_v42 = vadd.f32 %v3522_v16, %v10934_v32  ;;  %v10936_v22 = vld [vmem:[#allocation178_spill] sm:$0xff]  ;;  %v3524_v14 = vld [vmem:[#allocation4 + $0x818] sm:$0xff]  ;;  %v10938_v23 = vld [vmem:[#allocation37_spill] sm:$0xff] }
 0x20d   :  { %10933 = vst [vmem:[#allocation255_spill] sm:$0xff] %v6952_v17  ;;  %v6958_v59 = vadd.f32 %v3523_v46, %v10936_v22  ;;  %v6961_v45 = vadd.f32 %v3524_v14, %v10938_v23  ;;  %v6963_v13 = vld [vmem:[#allocation7 + $0x50] sm:$0xff]  ;;  %v6966_v34 = vld [vmem:[#allocation7 + $0x58] sm:$0xff]  ;;  %v6969_v21 = vld [vmem:[#allocation7 + $0x60] sm:$0xff] }
 0x20e   :  { %10935 = vst [vmem:[#allocation142_spill] sm:$0xff] %v6955_v42  ;;  %10940 = vst [vmem:[#allocation143_spill] sm:$0xff] %v6963_v13  ;;  %vm9482_vm10 = vcmp.gt.f32.partialorder %v6963_v13, 0.0  ;;  %vm9483_vm11 = vcmp.gt.f32.partialorder %v6966_v34, 0.0  ;;  %v6972_v9 = vld [vmem:[#allocation7 + $0x68] sm:$0xff]  ;;  %v3529_v46 = vld [vmem:[#allocation4 + $0x820] sm:$0xff] }
 0x20f   :  { %10937 = vst [vmem:[#allocation75_spill] sm:$0xff] %v6958_v59  ;;  %10939 = vst [vmem:[#allocation256_spill] sm:$0xff] %v6961_v45  ;;  %v10944_v22 = vld [vmem:[#allocation117_spill] sm:$0xff]  ;;  %v10946_v16 = vld [vmem:[#allocation38_spill] sm:$0xff] }
 0x210   :  { %10941 = vst [vmem:[#allocation76_spill] sm:$0xff] %v6966_v34  ;;  %10942 = vst [vmem:[#allocation257_spill] sm:$0xff] %v6969_v21  ;;  %v6976_v23 = vadd.f32 %v3529_v46, %v10944_v22  ;;  %v3530_v14 = vld [vmem:[#allocation4 + $0x828] sm:$0xff]  ;;  %v3531_v45 = vld [vmem:[#allocation4 + $0x830] sm:$0xff] }
 0x211   :  { %10943 = vst [vmem:[#allocation144_spill] sm:$0xff] %v6972_v9  ;;  %v6979_v32 = vadd.f32 %v3530_v14, %v10946_v16  ;;  %v10948_v59 = vld [vmem:[#allocation181_spill] sm:$0xff]  ;;  %v3532_v17 = vld [vmem:[#allocation4 + $0x838] sm:$0xff]  ;;  %v10950_v61 = vld [vmem:[#allocation120_spill] sm:$0xff] }
 0x212   :  { %10945 = vst [vmem:[#allocation77_spill] sm:$0xff] %v6976_v23  ;;  %v6982_v42 = vadd.f32 %v3531_v45, %v10948_v59  ;;  %v6985_v60 = vadd.f32 %v3532_v17, %v10950_v61  ;;  %v6987_v62 = vld [vmem:[#allocation7 + $0x70] sm:$0xff]  ;;  %v6990_v31 = vld [vmem:[#allocation7 + $0x78] sm:$0xff]  ;;  %v6993_v46 = vld [vmem:[#allocation7 + $0x80] sm:$0xff] }
 0x213   :  { %10947 = vst [vmem:[#allocation258_spill] sm:$0xff] %v6979_v32  ;;  %10952 = vst [vmem:[#allocation259_spill] sm:$0xff] %v6987_v62  ;;  %v6996_v22 = vld [vmem:[#allocation7 + $0x88] sm:$0xff]  ;;  %v3537_v45 = vld [vmem:[#allocation4 + $0x840] sm:$0xff] }
 0x214   :  { %10949 = vst [vmem:[#allocation145_spill] sm:$0xff] %v6982_v42  ;;  %10951 = vst [vmem:[#allocation78_spill] sm:$0xff] %v6985_v60  ;;  %v10956_v59 = vld [vmem:[#allocation219_spill] sm:$0xff]  ;;  %v3538_v17 = vld [vmem:[#allocation4 + $0x848] sm:$0xff] }
 0x215   :  { %10953 = vst [vmem:[#allocation146_spill] sm:$0xff] %v6990_v31  ;;  %10954 = vst [vmem:[#allocation79_spill] sm:$0xff] %v6993_v46  ;;  %v7000_v61 = vadd.f32 %v3537_v45, %v10956_v59  ;;  %v10958_v14 = vld [vmem:[#allocation184_spill] sm:$0xff]  ;;  %v3539_v60 = vld [vmem:[#allocation4 + $0x850] sm:$0xff] }
 0x216   :  { %10955 = vst [vmem:[#allocation260_spill] sm:$0xff] %v6996_v22  ;;  %v7003_v16 = vadd.f32 %v3538_v17, %v10958_v14  ;;  %v10960_v42 = vld [vmem:[#allocation40_spill] sm:$0xff]  ;;  %v3540_v23 = vld [vmem:[#allocation4 + $0x858] sm:$0xff]  ;;  %v7014_v47 = vld [vmem:[#allocation7 + $0x98] sm:$0xff] }
 0x217   :  { %10957 = vst [vmem:[#allocation147_spill] sm:$0xff] %v7000_v61  ;;  %v7006_v32 = vadd.f32 %v3539_v60, %v10960_v42  ;;  %v10962_v55 = vld [vmem:[#allocation123_spill] sm:$0xff]  ;;  %v7011_v26 = vld [vmem:[#allocation7 + $0x90] sm:$0xff]  ;;  %10965 = vst [vmem:[#allocation262_spill] sm:$0xff] %v7014_v47 }
 0x218   :  { %10959 = vst [vmem:[#allocation80_spill] sm:$0xff] %v7003_v16  ;;  %v7009_v58 = vadd.f32 %v3540_v23, %v10962_v55  ;;  %10964 = vst [vmem:[#allocation81_spill] sm:$0xff] %v7011_v26  ;;  %v7017_v45 = vld [vmem:[#allocation7 + $0xa0] sm:$0xff]  ;;  %v7020_v59 = vld [vmem:[#allocation7 + $0xa8] sm:$0xff] }
 0x219   :  { %10961 = vst [vmem:[#allocation261_spill] sm:$0xff] %v7006_v32  ;;  %10966 = vst [vmem:[#allocation149_spill] sm:$0xff] %v7017_v45  ;;  %v3545_v60 = vld [vmem:[#allocation4 + $0x860] sm:$0xff]  ;;  %v10968_v42 = vld [vmem:[#allocation41_spill] sm:$0xff] }
 0x21a   :  { %10963 = vst [vmem:[#allocation148_spill] sm:$0xff] %v7009_v58  ;;  %10967 = vst [vmem:[#allocation82_spill] sm:$0xff] %v7020_v59  ;;  %v7024_v55 = vadd.f32 %v3545_v60, %v10968_v42  ;;  %v3546_v23 = vld [vmem:[#allocation4 + $0x868] sm:$0xff]  ;;  %v10970_v17 = vld [vmem:[#allocation187_spill] sm:$0xff] }
 0x21b   :  { %v7027_v14 = vadd.f32 %v3546_v23, %v10970_v17  ;;  %v3547_v58 = vld [vmem:[#allocation4 + $0x870] sm:$0xff]  ;;  %v3548_v61 = vld [vmem:[#allocation4 + $0x878] sm:$0xff]  ;;  %v7035_v12 = vld [vmem:[#allocation7 + $0xb0] sm:$0xff] }
 0x21c   :  { %10969 = vst [vmem:[#allocation263_spill] sm:$0xff] %v7024_v55  ;;  %v10972_v32 = vld [vmem:[#allocation126_spill] sm:$0xff]  ;;  %10976 = vst [vmem:[#allocation151_spill] sm:$0xff] %v7035_v12  ;;  %v7038_v52 = vld [vmem:[#allocation7 + $0xb8] sm:$0xff] }
 0x21d   :  { %10971 = vst [vmem:[#allocation150_spill] sm:$0xff] %v7027_v14  ;;  %v7030_v16 = vadd.f32 %v3547_v58, %v10972_v32  ;;  %v10974_v7 = vld [vmem:[#allocation42_spill] sm:$0xff]  ;;  %10977 = vst [vmem:[#allocation84_spill] sm:$0xff] %v7038_v52  ;;  %v7044_v42 = vld [vmem:[#allocation7 + $0xc8] sm:$0xff] }
 0x21e   :  { %v7033_v6 = vadd.f32 %v3548_v61, %v10974_v7  ;;  %v7041_v60 = vld [vmem:[#allocation7 + $0xc0] sm:$0xff]  ;;  %10979 = vst [vmem:[#allocation152_spill] sm:$0xff] %v7044_v42  ;;  %v3553_v58 = vld [vmem:[#allocation4 + $0x880] sm:$0xff]  ;;  %v3554_v61 = vld [vmem:[#allocation4 + $0x888] sm:$0xff] }
 0x21f   :  { %10973 = vst [vmem:[#allocation83_spill] sm:$0xff] %v7030_v16  ;;  %10978 = vst [vmem:[#allocation265_spill] sm:$0xff] %v7041_v60  ;;  %v10980_v32 = vld [vmem:[#allocation190_spill] sm:$0xff]  ;;  %v7051_v23 = vadd.f32 %v3554_v61, %v6605_v24  ;;  %v3556_v16 = vld [vmem:[#allocation4 + $0x898] sm:$0xff] }
 0x220   :  { %10975 = vst [vmem:[#allocation264_spill] sm:$0xff] %v7033_v6  ;;  %v7048_v7 = vadd.f32 %v3553_v58, %v10980_v32  ;;  %v3555_v17 = vld [vmem:[#allocation4 + $0x890] sm:$0xff]  ;;  %v10984_v14 = vld [vmem:[#allocation191_spill] sm:$0xff]  ;;  %v7059_v37 = vld [vmem:[#allocation7 + $0xd0] sm:$0xff] }
 0x221   :  { %10982 = vst [vmem:[#allocation266_spill] sm:$0xff] %v7051_v23  ;;  %v7054_v6 = vadd.f32 %v3555_v17, %v6615_v5  ;;  %v7057_v55 = vadd.f32 %v3556_v16, %v10984_v14  ;;  %10986 = vst [vmem:[#allocation267_spill] sm:$0xff] %v7059_v37  ;;  %v7062_v41 = vld [vmem:[#allocation7 + $0xd8] sm:$0xff]  ;;  %v7065_v58 = vld [vmem:[#allocation7 + $0xe0] sm:$0xff] }
 0x222   :  { %10981 = vst [vmem:[#allocation85_spill] sm:$0xff] %v7048_v7  ;;  %10987 = vst [vmem:[#allocation154_spill] sm:$0xff] %v7062_v41  ;;  %v7068_v24 = vld [vmem:[#allocation7 + $0xe8] sm:$0xff]  ;;  %v3561_v5 = vld [vmem:[#allocation4 + $0x8a0] sm:$0xff] }
 0x223   :  { %10983 = vst [vmem:[#allocation153_spill] sm:$0xff] %v7054_v6  ;;  %10985 = vst [vmem:[#allocation86_spill] sm:$0xff] %v7057_v55  ;;  %v7072_v16 = vadd.f32 %v3561_v5, %v6625_v30  ;;  %v3562_v14 = vld [vmem:[#allocation4 + $0x8a8] sm:$0xff]  ;;  %v3563_v61 = vld [vmem:[#allocation4 + $0x8b0] sm:$0xff] }
 0x224   :  { %10988 = vst [vmem:[#allocation87_spill] sm:$0xff] %v7065_v58  ;;  %10989 = vst [vmem:[#allocation268_spill] sm:$0xff] %v7068_v24  ;;  %v7075_v32 = vadd.f32 %v3562_v14, %v6635_v54  ;;  %v10992_v17 = vld [vmem:[#allocation44_spill] sm:$0xff]  ;;  %v3564_v6 = vld [vmem:[#allocation4 + $0x8b8] sm:$0xff] }
 0x225   :  { %10990 = vst [vmem:[#allocation155_spill] sm:$0xff] %v7072_v16  ;;  %v7078_v55 = vadd.f32 %v3563_v61, %v10992_v17  ;;  %v10994_v23 = vld [vmem:[#allocation193_spill] sm:$0xff]  ;;  %v7083_v3 = vld [vmem:[#allocation7 + $0xf0] sm:$0xff]  ;;  %v7089_v30 = vld [vmem:[#allocation7 + $0x100] sm:$0xff] }
 0x226   :  { %10991 = vst [vmem:[#allocation88_spill] sm:$0xff] %v7075_v32  ;;  %v7081_v7 = vadd.f32 %v3564_v6, %v10994_v23  ;;  %10996 = vst [vmem:[#allocation89_spill] sm:$0xff] %v7083_v3  ;;  %v7086_v25 = vld [vmem:[#allocation7 + $0xf8] sm:$0xff]  ;;  %v7092_v54 = vld [vmem:[#allocation7 + $0x108] sm:$0xff] }
 0x227   :  { %10993 = vst [vmem:[#allocation269_spill] sm:$0xff] %v7078_v55  ;;  %10997 = vst [vmem:[#allocation270_spill] sm:$0xff] %v7086_v25  ;;  %v3569_v5 = vld [vmem:[#allocation4 + $0x8c0] sm:$0xff]  ;;  %v11000_v14 = vld [vmem:[#allocation45_spill] sm:$0xff] }
 0x228   :  { %10995 = vst [vmem:[#allocation156_spill] sm:$0xff] %v7081_v7  ;;  %10998 = vst [vmem:[#allocation157_spill] sm:$0xff] %v7089_v30  ;;  %v7096_v6 = vadd.f32 %v3569_v5, %v11000_v14  ;;  %v3570_v23 = vld [vmem:[#allocation4 + $0x8c8] sm:$0xff]  ;;  %v11002_v61 = vld [vmem:[#allocation196_spill] sm:$0xff] }
 0x229   :  { %10999 = vst [vmem:[#allocation90_spill] sm:$0xff] %v7092_v54  ;;  %v7099_v17 = vadd.f32 %v3570_v23, %v11002_v61  ;;  %v3571_v7 = vld [vmem:[#allocation4 + $0x8d0] sm:$0xff]  ;;  %v3572_v32 = vld [vmem:[#allocation4 + $0x8d8] sm:$0xff]  ;;  %v7107_v29 = vld [vmem:[#allocation7 + $0x110] sm:$0xff] }
 0x22a   :  { %11001 = vst [vmem:[#allocation271_spill] sm:$0xff] %v7096_v6  ;;  %v7102_v55 = vadd.f32 %v3571_v7, %v6675_v4  ;;  %v7105_v16 = vadd.f32 %v3572_v32, %v6685_v0  ;;  %11006 = vst [vmem:[#allocation159_spill] sm:$0xff] %v7107_v29  ;;  %v7110_v2 = vld [vmem:[#allocation7 + $0x118] sm:$0xff]  ;;  %v7113_v5 = vld [vmem:[#allocation7 + $0x120] sm:$0xff] }
 0x22b   :  { %11003 = vst [vmem:[#allocation158_spill] sm:$0xff] %v7099_v17  ;;  %11007 = vst [vmem:[#allocation92_spill] sm:$0xff] %v7110_v2  ;;  %v7116_v14 = vld [vmem:[#allocation7 + $0x128] sm:$0xff]  ;;  %v3577_v4 = vld [vmem:[#allocation4 + $0x8e0] sm:$0xff] }
 0x22c   :  { %11004 = vst [vmem:[#allocation91_spill] sm:$0xff] %v7102_v55  ;;  %11005 = vst [vmem:[#allocation272_spill] sm:$0xff] %v7105_v16  ;;  %v7120_v0 = vadd.f32 %v3577_v4, %v6695_v57  ;;  %v3578_v7 = vld [vmem:[#allocation4 + $0x8e8] sm:$0xff]  ;;  %v3579_v23 = vld [vmem:[#allocation4 + $0x8f0] sm:$0xff] }
 0x22d   :  { %11008 = vst [vmem:[#allocation273_spill] sm:$0xff] %v7113_v5  ;;  %11009 = vst [vmem:[#allocation161_spill] sm:$0xff] %v7116_v14  ;;  %v7123_v32 = vadd.f32 %v3578_v7, %v6705_v48  ;;  %v7126_v61 = vadd.f32 %v3579_v23, %v6715_v36  ;;  %v3580_v16 = vld [vmem:[#allocation4 + $0x8f8] sm:$0xff]  ;;  %v7131_v17 = vld [vmem:[#allocation7 + $0x130] sm:$0xff] }
 0x22e   :  { %11010 = vst [vmem:[#allocation93_spill] sm:$0xff] %v7120_v0  ;;  %v7129_v55 = vadd.f32 %v3580_v16, %v6725_v27  ;;  %11014 = vst [vmem:[#allocation275_spill] sm:$0xff] %v7131_v17  ;;  %v7134_v6 = vld [vmem:[#allocation7 + $0x138] sm:$0xff]  ;;  %v7137_v57 = vld [vmem:[#allocation7 + $0x140] sm:$0xff] }
 0x22f   :  { %11011 = vst [vmem:[#allocation274_spill] sm:$0xff] %v7123_v32  ;;  %11012 = vst [vmem:[#allocation162_spill] sm:$0xff] %v7126_v61  ;;  %v7140_v48 = vld [vmem:[#allocation7 + $0x148] sm:$0xff]  ;;  %v3585_v36 = vld [vmem:[#allocation4 + $0x900] sm:$0xff] }
 0x230   :  { %11013 = vst [vmem:[#allocation94_spill] sm:$0xff] %v7129_v55  ;;  %11015 = vst [vmem:[#allocation164_spill] sm:$0xff] %v7134_v6  ;;  %v7144_v27 = vadd.f32 %v3585_v36, %v6735_v50  ;;  %v3586_v16 = vld [vmem:[#allocation4 + $0x908] sm:$0xff]  ;;  %v3587_v7 = vld [vmem:[#allocation4 + $0x910] sm:$0xff] }
 0x231   :  { %11016 = vst [vmem:[#allocation95_spill] sm:$0xff] %v7137_v57  ;;  %11017 = vst [vmem:[#allocation276_spill] sm:$0xff] %v7140_v48  ;;  %v7147_v4 = vadd.f32 %v3586_v16, %v6745_v40  ;;  %v7150_v23 = vadd.f32 %v3587_v7, %v6754_v19  ;;  %v3588_v55 = vld [vmem:[#allocation4 + $0x918] sm:$0xff]  ;;  %v7155_v32 = vld [vmem:[#allocation7 + $0x150] sm:$0xff] }
 0x232   :  { %11018 = vst [vmem:[#allocation165_spill] sm:$0xff] %v7144_v27  ;;  %v7153_v61 = vadd.f32 %v3588_v55, %v6766_v28  ;;  %11022 = vst [vmem:[#allocation97_spill] sm:$0xff] %v7155_v32  ;;  %vm9516_vm12 = vcmp.gt.f32.partialorder %v7155_v32, 0.0  ;;  %v7158_v0 = vld [vmem:[#allocation7 + $0x158] sm:$0xff]  ;;  %v7161_v50 = vld [vmem:[#allocation7 + $0x160] sm:$0xff] }
 0x233   :  { %11019 = vst [vmem:[#allocation96_spill] sm:$0xff] %v7147_v4  ;;  %11020 = vst [vmem:[#allocation277_spill] sm:$0xff] %v7150_v23  ;;  %v7164_v40 = vld [vmem:[#allocation7 + $0x168] sm:$0xff]  ;;  %v3593_v19 = vld [vmem:[#allocation4 + $0x920] sm:$0xff] }
 0x234   :  { %11021 = vst [vmem:[#allocation167_spill] sm:$0xff] %v7153_v61  ;;  %11023 = vst [vmem:[#allocation278_spill] sm:$0xff] %v7158_v0  ;;  %v7168_v28 = vadd.f32 %v3593_v19, %v6778_v53  ;;  %v3594_v55 = vld [vmem:[#allocation4 + $0x928] sm:$0xff]  ;;  %v11028_v16 = vld [vmem:[#allocation163_spill] sm:$0xff] }
 0x235   :  { %11024 = vst [vmem:[#allocation168_spill] sm:$0xff] %v7161_v50  ;;  %11025 = vst [vmem:[#allocation98_spill] sm:$0xff] %v7164_v40  ;;  %v7171_v36 = vadd.f32 %v3594_v55, %v6790_v51  ;;  %v7176_v7 = vsel %vm9462_vm0, %v11028_v16, 0.0  ;;  %v11029_v61 = vld [vmem:[#allocation107_spill] sm:$0xff]  ;;  %v7183_v4 = vld [vmem:[#allocation7 + $0x170] sm:$0xff] }
 0x236   :  { %11026 = vst [vmem:[#allocation279_spill] sm:$0xff] %v7168_v28  ;;  %v7181_v23 = vsel %vm9466_vm1, %v11029_v61, 0.0  ;;  %11031 = vst [vmem:[#allocation280_spill] sm:$0xff] %v7183_v4  ;;  %vm9519_vm14 = vcmp.gt.f32.partialorder %v7183_v4, 0.0  ;;  %v7186_v53 = vld [vmem:[#allocation7 + $0x178] sm:$0xff]  ;;  %v7189_v51 = vld [vmem:[#allocation7 + $0x180] sm:$0xff] }
 0x237   :  { %11027 = vst [vmem:[#allocation171_spill] sm:$0xff] %v7171_v36  ;;  %11030 = vst [vmem:[#allocation99_spill] sm:$0xff] %v7181_v23  ;;  %vm9520_vm15 = vcmp.gt.f32.partialorder %v7186_v53, 0.0  ;;  %vm9521_vm13 = vcmp.gt.f32.partialorder %v7189_v51, 0.0  ;;  %v7192_v19 = vld [vmem:[#allocation7 + $0x188] sm:$0xff]  ;;  %v11035_v55 = vld [vmem:[#allocation210_spill] sm:$0xff] }
 0x238   :  { %11032 = vst [vmem:[#allocation173_spill] sm:$0xff] %v7186_v53  ;;  %11033 = vst [vmem:[#allocation100_spill] sm:$0xff] %v7189_v51  ;;  %vm9524_vm0 = vcmp.gt.f32.partialorder %v7192_v19, 0.0  ;;  %v7198_v61 = vsel %vm9465_vm2, %v11035_v55, 0.0  ;;  %v11037_v16 = vld [vmem:[#allocation108_spill] sm:$0xff]  ;;  %v11039_v28 = vld [vmem:[#allocation211_spill] sm:$0xff] }
 0x239   :  { %11034 = vst [vmem:[#allocation281_spill] sm:$0xff] %v7192_v19  ;;  %11036 = vst [vmem:[#allocation282_spill] sm:$0xff] %v7198_v61  ;;  %v7203_v36 = vsel %vm9467_vm3, %v11037_v16, 0.0  ;;  %v7208_v27 = vsel %vm9469_vm4, %v11039_v28, 0.0  ;;  %v11041_v20 = vld [vmem:[#allocation32_spill] sm:$0xff]  ;;  %v7218_v55 = vld [vmem:[#allocation7 + $0x198] sm:$0xff] }
 0x23a   :  { %11038 = vst [vmem:[#allocation101_spill] sm:$0xff] %v7203_v36  ;;  %11040 = vst [vmem:[#allocation283_spill] sm:$0xff] %v7208_v27  ;;  %v7213_v15 = vsel %vm9474_vm5, %v11041_v20, 0.0  ;;  %v7215_v23 = vld [vmem:[#allocation7 + $0x190] sm:$0xff]  ;;  %vm9525_vm1 = vcmp.gt.f32.partialorder %v7218_v55, 0.0  ;;  %v7221_v16 = vld [vmem:[#allocation7 + $0x1a0] sm:$0xff] }
 0x23b   :  { %11042 = vst [vmem:[#allocation176_spill] sm:$0xff] %v7213_v15  ;;  %11043 = vst [vmem:[#allocation284_spill] sm:$0xff] %v7215_v23  ;;  %vm9523_vm2 = vcmp.gt.f32.partialorder %v7215_v23, 0.0  ;;  %vm9527_vm3 = vcmp.gt.f32.partialorder %v7221_v16, 0.0  ;;  %v7224_v33 = vld [vmem:[#allocation7 + $0x1a8] sm:$0xff]  ;;  %v11047_v28 = vld [vmem:[#allocation169_spill] sm:$0xff] }
 0x23c   :  { %11044 = vst [vmem:[#allocation285_spill] sm:$0xff] %v7218_v55  ;;  %11045 = vst [vmem:[#allocation177_spill] sm:$0xff] %v7221_v16  ;;  %vm9531_vm4 = vcmp.gt.f32.partialorder %v7224_v33, 0.0  ;;  %v7230_v20 = vsel %vm9473_vm6, %v11047_v28, 0.0  ;;  %v11049_v1 = vld [vmem:[#allocation111_spill] sm:$0xff]  ;;  %v11051_v35 = vld [vmem:[#allocation213_spill] sm:$0xff] }
 0x23d   :  { %11046 = vst [vmem:[#allocation286_spill] sm:$0xff] %v7224_v33  ;;  %11048 = vst [vmem:[#allocation179_spill] sm:$0xff] %v7230_v20  ;;  %v7235_v10 = vsel %vm9475_vm7, %v11049_v1, 0.0  ;;  %v7240_v15 = vsel %vm9477_vm8, %v11051_v35, 0.0  ;;  %v11053_v27 = vld [vmem:[#allocation112_spill] sm:$0xff]  ;;  %v7250_v28 = vld [vmem:[#allocation7 + $0x1b8] sm:$0xff] }
 0x23e   :  { %11050 = vst [vmem:[#allocation180_spill] sm:$0xff] %v7235_v10  ;;  %11052 = vst [vmem:[#allocation287_spill] sm:$0xff] %v7240_v15  ;;  %v7245_v36 = vsel %vm9481_vm9, %v11053_v27, 0.0  ;;  %v7247_v61 = vld [vmem:[#allocation7 + $0x1b0] sm:$0xff]  ;;  %vm9537_vm5 = vcmp.gt.f32.partialorder %v7250_v28, 0.0  ;;  %v7253_v1 = vld [vmem:[#allocation7 + $0x1c0] sm:$0xff] }
 0x23f   :  { %11054 = vst [vmem:[#allocation183_spill] sm:$0xff] %v7245_v36  ;;  %11055 = vst [vmem:[#allocation288_spill] sm:$0xff] %v7247_v61  ;;  %vm9536_vm6 = vcmp.gt.f32.partialorder %v7247_v61, 0.0  ;;  %v7256_v49 = vld [vmem:[#allocation7 + $0x1c8] sm:$0xff]  ;;  %v11059_v35 = vld [vmem:[#allocation214_spill] sm:$0xff]  ;;  %vm11064_vm9 = vcmp.gt.f32.partialorder %v6969_v21, 0.0 }
 0x240   :  { %11056 = vst [vmem:[#allocation18_spill] sm:$0xff] %v7250_v28  ;;  %11057 = vst [vmem:[#allocation186_spill] sm:$0xff] %v7253_v1  ;;  %v7262_v27 = vsel %vm9482_vm10, %v11059_v35, 0.0  ;;  %v11061_v43 = vld [vmem:[#allocation35_spill] sm:$0xff]  ;;  %vm11067_vm7 = vcmp.gt.f32.partialorder %v6972_v9, 0.0  ;;  %v7279_v20 = vld [vmem:[#allocation7 + $0x1d0] sm:$0xff] }
 0x241   :  { %11058 = vst [vmem:[#allocation289_spill] sm:$0xff] %v7256_v49  ;;  %11060 = vst [vmem:[#allocation19_spill] sm:$0xff] %v7262_v27  ;;  %v7267_v63 = vsel %vm9483_vm11, %v11061_v43, 0.0  ;;  %v11063_v39 = vld [vmem:[#allocation175_spill] sm:$0xff]  ;;  %v7282_v35 = vld [vmem:[#allocation7 + $0x1d8] sm:$0xff]  ;;  %vm11077_vm10 = vcmp.gt.f32.partialorder %v6990_v31, 0.0 }
 0x242   :  { %11062 = vst [vmem:[#allocation290_spill] sm:$0xff] %v7267_v63  ;;  %v7272_v36 = vsel %vm11064_vm9, %v11063_v39, 0.0  ;;  %v11066_v15 = vld [vmem:[#allocation115_spill] sm:$0xff]  ;;  %11069 = vst [vmem:[#allocation291_spill] sm:$0xff] %v7279_v20  ;;  %v7285_v43 = vld [vmem:[#allocation7 + $0x1e0] sm:$0xff]  ;;  %vm11080_vm8 = vcmp.gt.f32.partialorder %v6993_v46, 0.0 }
 0x243   :  { %11065 = vst [vmem:[#allocation189_spill] sm:$0xff] %v7272_v36  ;;  %v7277_v10 = vsel %vm11067_vm7, %v11066_v15, 0.0  ;;  %11070 = vst [vmem:[#allocation194_spill] sm:$0xff] %v7282_v35  ;;  %v7288_v21 = vld [vmem:[#allocation7 + $0x1e8] sm:$0xff]  ;;  %v11073_v39 = vld [vmem:[#allocation216_spill] sm:$0xff]  ;;  %vm11074_vm7 = vcmp.gt.f32.partialorder %v6987_v62, 0.0 }
 0x244   :  { %11068 = vst [vmem:[#allocation20_spill] sm:$0xff] %v7277_v10  ;;  %11071 = vst [vmem:[#allocation195_spill] sm:$0xff] %v7285_v43  ;;  %v7294_v15 = vsel %vm11074_vm7, %v11073_v39, 0.0  ;;  %v11076_v9 = vld [vmem:[#allocation116_spill] sm:$0xff]  ;;  %v11079_v13 = vld [vmem:[#allocation217_spill] sm:$0xff]  ;;  %vm11083_vm11 = vcmp.gt.f32.partialorder %v6996_v22, 0.0 }
 0x245   :  { %11072 = vst [vmem:[#allocation13_spill] sm:$0xff] %v7288_v21  ;;  %11075 = vst [vmem:[#allocation197_spill] sm:$0xff] %v7294_v15  ;;  %v7299_v34 = vsel %vm11077_vm10, %v11076_v9, 0.0  ;;  %v7304_v10 = vsel %vm11080_vm8, %v11079_v13, 0.0  ;;  %v11082_v36 = vld [vmem:[#allocation118_spill] sm:$0xff]  ;;  %v7311_v27 = vld [vmem:[#allocation7 + $0x1f0] sm:$0xff] }
 0x246   :  { %11078 = vst [vmem:[#allocation198_spill] sm:$0xff] %v7299_v34  ;;  %11081 = vst [vmem:[#allocation292_spill] sm:$0xff] %v7304_v10  ;;  %v7309_v63 = vsel %vm11083_vm11, %v11082_v36, 0.0  ;;  %v7314_v39 = vld [vmem:[#allocation7 + $0x1f8] sm:$0xff]  ;;  %v7317_v9 = vld [vmem:[#allocation7 + $0x200] sm:$0xff]  ;;  %vm11090_vm11 = vcmp.gt.f32.partialorder %v7011_v26, 0.0 }
 0x247   :  { %11084 = vst [vmem:[#allocation199_spill] sm:$0xff] %v7309_v63  ;;  %11085 = vst [vmem:[#allocation23_spill] sm:$0xff] %v7311_v27  ;;  %v7320_v46 = vld [vmem:[#allocation7 + $0x208] sm:$0xff]  ;;  %v11089_v13 = vld [vmem:[#allocation218_spill] sm:$0xff]  ;;  %vm11093_vm7 = vcmp.gt.f32.partialorder %v7014_v47, 0.0  ;;  %vm11096_vm9 = vcmp.gt.f32.partialorder %v7017_v45, 0.0 }
 0x248   :  { %11086 = vst [vmem:[#allocation14_spill] sm:$0xff] %v7314_v39  ;;  %11087 = vst [vmem:[#allocation200_spill] sm:$0xff] %v7317_v9  ;;  %v7326_v36 = vsel %vm11090_vm11, %v11089_v13, 0.0  ;;  %v11092_v22 = vld [vmem:[#allocation119_spill] sm:$0xff]  ;;  %v11098_v10 = vld [vmem:[#allocation121_spill] sm:$0xff]  ;;  %vm11099_vm10 = vcmp.gt.f32.partialorder %v7020_v59, 0.0 }
 0x249   :  { %11088 = vst [vmem:[#allocation293_spill] sm:$0xff] %v7320_v46  ;;  %11091 = vst [vmem:[#allocation201_spill] sm:$0xff] %v7326_v36  ;;  %v7331_v31 = vsel %vm11093_vm7, %v11092_v22, 0.0  ;;  %v11095_v62 = vld [vmem:[#allocation39_spill] sm:$0xff]  ;;  %v7341_v34 = vsel %vm11099_vm10, %v11098_v10, 0.0  ;;  %v7343_v15 = vld [vmem:[#allocation7 + $0x210] sm:$0xff] }
 0x24a   :  { %11094 = vst [vmem:[#allocation15_spill] sm:$0xff] %v7331_v31  ;;  %v7336_v63 = vsel %vm11096_vm9, %v11095_v62, 0.0  ;;  %11100 = vst [vmem:[#allocation294_spill] sm:$0xff] %v7341_v34  ;;  %v7346_v13 = vld [vmem:[#allocation7 + $0x218] sm:$0xff]  ;;  %v7349_v22 = vld [vmem:[#allocation7 + $0x220] sm:$0xff]  ;;  %vm11106_vm10 = vcmp.gt.f32.partialorder %v7035_v12, 0.0 }
 0x24b   :  { %11097 = vst [vmem:[#allocation202_spill] sm:$0xff] %v7336_v63  ;;  %11101 = vst [vmem:[#allocation24_spill] sm:$0xff] %v7343_v15  ;;  %v7352_v45 = vld [vmem:[#allocation7 + $0x228] sm:$0xff]  ;;  %v11105_v62 = vld [vmem:[#allocation122_spill] sm:$0xff]  ;;  %vm11109_vm11 = vcmp.gt.f32.partialorder %v7038_v52, 0.0  ;;  %vm11112_vm8 = vcmp.gt.f32.partialorder %v7041_v60, 0.0 }
 0x24c   :  { %11102 = vst [vmem:[#allocation16_spill] sm:$0xff] %v7346_v13  ;;  %11103 = vst [vmem:[#allocation295_spill] sm:$0xff] %v7349_v22  ;;  %v7358_v10 = vsel %vm11106_vm10, %v11105_v62, 0.0  ;;  %v11108_v59 = vld [vmem:[#allocation220_spill] sm:$0xff]  ;;  %v11114_v63 = vld [vmem:[#allocation221_spill] sm:$0xff]  ;;  %vm11115_vm7 = vcmp.gt.f32.partialorder %v7044_v42, 0.0 }
 0x24d   :  { %11104 = vst [vmem:[#allocation17_spill] sm:$0xff] %v7352_v45  ;;  %11107 = vst [vmem:[#allocation203_spill] sm:$0xff] %v7358_v10  ;;  %v7363_v47 = vsel %vm11109_vm11, %v11108_v59, 0.0  ;;  %v11111_v26 = vld [vmem:[#allocation124_spill] sm:$0xff]  ;;  %v7373_v31 = vsel %vm11115_vm7, %v11114_v63, 0.0  ;;  %v7378_v62 = vld [vmem:[#allocation7 + $0x238] sm:$0xff] }
 0x24e   :  { %11110 = vst [vmem:[#allocation204_spill] sm:$0xff] %v7363_v47  ;;  %v7368_v34 = vsel %vm11112_vm8, %v11111_v26, 0.0  ;;  %11116 = vst [vmem:[#allocation205_spill] sm:$0xff] %v7373_v31  ;;  %v7375_v36 = vld [vmem:[#allocation7 + $0x230] sm:$0xff]  ;;  %v7381_v59 = vld [vmem:[#allocation7 + $0x240] sm:$0xff]  ;;  %vm11122_vm7 = vcmp.gt.f32.partialorder %v7059_v37, 0.0 }
 0x24f   :  { %11113 = vst [vmem:[#allocation25_spill] sm:$0xff] %v7368_v34  ;;  %11117 = vst [vmem:[#allocation26_spill] sm:$0xff] %v7375_v36  ;;  %v7384_v60 = vld [vmem:[#allocation7 + $0x248] sm:$0xff]  ;;  %v11121_v26 = vld [vmem:[#allocation125_spill] sm:$0xff]  ;;  %vm11125_vm10 = vcmp.gt.f32.partialorder %v7062_v41, 0.0  ;;  %vm11128_vm9 = vcmp.gt.f32.partialorder %v7065_v58, 0.0 }
 0x250   :  { %11118 = vst [vmem:[#allocation206_spill] sm:$0xff] %v7378_v62  ;;  %11119 = vst [vmem:[#allocation102_spill] sm:$0xff] %v7381_v59  ;;  %v7390_v63 = vsel %vm11122_vm7, %v11121_v26, 0.0  ;;  %v11124_v42 = vld [vmem:[#allocation127_spill] sm:$0xff]  ;;  %v11127_v12 = vld [vmem:[#allocation128_spill] sm:$0xff]  ;;  %vm11131_vm11 = vcmp.gt.f32.partialorder %v7068_v24, 0.0 }
 0x251   :  { %11120 = vst [vmem:[#allocation103_spill] sm:$0xff] %v7384_v60  ;;  %11123 = vst [vmem:[#allocation27_spill] sm:$0xff] %v7390_v63  ;;  %v7395_v52 = vsel %vm11125_vm10, %v11124_v42, 0.0  ;;  %v7400_v31 = vsel %vm11128_vm9, %v11127_v12, 0.0  ;;  %v11130_v34 = vld [vmem:[#allocation43_spill] sm:$0xff]  ;;  %v7407_v10 = vld [vmem:[#allocation7 + $0x250] sm:$0xff] }
 0x252   :  { %11126 = vst [vmem:[#allocation207_spill] sm:$0xff] %v7395_v52  ;;  %11129 = vst [vmem:[#allocation160_spill] sm:$0xff] %v7400_v31  ;;  %v7405_v47 = vsel %vm11131_vm11, %v11130_v34, 0.0  ;;  %v7410_v26 = vld [vmem:[#allocation7 + $0x258] sm:$0xff]  ;;  %v7413_v42 = vld [vmem:[#allocation7 + $0x260] sm:$0xff]  ;;  %vm11138_vm11 = vcmp.gt.f32.partialorder %v7083_v3, 0.0 }
 0x253   :  { %11132 = vst [vmem:[#allocation104_spill] sm:$0xff] %v7405_v47  ;;  %11133 = vst [vmem:[#allocation28_spill] sm:$0xff] %v7407_v10  ;;  %v7416_v58 = vld [vmem:[#allocation7 + $0x268] sm:$0xff]  ;;  %v11140_v41 = vld [vmem:[#allocation129_spill] sm:$0xff]  ;;  %vm11141_vm7 = vcmp.gt.f32.partialorder %v7086_v25, 0.0  ;;  %vm11144_vm8 = vcmp.gt.f32.partialorder %v7089_v30, 0.0 }
 0x254   :  { %11134 = vst [vmem:[#allocation208_spill] sm:$0xff] %v7410_v26  ;;  %11135 = vst [vmem:[#allocation105_spill] sm:$0xff] %v7413_v42  ;;  %v11137_v12 = vld [vmem:[#allocation223_spill] sm:$0xff]  ;;  %v7427_v24 = vsel %vm11141_vm7, %v11140_v41, 0.0  ;;  %v11143_v37 = vld [vmem:[#allocation192_spill] sm:$0xff]  ;;  %vm11147_vm10 = vcmp.gt.f32.partialorder %v7092_v54, 0.0 }
 0x255   :  { %11136 = vst [vmem:[#allocation29_spill] sm:$0xff] %v7416_v58  ;;  %v7422_v34 = vsel %vm11138_vm11, %v11137_v12, 0.0  ;;  %11142 = vst [vmem:[#allocation106_spill] sm:$0xff] %v7427_v24  ;;  %v7432_v47 = vsel %vm11144_vm8, %v11143_v37, 0.0  ;;  %v11146_v31 = vld [vmem:[#allocation130_spill] sm:$0xff]  ;;  %v7439_v63 = vld [vmem:[#allocation7 + $0x270] sm:$0xff] }
 0x256   :  { %11139 = vst [vmem:[#allocation209_spill] sm:$0xff] %v7422_v34  ;;  %11145 = vst [vmem:[#allocation30_spill] sm:$0xff] %v7432_v47  ;;  %v7437_v52 = vsel %vm11147_vm10, %v11146_v31, 0.0  ;;  %v7442_v12 = vld [vmem:[#allocation7 + $0x278] sm:$0xff]  ;;  %v7445_v41 = vld [vmem:[#allocation7 + $0x280] sm:$0xff]  ;;  %vm11154_vm10 = vcmp.gt.f32.partialorder %v7107_v29, 0.0 }
 0x257   :  { %11148 = vst [vmem:[#allocation166_spill] sm:$0xff] %v7437_v52  ;;  %11149 = vst [vmem:[#allocation31_spill] sm:$0xff] %v7439_v63  ;;  %v7448_v25 = vld [vmem:[#allocation7 + $0x288] sm:$0xff]  ;;  %v11153_v37 = vld [vmem:[#allocation224_spill] sm:$0xff]  ;;  %vm11157_vm11 = vcmp.gt.f32.partialorder %v7110_v2, 0.0  ;;  %vm11160_vm9 = vcmp.gt.f32.partialorder %v7113_v5, 0.0 }
 0x258   :  { %11150 = vst [vmem:[#allocation109_spill] sm:$0xff] %v7442_v12  ;;  %11151 = vst [vmem:[#allocation212_spill] sm:$0xff] %v7445_v41  ;;  %v7454_v31 = vsel %vm11154_vm10, %v11153_v37, 0.0  ;;  %v11156_v30 = vld [vmem:[#allocation131_spill] sm:$0xff]  ;;  %v11159_v52 = vld [vmem:[#allocation132_spill] sm:$0xff]  ;;  %vm11163_vm7 = vcmp.gt.f32.partialorder %v7116_v14, 0.0 }
 0x259   :  { %11152 = vst [vmem:[#allocation110_spill] sm:$0xff] %v7448_v25  ;;  %11155 = vst [vmem:[#allocation33_spill] sm:$0xff] %v7454_v31  ;;  %v7459_v3 = vsel %vm11157_vm11, %v11156_v30, 0.0  ;;  %v7464_v47 = vsel %vm11160_vm9, %v11159_v52, 0.0  ;;  %v11162_v24 = vld [vmem:[#allocation225_spill] sm:$0xff]  ;;  %v7471_v54 = vld [vmem:[#allocation7 + $0x290] sm:$0xff] }
 0x25a   :  { %11158 = vst [vmem:[#allocation172_spill] sm:$0xff] %v7459_v3  ;;  %11161 = vst [vmem:[#allocation34_spill] sm:$0xff] %v7464_v47  ;;  %v7469_v34 = vsel %vm11163_vm7, %v11162_v24, 0.0  ;;  %v7474_v37 = vld [vmem:[#allocation7 + $0x298] sm:$0xff]  ;;  %v7477_v30 = vld [vmem:[#allocation7 + $0x2a0] sm:$0xff]  ;;  %vm11170_vm7 = vcmp.gt.f32.partialorder %v7131_v17, 0.0 }
 0x25b   :  { %11164 = vst [vmem:[#allocation113_spill] sm:$0xff] %v7469_v34  ;;  %11165 = vst [vmem:[#allocation215_spill] sm:$0xff] %v7471_v54  ;;  %v7480_v3 = vld [vmem:[#allocation7 + $0x2a8] sm:$0xff]  ;;  %v11169_v52 = vld [vmem:[#allocation133_spill] sm:$0xff]  ;;  %vm11173_vm10 = vcmp.gt.f32.partialorder %v7134_v6, 0.0  ;;  %vm11176_vm8 = vcmp.gt.f32.partialorder %v7137_v57, 0.0 }
 0x25c   :  { %11166 = vst [vmem:[#allocation114_spill] sm:$0xff] %v7474_v37  ;;  %11167 = vst [vmem:[#allocation36_spill] sm:$0xff] %v7477_v30  ;;  %v7486_v24 = vsel %vm11170_vm7, %v11169_v52, 0.0  ;;  %v11172_v34 = vld [vmem:[#allocation134_spill] sm:$0xff]  ;;  %vm11179_vm11 = vcmp.gt.f32.partialorder %v7140_v48, 0.0  ;;  %v7503_v29 = vld [vmem:[#allocation7 + $0x2b0] sm:$0xff] }
 0x25d   :  { %11168 = vst [vmem:[#allocation178_spill] sm:$0xff] %v7480_v3  ;;  %11171 = vst [vmem:[#allocation37_spill] sm:$0xff] %v7486_v24  ;;  %v7491_v47 = vsel %vm11173_vm10, %v11172_v34, 0.0  ;;  %v11175_v31 = vld [vmem:[#allocation46_spill] sm:$0xff]  ;;  %vm9571_vm7 = vcmp.gt.f32.partialorder %v7503_v29, 0.0  ;;  %v7506_v52 = vld [vmem:[#allocation7 + $0x2b8] sm:$0xff] }
 0x25e   :  { %11174 = vst [vmem:[#allocation117_spill] sm:$0xff] %v7491_v47  ;;  %v7496_v14 = vsel %vm11176_vm8, %v11175_v31, 0.0  ;;  %v11178_v5 = vld [vmem:[#allocation226_spill] sm:$0xff]  ;;  %11181 = vst [vmem:[#allocation120_spill] sm:$0xff] %v7503_v29  ;;  %v7512_v47 = vld [vmem:[#allocation7 + $0x2c8] sm:$0xff]  ;;  %vm11191_vm9 = vcmp.gt.f32.partialorder %v7161_v50, 0.0 }
 0x25f   :  { %11177 = vst [vmem:[#allocation38_spill] sm:$0xff] %v7496_v14  ;;  %v7501_v2 = vsel %vm11179_vm11, %v11178_v5, 0.0  ;;  %11182 = vst [vmem:[#allocation219_spill] sm:$0xff] %v7506_v52  ;;  %v7509_v34 = vld [vmem:[#allocation7 + $0x2c0] sm:$0xff]  ;;  %v11185_v31 = vld [vmem:[#allocation135_spill] sm:$0xff]  ;;  %vm11188_vm11 = vcmp.gt.f32.partialorder %v7158_v0, 0.0 }
 0x260   :  { %11180 = vst [vmem:[#allocation181_spill] sm:$0xff] %v7501_v2  ;;  %11183 = vst [vmem:[#allocation184_spill] sm:$0xff] %v7509_v34  ;;  %v7518_v5 = vsel %vm9516_vm12, %v11185_v31, 0.0  ;;  %v11187_v2 = vld [vmem:[#allocation136_spill] sm:$0xff]  ;;  %v11190_v24 = vld [vmem:[#allocation47_spill] sm:$0xff]  ;;  %vm11194_vm10 = vcmp.gt.f32.partialorder %v7164_v40, 0.0 }
 0x261   :  { %11184 = vst [vmem:[#allocation40_spill] sm:$0xff] %v7512_v47  ;;  %11186 = vst [vmem:[#allocation123_spill] sm:$0xff] %v7518_v5  ;;  %v7523_v14 = vsel %vm11188_vm11, %v11187_v2, 0.0  ;;  %v7528_v48 = vsel %vm11191_vm9, %v11190_v24, 0.0  ;;  %v11193_v57 = vld [vmem:[#allocation227_spill] sm:$0xff]  ;;  %v7535_v17 = vld [vmem:[#allocation7 + $0x2d0] sm:$0xff] }
 0x262   :  { %11189 = vst [vmem:[#allocation41_spill] sm:$0xff] %v7523_v14  ;;  %11192 = vst [vmem:[#allocation187_spill] sm:$0xff] %v7528_v48  ;;  %v7533_v6 = vsel %vm11194_vm10, %v11193_v57, 0.0  ;;  %vm696_vm12 = vcmp.gt.f32.partialorder %v7535_v17, 0.0  ;;  %v7538_v31 = vld [vmem:[#allocation7 + $0x2d8] sm:$0xff]  ;;  %v7541_v2 = vld [vmem:[#allocation7 + $0x310] sm:$0xff] }
 0x263   :  { %11195 = vst [vmem:[#allocation126_spill] sm:$0xff] %v7533_v6  ;;  %11196 = vst [vmem:[#allocation42_spill] sm:$0xff] %v7535_v17  ;;  %vm697_vm8 = vcmp.gt.f32.partialorder %v7538_v31, 0.0  ;;  %vm704_vm11 = vcmp.gt.f32.partialorder %v7541_v2, 0.0  ;;  %v7544_v14 = vld [vmem:[#allocation7 + $0x318] sm:$0xff]  ;;  %v11202_v6 = vld [vmem:[#allocation138_spill] sm:$0xff] }
 0x264   :  { %11197 = vst [vmem:[#allocation190_spill] sm:$0xff] %v7538_v31  ;;  %11198 = vst [vmem:[#allocation191_spill] sm:$0xff] %v7541_v2  ;;  %vm705_vm9 = vcmp.gt.f32.partialorder %v7544_v14, 0.0  ;;  %v11200_v24 = vld [vmem:[#allocation137_spill] sm:$0xff]  ;;  %v7555_v48 = vsel %vm9520_vm15, %v11202_v6, 0.0  ;;  %v7560_v5 = vsel %vm9521_vm13, %v6711_v11, 0.0 }
 0x265   :  { %11199 = vst [vmem:[#allocation44_spill] sm:$0xff] %v7544_v14  ;;  %v7550_v57 = vsel %vm9519_vm14, %v11200_v24, 0.0  ;;  %11203 = vst [vmem:[#allocation45_spill] sm:$0xff] %v7555_v48  ;;  %v7565_v40 = vsel %vm9524_vm0, %v6718_v56, 0.0  ;;  %v7567_v50 = vld [vmem:[#allocation7 + $0x320] sm:$0xff]  ;;  %v7570_v24 = vld [vmem:[#allocation7 + $0x328] sm:$0xff] }
 0x266   :  { %11201 = vst [vmem:[#allocation193_spill] sm:$0xff] %v7550_v57  ;;  %11204 = vst [vmem:[#allocation196_spill] sm:$0xff] %v7560_v5  ;;  %vm9587_vm10 = vcmp.gt.f32.partialorder %v7567_v50, 0.0  ;;  %vm9580_vm14 = vcmp.gt.f32.partialorder %v7570_v24, 0.0  ;;  %v7573_v6 = vld [vmem:[#allocation7 + $0x330] sm:$0xff]  ;;  %v7576_v48 = vld [vmem:[#allocation7 + $0x338] sm:$0xff] }
 0x267   :  { %11205 = vst [vmem:[#allocation163_spill] sm:$0xff] %v7567_v50  ;;  %11206 = vst [vmem:[#allocation107_spill] sm:$0xff] %v7570_v24  ;;  %vm9582_vm15 = vcmp.gt.f32.partialorder %v7573_v6, 0.0  ;;  %vm9584_vm13 = vcmp.gt.f32.partialorder %v7576_v48, 0.0  ;;  %v7582_v11 = vsel %vm9523_vm2, %v6721_v18, 0.0  ;;  %v7587_v56 = vsel %vm9525_vm1, %v6728_v8, 0.0 }
 0x268   :  { %11207 = vst [vmem:[#allocation210_spill] sm:$0xff] %v7573_v6  ;;  %11208 = vst [vmem:[#allocation108_spill] sm:$0xff] %v7576_v48  ;;  %v7592_v5 = vsel %vm9527_vm3, %v6731_v38, 0.0  ;;  %v7597_v57 = vsel %vm9531_vm4, %v6738_v44, 0.0  ;;  %v7599_v19 = vld [vmem:[#allocation7 + $0x340] sm:$0xff]  ;;  %v7602_v18 = vld [vmem:[#allocation7 + $0x348] sm:$0xff] }
 0x269   :  { %11209 = vst [vmem:[#allocation211_spill] sm:$0xff] %v7599_v19  ;;  %vm9589_vm2 = vcmp.gt.f32.partialorder %v7599_v19, 0.0  ;;  %11210 = vst [vmem:[#allocation32_spill] sm:$0xff] %v7602_v18  ;;  %vm9597_vm0 = vcmp.gt.f32.partialorder %v7602_v18, 0.0  ;;  %v7605_v8 = vld [vmem:[#allocation7 + $0x350] sm:$0xff]  ;;  %v7608_v16 = vld [vmem:[#allocation7 + $0x358] sm:$0xff] }
 0x26a   :  { %11211 = vst [vmem:[#allocation169_spill] sm:$0xff] %v7605_v8  ;;  %11212 = vst [vmem:[#allocation111_spill] sm:$0xff] %v7608_v16  ;;  %v11213_v38 = vld [vmem:[#allocation48_spill] sm:$0xff]  ;;  %v11216_v23 = vld [vmem:[#allocation139_spill] sm:$0xff]  ;;  %vm11217_vm4 = vcmp.gt.f32.partialorder %v7253_v1, 0.0  ;;  %vm11220_vm1 = vcmp.gt.f32.partialorder %v7256_v49, 0.0 }
 0x26b   :  { %v7614_v44 = vsel %vm9536_vm6, %v11213_v38, 0.0  ;;  %v11214_v33 = vld [vmem:[#allocation228_spill] sm:$0xff]  ;;  %v7624_v51 = vsel %vm11217_vm4, %v11216_v23, 0.0  ;;  %v11219_v53 = vld [vmem:[#allocation49_spill] sm:$0xff]  ;;  %v7631_v0 = vld [vmem:[#allocation7 + $0x360] sm:$0xff]  ;;  %vm11229_vm6 = vcmp.gt.f32.partialorder %v7282_v35, 0.0 }
 0x26c   :  { %v7619_v55 = vsel %vm9537_vm5, %v11214_v33, 0.0  ;;  %11218 = vst [vmem:[#allocation112_spill] sm:$0xff] %v7624_v51  ;;  %v7629_v4 = vsel %vm11220_vm1, %v11219_v53, 0.0  ;;  %11222 = vst [vmem:[#allocation35_spill] sm:$0xff] %v7631_v0  ;;  %v7634_v38 = vld [vmem:[#allocation7 + $0x368] sm:$0xff]  ;;  %v7637_v33 = vld [vmem:[#allocation7 + $0x370] sm:$0xff] }
 0x26d   :  { %11215 = vst [vmem:[#allocation213_spill] sm:$0xff] %v7619_v55  ;;  %11221 = vst [vmem:[#allocation214_spill] sm:$0xff] %v7629_v4  ;;  %v7640_v1 = vld [vmem:[#allocation7 + $0x378] sm:$0xff]  ;;  %vm11227_vm1 = vcmp.gt.f32.partialorder %v7279_v20, 0.0  ;;  %v11228_v49 = vld [vmem:[#allocation140_spill] sm:$0xff]  ;;  %vm11231_vm3 = vcmp.gt.f32.partialorder %v7285_v43, 0.0 }
 0x26e   :  { %11223 = vst [vmem:[#allocation175_spill] sm:$0xff] %v7634_v38  ;;  %11224 = vst [vmem:[#allocation115_spill] sm:$0xff] %v7637_v33  ;;  %v11226_v23 = vld [vmem:[#allocation229_spill] sm:$0xff]  ;;  %v7651_v28 = vsel %vm11229_vm6, %v11228_v49, 0.0  ;;  %v11230_v61 = vld [vmem:[#allocation50_spill] sm:$0xff]  ;;  %vm11234_vm5 = vcmp.gt.f32.partialorder %v7288_v21, 0.0 }
 0x26f   :  { %11225 = vst [vmem:[#allocation216_spill] sm:$0xff] %v7640_v1  ;;  %v7646_v53 = vsel %vm11227_vm1, %v11226_v23, 0.0  ;;  %v7656_v32 = vsel %vm11231_vm3, %v11230_v61, 0.0  ;;  %v11233_v4 = vld [vmem:[#allocation230_spill] sm:$0xff]  ;;  %v7666_v23 = vld [vmem:[#allocation7 + $0x388] sm:$0xff]  ;;  %vm11239_vm6 = vcmp.gt.f32.partialorder %v7311_v27, 0.0 }
 0x270   :  { %11232 = vst [vmem:[#allocation116_spill] sm:$0xff] %v7656_v32  ;;  %v7661_v51 = vsel %vm11234_vm5, %v11233_v4, 0.0  ;;  %v7663_v55 = vld [vmem:[#allocation7 + $0x380] sm:$0xff]  ;;  %11237 = vst [vmem:[#allocation218_spill] sm:$0xff] %v7666_v23  ;;  %v11238_v49 = vld [vmem:[#allocation51_spill] sm:$0xff]  ;;  %vm11242_vm3 = vcmp.gt.f32.partialorder %v7314_v39, 0.0 }
 0x271   :  { %11235 = vst [vmem:[#allocation217_spill] sm:$0xff] %v7661_v51  ;;  %11236 = vst [vmem:[#allocation118_spill] sm:$0xff] %v7663_v55  ;;  %v7672_v35 = vsel %vm11239_vm6, %v11238_v49, 0.0  ;;  %v11241_v61 = vld [vmem:[#allocation231_spill] sm:$0xff]  ;;  %v11244_v4 = vld [vmem:[#allocation52_spill] sm:$0xff]  ;;  %vm11245_vm5 = vcmp.gt.f32.partialorder %v7317_v9, 0.0 }
 0x272   :  { %11240 = vst [vmem:[#allocation119_spill] sm:$0xff] %v7672_v35  ;;  %v7677_v43 = vsel %vm11242_vm3, %v11241_v61, 0.0  ;;  %v7682_v21 = vsel %vm11245_vm5, %v11244_v4, 0.0  ;;  %v11247_v20 = vld [vmem:[#allocation232_spill] sm:$0xff]  ;;  %vm11248_vm1 = vcmp.gt.f32.partialorder %v7320_v46, 0.0  ;;  %v7692_v49 = vld [vmem:[#allocation7 + $0x398] sm:$0xff] }
 0x273   :  { %11243 = vst [vmem:[#allocation39_spill] sm:$0xff] %v7677_v43  ;;  %11246 = vst [vmem:[#allocation121_spill] sm:$0xff] %v7682_v21  ;;  %v7687_v51 = vsel %vm11248_vm1, %v11247_v20, 0.0  ;;  %v7689_v32 = vld [vmem:[#allocation7 + $0x390] sm:$0xff]  ;;  %v7695_v61 = vld [vmem:[#allocation7 + $0x3a0] sm:$0xff]  ;;  %vm11255_vm1 = vcmp.gt.f32.partialorder %v7343_v15, 0.0 }
 0x274   :  { %11249 = vst [vmem:[#allocation122_spill] sm:$0xff] %v7687_v51  ;;  %11250 = vst [vmem:[#allocation220_spill] sm:$0xff] %v7689_v32  ;;  %v7698_v9 = vld [vmem:[#allocation7 + $0x3a8] sm:$0xff]  ;;  %v11254_v4 = vld [vmem:[#allocation53_spill] sm:$0xff]  ;;  %vm11257_vm6 = vcmp.gt.f32.partialorder %v7346_v13, 0.0  ;;  %vm11260_vm4 = vcmp.gt.f32.partialorder %v7349_v22, 0.0 }
 0x275   :  { %11251 = vst [vmem:[#allocation124_spill] sm:$0xff] %v7692_v49  ;;  %11252 = vst [vmem:[#allocation221_spill] sm:$0xff] %v7695_v61  ;;  %v7704_v20 = vsel %vm11255_vm1, %v11254_v4, 0.0  ;;  %v11256_v46 = vld [vmem:[#allocation233_spill] sm:$0xff]  ;;  %v11259_v27 = vld [vmem:[#allocation54_spill] sm:$0xff]  ;;  %vm11263_vm3 = vcmp.gt.f32.partialorder %v7352_v45, 0.0 }
 0x276   :  { %11253 = vst [vmem:[#allocation125_spill] sm:$0xff] %v7698_v9  ;;  %v7709_v39 = vsel %vm11257_vm6, %v11256_v46, 0.0  ;;  %v7714_v51 = vsel %vm11260_vm4, %v11259_v27, 0.0  ;;  %v11262_v21 = vld [vmem:[#allocation234_spill] sm:$0xff]  ;;  %v7721_v35 = vld [vmem:[#allocation7 + $0x3b0] sm:$0xff]  ;;  %v7724_v4 = vld [vmem:[#allocation7 + $0x3b8] sm:$0xff] }
 0x277   :  { %11258 = vst [vmem:[#allocation127_spill] sm:$0xff] %v7709_v39  ;;  %11261 = vst [vmem:[#allocation128_spill] sm:$0xff] %v7714_v51  ;;  %v7719_v43 = vsel %vm11263_vm3, %v11262_v21, 0.0  ;;  %v7727_v46 = vld [vmem:[#allocation7 + $0x3c0] sm:$0xff]  ;;  %v11268_v22 = vld [vmem:[#allocation55_spill] sm:$0xff]  ;;  %vm11269_vm4 = vcmp.gt.f32.partialorder %v7375_v36, 0.0 }
 0x278   :  { %11264 = vst [vmem:[#allocation43_spill] sm:$0xff] %v7719_v43  ;;  %11265 = vst [vmem:[#allocation223_spill] sm:$0xff] %v7721_v35  ;;  %v7733_v27 = vsel %vm11269_vm4, %v11268_v22, 0.0  ;;  %v11271_v45 = vld [vmem:[#allocation235_spill] sm:$0xff]  ;;  %vm11272_vm3 = vcmp.gt.f32.partialorder %v7378_v62, 0.0  ;;  %v11274_v13 = vld [vmem:[#allocation56_spill] sm:$0xff] }
 0x279   :  { %11266 = vst [vmem:[#allocation129_spill] sm:$0xff] %v7724_v4  ;;  %11267 = vst [vmem:[#allocation192_spill] sm:$0xff] %v7727_v46  ;;  %v7738_v21 = vsel %vm11272_vm3, %v11271_v45, 0.0  ;;  %vm11275_vm1 = vcmp.gt.f32.partialorder %v7381_v59, 0.0  ;;  %v11277_v43 = vld [vmem:[#allocation236_spill] sm:$0xff]  ;;  %vm11278_vm5 = vcmp.gt.f32.partialorder %v7384_v60, 0.0 }
 0x27a   :  { %11270 = vst [vmem:[#allocation130_spill] sm:$0xff] %v7733_v27  ;;  %11273 = vst [vmem:[#allocation224_spill] sm:$0xff] %v7738_v21  ;;  %v7743_v15 = vsel %vm11275_vm1, %v11274_v13, 0.0  ;;  %v7748_v51 = vsel %vm11278_vm5, %v11277_v43, 0.0  ;;  %v7750_v39 = vld [vmem:[#allocation7 + $0x3c8] sm:$0xff]  ;;  %v7753_v22 = vld [vmem:[#allocation7 + $0x3d0] sm:$0xff] }
 0x27b   :  { %11276 = vst [vmem:[#allocation131_spill] sm:$0xff] %v7743_v15  ;;  %11279 = vst [vmem:[#allocation132_spill] sm:$0xff] %v7748_v51  ;;  %v7756_v45 = vld [vmem:[#allocation7 + $0x3d8] sm:$0xff]  ;;  %v7759_v59 = vld [vmem:[#allocation7 + $0x3e0] sm:$0xff]  ;;  %vm11285_vm5 = vcmp.gt.f32.partialorder %v7407_v10, 0.0  ;;  %vm11287_vm4 = vcmp.gt.f32.partialorder %v7410_v26, 0.0 }
 0x27c   :  { %11280 = vst [vmem:[#allocation225_spill] sm:$0xff] %v7750_v39  ;;  %11281 = vst [vmem:[#allocation133_spill] sm:$0xff] %v7753_v22  ;;  %v11284_v13 = vld [vmem:[#allocation170_spill] sm:$0xff]  ;;  %v11288_v36 = vld [vmem:[#allocation57_spill] sm:$0xff]  ;;  %vm11289_vm6 = vcmp.gt.f32.partialorder %v7413_v42, 0.0  ;;  %vm11291_vm3 = vcmp.gt.f32.partialorder %v7416_v58, 0.0 }
 0x27d   :  { %11282 = vst [vmem:[#allocation134_spill] sm:$0xff] %v7756_v45  ;;  %11283 = vst [vmem:[#allocation46_spill] sm:$0xff] %v7759_v59  ;;  %v7765_v43 = vsel %vm11285_vm5, %v11284_v13, 0.0  ;;  %v11286_v60 = vld [vmem:[#allocation174_spill] sm:$0xff]  ;;  %v7775_v51 = vsel %vm11289_vm6, %v11288_v36, 0.0  ;;  %v11290_v15 = vld [vmem:[#allocation237_spill] sm:$0xff] }
 0x27e   :  { %v7770_v62 = vsel %vm11287_vm4, %v11286_v60, 0.0  ;;  %v7780_v21 = vsel %vm11291_vm3, %v11290_v15, 0.0  ;;  %v7782_v27 = vld [vmem:[#allocation7 + $0x3e8] sm:$0xff]  ;;  %v11294_v13 = vld [vmem:[#allocation182_spill] sm:$0xff]  ;;  %vm11295_vm1 = vcmp.gt.f32.partialorder %v7439_v63, 0.0  ;;  %vm11298_vm4 = vcmp.gt.f32.partialorder %v7442_v12, 0.0 }
 0x27f   :  { %11292 = vst [vmem:[#allocation226_spill] sm:$0xff] %v7780_v21  ;;  %11293 = vst [vmem:[#allocation135_spill] sm:$0xff] %v7782_v27  ;;  %v7788_v26 = vsel %vm11295_vm1, %v11294_v13, 0.0  ;;  %v11297_v60 = vld [vmem:[#allocation58_spill] sm:$0xff]  ;;  %vm11301_vm6 = vcmp.gt.f32.partialorder %v7445_v41, 0.0  ;;  %v11303_v15 = vld [vmem:[#allocation185_spill] sm:$0xff] }
 0x280   :  { %11296 = vst [vmem:[#allocation136_spill] sm:$0xff] %v7788_v26  ;;  %v7793_v42 = vsel %vm11298_vm4, %v11297_v60, 0.0  ;;  %v11300_v36 = vld [vmem:[#allocation238_spill] sm:$0xff]  ;;  %vm11304_vm3 = vcmp.gt.f32.partialorder %v7448_v25, 0.0  ;;  %v7805_v21 = vld [vmem:[#allocation7 + $0x3f0] sm:$0xff]  ;;  %v7808_v13 = vld [vmem:[#allocation7 + $0x3f8] sm:$0xff] }
 0x281   :  { %11299 = vst [vmem:[#allocation47_spill] sm:$0xff] %v7793_v42  ;;  %v7798_v58 = vsel %vm11301_vm6, %v11300_v36, 0.0  ;;  %v7803_v10 = vsel %vm11304_vm3, %v11303_v15, 0.0  ;;  %11306 = vst [vmem:[#allocation138_spill] sm:$0xff] %v7805_v21  ;;  %v7811_v60 = vld [vmem:[#allocation7 + $0x400] sm:$0xff]  ;;  %v7814_v41 = vld [vmem:[#allocation7 + $0x408] sm:$0xff] }
 0x282   :  { %11302 = vst [vmem:[#allocation227_spill] sm:$0xff] %v7798_v58  ;;  %11305 = vst [vmem:[#allocation137_spill] sm:$0xff] %v7803_v10  ;;  %v11310_v36 = vld [vmem:[#allocation222_spill] sm:$0xff]  ;;  %vm11311_vm3 = vcmp.gt.f32.partialorder %v7471_v54, 0.0  ;;  %v11312_v25 = vld [vmem:[#allocation188_spill] sm:$0xff]  ;;  %vm11313_vm1 = vcmp.gt.f32.partialorder %v7474_v37, 0.0 }
 0x283   :  { %11307 = vst [vmem:[#allocation48_spill] sm:$0xff] %v7808_v13  ;;  %11308 = vst [vmem:[#allocation228_spill] sm:$0xff] %v7811_v60  ;;  %v7820_v15 = vsel %vm11311_vm3, %v11310_v36, 0.0  ;;  %v7825_v12 = vsel %vm11313_vm1, %v11312_v25, 0.0  ;;  %v11315_v63 = vld [vmem:[#allocation59_spill] sm:$0xff]  ;;  %vm11316_vm5 = vcmp.gt.f32.partialorder %v7477_v30, 0.0 }
 0x284   :  { %11309 = vst [vmem:[#allocation139_spill] sm:$0xff] %v7814_v41  ;;  %11314 = vst [vmem:[#allocation49_spill] sm:$0xff] %v7825_v12  ;;  %v7830_v10 = vsel %vm11316_vm5, %v11315_v63, 0.0  ;;  %v11318_v58 = vld [vmem:[#allocation239_spill] sm:$0xff]  ;;  %vm11319_vm4 = vcmp.gt.f32.partialorder %v7480_v3, 0.0  ;;  %v7837_v26 = vld [vmem:[#allocation7 + $0x410] sm:$0xff] }
 0x285   :  { %11317 = vst [vmem:[#allocation229_spill] sm:$0xff] %v7830_v10  ;;  %v7835_v42 = vsel %vm11319_vm4, %v11318_v58, 0.0  ;;  %11321 = vst [vmem:[#allocation50_spill] sm:$0xff] %v7837_v26  ;;  %vm736_vm3 = vcmp.gt.f32.partialorder %v7837_v26, 0.0  ;;  %v7840_v36 = vld [vmem:[#allocation7 + $0x418] sm:$0xff]  ;;  %v11325_v63 = vld [vmem:[#allocation22_spill] sm:$0xff] }
 0x286   :  { %11320 = vst [vmem:[#allocation140_spill] sm:$0xff] %v7835_v42  ;;  %11322 = vst [vmem:[#allocation230_spill] sm:$0xff] %v7840_v36  ;;  %v11323_v25 = vld [vmem:[#allocation21_spill] sm:$0xff]  ;;  %vm11326_vm5 = vcmp.gt.f32.partialorder %v7506_v52, 0.0  ;;  %v11328_v58 = vld [vmem:[#allocation60_spill] sm:$0xff]  ;;  %vm11329_vm1 = vcmp.gt.f32.partialorder %v7509_v34, 0.0 }
 0x287   :  { %v7846_v37 = vsel %vm9571_vm7, %v11323_v25, 0.0  ;;  %v7851_v30 = vsel %vm11326_vm5, %v11325_v63, 0.0  ;;  %v7856_v3 = vsel %vm11329_vm1, %v11328_v58, 0.0  ;;  %v11331_v54 = vld [vmem:[#allocation240_spill] sm:$0xff]  ;;  %vm11332_vm4 = vcmp.gt.f32.partialorder %v7512_v47, 0.0  ;;  %v7863_v10 = vld [vmem:[#allocation7 + $0x420] sm:$0xff] }
 0x288   :  { %11324 = vst [vmem:[#allocation51_spill] sm:$0xff] %v7846_v37  ;;  %11327 = vst [vmem:[#allocation231_spill] sm:$0xff] %v7851_v30  ;;  %v7861_v42 = vsel %vm11332_vm4, %v11331_v54, 0.0  ;;  %vm738_vm7 = vcmp.gt.f32.partialorder %v7863_v10, 0.0  ;;  %v7866_v25 = vld [vmem:[#allocation7 + $0x428] sm:$0xff]  ;;  %v7869_v63 = vld [vmem:[#allocation7 + $0x430] sm:$0xff] }
 0x289   :  { %11330 = vst [vmem:[#allocation52_spill] sm:$0xff] %v7856_v3  ;;  %11333 = vst [vmem:[#allocation232_spill] sm:$0xff] %v7861_v42  ;;  %vm9630_vm6 = vcmp.gt.f32.partialorder %v7866_v25, 0.0  ;;  %vm9629_vm5 = vcmp.gt.f32.partialorder %v7869_v63, 0.0  ;;  %v7872_v34 = vld [vmem:[#allocation7 + $0x438] sm:$0xff]  ;;  %v11344_v37 = vld [vmem:[#allocation66_spill] sm:$0xff] }
 0x28a   :  { %11334 = vst [vmem:[#allocation53_spill] sm:$0xff] %v7863_v10  ;;  %11335 = vst [vmem:[#allocation233_spill] sm:$0xff] %v7866_v25  ;;  %vm9628_vm1 = vcmp.gt.f32.partialorder %v7872_v34, 0.0  ;;  %v11338_v58 = vld [vmem:[#allocation61_spill] sm:$0xff]  ;;  %v1882_v12 = vsel %vm9587_vm10, %v11344_v37, 0.0  ;;  %v11345_v17 = vld [vmem:[#allocation247_spill] sm:$0xff] }
 0x28b   :  { %11336 = vst [vmem:[#allocation54_spill] sm:$0xff] %v7869_v63  ;;  %11337 = vst [vmem:[#allocation234_spill] sm:$0xff] %v7872_v34  ;;  %v7878_v54 = vsel %vm696_vm12, %v11338_v58, 0.0  ;;  %v11340_v47 = vld [vmem:[#allocation241_spill] sm:$0xff]  ;;  %v1883_v58 = vsel %vm9580_vm14, %v11345_v17, 0.0  ;;  %v7903_v2 = vld [vmem:[#allocation7 + $0x440] sm:$0xff] }
 0x28c   :  { %11339 = vst [vmem:[#allocation55_spill] sm:$0xff] %v7878_v54  ;;  %v7883_v52 = vsel %vm697_vm8, %v11340_v47, 0.0  ;;  %v11342_v42 = vld [vmem:[#allocation65_spill] sm:$0xff]  ;;  %v11346_v54 = vld [vmem:[#allocation68_spill] sm:$0xff]  ;;  %11348 = vst [vmem:[#allocation56_spill] sm:$0xff] %v7903_v2  ;;  %vm9627_vm4 = vcmp.gt.f32.partialorder %v7903_v2, 0.0 }
 0x28d   :  { %11341 = vst [vmem:[#allocation235_spill] sm:$0xff] %v7883_v52  ;;  %v1880_v29 = vsel %vm704_vm11, %v11342_v42, 0.0  ;;  %v11343_v3 = vld [vmem:[#allocation245_spill] sm:$0xff]  ;;  %v1884_v47 = vsel %vm9582_vm15, %v11346_v54, 0.0  ;;  %v11347_v52 = vld [vmem:[#allocation248_spill] sm:$0xff]  ;;  %v11350_v50 = vld [vmem:[#allocation71_spill] sm:$0xff] }
 0x28e   :  { %v1881_v30 = vsel %vm705_vm9, %v11343_v3, 0.0  ;;  %v1885_v42 = vsel %vm9584_vm13, %v11347_v52, 0.0  ;;  %v11349_v3 = vld [vmem:[#allocation249_spill] sm:$0xff]  ;;  %v1887_v17 = vsel %vm9597_vm0, %v11350_v50, 0.0  ;;  %v11351_v24 = vld [vmem:[#allocation252_spill] sm:$0xff]  ;;  %vm11352_vm14 = vcmp.gt.f32.partialorder %v7605_v8, 0.0 }
 0x28f   :  { %v1886_v37 = vsel %vm9589_vm2, %v11349_v3, 0.0  ;;  %v1888_v54 = vsel %vm11352_vm14, %v11351_v24, 0.0  ;;  %v11353_v6 = vld [vmem:[#allocation72_spill] sm:$0xff]  ;;  %vm11354_vm15 = vcmp.gt.f32.partialorder %v7608_v16, 0.0  ;;  %v11355_v48 = vld [vmem:[#allocation253_spill] sm:$0xff]  ;;  %vm11356_vm13 = vcmp.gt.f32.partialorder %v7631_v0, 0.0 }
 0x290   :  { %v1889_v52 = vsel %vm11354_vm15, %v11353_v6, 0.0  ;;  %v1890_v14 = vsel %vm11356_vm13, %v11355_v48, 0.0  ;;  %v11357_v31 = vld [vmem:[#allocation255_spill] sm:$0xff]  ;;  %vm11358_vm10 = vcmp.gt.f32.partialorder %v7634_v38, 0.0  ;;  %v11359_v19 = vld [vmem:[#allocation142_spill] sm:$0xff]  ;;  %vm11360_vm2 = vcmp.gt.f32.partialorder %v7637_v33, 0.0 }
 0x291   :  { %v1891_v3 = vsel %vm11358_vm10, %v11357_v31, 0.0  ;;  %v7927_v50 = vsel %vm11360_vm2, %v11359_v19, 0.0  ;;  %v11361_v18 = vld [vmem:[#allocation75_spill] sm:$0xff]  ;;  %vm11362_vm14 = vcmp.gt.f32.partialorder %v7640_v1, 0.0  ;;  %v11363_v16 = vld [vmem:[#allocation256_spill] sm:$0xff]  ;;  %vm11364_vm15 = vcmp.gt.f32.partialorder %v7663_v55, 0.0 }
 0x292   :  { %v7932_v24 = vsel %vm11362_vm14, %v11361_v18, 0.0  ;;  %v7937_v6 = vsel %vm11364_vm15, %v11363_v16, 0.0  ;;  %v11365_v48 = vld [vmem:[#allocation77_spill] sm:$0xff]  ;;  %vm11366_vm13 = vcmp.gt.f32.partialorder %v7666_v23, 0.0  ;;  %v1978_v31 = vadd.f32 %v7565_v40, %v7176_v7  ;;  %v11367_v19 = vld [vmem:[#allocation99_spill] sm:$0xff]  ;;  %v11369_v18 = vld [vmem:[#allocation258_spill] sm:$0xff] }
 0x293   :  { %v7942_v38 = vsel %vm11366_vm13, %v11365_v48, 0.0  ;;  %v1980_v33 = vadd.f32 %v7582_v11, %v11367_v19  ;;  %v7948_v0 = vld [vmem:[#allocation7 + $0x448] sm:$0xff]  ;;  %vm11370_vm10 = vcmp.gt.f32.partialorder %v7689_v32, 0.0  ;;  %v11371_v55 = vld [vmem:[#allocation145_spill] sm:$0xff]  ;;  %vm11372_vm14 = vcmp.gt.f32.partialorder %v7692_v49, 0.0  ;;  %v11373_v23 = vld [vmem:[#allocation78_spill] sm:$0xff] }
 0x294   :  { %11368 = vst [vmem:[#allocation236_spill] sm:$0xff] %v7948_v0  ;;  %vm9625_vm2 = vcmp.gt.f32.partialorder %v7948_v0, 0.0  ;;  %v7954_v16 = vsel %vm11370_vm10, %v11369_v18, 0.0  ;;  %v7959_v48 = vsel %vm11372_vm14, %v11371_v55, 0.0  ;;  %vm11374_vm15 = vcmp.gt.f32.partialorder %v7695_v61, 0.0  ;;  %v11375_v7 = vld [vmem:[#allocation147_spill] sm:$0xff] }
 0x295   :  { %v7964_v40 = vsel %vm11374_vm15, %v11373_v23, 0.0  ;;  %vm11376_vm13 = vcmp.gt.f32.partialorder %v7698_v9, 0.0  ;;  %v11377_v19 = vld [vmem:[#allocation80_spill] sm:$0xff]  ;;  %vm11378_vm0 = vcmp.gt.f32.partialorder %v7721_v35, 0.0  ;;  %v11379_v32 = vld [vmem:[#allocation261_spill] sm:$0xff]  ;;  %vm11380_vm10 = vcmp.gt.f32.partialorder %v7724_v4, 0.0 }
 0x296   :  { %v7969_v11 = vsel %vm11376_vm13, %v11375_v7, 0.0  ;;  %v7974_v18 = vsel %vm11378_vm0, %v11377_v19, 0.0  ;;  %v7979_v55 = vsel %vm11380_vm10, %v11379_v32, 0.0  ;;  %v11381_v49 = vld [vmem:[#allocation148_spill] sm:$0xff]  ;;  %vm11382_vm14 = vcmp.gt.f32.partialorder %v7727_v46, 0.0  ;;  %v11383_v61 = vld [vmem:[#allocation282_spill] sm:$0xff] }
 0x297   :  { %v7984_v23 = vsel %vm11382_vm14, %v11381_v49, 0.0  ;;  %v1982_v9 = vadd.f32 %v7587_v56, %v11383_v61  ;;  %v11384_v7 = vld [vmem:[#allocation263_spill] sm:$0xff]  ;;  %vm11385_vm15 = vcmp.gt.f32.partialorder %v7750_v39, 0.0  ;;  %v11386_v19 = vld [vmem:[#allocation150_spill] sm:$0xff]  ;;  %vm11387_vm0 = vcmp.gt.f32.partialorder %v7753_v22, 0.0  ;;  %v11390_v49 = vld [vmem:[#allocation264_spill] sm:$0xff] }
 0x298   :  { %v7991_v1 = vsel %vm11385_vm15, %v11384_v7, 0.0  ;;  %v7996_v35 = vsel %vm11387_vm0, %v11386_v19, 0.0  ;;  %v11388_v32 = vld [vmem:[#allocation83_spill] sm:$0xff]  ;;  %vm11389_vm13 = vcmp.gt.f32.partialorder %v7756_v45, 0.0  ;;  %vm11391_vm10 = vcmp.gt.f32.partialorder %v7759_v59, 0.0  ;;  %v11392_v56 = vld [vmem:[#allocation85_spill] sm:$0xff] }
 0x299   :  { %v8001_v4 = vsel %vm11389_vm13, %v11388_v32, 0.0  ;;  %v8006_v46 = vsel %vm11391_vm10, %v11390_v49, 0.0  ;;  %vm11393_vm14 = vcmp.gt.f32.partialorder %v7782_v27, 0.0  ;;  %v1979_v7 = vadd.f32 %v1978_v31, %v1880_v29  ;;  %v11394_v22 = vld [vmem:[#allocation101_spill] sm:$0xff]  ;;  %v11395_v8 = vld [vmem:[#allocation266_spill] sm:$0xff]  ;;  %v11401_v29 = vld [vmem:[#allocation155_spill] sm:$0xff] }
 0x29a   :  { %v8011_v61 = vsel %vm11393_vm14, %v11392_v56, 0.0  ;;  %v1981_v39 = vadd.f32 %v1980_v33, %v1881_v30  ;;  %v1984_v19 = vadd.f32 %v7592_v5, %v11394_v22  ;;  %vm11396_vm15 = vcmp.gt.f32.partialorder %v7805_v21, 0.0  ;;  %v11397_v45 = vld [vmem:[#allocation153_spill] sm:$0xff]  ;;  %v11399_v59 = vld [vmem:[#allocation86_spill] sm:$0xff]  ;;  %v11403_v5 = vld [vmem:[#allocation88_spill] sm:$0xff] }
 0x29b   :  { %v8018_v32 = vsel %vm11396_vm15, %v11395_v8, 0.0  ;;  %vm11398_vm0 = vcmp.gt.f32.partialorder %v7808_v13, 0.0  ;;  %vm11400_vm13 = vcmp.gt.f32.partialorder %v7811_v60, 0.0  ;;  %vm11402_vm10 = vcmp.gt.f32.partialorder %v7814_v41, 0.0  ;;  %v11405_v33 = vld [vmem:[#allocation269_spill] sm:$0xff]  ;;  %v11408_v31 = vld [vmem:[#allocation283_spill] sm:$0xff] }
 0x29c   :  { %v8023_v49 = vsel %vm11398_vm0, %v11397_v45, 0.0  ;;  %v8028_v56 = vsel %vm11400_vm13, %v11399_v59, 0.0  ;;  %v8033_v30 = vsel %vm11402_vm10, %v11401_v29, 0.0  ;;  %v8038_v8 = vsel %vm736_vm3, %v11403_v5, 0.0  ;;  %v11409_v60 = vld [vmem:[#allocation156_spill] sm:$0xff]  ;;  %v11411_v29 = vld [vmem:[#allocation271_spill] sm:$0xff] }
 0x29d   :  { %11404 = vst [vmem:[#allocation170_spill] sm:$0xff] %v8038_v8  ;;  %vm11406_vm14 = vcmp.gt.f32.partialorder %v7840_v36, 0.0  ;;  %v1983_v45 = vadd.f32 %v1982_v9, %v1882_v12  ;;  %v1986_v59 = vadd.f32 %v7597_v57, %v11408_v31  ;;  %v8050_v41 = vsel %vm738_vm7, %v11409_v60, 0.0  ;;  %v11413_v5 = vld [vmem:[#allocation158_spill] sm:$0xff]  ;;  %v11417_v57 = vld [vmem:[#allocation176_spill] sm:$0xff]  ;;  %v11418_v31 = vld [vmem:[#allocation179_spill] sm:$0xff] }
 0x29e   :  { %v8043_v22 = vsel %vm11406_vm14, %v11405_v33, 0.0  ;;  %11410 = vst [vmem:[#allocation57_spill] sm:$0xff] %v8050_v41  ;;  %v8055_v13 = vsel %vm9630_vm6, %v11411_v29, 0.0  ;;  %v8060_v21 = vsel %vm9629_vm5, %v11413_v5, 0.0  ;;  %v11415_v33 = vld [vmem:[#allocation91_spill] sm:$0xff]  ;;  %v1985_v12 = vadd.f32 %v1984_v19, %v1883_v58  ;;  %v11419_v27 = vld [vmem:[#allocation213_spill] sm:$0xff] }
 0x29f   :  { %11407 = vst [vmem:[#allocation174_spill] sm:$0xff] %v8043_v22  ;;  %11412 = vst [vmem:[#allocation237_spill] sm:$0xff] %v8055_v13  ;;  %v8065_v9 = vsel %vm9628_vm1, %v11415_v33, 0.0  ;;  %v1988_v60 = vadd.f32 %v7614_v44, %v11417_v57  ;;  %v1990_v10 = vadd.f32 %v11419_v27, %v11418_v31  ;;  %v2765_v25 = vadd.f32 %v1981_v39, %v1979_v7  ;;  %v11420_v29 = vld [vmem:[#allocation272_spill] sm:$0xff]  ;;  %v11425_v34 = vld [vmem:[#allocation214_spill] sm:$0xff] }
 0x2a0   :  { %11414 = vst [vmem:[#allocation182_spill] sm:$0xff] %v8060_v21  ;;  %11416 = vst [vmem:[#allocation58_spill] sm:$0xff] %v8065_v9  ;;  %v8074_v36 = vsel %vm9627_vm4, %v11420_v29, 0.0  ;;  %v11422_v5 = vld [vmem:[#allocation180_spill] sm:$0xff]  ;;  %v11424_v21 = vld [vmem:[#allocation287_spill] sm:$0xff]  ;;  %v1987_v19 = vadd.f32 %v1986_v59, %v1884_v47 }
 0x2a1   :  { %11421 = vst [vmem:[#allocation238_spill] sm:$0xff] %v8074_v36  ;;  %v11423_v63 = vld [vmem:[#allocation112_spill] sm:$0xff]  ;;  %v1994_v33 = vadd.f32 %v11425_v34, %v11424_v21  ;;  %v11426_v9 = vld [vmem:[#allocation183_spill] sm:$0xff]  ;;  %v11428_v27 = vld [vmem:[#allocation290_spill] sm:$0xff]  ;;  %v2766_v31 = vadd.f32 %v2765_v25, %v1983_v45  ;;  %v1989_v59 = vadd.f32 %v1988_v60, %v1885_v42 }
 0x2a2   :  { %v1992_v26 = vadd.f32 %v11423_v63, %v11422_v5  ;;  %v1996_v58 = vadd.f32 %v7646_v53, %v11426_v9  ;;  %v11427_v44 = vld [vmem:[#allocation19_spill] sm:$0xff]  ;;  %v11429_v39 = vld [vmem:[#allocation116_spill] sm:$0xff]  ;;  %v11430_v2 = vld [vmem:[#allocation189_spill] sm:$0xff]  ;;  %v1991_v9 = vadd.f32 %v1990_v10, %v1886_v37 }
 0x2a3   :  { %v1998_v57 = vadd.f32 %v7651_v28, %v11427_v44  ;;  %v2000_v7 = vadd.f32 %v11429_v39, %v11428_v27  ;;  %v11431_v29 = vld [vmem:[#allocation217_spill] sm:$0xff]  ;;  %v11432_v13 = vld [vmem:[#allocation20_spill] sm:$0xff]  ;;  %v11433_v41 = vld [vmem:[#allocation119_spill] sm:$0xff]  ;;  %v2767_v25 = vadd.f32 %v2766_v31, %v1985_v12  ;;  %v1995_v44 = vadd.f32 %v1994_v33, %v1888_v54 }
 0x2a4   :  { %v2002_v36 = vadd.f32 %v11431_v29, %v11430_v2  ;;  %v2004_v63 = vadd.f32 %v11433_v41, %v11432_v13  ;;  %v11434_v5 = vld [vmem:[#allocation197_spill] sm:$0xff]  ;;  %v11435_v22 = vld [vmem:[#allocation39_spill] sm:$0xff]  ;;  %v11436_v21 = vld [vmem:[#allocation198_spill] sm:$0xff]  ;;  %v1993_v45 = vadd.f32 %v1992_v26, %v1887_v17  ;;  %v1997_v2 = vadd.f32 %v1996_v58, %v1889_v52 }
 0x2a5   :  { %v2006_v34 = vadd.f32 %v11435_v22, %v11434_v5  ;;  %v11437_v8 = vld [vmem:[#allocation121_spill] sm:$0xff]  ;;  %v11440_v27 = vld [vmem:[#allocation292_spill] sm:$0xff]  ;;  %v11441_v39 = vld [vmem:[#allocation122_spill] sm:$0xff]  ;;  %v1999_v13 = vadd.f32 %v1998_v57, %v1890_v14  ;;  %v2001_v29 = vadd.f32 %v2000_v7, %v1891_v3 }
 0x2a6   :  { %v2008_v53 = vadd.f32 %v11437_v8, %v11436_v21  ;;  %v11438_v47 = vld [vmem:[#allocation93_spill] sm:$0xff]  ;;  %v2010_v41 = vadd.f32 %v11441_v39, %v11440_v27  ;;  %v11442_v22 = vld [vmem:[#allocation199_spill] sm:$0xff]  ;;  %v2768_v8 = vadd.f32 %v2767_v25, %v1987_v19  ;;  %v8104_v21 = vadd.f32 %v2002_v36, %v7927_v50  ;;  %v11446_v54 = vld [vmem:[#allocation128_spill] sm:$0xff] }
 0x2a7   :  { %v8097_v28 = vsel %vm9625_vm2, %v11438_v47, 0.0  ;;  %v2012_v5 = vadd.f32 %v7704_v20, %v11442_v22  ;;  %v8107_v47 = vadd.f32 %v2004_v63, %v7932_v24  ;;  %v8110_v10 = vadd.f32 %v2006_v34, %v7937_v6  ;;  %v11443_v42 = vld [vmem:[#allocation201_spill] sm:$0xff]  ;;  %v11444_v37 = vld [vmem:[#allocation127_spill] sm:$0xff]  ;;  %v11447_v20 = vld [vmem:[#allocation202_spill] sm:$0xff] }
 0x2a8   :  { %11439 = vst [vmem:[#allocation185_spill] sm:$0xff] %v8097_v28  ;;  %v8113_v26 = vadd.f32 %v2008_v53, %v7942_v38  ;;  %v2014_v14 = vadd.f32 %v11444_v37, %v11443_v42  ;;  %v11445_v17 = vld [vmem:[#allocation15_spill] sm:$0xff]  ;;  %v2769_v36 = vadd.f32 %v2768_v8, %v1989_v59  ;;  %v8122_v50 = vadd.f32 %v2010_v41, %v7954_v16  ;;  %v11449_v24 = vld [vmem:[#allocation294_spill] sm:$0xff]  ;;  %v11452_v58 = vld [vmem:[#allocation224_spill] sm:$0xff] }
 0x2a9   :  { %v2016_v52 = vadd.f32 %v11446_v54, %v11445_v17  ;;  %v11448_v3 = vld [vmem:[#allocation43_spill] sm:$0xff]  ;;  %v11450_v60 = vld [vmem:[#allocation130_spill] sm:$0xff]  ;;  %v8129_v19 = vadd.f32 %v2012_v5, %v7959_v48  ;;  %v11453_v57 = vld [vmem:[#allocation204_spill] sm:$0xff]  ;;  %v9623_v34 = vmov 0.0  }
 0x2aa   :  { %v2018_v12 = vadd.f32 %v11448_v3, %v11447_v20  ;;  %v2020_v6 = vadd.f32 %v11450_v60, %v11449_v24  ;;  %v11451_v33 = vld [vmem:[#allocation203_spill] sm:$0xff]  ;;  %v2770_v63 = vadd.f32 %v2769_v36, %v1991_v9  ;;  %v11455_v53 = vld [vmem:[#allocation90_spill] sm:$0xff]  ;;  %v11461_v27 = vld [vmem:[#allocation92_spill] sm:$0xff] }
 0x2ab   :  { %v2022_v38 = vadd.f32 %v11452_v58, %v11451_v33  ;;  %v11454_v7 = vld [vmem:[#allocation131_spill] sm:$0xff]  ;;  %vm11456_vm15 = vcmp.gt.f32.partialorder %v11455_v53, 0.0  ;;  %vm11462_vm13 = vcmp.gt.f32.partialorder %v11461_v27, 0.0  ;;  %v11464_v39 = vld [vmem:[#allocation273_spill] sm:$0xff]  ;;  %v11473_v37 = vld [vmem:[#allocation164_spill] sm:$0xff] }
 0x2ac   :  { %v2024_v31 = vadd.f32 %v11454_v7, %v11453_v57  ;;  %v8136_v59 = vsel %vm11456_vm15, 1.0, %v9623_v34  ;;  %v11458_v16 = vld [vmem:[#allocation159_spill] sm:$0xff]  ;;  %v8146_v48 = vsel %vm11462_vm13, 1.0, %v9623_v34  ;;  %vm11465_vm10 = vcmp.gt.f32.partialorder %v11464_v39, 0.0  ;;  %v11467_v41 = vld [vmem:[#allocation161_spill] sm:$0xff]  ;;  %v11479_v3 = vld [vmem:[#allocation276_spill] sm:$0xff] }
 0x2ad   :  { %11457 = vst [vmem:[#allocation222_spill] sm:$0xff] %v8136_v59  ;;  %vm11459_vm0 = vcmp.gt.f32.partialorder %v11458_v16, 0.0  ;;  %11463 = vst [vmem:[#allocation59_spill] sm:$0xff] %v8146_v48  ;;  %v8151_v9 = vsel %vm11465_vm10, 1.0, %v9623_v34  ;;  %vm11468_vm14 = vcmp.gt.f32.partialorder %v11467_v41, 0.0  ;;  %v2771_v5 = vadd.f32 %v2770_v63, %v1993_v45  ;;  %v11470_v8 = vld [vmem:[#allocation275_spill] sm:$0xff] }
 0x2ae   :  { %v8141_v25 = vsel %vm11459_vm0, 1.0, %v9623_v34  ;;  %11466 = vst [vmem:[#allocation239_spill] sm:$0xff] %v8151_v9  ;;  %v8156_v22 = vsel %vm11468_vm14, 1.0, %v9623_v34  ;;  %vm11471_vm15 = vcmp.gt.f32.partialorder %v11470_v8, 0.0  ;;  %vm11474_vm0 = vcmp.gt.f32.partialorder %v11473_v37, 0.0  ;;  %v11476_v54 = vld [vmem:[#allocation95_spill] sm:$0xff] }
 0x2af   :  { %11460 = vst [vmem:[#allocation188_spill] sm:$0xff] %v8141_v25  ;;  %11469 = vst [vmem:[#allocation21_spill] sm:$0xff] %v8156_v22  ;;  %v8161_v42 = vsel %vm11471_vm15, 1.0, %v9623_v34  ;;  %v8166_v17 = vsel %vm11474_vm0, 1.0, %v9623_v34  ;;  %vm11477_vm13 = vcmp.gt.f32.partialorder %v11476_v54, 0.0  ;;  %vm11480_vm10 = vcmp.gt.f32.partialorder %v11479_v3, 0.0 }
 0x2b0   :  { %11472 = vst [vmem:[#allocation22_spill] sm:$0xff] %v8161_v42  ;;  %11475 = vst [vmem:[#allocation60_spill] sm:$0xff] %v8166_v17  ;;  %v8171_v20 = vsel %vm11477_vm13, 1.0, %v9623_v34  ;;  %v8176_v36 = vsel %vm11480_vm10, 1.0, %v9623_v34  ;;  %v11482_v45 = vld [vmem:[#allocation97_spill] sm:$0xff]  ;;  %v11485_v60 = vld [vmem:[#allocation278_spill] sm:$0xff]  ;;  %v2772_v7 = vadd.f32 %v2771_v5, %v1995_v44  ;;  %v8209_v8 = vadd.f32 %v2014_v14, %v7964_v40 }
 0x2b1   :  { %11478 = vst [vmem:[#allocation240_spill] sm:$0xff] %v8171_v20  ;;  %11481 = vst [vmem:[#allocation61_spill] sm:$0xff] %v8176_v36  ;;  %vm11483_vm14 = vcmp.gt.f32.partialorder %v11482_v45, 0.0  ;;  %vm11486_vm15 = vcmp.gt.f32.partialorder %v11485_v60, 0.0  ;;  %v11488_v58 = vld [vmem:[#allocation168_spill] sm:$0xff]  ;;  %v11491_v63 = vld [vmem:[#allocation98_spill] sm:$0xff]  ;;  %v8212_v44 = vadd.f32 %v2016_v52, %v7969_v11  ;;  %v8222_v60 = vadd.f32 %v2018_v12, %v7974_v18 }
 0x2b2   :  { %v8181_v24 = vsel %vm11483_vm14, 1.0, %v9623_v34  ;;  %v8186_v33 = vsel %vm11486_vm15, 1.0, %v9623_v34  ;;  %vm11489_vm0 = vcmp.gt.f32.partialorder %v11488_v58, 0.0  ;;  %vm11492_vm13 = vcmp.gt.f32.partialorder %v11491_v63, 0.0  ;;  %v11494_v16 = vld [vmem:[#allocation280_spill] sm:$0xff]  ;;  %v11497_v39 = vld [vmem:[#allocation173_spill] sm:$0xff] }
 0x2b3   :  { %11484 = vst [vmem:[#allocation241_spill] sm:$0xff] %v8181_v24  ;;  %11487 = vst [vmem:[#allocation65_spill] sm:$0xff] %v8186_v33  ;;  %v8191_v57 = vsel %vm11489_vm0, 1.0, %v9623_v34  ;;  %v8196_v53 = vsel %vm11492_vm13, 1.0, %v9623_v34  ;;  %vm11495_vm10 = vcmp.gt.f32.partialorder %v11494_v16, 0.0  ;;  %vm11498_vm14 = vcmp.gt.f32.partialorder %v11497_v39, 0.0 }
 0x2b4   :  { %11490 = vst [vmem:[#allocation245_spill] sm:$0xff] %v8191_v57  ;;  %11493 = vst [vmem:[#allocation66_spill] sm:$0xff] %v8196_v53  ;;  %v8201_v27 = vsel %vm11495_vm10, 1.0, %v9623_v34  ;;  %v8206_v41 = vsel %vm11498_vm14, 1.0, %v9623_v34  ;;  %v11500_v5 = vld [vmem:[#allocation25_spill] sm:$0xff]  ;;  %v11501_v37 = vld [vmem:[#allocation132_spill] sm:$0xff]  ;;  %v2773_v14 = vadd.f32 %v2772_v7, %v1997_v2  ;;  %v8229_v11 = vadd.f32 %v2020_v6, %v7979_v55 }
 0x2b5   :  { %11496 = vst [vmem:[#allocation247_spill] sm:$0xff] %v8201_v27  ;;  %11499 = vst [vmem:[#allocation68_spill] sm:$0xff] %v8206_v41  ;;  %v2026_v54 = vadd.f32 %v11501_v37, %v11500_v5  ;;  %v11502_v3 = vld [vmem:[#allocation100_spill] sm:$0xff]  ;;  %v11505_v58 = vld [vmem:[#allocation205_spill] sm:$0xff]  ;;  %v8232_v52 = vadd.f32 %v2022_v38, %v7984_v23  ;;  %v8235_v39 = vadd.f32 %v2024_v31, %v7991_v1 }
 0x2b6   :  { %vm11503_vm15 = vcmp.gt.f32.partialorder %v11502_v3, 0.0  ;;  %v2028_v63 = vadd.f32 %v7765_v43, %v11505_v58  ;;  %v11506_v16 = vld [vmem:[#allocation27_spill] sm:$0xff]  ;;  %v11508_v12 = vld [vmem:[#allocation160_spill] sm:$0xff]  ;;  %v11509_v37 = vld [vmem:[#allocation226_spill] sm:$0xff]  ;;  %v2774_v55 = vadd.f32 %v2773_v14, %v1999_v13 }
 0x2b7   :  { %v8219_v45 = vsel %vm11503_vm15, 1.0, %v9623_v34  ;;  %v2030_v40 = vadd.f32 %v7770_v62, %v11506_v16  ;;  %v11507_v5 = vld [vmem:[#allocation207_spill] sm:$0xff]  ;;  %v2034_v3 = vadd.f32 %v11509_v37, %v11508_v12  ;;  %v11510_v43 = vld [vmem:[#allocation104_spill] sm:$0xff]  ;;  %v11512_v62 = vld [vmem:[#allocation209_spill] sm:$0xff]  ;;  %v8246_v6 = vadd.f32 %v2026_v54, %v7996_v35 }
 0x2b8   :  { %11504 = vst [vmem:[#allocation248_spill] sm:$0xff] %v8219_v45  ;;  %v2032_v18 = vadd.f32 %v7775_v51, %v11507_v5  ;;  %v11511_v58 = vld [vmem:[#allocation136_spill] sm:$0xff]  ;;  %v11513_v2 = vld [vmem:[#allocation47_spill] sm:$0xff]  ;;  %v11514_v23 = vld [vmem:[#allocation106_spill] sm:$0xff]  ;;  %v8255_v12 = vadd.f32 %v2028_v63, %v8001_v4  ;;  %v2775_v35 = vadd.f32 %v2774_v55, %v2001_v29 }
 0x2b9   :  { %v2036_v34 = vadd.f32 %v11511_v58, %v11510_v43  ;;  %v2038_v7 = vadd.f32 %v11513_v2, %v11512_v62  ;;  %v11515_v38 = vld [vmem:[#allocation227_spill] sm:$0xff]  ;;  %v11516_v31 = vld [vmem:[#allocation30_spill] sm:$0xff]  ;;  %v11517_v16 = vld [vmem:[#allocation137_spill] sm:$0xff]  ;;  %v8258_v37 = vadd.f32 %v2030_v40, %v8006_v46  ;;  %v8272_v63 = vadd.f32 %v2034_v3, %v8018_v32 }
 0x2ba   :  { %v2040_v1 = vadd.f32 %v11515_v38, %v11514_v23  ;;  %v2042_v28 = vadd.f32 %v11517_v16, %v11516_v31  ;;  %v11518_v51 = vld [vmem:[#allocation166_spill] sm:$0xff]  ;;  %v11519_v43 = vld [vmem:[#allocation33_spill] sm:$0xff]  ;;  %v8263_v54 = vadd.f32 %v2032_v18, %v8011_v61  ;;  %v11521_v58 = vld [vmem:[#allocation172_spill] sm:$0xff]  ;;  %v2776_v61 = vadd.f32 %v2775_v35, %v8104_v21 }
 0x2bb   :  { %v2044_v5 = vadd.f32 %v7820_v15, %v11518_v51  ;;  %v11520_v13 = vld [vmem:[#allocation49_spill] sm:$0xff]  ;;  %v11523_v23 = vld [vmem:[#allocation34_spill] sm:$0xff]  ;;  %v11524_v38 = vld [vmem:[#allocation140_spill] sm:$0xff]  ;;  %v8275_v46 = vadd.f32 %v2036_v34, %v8023_v49  ;;  %v8281_v18 = vadd.f32 %v2038_v7, %v8028_v56  ;;  %v11541_v56 = vmov 0.0  }
 0x2bc   :  { %v2046_v14 = vadd.f32 %v11520_v13, %v11519_v43  ;;  %v11522_v62 = vld [vmem:[#allocation229_spill] sm:$0xff]  ;;  %v2050_v31 = vadd.f32 %v11524_v38, %v11523_v23  ;;  %v11526_v16 = vld [vmem:[#allocation51_spill] sm:$0xff]  ;;  %v8284_v51 = vadd.f32 %v2040_v1, %v8033_v30  ;;  %v11532_v43 = vld [vmem:[#allocation170_spill] sm:$0xff]  ;;  %v2777_v21 = vadd.f32 %v2776_v61, %v8107_v47 }
 0x2bd   :  { %v2048_v2 = vadd.f32 %v11522_v62, %v11521_v58  ;;  %v11525_v15 = vld [vmem:[#allocation113_spill] sm:$0xff]  ;;  %11527 = vst [vmem:[#allocation249_spill] sm:$0xff] %v8275_v46  ;;  %v11529_v29 = vld [vmem:[#allocation231_spill] sm:$0xff]  ;;  %11530 = vst [vmem:[#allocation71_spill] sm:$0xff] %v8281_v18  ;;  %v8287_v13 = vadd.f32 %v2042_v28, %v11532_v43 }
 0x2be   :  { %v2052_v4 = vadd.f32 %v11526_v16, %v11525_v15  ;;  %v11528_v40 = vld [vmem:[#allocation37_spill] sm:$0xff]  ;;  %11531 = vst [vmem:[#allocation252_spill] sm:$0xff] %v8284_v51  ;;  %v11534_v58 = vld [vmem:[#allocation174_spill] sm:$0xff]  ;;  %v11539_v62 = vld [vmem:[#allocation52_spill] sm:$0xff] }
 0x2bf   :  { %v2054_v55 = vadd.f32 %v11529_v29, %v11528_v40  ;;  %11533 = vst [vmem:[#allocation72_spill] sm:$0xff] %v8287_v13  ;;  %v8290_v32 = vadd.f32 %v2044_v5, %v11534_v58  ;;  %v11536_v3 = vld [vmem:[#allocation57_spill] sm:$0xff]  ;;  %v11542_v7 = vld [vmem:[#allocation215_spill] sm:$0xff]  ;;  %v11547_v35 = vld [vmem:[#allocation182_spill] sm:$0xff] }
 0x2c0   :  { %v8293_v49 = vadd.f32 %v2046_v14, %v11536_v3  ;;  %v11538_v34 = vld [vmem:[#allocation117_spill] sm:$0xff]  ;;  %vm11543_vm0 = vcmp.gt.f32.partialorder %v11542_v7, 0.0  ;;  %v8309_v5 = vadd.f32 %v2050_v31, %v11547_v35  ;;  %v11549_v38 = vld [vmem:[#allocation58_spill] sm:$0xff]  ;;  %v11551_v15 = vld [vmem:[#allocation120_spill] sm:$0xff] }
 0x2c1   :  { %11535 = vst [vmem:[#allocation253_spill] sm:$0xff] %v8290_v32  ;;  %v8297_v23 = vadd.f32 %v11539_v62, %v11538_v34  ;;  %v8303_v30 = vsel %vm11543_vm0, 1.0, %v11541_v56  ;;  %v11545_v1 = vld [vmem:[#allocation237_spill] sm:$0xff]  ;;  %v8312_v14 = vadd.f32 %v2052_v4, %v11549_v38  ;;  %vm11552_vm13 = vcmp.gt.f32.partialorder %v11551_v15, 0.0  ;;  %v11554_v47 = vld [vmem:[#allocation238_spill] sm:$0xff]  ;;  %v11557_v61 = vld [vmem:[#allocation232_spill] sm:$0xff] }
 0x2c2   :  { %11537 = vst [vmem:[#allocation255_spill] sm:$0xff] %v8293_v49  ;;  %11544 = vst [vmem:[#allocation75_spill] sm:$0xff] %v8303_v30  ;;  %v8306_v28 = vadd.f32 %v2048_v2, %v11545_v1  ;;  %v8317_v16 = vsel %vm11552_vm13, 1.0, %v11541_v56  ;;  %v8320_v40 = vadd.f32 %v2054_v55, %v11554_v47  ;;  %v11556_v29 = vld [vmem:[#allocation38_spill] sm:$0xff]  ;;  %v2778_v2 = vadd.f32 %v2777_v21, %v8110_v10  ;;  %v11561_v4 = vld [vmem:[#allocation67_spill] sm:$0xff] }
 0x2c3   :  { %11540 = vst [vmem:[#allocation142_spill] sm:$0xff] %v8297_v23  ;;  %11548 = vst [vmem:[#allocation77_spill] sm:$0xff] %v8309_v5  ;;  %v8324_v43 = vadd.f32 %v11557_v61, %v11556_v29  ;;  %v11559_v31 = vld [vmem:[#allocation246_spill] sm:$0xff]  ;;  %vm11562_vm14 = vcmp.gt.f32.partialorder %v11561_v4, 0.0  ;;  %v11563_v34 = vld [vmem:[#allocation69_spill] sm:$0xff] }
 0x2c4   :  { %11546 = vst [vmem:[#allocation256_spill] sm:$0xff] %v8306_v28  ;;  %11550 = vst [vmem:[#allocation99_spill] sm:$0xff] %v8312_v14  ;;  %vm11560_vm10 = vcmp.gt.f32.partialorder %v11559_v31, 0.0  ;;  %v8335_v3 = vsel %vm11562_vm14, 1.0, %v11541_v56  ;;  %vm11564_vm15 = vcmp.gt.f32.partialorder %v11563_v34, 0.0  ;;  %v11565_v62 = vld [vmem:[#allocation250_spill] sm:$0xff]  ;;  %v2779_v1 = vadd.f32 %v2778_v2, %v8113_v26 }
 0x2c5   :  { %11553 = vst [vmem:[#allocation258_spill] sm:$0xff] %v8317_v16  ;;  %11555 = vst [vmem:[#allocation145_spill] sm:$0xff] %v8320_v40  ;;  %v8330_v58 = vsel %vm11560_vm10, 1.0, %v11541_v56  ;;  %v8340_v55 = vsel %vm11564_vm15, 1.0, %v11541_v56  ;;  %vm11566_vm0 = vcmp.gt.f32.partialorder %v11565_v62, 0.0  ;;  %v11567_v10 = vld [vmem:[#allocation70_spill] sm:$0xff] }
 0x2c6   :  { %11558 = vst [vmem:[#allocation78_spill] sm:$0xff] %v8324_v43  ;;  %v8345_v7 = vsel %vm11566_vm0, 1.0, %v11541_v56  ;;  %vm11568_vm13 = vcmp.gt.f32.partialorder %v11567_v10, 0.0  ;;  %v11569_v35 = vld [vmem:[#allocation251_spill] sm:$0xff]  ;;  %v11571_v15 = vld [vmem:[#allocation73_spill] sm:$0xff]  ;;  %v11573_v29 = vld [vmem:[#allocation254_spill] sm:$0xff] }
 0x2c7   :  { %v8350_v21 = vsel %vm11568_vm13, 1.0, %v11541_v56  ;;  %vm11570_vm10 = vcmp.gt.f32.partialorder %v11569_v35, 0.0  ;;  %vm11572_vm14 = vcmp.gt.f32.partialorder %v11571_v15, 0.0  ;;  %vm11574_vm15 = vcmp.gt.f32.partialorder %v11573_v29, 0.0  ;;  %v11575_v31 = vld [vmem:[#allocation141_spill] sm:$0xff]  ;;  %v11577_v26 = vld [vmem:[#allocation74_spill] sm:$0xff] }
 0x2c8   :  { %v8356_v38 = vsel %vm11570_vm10, 1.0, %v11541_v56  ;;  %v8361_v47 = vsel %vm11572_vm14, 1.0, %v11541_v56  ;;  %v8366_v61 = vsel %vm11574_vm15, 1.0, %v11541_v56  ;;  %vm11576_vm0 = vcmp.gt.f32.partialorder %v11575_v31, 0.0  ;;  %v11579_v34 = vld [vmem:[#allocation143_spill] sm:$0xff]  ;;  %v11581_v10 = vld [vmem:[#allocation76_spill] sm:$0xff] }
 0x2c9   :  { %v8371_v4 = vsel %vm11576_vm0, 1.0, %v11541_v56  ;;  %vm11578_vm13 = vcmp.gt.f32.partialorder %v11577_v26, 0.0  ;;  %vm11580_vm10 = vcmp.gt.f32.partialorder %v11579_v34, 0.0  ;;  %vm11582_vm14 = vcmp.gt.f32.partialorder %v11581_v10, 0.0  ;;  %v11583_v29 = vld [vmem:[#allocation257_spill] sm:$0xff]  ;;  %v11585_v26 = vld [vmem:[#allocation144_spill] sm:$0xff] }
 0x2ca   :  { %v8376_v2 = vsel %vm11578_vm13, 1.0, %v11541_v56  ;;  %v8381_v62 = vsel %vm11580_vm10, 1.0, %v11541_v56  ;;  %v8386_v35 = vsel %vm11582_vm14, 1.0, %v11541_v56  ;;  %v2780_v15 = vadd.f32 %v2779_v1, %v8122_v50  ;;  %v11587_v34 = vld [vmem:[#allocation259_spill] sm:$0xff]  ;;  %v11589_v10 = vld [vmem:[#allocation146_spill] sm:$0xff]  ;;  %v11595_v23 = vld [vmem:[#allocation81_spill] sm:$0xff] }
 0x2cb   :  { %vm11584_vm15 = vcmp.gt.f32.partialorder %v11583_v29, 0.0  ;;  %vm11586_vm0 = vcmp.gt.f32.partialorder %v11585_v26, 0.0  ;;  %vm11588_vm13 = vcmp.gt.f32.partialorder %v11587_v34, 0.0  ;;  %vm11590_vm10 = vcmp.gt.f32.partialorder %v11589_v10, 0.0  ;;  %v11591_v50 = vld [vmem:[#allocation79_spill] sm:$0xff]  ;;  %v11593_v29 = vld [vmem:[#allocation260_spill] sm:$0xff] }
 0x2cc   :  { %v8392_v31 = vsel %vm11584_vm15, 1.0, %v11541_v56  ;;  %v8397_v40 = vsel %vm11586_vm0, 1.0, %v11541_v56  ;;  %v8402_v43 = vsel %vm11588_vm13, 1.0, %v11541_v56  ;;  %v8407_v14 = vsel %vm11590_vm10, 1.0, %v11541_v56  ;;  %v11597_v10 = vld [vmem:[#allocation262_spill] sm:$0xff]  ;;  %v11614_v28 = vld [vmem:[#allocation268_spill] sm:$0xff] }
 0x2cd   :  { %vm11592_vm14 = vcmp.gt.f32.partialorder %v11591_v50, 0.0  ;;  %vm11594_vm15 = vcmp.gt.f32.partialorder %v11593_v29, 0.0  ;;  %vm11596_vm0 = vcmp.gt.f32.partialorder %v11595_v23, 0.0  ;;  %v2781_v5 = vadd.f32 %v2780_v15, %v8129_v19  ;;  %v11599_v50 = vld [vmem:[#allocation82_spill] sm:$0xff]  ;;  %v11602_v29 = vld [vmem:[#allocation151_spill] sm:$0xff]  ;;  %v11605_v23 = vld [vmem:[#allocation84_spill] sm:$0xff] }
 0x2ce   :  { %v8412_v1 = vsel %vm11592_vm14, 1.0, %v11541_v56  ;;  %v8417_v26 = vsel %vm11594_vm15, 1.0, %v11541_v56  ;;  %v8422_v34 = vsel %vm11596_vm0, 1.0, %v11541_v56  ;;  %vm11598_vm13 = vcmp.gt.f32.partialorder %v11597_v10, 0.0  ;;  %v11608_v19 = vld [vmem:[#allocation152_spill] sm:$0xff]  ;;  %v11611_v10 = vld [vmem:[#allocation267_spill] sm:$0xff] }
 0x2cf   :  { %v8428_v45 = vsel %vm11598_vm13, 1.0, %v11541_v56  ;;  %vm11600_vm10 = vcmp.gt.f32.partialorder %v11599_v50, 0.0  ;;  %vm11603_vm14 = vcmp.gt.f32.partialorder %v11602_v29, 0.0  ;;  %vm11606_vm15 = vcmp.gt.f32.partialorder %v11605_v23, 0.0  ;;  %v11617_v23 = vld [vmem:[#allocation89_spill] sm:$0xff]  ;;  %v11645_v48 = vld [vmem:[#allocation195_spill] sm:$0xff] }
 0x2d0   :  { %v8433_v41 = vsel %vm11600_vm10, 1.0, %v11541_v56  ;;  %v8438_v27 = vsel %vm11603_vm14, 1.0, %v11541_v56  ;;  %v8443_v53 = vsel %vm11606_vm15, 1.0, %v11541_v56  ;;  %vm11609_vm0 = vcmp.gt.f32.partialorder %v11608_v19, 0.0  ;;  %v11620_v19 = vld [vmem:[#allocation157_spill] sm:$0xff]  ;;  %v8508_v13 = vld [vmem:[#allocation7 + $0x2e0] sm:$0xff] }
 0x2d1   :  { %11601 = vst [vmem:[#allocation147_spill] sm:$0xff] %v8433_v41  ;;  %11604 = vst [vmem:[#allocation80_spill] sm:$0xff] %v8438_v27  ;;  %v8448_v15 = vsel %vm11609_vm0, 1.0, %v11541_v56  ;;  %vm11612_vm13 = vcmp.gt.f32.partialorder %v11611_v10, 0.0  ;;  %vm11615_vm10 = vcmp.gt.f32.partialorder %v11614_v28, 0.0  ;;  %v2782_v57 = vadd.f32 %v2781_v5, %v8209_v8  ;;  %v11623_v10 = vld [vmem:[#allocation281_spill] sm:$0xff] }
 0x2d2   :  { %11607 = vst [vmem:[#allocation261_spill] sm:$0xff] %v8443_v53  ;;  %11610 = vst [vmem:[#allocation148_spill] sm:$0xff] %v8448_v15  ;;  %v8453_v50 = vsel %vm11612_vm13, 1.0, %v11541_v56  ;;  %v8458_v29 = vsel %vm11615_vm10, 1.0, %v11541_v56  ;;  %vm11618_vm14 = vcmp.gt.f32.partialorder %v11617_v23, 0.0  ;;  %vm11621_vm15 = vcmp.gt.f32.partialorder %v11620_v19, 0.0 }
 0x2d3   :  { %11613 = vst [vmem:[#allocation282_spill] sm:$0xff] %v8453_v50  ;;  %11616 = vst [vmem:[#allocation263_spill] sm:$0xff] %v8458_v29  ;;  %v8464_v33 = vsel %vm11618_vm14, 1.0, %v11541_v56  ;;  %v8469_v24 = vsel %vm11621_vm15, 1.0, %v11541_v56  ;;  %vm11624_vm0 = vcmp.gt.f32.partialorder %v11623_v10, 0.0  ;;  %v11625_v28 = vld [vmem:[#allocation284_spill] sm:$0xff]  ;;  %v2783_v42 = vadd.f32 %v2782_v57, %v8212_v44 }
 0x2d4   :  { %11619 = vst [vmem:[#allocation150_spill] sm:$0xff] %v8464_v33  ;;  %11622 = vst [vmem:[#allocation83_spill] sm:$0xff] %v8469_v24  ;;  %v3000_v49 = vsel %vm11624_vm0, 1.0, %v11541_v56  ;;  %vm11626_vm13 = vcmp.gt.f32.partialorder %v11625_v28, 0.0  ;;  %v11627_v8 = vld [vmem:[#allocation285_spill] sm:$0xff]  ;;  %v11631_v19 = vld [vmem:[#allocation286_spill] sm:$0xff] }
 0x2d5   :  { %v3001_v36 = vsel %vm11626_vm13, 1.0, %v11541_v56  ;;  %vm11628_vm10 = vcmp.gt.f32.partialorder %v11627_v8, 0.0  ;;  %v11629_v23 = vld [vmem:[#allocation177_spill] sm:$0xff]  ;;  %vm11632_vm15 = vcmp.gt.f32.partialorder %v11631_v19, 0.0  ;;  %v11633_v10 = vld [vmem:[#allocation288_spill] sm:$0xff]  ;;  %v11635_v28 = vld [vmem:[#allocation18_spill] sm:$0xff] }
 0x2d6   :  { %v3002_v5 = vsel %vm11628_vm10, 1.0, %v11541_v56  ;;  %vm11630_vm14 = vcmp.gt.f32.partialorder %v11629_v23, 0.0  ;;  %v3004_v17 = vsel %vm11632_vm15, 1.0, %v11541_v56  ;;  %vm11634_vm0 = vcmp.gt.f32.partialorder %v11633_v10, 0.0  ;;  %v11637_v8 = vld [vmem:[#allocation186_spill] sm:$0xff]  ;;  %v11639_v23 = vld [vmem:[#allocation289_spill] sm:$0xff] }
 0x2d7   :  { %v3003_v20 = vsel %vm11630_vm14, 1.0, %v11541_v56  ;;  %v3005_v32 = vsel %vm11634_vm0, 1.0, %v11541_v56  ;;  %vm11636_vm13 = vcmp.gt.f32.partialorder %v11635_v28, 0.0  ;;  %vm11638_vm10 = vcmp.gt.f32.partialorder %v11637_v8, 0.0  ;;  %v11641_v19 = vld [vmem:[#allocation291_spill] sm:$0xff]  ;;  %v11643_v44 = vld [vmem:[#allocation194_spill] sm:$0xff] }
 0x2d8   :  { %v3006_v16 = vsel %vm11636_vm13, 1.0, %v11541_v56  ;;  %v3007_v22 = vsel %vm11638_vm10, 1.0, %v11541_v56  ;;  %vm11640_vm14 = vcmp.gt.f32.partialorder %v11639_v23, 0.0  ;;  %vm11642_vm15 = vcmp.gt.f32.partialorder %v11641_v19, 0.0  ;;  %v11647_v23 = vld [vmem:[#allocation13_spill] sm:$0xff]  ;;  %v11649_v19 = vld [vmem:[#allocation23_spill] sm:$0xff] }
 0x2d9   :  { %v3008_v9 = vsel %vm11640_vm14, 1.0, %v11541_v56  ;;  %v3009_v57 = vsel %vm11642_vm15, 1.0, %v11541_v56  ;;  %vm11644_vm2 = vcmp.gt.f32.partialorder %v11643_v44, 0.0  ;;  %vm11646_vm0 = vcmp.gt.f32.partialorder %v11645_v48, 0.0  ;;  %v11651_v44 = vld [vmem:[#allocation14_spill] sm:$0xff]  ;;  %v11653_v59 = vld [vmem:[#allocation200_spill] sm:$0xff] }
 0x2da   :  { %v3010_v10 = vsel %vm11644_vm2, 1.0, %v11541_v56  ;;  %v3011_v28 = vsel %vm11646_vm0, 1.0, %v11541_v56  ;;  %vm698_vm13 = vcmp.gt.f32.partialorder %v8508_v13, 0.0  ;;  %v2784_v8 = vadd.f32 %v2783_v42, %v8222_v60  ;;  %v11655_v42 = vld [vmem:[#allocation293_spill] sm:$0xff]  ;;  %v11659_v51 = vld [vmem:[#allocation16_spill] sm:$0xff]  ;;  %v8545_v33 = vld [vmem:[#allocation7 + $0x2e8] sm:$0xff] }
 0x2db   :  { %vm11648_vm10 = vcmp.gt.f32.partialorder %v11647_v23, 0.0  ;;  %vm11650_vm14 = vcmp.gt.f32.partialorder %v11649_v19, 0.0  ;;  %vm11652_vm2 = vcmp.gt.f32.partialorder %v11651_v44, 0.0  ;;  %vm11654_vm15 = vcmp.gt.f32.partialorder %v11653_v59, 0.0  ;;  %v11657_v23 = vld [vmem:[#allocation24_spill] sm:$0xff]  ;;  %v11663_v29 = vld [vmem:[#allocation295_spill] sm:$0xff] }
 0x2dc   :  { %v3012_v25 = vsel %vm11648_vm10, 1.0, %v11541_v56  ;;  %v8518_v30 = vsel %vm11650_vm14, 1.0, %v11541_v56  ;;  %v8523_v48 = vsel %vm11652_vm2, 1.0, %v11541_v56  ;;  %v8528_v24 = vsel %vm11654_vm15, 1.0, %v11541_v56  ;;  %v8548_v59 = vld [vmem:[#allocation7 + $0x2f0] sm:$0xff]  ;;  %v11665_v18 = vld [vmem:[#allocation26_spill] sm:$0xff] }
 0x2dd   :  { %vm11656_vm0 = vcmp.gt.f32.partialorder %v11655_v42, 0.0  ;;  %vm11658_vm10 = vcmp.gt.f32.partialorder %v11657_v23, 0.0  ;;  %vm11660_vm14 = vcmp.gt.f32.partialorder %v11659_v51, 0.0  ;;  %vm9631_vm2 = vcmp.gt.f32.partialorder %v8545_v33, 0.0  ;;  %11661 = vst [vmem:[#allocation264_spill] sm:$0xff] %v8548_v59  ;;  %v8551_v42 = vld [vmem:[#allocation7 + $0x2f8] sm:$0xff] }
 0x2de   :  { %v8533_v60 = vsel %vm11656_vm0, 1.0, %v11541_v56  ;;  %v8538_v19 = vsel %vm11658_vm10, 1.0, %v11541_v56  ;;  %v8543_v44 = vsel %vm11660_vm14, 1.0, %v11541_v56  ;;  %vm9635_vm15 = vcmp.gt.f32.partialorder %v8548_v59, 0.0  ;;  %11662 = vst [vmem:[#allocation85_spill] sm:$0xff] %v8551_v42  ;;  %v11668_v50 = vld [vmem:[#allocation206_spill] sm:$0xff] }
 0x2df   :  { %vm9632_vm0 = vcmp.gt.f32.partialorder %v8551_v42, 0.0  ;;  %v2785_v23 = vadd.f32 %v2784_v8, %v8229_v11  ;;  %vm11664_vm10 = vcmp.gt.f32.partialorder %v11663_v29, 0.0  ;;  %vm11666_vm14 = vcmp.gt.f32.partialorder %v11665_v18, 0.0  ;;  %v8570_v46 = vld [vmem:[#allocation7 + $0x300] sm:$0xff]  ;;  %v8573_v11 = vld [vmem:[#allocation7 + $0x308] sm:$0xff]  ;;  %v11676_v18 = vld [vmem:[#allocation28_spill] sm:$0xff] }
 0x2e0   :  { %v8558_v51 = vsel %vm11664_vm10, 1.0, %v11541_v56  ;;  %v8563_v0 = vsel %vm11666_vm14, 1.0, %v11541_v56  ;;  %vm11669_vm4 = vcmp.gt.f32.partialorder %v11668_v50, 0.0  ;;  %11671 = vst [vmem:[#allocation153_spill] sm:$0xff] %v8570_v46  ;;  %vm9634_vm1 = vcmp.gt.f32.partialorder %v8570_v46, 0.0  ;;  %11672 = vst [vmem:[#allocation86_spill] sm:$0xff] %v8573_v11 }
 0x2e1   :  { %11667 = vst [vmem:[#allocation101_spill] sm:$0xff] %v8563_v0  ;;  %v8568_v15 = vsel %vm11669_vm4, 1.0, %v11541_v56  ;;  %vm9633_vm5 = vcmp.gt.f32.partialorder %v8573_v11, 0.0  ;;  %v11673_v29 = vld [vmem:[#allocation102_spill] sm:$0xff]  ;;  %vm11677_vm14 = vcmp.gt.f32.partialorder %v11676_v18, 0.0  ;;  %v11679_v50 = vld [vmem:[#allocation208_spill] sm:$0xff]  ;;  %v2786_v41 = vadd.f32 %v2785_v23, %v8232_v52 }
 0x2e2   :  { %11670 = vst [vmem:[#allocation266_spill] sm:$0xff] %v8568_v15  ;;  %vm11674_vm10 = vcmp.gt.f32.partialorder %v11673_v29, 0.0  ;;  %v8584_v53 = vsel %vm11677_vm14, 1.0, %v11541_v56  ;;  %vm11680_vm4 = vcmp.gt.f32.partialorder %v11679_v50, 0.0  ;;  %v11682_v27 = vld [vmem:[#allocation31_spill] sm:$0xff]  ;;  %v11685_v29 = vld [vmem:[#allocation109_spill] sm:$0xff]  ;;  %v8618_v52 = vadd.f32 %v3000_v49, %v8330_v58 }
 0x2e3   :  { %v8579_v8 = vsel %vm11674_vm10, 1.0, %v11541_v56  ;;  %11678 = vst [vmem:[#allocation88_spill] sm:$0xff] %v8584_v53  ;;  %v8589_v15 = vsel %vm11680_vm4, 1.0, %v11541_v56  ;;  %vm11683_vm6 = vcmp.gt.f32.partialorder %v11682_v27, 0.0  ;;  %vm11686_vm10 = vcmp.gt.f32.partialorder %v11685_v29, 0.0  ;;  %v11687_v18 = vld [vmem:[#allocation110_spill] sm:$0xff] }
 0x2e4   :  { %11675 = vst [vmem:[#allocation155_spill] sm:$0xff] %v8579_v8  ;;  %11681 = vst [vmem:[#allocation269_spill] sm:$0xff] %v8589_v15  ;;  %v8594_v0 = vsel %vm11683_vm6, 1.0, %v11541_v56  ;;  %v8600_v8 = vsel %vm11686_vm10, 1.0, %v11541_v56  ;;  %vm11688_vm14 = vcmp.gt.f32.partialorder %v11687_v18, 0.0  ;;  %v11689_v50 = vld [vmem:[#allocation114_spill] sm:$0xff]  ;;  %v8621_v23 = vadd.f32 %v3001_v36, %v8335_v3 }
 0x2e5   :  { %11684 = vst [vmem:[#allocation283_spill] sm:$0xff] %v8594_v0  ;;  %v8605_v53 = vsel %vm11688_vm14, 1.0, %v11541_v56  ;;  %vm11690_vm4 = vcmp.gt.f32.partialorder %v11689_v50, 0.0  ;;  %v11692_v27 = vld [vmem:[#allocation36_spill] sm:$0xff]  ;;  %v8624_v29 = vadd.f32 %v3002_v5, %v8340_v55  ;;  %v2787_v18 = vadd.f32 %v2786_v41, %v8235_v39  ;;  %v11694_v49 = vld [vmem:[#allocation178_spill] sm:$0xff]  ;;  %v11696_v36 = vld [vmem:[#allocation219_spill] sm:$0xff] }
 0x2e6   :  { %v8610_v15 = vsel %vm11690_vm4, 1.0, %v11541_v56  ;;  %vm11693_vm6 = vcmp.gt.f32.partialorder %v11692_v27, 0.0  ;;  %v8628_v50 = vadd.f32 %v3003_v20, %v8345_v7  ;;  %v8634_v27 = vadd.f32 %v3005_v32, %v8356_v38  ;;  %v11698_v41 = vld [vmem:[#allocation184_spill] sm:$0xff]  ;;  %v8748_v7 = vld [vmem:[#allocation7 + $0x488] sm:$0xff] }
 0x2e7   :  { %11691 = vst [vmem:[#allocation156_spill] sm:$0xff] %v8610_v15  ;;  %v8615_v0 = vsel %vm11693_vm6, 1.0, %v11541_v56  ;;  %v8631_v15 = vadd.f32 %v3004_v17, %v8350_v21  ;;  %vm11695_vm10 = vcmp.gt.f32.partialorder %v11694_v49, 0.0  ;;  %vm11697_vm14 = vcmp.gt.f32.partialorder %v11696_v36, 0.0  ;;  %v11701_v32 = vld [vmem:[#allocation40_spill] sm:$0xff]  ;;  %v8687_v36 = vld [vmem:[#allocation7 + $0x458] sm:$0xff] }
 0x2e8   :  { %v8639_v58 = vsel %vm11695_vm10, 1.0, %v11541_v56  ;;  %v8644_v3 = vsel %vm11697_vm14, 1.0, %v11541_v56  ;;  %vm11699_vm4 = vcmp.gt.f32.partialorder %v11698_v41, 0.0  ;;  %v8652_v17 = vadd.f32 %v3006_v16, %v8361_v47  ;;  %v8684_v49 = vld [vmem:[#allocation7 + $0x450] sm:$0xff]  ;;  %11717 = vst [vmem:[#allocation19_spill] sm:$0xff] %v8748_v7 }
 0x2e9   :  { %v8649_v20 = vsel %vm11699_vm4, 1.0, %v11541_v56  ;;  %v2788_v39 = vadd.f32 %v2787_v18, %v8246_v6  ;;  %vm11702_vm6 = vcmp.gt.f32.partialorder %v11701_v32, 0.0  ;;  %v8663_v21 = vsel %vm696_vm12, 1.0, %v11541_v56 }
 0x2ea   :  { %11700 = vst [vmem:[#allocation271_spill] sm:$0xff] %v8652_v17  ;;  %v8658_v55 = vsel %vm11702_vm6, 1.0, %v11541_v56  ;;  %v8668_v5 = vsel %vm697_vm8, 1.0, %v11541_v56  ;;  %v8673_v16 = vsel %vm698_vm13, 1.0, %v11541_v56  ;;  %v8676_v6 = vadd.f32 %v3007_v22, %v8366_v61  ;;  %v8700_v61 = vld [vmem:[#allocation7 + $0x460] sm:$0xff] }
 0x2eb   :  { %v8679_v47 = vadd.f32 %v3008_v9, %v8371_v4  ;;  %v8682_v18 = vadd.f32 %v3009_v57, %v8376_v2  ;;  %vm744_vm12 = vcmp.gt.f32.partialorder %v8684_v49, 0.0  ;;  %vm745_vm8 = vcmp.gt.f32.partialorder %v8687_v36, 0.0  ;;  %v8703_v4 = vld [vmem:[#allocation7 + $0x468] sm:$0xff]  ;;  %v8706_v2 = vld [vmem:[#allocation7 + $0x470] sm:$0xff]  ;;  %v8731_v57 = vld [vmem:[#allocation7 + $0x480] sm:$0xff] }
 0x2ec   :  { %11705 = vst [vmem:[#allocation158_spill] sm:$0xff] %v8676_v6  ;;  %v2789_v41 = vadd.f32 %v2788_v39, %v8255_v12  ;;  %v8692_v32 = vadd.f32 %v3010_v10, %v8381_v62  ;;  %v8695_v22 = vadd.f32 %v3011_v28, %v8386_v35  ;;  %v8698_v9 = vadd.f32 %v3012_v25, %v8392_v31  ;;  %v8728_v31 = vld [vmem:[#allocation7 + $0x478] sm:$0xff]  ;;  %v11770_v17 = vld [vmem:[#allocation222_spill] sm:$0xff] }
 0x2ed   :  { %11706 = vst [vmem:[#allocation91_spill] sm:$0xff] %v8679_v47  ;;  %11707 = vst [vmem:[#allocation176_spill] sm:$0xff] %v8682_v18  ;;  %vm746_vm10 = vcmp.gt.f32.partialorder %v8700_v61, 0.0  ;;  %vm747_vm14 = vcmp.gt.f32.partialorder %v8703_v4, 0.0  ;;  %vm748_vm4 = vcmp.gt.f32.partialorder %v8706_v2, 0.0  ;;  %v8712_v12 = vsel %vm9631_vm2, 1.0, %v11541_v56 }
 0x2ee   :  { %11708 = vst [vmem:[#allocation179_spill] sm:$0xff] %v8692_v32  ;;  %11709 = vst [vmem:[#allocation213_spill] sm:$0xff] %v8695_v22  ;;  %v8717_v25 = vsel %vm9635_vm15, 1.0, %v11541_v56  ;;  %v8722_v62 = vsel %vm9632_vm0, 1.0, %v11541_v56  ;;  %v8726_v35 = vadd.f32 %v8518_v30, %v8397_v40  ;;  %vm749_vm6 = vcmp.gt.f32.partialorder %v8728_v31, 0.0  ;;  %v11749_v32 = vld [vmem:[#allocation249_spill] sm:$0xff] }
 0x2ef   :  { %11710 = vst [vmem:[#allocation272_spill] sm:$0xff] %v8698_v9  ;;  %11711 = vst [vmem:[#allocation180_spill] sm:$0xff] %v8703_v4  ;;  %vm750_vm2 = vcmp.gt.f32.partialorder %v8731_v57, 0.0  ;;  %v2790_v10 = vadd.f32 %v2789_v41, %v8258_v37  ;;  %v8738_v28 = vsel %vm9634_vm1, 1.0, %v11541_v56  ;;  %v8743_v30 = vsel %vm9633_vm5, 1.0, %v11541_v56  ;;  %v8766_v9 = vld [vmem:[#allocation7 + $0x490] sm:$0xff] }
 0x2f0   :  { %11712 = vst [vmem:[#allocation112_spill] sm:$0xff] %v8706_v2  ;;  %11713 = vst [vmem:[#allocation287_spill] sm:$0xff] %v8726_v35  ;;  %v3049_v39 = vsel %vm704_vm11, 1.0, %v11541_v56  ;;  %vm751_vm0 = vcmp.gt.f32.partialorder %v8748_v7, 0.0  ;;  %v3050_v38 = vsel %vm705_vm9, 1.0, %v11541_v56  ;;  %v8756_v41 = vadd.f32 %v8523_v48, %v8402_v43  ;;  %v11728_v48 = vld [vmem:[#allocation107_spill] sm:$0xff] }
 0x2f1   :  { %11714 = vst [vmem:[#allocation214_spill] sm:$0xff] %v8728_v31  ;;  %11715 = vst [vmem:[#allocation183_spill] sm:$0xff] %v8731_v57  ;;  %v8760_v35 = vadd.f32 %v8528_v24, %v8407_v14  ;;  %v8764_v40 = vadd.f32 %v8533_v60, %v8412_v1  ;;  %vm752_vm11 = vcmp.gt.f32.partialorder %v8766_v9, 0.0  ;;  %v2791_v22 = vadd.f32 %v2790_v10, %v8263_v54  ;;  %v11726_v14 = vld [vmem:[#allocation163_spill] sm:$0xff]  ;;  %v11753_v47 = vld [vmem:[#allocation88_spill] sm:$0xff] }
 0x2f2   :  { %11719 = vst [vmem:[#allocation290_spill] sm:$0xff] %v8756_v41  ;;  %11722 = vst [vmem:[#allocation217_spill] sm:$0xff] %v8766_v9  ;;  %v8772_v37 = vadd.f32 %v8538_v19, %v8417_v26  ;;  %v8776_v43 = vadd.f32 %v8543_v44, %v8422_v34  ;;  %v8780_v24 = vadd.f32 %v8558_v51, %v8428_v45  ;;  %vm11727_vm9 = vcmp.gt.f32.partialorder %v11726_v14, 0.0  ;;  %v11730_v26 = vld [vmem:[#allocation210_spill] sm:$0xff]  ;;  %v11740_v34 = vld [vmem:[#allocation147_spill] sm:$0xff] }
 0x2f3   :  { %11720 = vst [vmem:[#allocation116_spill] sm:$0xff] %v8760_v35  ;;  %11721 = vst [vmem:[#allocation189_spill] sm:$0xff] %v8764_v40  ;;  %v3051_v1 = vsel %vm11727_vm9, 1.0, %v11541_v56  ;;  %vm11729_vm5 = vcmp.gt.f32.partialorder %v11728_v48, 0.0  ;;  %vm11731_vm1 = vcmp.gt.f32.partialorder %v11730_v26, 0.0  ;;  %v3081_v19 = vsel %vm736_vm3, 1.0, %v11541_v56 }
 0x2f4   :  { %11723 = vst [vmem:[#allocation20_spill] sm:$0xff] %v8772_v37  ;;  %11724 = vst [vmem:[#allocation119_spill] sm:$0xff] %v8776_v43  ;;  %v8788_v54 = vsel %vm11729_vm5, 1.0, %v11541_v56  ;;  %v8793_v60 = vsel %vm11731_vm1, 1.0, %v11541_v56  ;;  %v2792_v45 = vadd.f32 %v2791_v22, %v8272_v63  ;;  %v11733_v44 = vld [vmem:[#allocation230_spill] sm:$0xff]  ;;  %v3083_v14 = vsel %vm738_vm7, 1.0, %v11541_v56 }
 0x2f5   :  { %11725 = vst [vmem:[#allocation197_spill] sm:$0xff] %v8780_v24  ;;  %vm11734_vm15 = vcmp.gt.f32.partialorder %v11733_v44, 0.0  ;;  %v11736_v48 = vld [vmem:[#allocation233_spill] sm:$0xff]  ;;  %v11738_v24 = vld [vmem:[#allocation54_spill] sm:$0xff]  ;;  %v11743_v63 = vld [vmem:[#allocation80_spill] sm:$0xff]  ;;  %v3096_v2 = vsel %vm751_vm0, 1.0, %v11541_v56  ;;  %v2522_v7 = vadd.f32 %v3051_v1, %v8624_v29 }
 0x2f6   :  { %v3082_v51 = vsel %vm11734_vm15, 1.0, %v11541_v56  ;;  %vm11737_vm5 = vcmp.gt.f32.partialorder %v11736_v48, 0.0  ;;  %vm11739_vm1 = vcmp.gt.f32.partialorder %v11738_v24, 0.0  ;;  %v11741_v37 = vld [vmem:[#allocation101_spill] sm:$0xff]  ;;  %v11744_v22 = vld [vmem:[#allocation266_spill] sm:$0xff]  ;;  %v11747_v41 = vld [vmem:[#allocation155_spill] sm:$0xff]  ;;  %v2793_v18 = vadd.f32 %v2792_v45, %v11749_v32 }
 0x2f7   :  { %v3084_v26 = vsel %vm11737_vm5, 1.0, %v11541_v56  ;;  %v3085_v43 = vsel %vm11739_vm1, 1.0, %v11541_v56  ;;  %v8813_v40 = vadd.f32 %v11741_v37, %v11740_v34  ;;  %v8817_v44 = vadd.f32 %v11744_v22, %v11743_v63  ;;  %v11746_v35 = vld [vmem:[#allocation261_spill] sm:$0xff]  ;;  %v11750_v48 = vld [vmem:[#allocation234_spill] sm:$0xff]  ;;  %v11752_v24 = vld [vmem:[#allocation148_spill] sm:$0xff] }
 0x2f8   :  { %v8821_v10 = vadd.f32 %v11747_v41, %v11746_v35  ;;  %vm11751_vm7 = vcmp.gt.f32.partialorder %v11750_v48, 0.0  ;;  %v8829_v46 = vadd.f32 %v11753_v47, %v11752_v24  ;;  %v11755_v37 = vld [vmem:[#allocation282_spill] sm:$0xff]  ;;  %v11756_v34 = vld [vmem:[#allocation269_spill] sm:$0xff]  ;;  %v11758_v63 = vld [vmem:[#allocation56_spill] sm:$0xff]  ;;  %v3089_v41 = vsel %vm744_vm12, 1.0, %v11541_v56 }
 0x2f9   :  { %11742 = vst [vmem:[#allocation39_spill] sm:$0xff] %v8813_v40  ;;  %11745 = vst [vmem:[#allocation198_spill] sm:$0xff] %v8817_v44  ;;  %v3086_v11 = vsel %vm11751_vm7, 1.0, %v11541_v56  ;;  %v8833_v40 = vadd.f32 %v11756_v34, %v11755_v37  ;;  %vm11759_vm3 = vcmp.gt.f32.partialorder %v11758_v63, 0.0  ;;  %v11760_v35 = vld [vmem:[#allocation236_spill] sm:$0xff]  ;;  %v3090_v47 = vsel %vm745_vm8, 1.0, %v11541_v56 }
 0x2fa   :  { %11748 = vst [vmem:[#allocation121_spill] sm:$0xff] %v8821_v10  ;;  %11754 = vst [vmem:[#allocation93_spill] sm:$0xff] %v8829_v46  ;;  %v3087_v22 = vsel %vm11759_vm3, 1.0, %v11541_v56  ;;  %vm11761_vm15 = vcmp.gt.f32.partialorder %v11760_v35, 0.0  ;;  %v11762_v45 = vld [vmem:[#allocation71_spill] sm:$0xff]  ;;  %v3091_v24 = vsel %vm746_vm10, 1.0, %v11541_v56 }
 0x2fb   :  { %11757 = vst [vmem:[#allocation292_spill] sm:$0xff] %v8833_v40  ;;  %v3088_v32 = vsel %vm11761_vm15, 1.0, %v11541_v56  ;;  %v2794_v48 = vadd.f32 %v2793_v18, %v11762_v45  ;;  %v3092_v37 = vsel %vm747_vm14, 1.0, %v11541_v56  ;;  %v3093_v34 = vsel %vm748_vm4, 1.0, %v11541_v56  ;;  %v11763_v35 = vld [vmem:[#allocation263_spill] sm:$0xff]  ;;  %v11766_v46 = vld [vmem:[#allocation150_spill] sm:$0xff] }
 0x2fc   :  { %v3094_v63 = vsel %vm749_vm6, 1.0, %v11541_v56  ;;  %v3095_v18 = vsel %vm750_vm2, 1.0, %v11541_v56  ;;  %v11764_v45 = vld [vmem:[#allocation283_spill] sm:$0xff]  ;;  %v8869_v10 = vadd.f32 %v8600_v8, %v11766_v46  ;;  %v11768_v44 = vld [vmem:[#allocation252_spill] sm:$0xff]  ;;  %v2520_v46 = vadd.f32 %v3050_v38, %v8621_v23  ;;  %v11777_v23 = vld [vmem:[#allocation21_spill] sm:$0xff] }
 0x2fd   :  { %v8865_v40 = vadd.f32 %v11764_v45, %v11763_v35  ;;  %v2795_v6 = vadd.f32 %v2794_v48, %v11768_v44  ;;  %v11769_v31 = vld [vmem:[#allocation83_spill] sm:$0xff]  ;;  %v3097_v35 = vsel %vm752_vm11, 1.0, %v11541_v56  ;;  %v2518_v45 = vadd.f32 %v3049_v39, %v8618_v52  ;;  %v11772_v8 = vld [vmem:[#allocation188_spill] sm:$0xff]  ;;  %v11778_v39 = vld [vmem:[#allocation258_spill] sm:$0xff] }
 0x2fe   :  { %11767 = vst [vmem:[#allocation199_spill] sm:$0xff] %v8869_v10  ;;  %v2581_v42 = vadd.f32 %v8605_v53, %v11769_v31  ;;  %v11771_v57 = vld [vmem:[#allocation75_spill] sm:$0xff]  ;;  %v11773_v44 = vld [vmem:[#allocation156_spill] sm:$0xff]  ;;  %v2591_v38 = vadd.f32 %v11778_v39, %v11777_v23  ;;  %v11789_v39 = vld [vmem:[#allocation66_spill] sm:$0xff] }
 0x2ff   :  { %11765 = vst [vmem:[#allocation122_spill] sm:$0xff] %v8865_v40  ;;  %v2583_v4 = vadd.f32 %v11771_v57, %v11770_v17  ;;  %v2585_v48 = vadd.f32 %v11773_v44, %v11772_v8  ;;  %v11774_v10 = vld [vmem:[#allocation72_spill] sm:$0xff]  ;;  %v11775_v31 = vld [vmem:[#allocation59_spill] sm:$0xff]  ;;  %v11779_v8 = vld [vmem:[#allocation253_spill] sm:$0xff] }
 0x300   :  { %v2796_v40 = vadd.f32 %v2795_v6, %v11774_v10  ;;  %v8888_v59 = vadd.f32 %v3081_v19, %v2581_v42  ;;  %v2587_v57 = vadd.f32 %v8615_v0, %v11775_v31  ;;  %v11776_v9 = vld [vmem:[#allocation239_spill] sm:$0xff]  ;;  %v11780_v6 = vld [vmem:[#allocation22_spill] sm:$0xff]  ;;  %v11781_v42 = vld [vmem:[#allocation60_spill] sm:$0xff] }
 0x301   :  { %v8890_v53 = vadd.f32 %v3082_v51, %v2583_v4  ;;  %v8892_v17 = vadd.f32 %v3083_v14, %v2585_v48  ;;  %v2589_v52 = vadd.f32 %v8639_v58, %v11776_v9  ;;  %v2593_v29 = vadd.f32 %v8644_v3, %v11780_v6  ;;  %v11782_v1 = vld [vmem:[#allocation240_spill] sm:$0xff]  ;;  %v11783_v58 = vld [vmem:[#allocation61_spill] sm:$0xff]  ;;  %v11784_v10 = vld [vmem:[#allocation255_spill] sm:$0xff] }
 0x302   :  { %v2797_v44 = vadd.f32 %v2796_v40, %v11779_v8  ;;  %v2595_v4 = vadd.f32 %v8649_v20, %v11781_v42  ;;  %v2597_v19 = vadd.f32 %v8658_v55, %v11782_v1  ;;  %v8907_v51 = vadd.f32 %v3084_v26, %v2587_v57  ;;  %v11785_v55 = vld [vmem:[#allocation241_spill] sm:$0xff]  ;;  %v11802_v49 = vld [vmem:[#allocation62_spill] sm:$0xff] }
 0x303   :  { %v8909_v0 = vadd.f32 %v3085_v43, %v2589_v52  ;;  %v8911_v14 = vadd.f32 %v3086_v11, %v2591_v38  ;;  %v2599_v9 = vadd.f32 %v8663_v21, %v11783_v58  ;;  %v8916_v48 = vadd.f32 %v3087_v22, %v2593_v29  ;;  %v11786_v43 = vld [vmem:[#allocation65_spill] sm:$0xff]  ;;  %v11788_v21 = vld [vmem:[#allocation256_spill] sm:$0xff] }
 0x304   :  { %v2798_v40 = vadd.f32 %v2797_v44, %v11784_v10  ;;  %v8918_v3 = vadd.f32 %v3088_v32, %v2595_v4  ;;  %v8920_v31 = vadd.f32 %v3089_v41, %v2597_v19  ;;  %v2601_v26 = vadd.f32 %v8668_v5, %v11785_v55  ;;  %v11787_v57 = vld [vmem:[#allocation245_spill] sm:$0xff]  ;;  %v11790_v32 = vld [vmem:[#allocation247_spill] sm:$0xff]  ;;  %v11791_v38 = vld [vmem:[#allocation68_spill] sm:$0xff] }
 0x305   :  { %v8922_v20 = vadd.f32 %v3090_v47, %v2599_v9  ;;  %v2603_v11 = vadd.f32 %v8673_v16, %v11786_v43  ;;  %v2605_v52 = vadd.f32 %v8712_v12, %v11787_v57  ;;  %v2607_v22 = vadd.f32 %v8717_v25, %v11789_v39  ;;  %v11792_v16 = vld [vmem:[#allocation248_spill] sm:$0xff]  ;;  %v11793_v6 = vld [vmem:[#allocation77_spill] sm:$0xff]  ;;  %v11805_v43 = vld [vmem:[#allocation123_spill] sm:$0xff] }
 0x306   :  { %v2799_v23 = vadd.f32 %v2798_v40, %v11788_v21  ;;  %v2609_v41 = vadd.f32 %v8722_v62, %v11790_v32  ;;  %v2611_v47 = vadd.f32 %v8738_v28, %v11791_v38  ;;  %v8937_v8 = vadd.f32 %v3091_v24, %v2601_v26  ;;  %v11794_v62 = vld [vmem:[#allocation274_spill] sm:$0xff]  ;;  %v11795_v1 = vld [vmem:[#allocation185_spill] sm:$0xff] }
 0x307   :  { %v8939_v5 = vadd.f32 %v3092_v37, %v2603_v11  ;;  %v8941_v44 = vadd.f32 %v3093_v34, %v2605_v52  ;;  %v2613_v12 = vadd.f32 %v8743_v30, %v11792_v16  ;;  %v8946_v42 = vadd.f32 %v3094_v63, %v2607_v22  ;;  %v11796_v30 = vld [vmem:[#allocation142_spill] sm:$0xff]  ;;  %v11797_v58 = vld [vmem:[#allocation181_spill] sm:$0xff]  ;;  %v11798_v63 = vld [vmem:[#allocation55_spill] sm:$0xff] }
 0x308   :  { %v2800_v29 = vadd.f32 %v2799_v23, %v11793_v6  ;;  %v8948_v25 = vadd.f32 %v3095_v18, %v2609_v41  ;;  %v8950_v4 = vadd.f32 %v3096_v2, %v2611_v47  ;;  %v1920_v28 = vsel %vm744_vm12, %v11794_v62, 0.0  ;;  %v11799_v18 = vld [vmem:[#allocation99_spill] sm:$0xff]  ;;  %v11800_v2 = vld [vmem:[#allocation108_spill] sm:$0xff]  ;;  %v11807_v52 = vld [vmem:[#allocation145_spill] sm:$0xff] }
 0x309   :  { %v2524_v24 = vadd.f32 %v8788_v54, %v8628_v50  ;;  %v8957_v37 = vadd.f32 %v3097_v35, %v2613_v12  ;;  %v2873_v34 = vadd.f32 %v2520_v46, %v2518_v45  ;;  %v2057_v19 = vadd.f32 %v11796_v30, %v11795_v1  ;;  %v11803_v50 = vld [vmem:[#allocation162_spill] sm:$0xff]  ;;  %v11806_v11 = vld [vmem:[#allocation235_spill] sm:$0xff]  ;;  %v11813_v41 = vld [vmem:[#allocation41_spill] sm:$0xff] }
 0x30a   :  { %v2060_v9 = vadd.f32 %v11798_v63, %v11797_v58  ;;  %v2801_v10 = vadd.f32 %v2800_v29, %v11799_v18  ;;  %vm11801_vm9 = vcmp.gt.f32.partialorder %v11800_v2, 0.0  ;;  %v1874_v55 = vsel %vm698_vm13, %v11802_v49, 0.0  ;;  %v11804_v46 = vld [vmem:[#allocation78_spill] sm:$0xff]  ;;  %v11808_v23 = vld [vmem:[#allocation211_spill] sm:$0xff]  ;;  %v11814_v16 = vld [vmem:[#allocation32_spill] sm:$0xff] }
 0x30b   :  { %v3054_v40 = vsel %vm11801_vm9, 1.0, %v11541_v56  ;;  %v1921_v54 = vsel %vm745_vm8, %v11803_v50, 0.0  ;;  %v2526_v35 = vadd.f32 %v8793_v60, %v8631_v15  ;;  %v2874_v45 = vadd.f32 %v2873_v34, %v2522_v7  ;;  %v11810_v39 = vld [vmem:[#allocation242_spill] sm:$0xff]  ;;  %v11816_v6 = vld [vmem:[#allocation63_spill] sm:$0xff]  ;;  %v11817_v29 = vld [vmem:[#allocation264_spill] sm:$0xff] }
 0x30c   :  { %v2059_v26 = vadd.f32 %v11804_v46, %v1920_v28  ;;  %v2062_v57 = vadd.f32 %v11806_v11, %v11805_v43  ;;  %v2802_v21 = vadd.f32 %v2801_v10, %v11807_v52  ;;  %vm11809_vm12 = vcmp.gt.f32.partialorder %v11808_v23, 0.0  ;;  %v11812_v22 = vld [vmem:[#allocation94_spill] sm:$0xff]  ;;  %v11819_v62 = vld [vmem:[#allocation165_spill] sm:$0xff]  ;;  %v11821_v34 = vld [vmem:[#allocation271_spill] sm:$0xff] }
 0x30d   :  { %v3055_v13 = vsel %vm11809_vm12, 1.0, %v11541_v56  ;;  %vm11811_vm13 = vcmp.gt.f32.partialorder %v8545_v33, 0.0  ;;  %v1922_v15 = vsel %vm746_vm10, %v11812_v22, 0.0  ;;  %v2528_v7 = vadd.f32 %v3054_v40, %v8634_v27  ;;  %v11822_v30 = vld [vmem:[#allocation187_spill] sm:$0xff]  ;;  %v11826_v10 = vld [vmem:[#allocation85_spill] sm:$0xff]  ;;  %v11828_v40 = vld [vmem:[#allocation96_spill] sm:$0xff] }
 0x30e   :  { %v1875_v36 = vsel %vm11811_vm13, %v11810_v39, 0.0  ;;  %v2875_v60 = vadd.f32 %v2874_v45, %v2524_v24  ;;  %v2061_v32 = vadd.f32 %v2060_v9, %v1921_v54  ;;  %v2064_v38 = vadd.f32 %v1874_v55, %v11813_v41  ;;  %v11825_v18 = vld [vmem:[#allocation243_spill] sm:$0xff]  ;;  %v11830_v50 = vld [vmem:[#allocation158_spill] sm:$0xff]  ;;  %v11834_v52 = vld [vmem:[#allocation64_spill] sm:$0xff] }
 0x30f   :  { %v2803_v47 = vadd.f32 %v2802_v21, %v2057_v19  ;;  %vm11815_vm8 = vcmp.gt.f32.partialorder %v11814_v16, 0.0  ;;  %vm11818_vm5 = vcmp.gt.f32.partialorder %v11817_v29, 0.0  ;;  %v1923_v61 = vsel %vm747_vm14, %v11819_v62, 0.0  ;;  %v11823_v19 = vld [vmem:[#allocation169_spill] sm:$0xff]  ;;  %v11831_v46 = vld [vmem:[#allocation126_spill] sm:$0xff]  ;;  %v11839_v22 = vld [vmem:[#allocation91_spill] sm:$0xff] }
 0x310   :  { %v3056_v12 = vsel %vm11815_vm8, 1.0, %v11541_v56  ;;  %v1876_v33 = vsel %vm11818_vm5, %v11816_v6, 0.0  ;;  %v2530_v1 = vadd.f32 %v3055_v13, %v11821_v34  ;;  %v2876_v27 = vadd.f32 %v2875_v60, %v2526_v35  ;;  %v11835_v21 = vld [vmem:[#allocation153_spill] sm:$0xff]  ;;  %v11844_v6 = vld [vmem:[#allocation86_spill] sm:$0xff]  ;;  %v11861_v39 = vld [vmem:[#allocation216_spill] sm:$0xff] }
 0x311   :  { %v2063_v24 = vadd.f32 %v2062_v57, %v1922_v15  ;;  %v2066_v58 = vadd.f32 %v1875_v36, %v11822_v30  ;;  %v2804_v63 = vadd.f32 %v2803_v47, %v2059_v26  ;;  %vm11824_vm10 = vcmp.gt.f32.partialorder %v11823_v19, 0.0  ;;  %v11832_v26 = vld [vmem:[#allocation111_spill] sm:$0xff]  ;;  %v11837_v13 = vld [vmem:[#allocation277_spill] sm:$0xff]  ;;  %v11869_v62 = vld [vmem:[#allocation290_spill] sm:$0xff] }
 0x312   :  { %v3057_v9 = vsel %vm11824_vm10, 1.0, %v11541_v56  ;;  %vm11827_vm1 = vcmp.gt.f32.partialorder %v11826_v10, 0.0  ;;  %v1924_v55 = vsel %vm748_vm4, %v11828_v40, 0.0  ;;  %v2532_v54 = vadd.f32 %v3056_v12, %v11830_v50  ;;  %v11840_v41 = vld [vmem:[#allocation193_spill] sm:$0xff]  ;;  %v11843_v12 = vld [vmem:[#allocation244_spill] sm:$0xff] }
 0x313   :  { %v1877_v2 = vsel %vm11827_vm1, %v11825_v18, 0.0  ;;  %v2877_v45 = vadd.f32 %v2876_v27, %v2528_v7  ;;  %v2065_v35 = vadd.f32 %v2064_v38, %v1923_v61  ;;  %v2068_v43 = vadd.f32 %v1876_v33, %v11831_v46  ;;  %v11846_v33 = vld [vmem:[#allocation167_spill] sm:$0xff]  ;;  %v11848_v61 = vld [vmem:[#allocation176_spill] sm:$0xff]  ;;  %v11849_v30 = vld [vmem:[#allocation45_spill] sm:$0xff] }
 0x314   :  { %v2805_v11 = vadd.f32 %v2804_v63, %v2061_v32  ;;  %vm11833_vm14 = vcmp.gt.f32.partialorder %v11832_v26, 0.0  ;;  %vm11836_vm7 = vcmp.gt.f32.partialorder %v11835_v21, 0.0  ;;  %v1925_v36 = vsel %vm749_vm6, %v11837_v13, 0.0  ;;  %v11841_v32 = vld [vmem:[#allocation35_spill] sm:$0xff]  ;;  %v11855_v50 = vld [vmem:[#allocation196_spill] sm:$0xff] }
 0x315   :  { %v3058_v57 = vsel %vm11833_vm14, 1.0, %v11541_v56  ;;  %v1878_v23 = vsel %vm11836_vm7, %v11834_v52, 0.0  ;;  %v2534_v15 = vadd.f32 %v3057_v9, %v11839_v22  ;;  %v2878_v60 = vadd.f32 %v2877_v45, %v2530_v1  ;;  %v11852_v9 = vld [vmem:[#allocation279_spill] sm:$0xff]  ;;  %v11863_v22 = vld [vmem:[#allocation272_spill] sm:$0xff] }
 0x316   :  { %v2067_v7 = vadd.f32 %v2066_v58, %v1924_v55  ;;  %v2070_v38 = vadd.f32 %v1877_v2, %v11840_v41  ;;  %v2806_v47 = vadd.f32 %v2805_v11, %v2063_v24  ;;  %vm11842_vm4 = vcmp.gt.f32.partialorder %v11841_v32, 0.0  ;;  %v11850_v24 = vld [vmem:[#allocation175_spill] sm:$0xff] }
 0x317   :  { %v3059_v16 = vsel %vm11842_vm4, 1.0, %v11541_v56  ;;  %vm11845_vm3 = vcmp.gt.f32.partialorder %v11844_v6, 0.0  ;;  %v1926_v28 = vsel %vm750_vm2, %v11846_v33, 0.0  ;;  %v2536_v34 = vadd.f32 %v3058_v57, %v11848_v61  ;;  %v11854_v2 = vld [vmem:[#allocation179_spill] sm:$0xff]  ;;  %v11860_v57 = vld [vmem:[#allocation213_spill] sm:$0xff] }
 0x318   :  { %v1879_v29 = vsel %vm11845_vm3, %v11843_v12, 0.0  ;;  %v2879_v27 = vadd.f32 %v2878_v60, %v2532_v54  ;;  %v2069_v1 = vadd.f32 %v2068_v43, %v1925_v36  ;;  %v2072_v58 = vadd.f32 %v1878_v23, %v11849_v30  ;;  %v11856_v54 = vld [vmem:[#allocation115_spill] sm:$0xff]  ;;  %v11872_v30 = vld [vmem:[#allocation116_spill] sm:$0xff] }
 0x319   :  { %v2807_v63 = vadd.f32 %v2806_v47, %v2065_v35  ;;  %vm11851_vm6 = vcmp.gt.f32.partialorder %v11850_v24, 0.0  ;;  %v1927_v10 = vsel %vm751_vm0, %v11852_v9, 0.0  ;;  %v2538_v40 = vadd.f32 %v3059_v16, %v11854_v2  ;;  %v11858_v35 = vld [vmem:[#allocation171_spill] sm:$0xff]  ;;  %v11873_v24 = vld [vmem:[#allocation124_spill] sm:$0xff]  ;;  %v11875_v9 = vld [vmem:[#allocation189_spill] sm:$0xff] }
 0x31a   :  { %v3060_v19 = vsel %vm11851_vm6, 1.0, %v11541_v56  ;;  %v2880_v49 = vadd.f32 %v2879_v27, %v2534_v15  ;;  %v2071_v55 = vadd.f32 %v2070_v38, %v1926_v28  ;;  %v2074_v45 = vadd.f32 %v1879_v29, %v11855_v50  ;;  %v11864_v38 = vld [vmem:[#allocation118_spill] sm:$0xff]  ;;  %v11866_v32 = vld [vmem:[#allocation287_spill] sm:$0xff]  ;;  %v11870_v27 = vld [vmem:[#allocation220_spill] sm:$0xff] }
 0x31b   :  { %v2808_v46 = vadd.f32 %v2807_v63, %v2067_v7  ;;  %vm11857_vm2 = vcmp.gt.f32.partialorder %v11856_v54, 0.0  ;;  %v1928_v26 = vsel %vm752_vm11, %v11858_v35, 0.0  ;;  %v2540_v52 = vadd.f32 %v3060_v19, %v11860_v57  ;;  %v11867_v29 = vld [vmem:[#allocation218_spill] sm:$0xff]  ;;  %v11876_v2 = vld [vmem:[#allocation149_spill] sm:$0xff] }
 0x31c   :  { %v3061_v43 = vsel %vm11857_vm2, 1.0, %v11541_v56  ;;  %v2881_v21 = vadd.f32 %v2880_v49, %v2536_v34  ;;  %v2073_v23 = vadd.f32 %v2072_v58, %v1927_v10  ;;  %vm11862_vm0 = vcmp.gt.f32.partialorder %v11861_v39, 0.0  ;;  %v11878_v49 = vld [vmem:[#allocation17_spill] sm:$0xff] }
 0x31d   :  { %v2809_v13 = vadd.f32 %v2808_v46, %v2069_v1  ;;  %v3062_v36 = vsel %vm11862_vm0, 1.0, %v11541_v56  ;;  %v2542_v15 = vadd.f32 %v3061_v43, %v11863_v22  ;;  %v2075_v7 = vadd.f32 %v2074_v45, %v1928_v26  ;;  %v11880_v50 = vld [vmem:[#allocation221_spill] sm:$0xff]  ;;  %v11882_v46 = vld [vmem:[#allocation20_spill] sm:$0xff]  ;;  %v11885_v26 = vld [vmem:[#allocation119_spill] sm:$0xff] }
 0x31e   :  { %v2882_v60 = vadd.f32 %v2881_v21, %v2538_v40  ;;  %vm11865_vm15 = vcmp.gt.f32.partialorder %v11864_v38, 0.0  ;;  %v2544_v16 = vadd.f32 %v3062_v36, %v11866_v32  ;;  %vm11868_vm11 = vcmp.gt.f32.partialorder %v11867_v29, 0.0  ;;  %v11883_v35 = vld [vmem:[#allocation125_spill] sm:$0xff]  ;;  %v11893_v32 = vld [vmem:[#allocation103_spill] sm:$0xff] }
 0x31f   :  { %v2810_v41 = vadd.f32 %v2809_v13, %v2071_v55  ;;  %v3063_v47 = vsel %vm11865_vm15, 1.0, %v11541_v56  ;;  %v3064_v33 = vsel %vm11868_vm11, 1.0, %v11541_v56  ;;  %vm11871_vm9 = vcmp.gt.f32.partialorder %v11870_v27, 0.0  ;;  %v11888_v39 = vld [vmem:[#allocation197_spill] sm:$0xff]  ;;  %v11897_v29 = vld [vmem:[#allocation39_spill] sm:$0xff] }
 0x320   :  { %v2883_v12 = vadd.f32 %v2882_v60, %v2540_v52  ;;  %v2546_v28 = vadd.f32 %v3063_v47, %v11869_v62  ;;  %v3065_v1 = vsel %vm11871_vm9, 1.0, %v11541_v56  ;;  %v2548_v58 = vadd.f32 %v3064_v33, %v11872_v30  ;;  %v11891_v38 = vld [vmem:[#allocation265_spill] sm:$0xff] }
 0x321   :  { %v2811_v6 = vadd.f32 %v2810_v41, %v2073_v23  ;;  %vm11874_vm12 = vcmp.gt.f32.partialorder %v11873_v24, 0.0  ;;  %v2550_v18 = vadd.f32 %v3065_v1, %v11875_v9  ;;  %vm11877_vm13 = vcmp.gt.f32.partialorder %v11876_v2, 0.0  ;;  %v11886_v23 = vld [vmem:[#allocation223_spill] sm:$0xff]  ;;  %v11903_v24 = vld [vmem:[#allocation121_spill] sm:$0xff] }
 0x322   :  { %v2884_v61 = vadd.f32 %v2883_v12, %v2542_v15  ;;  %v3066_v19 = vsel %vm11874_vm12, 1.0, %v11541_v56  ;;  %v2971_v40 = vsel %vm11877_vm13, 1.0, %v11541_v56  ;;  %vm11879_vm8 = vcmp.gt.f32.partialorder %v11878_v49, 0.0  ;;  %v11889_v15 = vld [vmem:[#allocation129_spill] sm:$0xff]  ;;  %v11895_v12 = vld [vmem:[#allocation192_spill] sm:$0xff]  ;;  %v11908_v49 = vld [vmem:[#allocation134_spill] sm:$0xff] }
 0x323   :  { %v2812_v34 = vadd.f32 %v2811_v6, %v2075_v7  ;;  %v3020_v55 = vsel %vm11879_vm8, 1.0, %v11541_v56  ;;  %vm11881_vm5 = vcmp.gt.f32.partialorder %v11880_v50, 0.0  ;;  %v2552_v54 = vadd.f32 %v3066_v19, %v11882_v46  ;;  %v11906_v2 = vld [vmem:[#allocation105_spill] sm:$0xff]  ;;  %v11910_v46 = vld [vmem:[#allocation87_spill] sm:$0xff] }
 0x324   :  { %v2885_v63 = vadd.f32 %v2884_v61, %v2544_v16  ;;  %v3067_v45 = vsel %vm11881_vm5, 1.0, %v11541_v56  ;;  %vm11884_vm10 = vcmp.gt.f32.partialorder %v11883_v35, 0.0  ;;  %v2557_v52 = vadd.f32 %v3020_v55, %v2971_v40 }
 0x325   :  { %2813 = vadd.xlane.f32.xlu0 %v2812_v34  ;;  %v3068_v11 = vsel %vm11884_vm10, 1.0, %v11541_v56  ;;  %v2554_v57 = vadd.f32 %v3067_v45, %v11885_v26  ;;  %vm11887_vm1 = vcmp.gt.f32.partialorder %v11886_v23, 0.0  ;;  %vm11890_vm14 = vcmp.gt.f32.partialorder %v11889_v15, 0.0  ;;  %v11900_v34 = vld [vmem:[#allocation198_spill] sm:$0xff] }
 0x326   :  { %v2886_v10 = vadd.f32 %v2885_v63, %v2546_v28  ;;  %v3069_v13 = vsel %vm11887_vm1, 1.0, %v11541_v56  ;;  %v2556_v36 = vadd.f32 %v3068_v11, %v11888_v39  ;;  %v3070_v60 = vsel %vm11890_vm14, 1.0, %v11541_v56  ;;  %v11898_v28 = vld [vmem:[#allocation225_spill] sm:$0xff]  ;;  %v11914_v11 = vld [vmem:[#allocation46_spill] sm:$0xff] }
 0x327   :  { %v2558_v7 = vadd.f32 %v3069_v13, %v2557_v52  ;;  %vm11892_vm7 = vcmp.gt.f32.partialorder %v11891_v38, 0.0  ;;  %vm11894_vm4 = vcmp.gt.f32.partialorder %v11893_v32, 0.0  ;;  %vm11896_vm3 = vcmp.gt.f32.partialorder %v11895_v12, 0.0  ;;  %v11917_v13 = vld [vmem:[#allocation135_spill] sm:$0xff]  ;;  %v11922_v32 = vld [vmem:[#allocation270_spill] sm:$0xff]  ;;  %v11924_v12 = vld [vmem:[#allocation212_spill] sm:$0xff] }
 0x328   :  { %v2887_v43 = vadd.f32 %v2886_v10, %v2548_v58  ;;  %v2975_v47 = vsel %vm11892_vm7, 1.0, %v11541_v56  ;;  %v3024_v16 = vsel %vm11894_vm4, 1.0, %v11541_v56  ;;  %v3071_v6 = vsel %vm11896_vm3, 1.0, %v11541_v56  ;;  %v11901_v58 = vld [vmem:[#allocation133_spill] sm:$0xff] }
 0x329   :  { %v2560_v33 = vadd.f32 %v3070_v60, %v11897_v29  ;;  %vm11899_vm6 = vcmp.gt.f32.partialorder %v11898_v28, 0.0  ;;  %v2562_v27 = vadd.f32 %v3071_v6, %v11900_v34  ;;  %v2565_v1 = vadd.f32 %v3024_v16, %v2975_v47  ;;  %v11926_v29 = vld [vmem:[#allocation48_spill] sm:$0xff] }
 0x32a   :  { %v2888_v21 = vadd.f32 %v2887_v43, %v2550_v18  ;;  %v3072_v61 = vsel %vm11899_vm6, 1.0, %v11541_v56  ;;  %vm11902_vm2 = vcmp.gt.f32.partialorder %v11901_v58, 0.0  ;;  %v11904_v18 = vld [vmem:[#allocation154_spill] sm:$0xff]  ;;  %vm11907_vm15 = vcmp.gt.f32.partialorder %v11906_v2, 0.0  ;;  %v11912_v43 = vld [vmem:[#allocation29_spill] sm:$0xff] }
 0x32b   :  { %v3073_v63 = vsel %vm11902_vm2, 1.0, %v11541_v56  ;;  %v2564_v19 = vadd.f32 %v3072_v61, %v11903_v24  ;;  %vm11905_vm0 = vcmp.gt.f32.partialorder %v11904_v18, 0.0  ;;  %v3027_v40 = vsel %vm11907_vm15, 1.0, %v11541_v56  ;;  %v11928_v61 = vld [vmem:[#allocation228_spill] sm:$0xff] }
 0x32c   :  { %v2889_v22 = vadd.f32 %v2888_v21, %v2552_v54  ;;  %v2978_v10 = vsel %vm11905_vm0, 1.0, %v11541_v56  ;;  %vm11909_vm11 = vcmp.gt.f32.partialorder %v11908_v49, 0.0  ;;  %v2566_v50 = vadd.f32 %v3073_v63, %v2565_v1  ;;  %v11931_v63 = vld [vmem:[#allocation139_spill] sm:$0xff] }
 0x32d   :  { %v3074_v55 = vsel %vm11909_vm11, 1.0, %v11541_v56  ;;  %vm11911_vm9 = vcmp.gt.f32.partialorder %v11910_v46, 0.0  ;;  %vm11913_vm12 = vcmp.gt.f32.partialorder %v11912_v43, 0.0  ;;  %vm11915_vm13 = vcmp.gt.f32.partialorder %v11914_v11, 0.0 }
 0x32e   :  { %v2890_v41 = vadd.f32 %v2889_v22, %v2554_v57  ;;  %v2979_v54 = vsel %vm11911_vm9, 1.0, %v11541_v56  ;;  %v3028_v35 = vsel %vm11913_vm12, 1.0, %v11541_v56  ;;  %v3075_v26 = vsel %vm11915_vm13, 1.0, %v11541_v56  ;;  %v11916_v57 = vld [vmem:[#allocation93_spill] sm:$0xff] }
 0x32f   :  { %v2568_v52 = vadd.f32 %v3074_v55, %v11916_v57  ;;  %v2571_v21 = vadd.f32 %v3027_v40, %v2978_v10  ;;  %vm11918_vm8 = vcmp.gt.f32.partialorder %v11917_v13, 0.0  ;;  %v2573_v15 = vadd.f32 %v3028_v35, %v2979_v54 }
 0x330   :  { %v2891_v62 = vadd.f32 %v2890_v41, %v2556_v36  ;;  %v3076_v39 = vsel %vm11918_vm8, 1.0, %v11541_v56  ;;  %v11919_v36 = vld [vmem:[#allocation292_spill] sm:$0xff]  ;;  %vm11923_vm10 = vcmp.gt.f32.partialorder %v11922_v32, 0.0  ;;  %vm11925_vm1 = vcmp.gt.f32.partialorder %v11924_v12, 0.0 }
 0x331   :  { %v2570_v22 = vadd.f32 %v3075_v26, %v11919_v36  ;;  %v2572_v38 = vadd.f32 %v3076_v39, %v2571_v21  ;;  %v2982_v16 = vsel %vm11923_vm10, 1.0, %v11541_v56  ;;  %v3031_v6 = vsel %vm11925_vm1, 1.0, %v11541_v56 }
 0x332   :  { %v2892_v30 = vadd.f32 %v2891_v62, %v2558_v7  ;;  %v11920_v7 = vld [vmem:[#allocation138_spill] sm:$0xff]  ;;  %vm11927_vm14 = vcmp.gt.f32.partialorder %v11926_v29, 0.0  ;;  %vm11929_vm7 = vcmp.gt.f32.partialorder %v11928_v61, 0.0  ;;  %vm11932_vm4 = vcmp.gt.f32.partialorder %v11931_v63, 0.0 }
 0x333   :  { %vm11921_vm5 = vcmp.gt.f32.partialorder %v11920_v7, 0.0  ;;  %v3079_v34 = vsel %vm11929_vm7, 1.0, %v11541_v56  ;;  %v3080_v24 = vsel %vm11932_vm4, 1.0, %v11541_v56 }
 0x334   :  { %v2893_v9 = vadd.f32 %v2892_v30, %v2560_v33  ;;  %v3077_v41 = vsel %vm11921_vm5, 1.0, %v11541_v56  ;;  %v3078_v33 = vsel %vm11927_vm14, 1.0, %v11541_v56  ;;  %v2579_v30 = vadd.f32 %v3031_v6, %v2982_v16 }
 0x335   :  { %v2574_v62 = vadd.f32 %v3077_v41, %v2573_v15 }
 0x336   :  { %v2894_v45 = vadd.f32 %v2893_v9, %v2562_v27  ;;  %v11930_v27 = vld [vmem:[#allocation122_spill] sm:$0xff]  ;;  %v2580_v10 = vadd.f32 %v3080_v24, %v2579_v30 }
 0x337   :  { %v2576_v1 = vadd.f32 %v3078_v33, %v11930_v27 }
 0x338   :  { %v2895_v23 = vadd.f32 %v2894_v45, %v2564_v19  ;;  %v11933_v19 = vld [vmem:[#allocation199_spill] sm:$0xff] }
 0x339   :  { %v2578_v9 = vadd.f32 %v3079_v34, %v11933_v19 }
 0x33a   :  { %v2896_v60 = vadd.f32 %v2895_v23, %v2566_v50 }
 0x33c   :  { %v2897_v47 = vadd.f32 %v2896_v60, %v2568_v52 }
 0x33e   :  { %v2898_v28 = vadd.f32 %v2897_v47, %v2570_v22 }
 0x340   :  { %v2899_v58 = vadd.f32 %v2898_v28, %v2572_v38 }
 0x342   :  { %v2900_v18 = vadd.f32 %v2899_v58, %v2574_v62 }
 0x344   :  { %v2901_v2 = vadd.f32 %v2900_v18, %v2576_v1 }
 0x346   :  { %v2902_v40 = vadd.f32 %v2901_v2, %v2578_v9 }
 0x348   :  { %v2903_v49 = vadd.f32 %v2902_v40, %v2580_v10 }
 0x34a   :  { %v2904_v55 = vadd.f32 %v2903_v49, %v8888_v59 }
 0x34c   :  { %v2905_v50 = vadd.f32 %v2904_v55, %v8890_v53 }
 0x34e   :  { %v2906_v45 = vadd.f32 %v2905_v50, %v8892_v17 }
 0x350   :  { %v2907_v46 = vadd.f32 %v2906_v45, %v8907_v51 }
 0x352   :  { %v2908_v54 = vadd.f32 %v2907_v46, %v8909_v0 }
 0x354   :  { %v2909_v43 = vadd.f32 %v2908_v54, %v8911_v14 }
 0x356   :  { %v2910_v56 = vadd.f32 %v2909_v43, %v8916_v48 }
 0x358   :  { %v2911_v35 = vadd.f32 %v2910_v56, %v8918_v3 }
 0x35a   :  { %v2912_v11 = vadd.f32 %v2911_v35, %v8920_v31 }
 0x35c   :  { %v2913_v26 = vadd.f32 %v2912_v11, %v8922_v20 }
 0x35e   :  { %v2914_v59 = vadd.f32 %v2913_v26, %v8937_v8 }
 0x360   :  { %v2915_v53 = vadd.f32 %v2914_v59, %v8939_v5 }
 0x362   :  { %v2916_v17 = vadd.f32 %v2915_v53, %v8941_v44 }
 0x364   :  { %v2917_v51 = vadd.f32 %v2916_v17, %v8946_v42 }
 0x366   :  { %v2918_v0 = vadd.f32 %v2917_v51, %v8948_v25 }
 0x368   :  { %v2919_v14 = vadd.f32 %v2918_v0, %v8950_v4 }
 0x36a   :  { %v2920_v48 = vadd.f32 %v2919_v14, %v8957_v37 }
 0x36c   :  { %2921 = vadd.xlane.f32.xlu0 %v2920_v48 }
 0x3ae   :  { %v2814_v3 = vpop.xlane.xlu0 %2813 }
 0x3af   :  { %v2815_v57 = vrot.slane %v2814_v3, 4 }
 0x3b1   :  { %v2816_v31 = vadd.f32 %v2815_v57, %v2814_v3 }
 0x3b3   :  { %v2817_v52 = vrot.slane %v2816_v31, 2 }
 0x3b5   :  { %v2818_v20 = vadd.f32 %v2817_v52, %v2816_v31 }
 0x3b7   :  { %v2819_v21 = vrot.slane %v2818_v20, 1 }
 0x3b9   :  { %v2820_v8 = vadd.f32 %v2819_v21, %v2818_v20 }
 0x3bb   :  { %3098 = vpush %v2820_v8 }
 0x3ec   :  { %s3099_s0 = spop %3098 }
 0x3ed   :  { %2823 = sst [smem:[#allocation9]] %s3099_s0 }
 0x3f5   :  { %v2922_v5 = vpop.xlane.xlu0 %2921 }
 0x3f6   :  { %v2923_v44 = vrot.slane %v2922_v5, 4 }
 0x3f8   :  { %v2924_v42 = vadd.f32 %v2923_v44, %v2922_v5 }
 0x3fa   :  { %v2925_v23 = vrot.slane %v2924_v42, 2 }
 0x3fc   :  { %v2926_v25 = vadd.f32 %v2925_v23, %v2924_v42 }
 0x3fe   :  { %v2927_v13 = vrot.slane %v2926_v25, 1 }
 0x400   :  { %v2928_v4 = vadd.f32 %v2927_v13, %v2926_v25 }
 0x402   :  { %3100 = vpush %v2928_v4 }
 0x433   :  { %s3101_s1 = spop %3100 }
 0x434   :  { %2931 = sst [smem:[#allocation9 + $0x1]] %s3101_s1 }
 0x435   :  { %2939 = dma.smem_to_hbm %s3755_s21, 16, %s9173_s2, [#allocation6]  }
 0x436   :  { %3748 = dma.done.wait [#allocation6], 16  }
 0x437   :  { %3749 = vsyncadd [#allocation6], 4294967280 }
 0x438   :  { %2943 = sfence }
 0x439   :  { %2944 = vsyncpa [#allocation5], 1 }
 0x43a   :  { %2945 = vsyncpa [#allocation8], 1 }
 0x43b   :  { %2946 = vsyncpa [#allocation6], 1 }

</bundles_post_ra>
